<compile_context>
chip_gen: v7x
topology: tpu7x:2x2x1
jax: 0.10.0
libtpu: 0.0.40
codegen_flags: <defaults>
</compile_context>

<pallas_src>
import functools

import jax
import jax.numpy as jnp
import numpy as np
from jax import lax
from jax.experimental import pallas as pl
from jax.experimental.pallas import tpu as pltpu


# ------------------------------ Pallas kernel -------------------------------

def _conv_bn_relu_kernel(x_ref, w_ref, b_ref, o_ref, patch_ref, *, kh, kw, oh, ow):
    """Fused Conv2d (stride 1) + folded-BN bias + ReLU over the whole batch.

    x_ref:     (N, Hp, Wp, Cin)   padded, channels-last input (bf16, VMEM)
    w_ref:     (Kp, Cout)         BN-folded weights, K rows + zero pad (bf16)
    b_ref:     (1, Cout)          folded BN bias (f32)
    o_ref:     (N*oh*ow, Cout)    output (f32)
    patch_ref: (N*oh*ow, Kp)      VMEM scratch for the im2col patch (bf16)
    """
    n, _, _, cin = x_ref.shape
    m = n * oh * ow
    k = kh * kw * cin
    kp = patch_ref.shape[1]

    # In-kernel im2col: write the kh*kw shifted slabs into the (M, Kp) patch.
    # Each slab is sliced directly from the ref (never materialise the whole
    # padded image as a register value).
    for i in range(kh):
        for j in range(kw):
            k0 = (i * kw + j) * cin
            slab = x_ref[:, pl.ds(i, oh), pl.ds(j, ow), :]      # (N, oh, ow, Cin)
            patch_ref[:, pl.ds(k0, cin)] = slab.reshape(m, cin)
    if kp > k:  # zero the K-padding columns so MXU sees deterministic zeros
        patch_ref[:, pl.ds(k, kp - k)] = jnp.zeros((m, kp - k), patch_ref.dtype)

    # Single MXU pass with K = kh*kw*Cin: accumulation happens inside the MXU.
    acc = jnp.dot(patch_ref[...], w_ref[...], preferred_element_type=jnp.float32)

    # f32 epilogue (folded-BN bias + ReLU); cast only at the final store.
    o_ref[...] = jnp.maximum(acc + b_ref[...], 0.0).astype(o_ref.dtype)


# ------------------------------- forward pass -------------------------------

def basic_conv2d_forward(x, params, *, padding=1):
    """x: (N, Cin, H, W) float32 NCHW  ->  (N, Cout, oh, ow) float32 NCHW."""
    N, Cin, H, W = x.shape
    w = params["conv_w"]                               # (Cout, Cin, kh, kw)
    Cout, _, kh, kw = w.shape
    eps = 1e-3                                         # BatchNorm2d(eps=0.001)

    # --- one-time parameter prep: fold inference BN into weights / bias -----
    # TODO(synk): BatchNorm is folded using running statistics (inference
    # mode); training mode would use batch statistics.
    scale = params["bn_gamma"] * lax.rsqrt(params["bn_var"] + eps)   # (Cout,)
    bias = params["bn_beta"] - params["bn_mean"] * scale
    w_folded = w * scale[:, None, None, None]

    K = kh * kw * Cin                                  # contraction dim (576)
    Kp = ((K + 127) // 128) * 128                      # lane-aligned K pad
    # (Cout, Cin, kh, kw) -> (kh, kw, Cin, Cout) -> (K, Cout); K index order
    # matches the in-kernel patch layout: k = (i*kw + j)*Cin + cin.
    w2 = jnp.transpose(w_folded, (2, 3, 1, 0)).reshape(K, Cout)
    w2 = jnp.pad(w2, ((0, Kp - K), (0, 0))).astype(jnp.bfloat16)
    b2 = bias.astype(jnp.float32)[None, :]             # (1, Cout) f32

    # TODO(synk): Dropout(p=0.1) is identity in inference mode; training-mode
    # masking/scaling is not implemented here.

    # --- activation layout prep (small; fusable into the kernel input DMA) --
    Hp, Wp = H + 2 * padding, W + 2 * padding
    oh, ow = Hp - kh + 1, Wp - kw + 1                  # stride 1
    M = N * oh * ow
    xpad = jnp.pad(x, ((0, 0), (0, 0), (padding, padding), (padding, padding)))
    xpad = xpad.transpose(0, 2, 3, 1).astype(jnp.bfloat16)   # (N, Hp, Wp, Cin)

    out = pl.pallas_call(
        functools.partial(_conv_bn_relu_kernel, kh=kh, kw=kw, oh=oh, ow=ow),
        out_shape=jax.ShapeDtypeStruct((M, Cout), jnp.float32),
        grid=(1,),                                     # whole batch in one step
        in_specs=[
            pl.BlockSpec((N, Hp, Wp, Cin), lambda i: (0, 0, 0, 0)),
            pl.BlockSpec((Kp, Cout), lambda i: (0, 0)),
            pl.BlockSpec((1, Cout), lambda i: (0, 0)),
        ],
        out_specs=pl.BlockSpec((M, Cout), lambda i: (0, 0)),
        scratch_shapes=[pltpu.VMEM((M, Kp), jnp.bfloat16)],   # im2col patch
        compiler_params=pltpu.CompilerParams(
            dimension_semantics=("arbitrary",),
            allow_input_fusion=[True, False, False],   # fuse pad/transpose/cast
        ),
    )(xpad, w2, b2)

    # (M, Cout) -> NCHW (cheap layout plumbing on a 128 KB tensor, outside kernel).
    return out.reshape(N, oh, ow, Cout).transpose(0, 3, 1, 2)


# ------------------------------ parameter init ------------------------------

def init_params(key, cout=64, cin=64, k=3):
    ks = jax.random.split(key, 5)
    p = {}
    p["conv_w"] = 0.05 * jax.random.normal(ks[0], (cout, cin, k, k), jnp.float32)
    p["bn_gamma"] = 1.0 + 0.1 * jax.random.normal(ks[1], (cout,), jnp.float32)
    p["bn_beta"] = 0.1 * jax.random.normal(ks[2], (cout,), jnp.float32)
    p["bn_mean"] = 0.1 * jax.random.normal(ks[3], (cout,), jnp.float32)
    p["bn_var"] = 1.0 + 0.1 * jnp.abs(jax.random.normal(ks[4], (cout,), jnp.float32))
    return p


# ----------------------------- pure-JAX reference ----------------------------

def reference_forward(x, p, *, padding=1):
    eps = 1e-3
    y = lax.conv_general_dilated(
        x, p["conv_w"], window_strides=(1, 1),
        padding=[(padding, padding), (padding, padding)],
        dimension_numbers=("NCHW", "OIHW", "NCHW"))
    scale = (p["bn_gamma"] / jnp.sqrt(p["bn_var"] + eps))[None, :, None, None]
    y = (y - p["bn_mean"][None, :, None, None]) * scale \
        + p["bn_beta"][None, :, None, None]
    return jnp.maximum(y, 0.0)


# ----------------------------------- main ------------------------------------

if __name__ == "__main__":
    key = jax.random.PRNGKey(0)
    kx, kparams = jax.random.split(key)
    # Cin = Cout = 64 are fixed by the module; Conv2d **kwargs taken as
    # kernel_size=3, stride=1, padding=1.  Small shapes: batch=2, 16x16.
    x = jax.random.normal(kx, (2, 64, 16, 16), jnp.float32)
    params = init_params(kparams)

    fwd = jax.jit(basic_conv2d_forward)
    out = jax.block_until_ready(fwd(x, params))
    assert out.shape == (2, 64, 16, 16), out.shape

    ref = reference_forward(x, params)
    # bf16 matmul operands vs f32 reference: intentionally loosened tolerance.
    np.testing.assert_allclose(np.asarray(out), np.asarray(ref),
                               rtol=5e-2, atol=5e-2)
    print("KERNEL_OK")
</pallas_src>

<mosaic_0001>
module attributes {stable_mosaic.version = 11 : i64} {
  func.func @_conv_bn_relu_kernel(%arg0: i32, %arg1: memref<2x18x18x64xbf16, #tpu.memory_space<vmem>>, %arg2: memref<640x64xbf16, #tpu.memory_space<vmem>>, %arg3: memref<1x64xf32, #tpu.memory_space<vmem>>, %arg4: memref<512x64xf32, #tpu.memory_space<vmem>>, %arg5: memref<512x640xbf16, #tpu.memory_space<vmem>>) attributes {dimension_semantics = [#tpu.dimension_semantics<arbitrary>], iteration_bounds = array<i64: 1>, scalar_prefetch = 0 : i64, scratch_operands = 1 : i64, tpu.core_type = #tpu.core_type<tc>, window_params = [{pipeline_mode = #tpu.pipeline_mode<synchronous>, transform_indices = @transform_0, window_bounds = array<i64: 2, 18, 18, 64>}, {pipeline_mode = #tpu.pipeline_mode<synchronous>, transform_indices = @transform_1, window_bounds = array<i64: 640, 64>}, {pipeline_mode = #tpu.pipeline_mode<synchronous>, transform_indices = @transform_2, window_bounds = array<i64: 1, 64>}, {pipeline_mode = #tpu.pipeline_mode<synchronous>, transform_indices = @transform_3, window_bounds = array<i64: 512, 64>}]} {
    %c0 = arith.constant 0 : index
    %c0_0 = arith.constant 0 : index
    %c0_1 = arith.constant 0 : index
    %c0_2 = arith.constant 0 : index
    %0 = vector.load %arg1[%c0, %c0_0, %c0_1, %c0_2] : memref<2x18x18x64xbf16, #tpu.memory_space<vmem>>, vector<2x16x16x64xbf16>
    %1 = vector.shape_cast %0 : vector<2x16x16x64xbf16> to vector<512x64xbf16>
    %c0_3 = arith.constant 0 : index
    %c0_4 = arith.constant 0 : index
    %2 = vector.load %arg5[%c0_3, %c0_4] : memref<512x640xbf16, #tpu.memory_space<vmem>>, vector<512x64xbf16>
    tpu.vector_store %arg5[%c0_3, %c0_4], %1 {strides = array<i32>} : memref<512x640xbf16, #tpu.memory_space<vmem>>, vector<512x64xbf16>,
    %c0_5 = arith.constant 0 : index
    %c0_6 = arith.constant 0 : index
    %c1 = arith.constant 1 : index
    %c0_7 = arith.constant 0 : index
    %3 = vector.load %arg1[%c0_5, %c0_6, %c1, %c0_7] : memref<2x18x18x64xbf16, #tpu.memory_space<vmem>>, vector<2x16x16x64xbf16>
    %4 = vector.shape_cast %3 : vector<2x16x16x64xbf16> to vector<512x64xbf16>
    %c0_8 = arith.constant 0 : index
    %c64 = arith.constant 64 : index
    %5 = vector.load %arg5[%c0_8, %c64] : memref<512x640xbf16, #tpu.memory_space<vmem>>, vector<512x64xbf16>
    tpu.vector_store %arg5[%c0_8, %c64], %4 {strides = array<i32>} : memref<512x640xbf16, #tpu.memory_space<vmem>>, vector<512x64xbf16>,
    %c0_9 = arith.constant 0 : index
    %c0_10 = arith.constant 0 : index
    %c2 = arith.constant 2 : index
    %c0_11 = arith.constant 0 : index
    %6 = vector.load %arg1[%c0_9, %c0_10, %c2, %c0_11] : memref<2x18x18x64xbf16, #tpu.memory_space<vmem>>, vector<2x16x16x64xbf16>
    %7 = vector.shape_cast %6 : vector<2x16x16x64xbf16> to vector<512x64xbf16>
    %c0_12 = arith.constant 0 : index
    %c128 = arith.constant 128 : index
    %8 = vector.load %arg5[%c0_12, %c128] : memref<512x640xbf16, #tpu.memory_space<vmem>>, vector<512x64xbf16>
    tpu.vector_store %arg5[%c0_12, %c128], %7 {strides = array<i32>} : memref<512x640xbf16, #tpu.memory_space<vmem>>, vector<512x64xbf16>,
    %c0_13 = arith.constant 0 : index
    %c1_14 = arith.constant 1 : index
    %c0_15 = arith.constant 0 : index
    %c0_16 = arith.constant 0 : index
    %9 = vector.load %arg1[%c0_13, %c1_14, %c0_15, %c0_16] : memref<2x18x18x64xbf16, #tpu.memory_space<vmem>>, vector<2x16x16x64xbf16>
    %10 = vector.shape_cast %9 : vector<2x16x16x64xbf16> to vector<512x64xbf16>
    %c0_17 = arith.constant 0 : index
    %c192 = arith.constant 192 : index
    %11 = vector.load %arg5[%c0_17, %c192] : memref<512x640xbf16, #tpu.memory_space<vmem>>, vector<512x64xbf16>
    tpu.vector_store %arg5[%c0_17, %c192], %10 {strides = array<i32>} : memref<512x640xbf16, #tpu.memory_space<vmem>>, vector<512x64xbf16>,
    %c0_18 = arith.constant 0 : index
    %c1_19 = arith.constant 1 : index
    %c1_20 = arith.constant 1 : index
    %c0_21 = arith.constant 0 : index
    %12 = vector.load %arg1[%c0_18, %c1_19, %c1_20, %c0_21] : memref<2x18x18x64xbf16, #tpu.memory_space<vmem>>, vector<2x16x16x64xbf16>
    %13 = vector.shape_cast %12 : vector<2x16x16x64xbf16> to vector<512x64xbf16>
    %c0_22 = arith.constant 0 : index
    %c256 = arith.constant 256 : index
    %14 = vector.load %arg5[%c0_22, %c256] : memref<512x640xbf16, #tpu.memory_space<vmem>>, vector<512x64xbf16>
    tpu.vector_store %arg5[%c0_22, %c256], %13 {strides = array<i32>} : memref<512x640xbf16, #tpu.memory_space<vmem>>, vector<512x64xbf16>,
    %c0_23 = arith.constant 0 : index
    %c1_24 = arith.constant 1 : index
    %c2_25 = arith.constant 2 : index
    %c0_26 = arith.constant 0 : index
    %15 = vector.load %arg1[%c0_23, %c1_24, %c2_25, %c0_26] : memref<2x18x18x64xbf16, #tpu.memory_space<vmem>>, vector<2x16x16x64xbf16>
    %16 = vector.shape_cast %15 : vector<2x16x16x64xbf16> to vector<512x64xbf16>
    %c0_27 = arith.constant 0 : index
    %c320 = arith.constant 320 : index
    %17 = vector.load %arg5[%c0_27, %c320] : memref<512x640xbf16, #tpu.memory_space<vmem>>, vector<512x64xbf16>
    tpu.vector_store %arg5[%c0_27, %c320], %16 {strides = array<i32>} : memref<512x640xbf16, #tpu.memory_space<vmem>>, vector<512x64xbf16>,
    %c0_28 = arith.constant 0 : index
    %c2_29 = arith.constant 2 : index
    %c0_30 = arith.constant 0 : index
    %c0_31 = arith.constant 0 : index
    %18 = vector.load %arg1[%c0_28, %c2_29, %c0_30, %c0_31] : memref<2x18x18x64xbf16, #tpu.memory_space<vmem>>, vector<2x16x16x64xbf16>
    %19 = vector.shape_cast %18 : vector<2x16x16x64xbf16> to vector<512x64xbf16>
    %c0_32 = arith.constant 0 : index
    %c384 = arith.constant 384 : index
    %20 = vector.load %arg5[%c0_32, %c384] : memref<512x640xbf16, #tpu.memory_space<vmem>>, vector<512x64xbf16>
    tpu.vector_store %arg5[%c0_32, %c384], %19 {strides = array<i32>} : memref<512x640xbf16, #tpu.memory_space<vmem>>, vector<512x64xbf16>,
    %c0_33 = arith.constant 0 : index
    %c2_34 = arith.constant 2 : index
    %c1_35 = arith.constant 1 : index
    %c0_36 = arith.constant 0 : index
    %21 = vector.load %arg1[%c0_33, %c2_34, %c1_35, %c0_36] : memref<2x18x18x64xbf16, #tpu.memory_space<vmem>>, vector<2x16x16x64xbf16>
    %22 = vector.shape_cast %21 : vector<2x16x16x64xbf16> to vector<512x64xbf16>
    %c0_37 = arith.constant 0 : index
    %c448 = arith.constant 448 : index
    %23 = vector.load %arg5[%c0_37, %c448] : memref<512x640xbf16, #tpu.memory_space<vmem>>, vector<512x64xbf16>
    tpu.vector_store %arg5[%c0_37, %c448], %22 {strides = array<i32>} : memref<512x640xbf16, #tpu.memory_space<vmem>>, vector<512x64xbf16>,
    %c0_38 = arith.constant 0 : index
    %c2_39 = arith.constant 2 : index
    %c2_40 = arith.constant 2 : index
    %c0_41 = arith.constant 0 : index
    %24 = vector.load %arg1[%c0_38, %c2_39, %c2_40, %c0_41] : memref<2x18x18x64xbf16, #tpu.memory_space<vmem>>, vector<2x16x16x64xbf16>
    %25 = vector.shape_cast %24 : vector<2x16x16x64xbf16> to vector<512x64xbf16>
    %c0_42 = arith.constant 0 : index
    %c512 = arith.constant 512 : index
    %26 = vector.load %arg5[%c0_42, %c512] : memref<512x640xbf16, #tpu.memory_space<vmem>>, vector<512x64xbf16>
    tpu.vector_store %arg5[%c0_42, %c512], %25 {strides = array<i32>} : memref<512x640xbf16, #tpu.memory_space<vmem>>, vector<512x64xbf16>,
    %cst = arith.constant 0.000000e+00 : bf16
    %27 = vector.broadcast %cst : bf16 to vector<512x64xbf16>
    %c0_43 = arith.constant 0 : index
    %c576 = arith.constant 576 : index
    %28 = vector.load %arg5[%c0_43, %c576] : memref<512x640xbf16, #tpu.memory_space<vmem>>, vector<512x64xbf16>
    tpu.vector_store %arg5[%c0_43, %c576], %27 {strides = array<i32>} : memref<512x640xbf16, #tpu.memory_space<vmem>>, vector<512x64xbf16>,
    %c0_44 = arith.constant 0 : index
    %c0_45 = arith.constant 0 : index
    %29 = vector.load %arg5[%c0_44, %c0_45] : memref<512x640xbf16, #tpu.memory_space<vmem>>, vector<512x640xbf16>
    %c0_46 = arith.constant 0 : index
    %c0_47 = arith.constant 0 : index
    %30 = vector.load %arg2[%c0_46, %c0_47] : memref<640x64xbf16, #tpu.memory_space<vmem>>, vector<640x64xbf16>
    %cst_48 = arith.constant dense<0.000000e+00> : vector<512x64xf32>
    %31 = tpu.matmul %29, %30, %cst_48 {dimension_numbers = #tpu.dot_dimension_numbers<[1], [0], [0], [1], [0, 0, 1, 1], [], []>} : vector<512x640xbf16>, vector<640x64xbf16>, vector<512x64xf32> -> vector<512x64xf32>
    %c0_49 = arith.constant 0 : index
    %c0_50 = arith.constant 0 : index
    %32 = vector.load %arg3[%c0_49, %c0_50] : memref<1x64xf32, #tpu.memory_space<vmem>>, vector<1x64xf32>
    %33 = vector.broadcast %32 : vector<1x64xf32> to vector<512x64xf32>
    %34 = arith.addf %31, %33 : vector<512x64xf32>
    %cst_51 = arith.constant 0.000000e+00 : f32
    %35 = vector.broadcast %cst_51 : f32 to vector<512x64xf32>
    %36 = arith.maximumf %34, %35 : vector<512x64xf32>
    %c0_52 = arith.constant 0 : index
    %c0_53 = arith.constant 0 : index
    %37 = vector.load %arg4[%c0_52, %c0_53] : memref<512x64xf32, #tpu.memory_space<vmem>>, vector<512x64xf32>
    tpu.vector_store %arg4[%c0_52, %c0_53], %36 {strides = array<i32>} : memref<512x64xf32, #tpu.memory_space<vmem>>, vector<512x64xf32>,
    return
  }
  func.func @transform_0(%arg0: i32) -> (i32, i32, i32, i32) {
    %c0_i32 = arith.constant 0 : i32
    %c0_i32_0 = arith.constant 0 : i32
    %c0_i32_1 = arith.constant 0 : i32
    %c0_i32_2 = arith.constant 0 : i32
    %c0_i32_3 = arith.constant 0 : i32
    return %c0_i32, %c0_i32_0, %c0_i32_1, %c0_i32_2 : i32, i32, i32, i32
  }
  func.func @transform_1(%arg0: i32) -> (i32, i32) {
    %c0_i32 = arith.constant 0 : i32
    %c0_i32_0 = arith.constant 0 : i32
    %c0_i32_1 = arith.constant 0 : i32
    return %c0_i32, %c0_i32_0 : i32, i32
  }
  func.func @transform_2(%arg0: i32) -> (i32, i32) {
    %c0_i32 = arith.constant 0 : i32
    %c0_i32_0 = arith.constant 0 : i32
    %c0_i32_1 = arith.constant 0 : i32
    return %c0_i32, %c0_i32_0 : i32, i32
  }
  func.func @transform_3(%arg0: i32) -> (i32, i32) {
    %c0_i32 = arith.constant 0 : i32
    %c0_i32_0 = arith.constant 0 : i32
    %c0_i32_1 = arith.constant 0 : i32
    return %c0_i32, %c0_i32_0 : i32, i32
  }
}

</mosaic_0001>

<bundles_post_ra>
// kernel: basic_conv2d_forward.2
= control target key start
LH: loop header
LB: loop body
LE: loop exit
PB: predicated region body
PF: predicated region fallthrough
CT: control target
= control target key end

     0   :  { %s13910_s0 = inlined_call_operand.vmem [shape: bf16[640,64], index: 0, kind: input, shape index: {}]   ;;  %s13911_s1 = inlined_call_operand.vmem [shape: f32[1,64], index: 1, kind: input, shape index: {}]   ;;  %s13912_s2 = inlined_call_operand.vmem [shape: bf16[2,64,16,16], index: 2, kind: input, shape index: {}]   ;;  %s13913_s3 = inlined_call_operand.<no memory space> [shape: bf16[], index: 3, kind: input, shape index: {}]   ;;  %s13914_s4 = inlined_call_operand.hbm [shape: f32[512,64], index: 4, kind: output, shape index: {}]  }
   0x1   :  { %v9_v0 = vstv %s13913_s3 }
   0x2   :  { %v10927_v1 = vunpack.i.l.bf16 %v9_v0 }
   0x3   :  { %v9912_v2 = vld [vmem:[%s13912_s2] sm:$0xff]   ;;  %v95_v3 = vlaneseq  ;;  %v9926_v6 = vld [vmem:[%s13912_s2 + $0x38] sm:$0xff]   ;;  %v10943_v11 = vld [vmem:[%s13912_s2 + $0x8] sm:$0xff]   ;;  %vm100_vm0 = vcmask 1046528   ;;  %v10893_v15 = vmov 0.0   ;;  %s10894_s28 = smov 64  }
   0x4   :  { %v9928_v4 = vld [vmem:[%s13912_s2 + $0x40] sm:$0xff]   ;;  %v10404_v5 = vpack.c.bf16 %v10927_v1, %v10927_v1  ;;  %v93_v7 = vunpack.c.l.bf16 %v9912_v2  ;;  %v118_v8 = vunpack.c.h.bf16 %v9912_v2  ;;  %v10948_v12 = vld [vmem:[%s13912_s2 + $0x48] sm:$0xff]   ;;  %v10953_v13 = vld [vmem:[%s13912_s2 + $0x10] sm:$0xff]   ;;  %v67_v16 = vpack.c.bf16 %v10893_v15, %v10927_v1 }
   0x5   :  { %v645_v9 = vunpack.c.l.bf16 %v9928_v4  ;;  %v670_v10 = vunpack.c.h.bf16 %v9928_v4  ;;  %v10955_v14 = vand.u32 127, %v95_v3  ;;  %vm2736_vm1 = vsmask.f32 3328 }
   0x6   :  { %10405 = vst [vmem:[#allocation10] sm:$0xff] %v10404_v5   ;;  %10415 = vst [vmem:[#allocation10 + $0xd0] sm:$0xff] %v10404_v5   ;;  %vm2737_vm2 = vsmask.f32 7440  ;;  %v576_v17 = vunpack.c.l.bf16 %v9926_v6  ;;  %v601_v18 = vunpack.c.h.bf16 %v9926_v6  ;;  %v162_v19 = vunpack.c.l.bf16 %v10943_v11 }
   0x7   :  { %10420 = vst [vmem:[#allocation10 + $0xd8] sm:$0xff] %v10404_v5   ;;  %10430 = vst [vmem:[#allocation10 + $0x1a8] sm:$0xff] %v10404_v5   ;;  %v187_v20 = vunpack.c.h.bf16 %v10943_v11  ;;  %vm98_vm3 = vcmp.lt.s32.totalorder %v10955_v14, 64  ;;  %v714_v21 = vunpack.c.l.bf16 %v10948_v12  ;;  %v739_v22 = vunpack.c.h.bf16 %v10948_v12 }
   0x8   :  { %69 = vst [vmem:[#allocation10 + $0x8] sm:$0xf] %v67_v16  ;;  %1233 = vst [vmem:[#allocation10 + $0xe0] sm:$0xf] %v67_v16  ;;  %v231_v23 = vunpack.c.l.bf16 %v10953_v13  ;;  %v99_v24 = vsel %vm98_vm3, %v93_v7, %v10927_v1  ;;  %v124_v25 = vsel %vm98_vm3, %v118_v8, %v10927_v1  ;;  %v651_v26 = vsel %vm98_vm3, %v645_v9, %v10927_v1 }
   0x9   :  { %v676_v27 = vsel %vm98_vm3, %v670_v10, %v10927_v1  ;;  %v101_v28 = vsel %vm100_vm0, %v99_v24, %v10927_v1  ;;  %v126_v29 = vsel %vm100_vm0, %v124_v25, %v99_v24  ;;  %v133_v30 = vsel %vm100_vm0, %v10927_v1, %v124_v25  ;;  %vm11007_vm4 = vmor %vm2736_vm1, %vm2737_vm2 }
   0xa   :  { %v653_v31 = vsel %vm100_vm0, %v651_v26, %v10927_v1  ;;  %v102_v32 = vrot.slane %v101_v28, 7  ;;  %v127_v33 = vrot.slane %v126_v29, 7  ;;  %v134_v34 = vrot.slane %v133_v30, 7 }
   0xb   :  { %v654_v35 = vrot.slane %v653_v31, 7  ;;  %v678_v36 = vsel %vm100_vm0, %v676_v27, %v651_v26  ;;  %v10987_v37 = vsel %vm100_vm0, %v10927_v1, %v676_v27  ;;  %v582_v38 = vsel %vm98_vm3, %v576_v17, %v10927_v1 }
   0xc   :  { %v607_v39 = vsel %vm98_vm3, %v601_v18, %v10927_v1  ;;  %v104_v40 = vpack.c.bf16 %v10893_v15, %v102_v32  ;;  %v129_v41 = vpack.c.bf16 %v10893_v15, %v127_v33  ;;  %v679_v43 = vrot.slane %v678_v36, 7 }
   0xd   :  { %v656_v42 = vpack.c.bf16 %v10893_v15, %v654_v35  ;;  %v2640_v44 = vld [vmem:[#allocation10] sm:$0xf]  ;;  %v2641_v45 = vld [vmem:[#allocation10 + $0x4] sm:$0xf]  ;;  %v686_v46 = vrot.slane %v10987_v37, 7  ;;  %v584_v53 = vsel %vm100_vm0, %v582_v38, %v10927_v1  ;;  %v609_v54 = vsel %vm100_vm0, %v607_v39, %v582_v38 }
   0xe   :  { %v2740_v47 = vshrl.u32 %v2640_v44, 16  ;;  %v2743_v48 = vshll.u32 %v2640_v44, 16  ;;  %v2749_v49 = vshll.u32 %v2641_v45, 16  ;;  %106 = vst [vmem:[#allocation10 + $0xc] sm:$0xf] %v104_v40  ;;  %v681_v50 = vpack.c.bf16 %v10893_v15, %v679_v43 }
   0xf   :  { %131 = vst [vmem:[#allocation10 + $0x10] sm:$0xf] %v129_v41  ;;  %658 = vst [vmem:[#allocation10 + $0x6c] sm:$0xf] %v656_v42  ;;  %v2642_v51 = vld [vmem:[#allocation10 + $0x8] sm:$0x1]  ;;  %v616_v62 = vsel %vm100_vm0, %v10927_v1, %v607_v39  ;;  %v168_v4 = vsel %vm98_vm3, %v162_v19, %v10927_v1  ;;  %v193_v17 = vsel %vm98_vm3, %v187_v20, %v10927_v1 }
  0x10   :  { %v2753_v52 = vshrl.u32 %v2641_v45, 16  ;;  %v2742_v55 = vrot.slane %v2740_v47, 4  ;;  %v2745_v56 = vrot.slane %v2743_v48, 5  ;;  %v2751_v57 = vrot.slane %v2749_v49, 5  ;;  %683 = vst [vmem:[#allocation10 + $0x70] sm:$0xf] %v681_v50 }
  0x11   :  { %v2759_v58 = vshll.u32 %v2642_v51, 16  ;;  %v585_v60 = vrot.slane %v584_v53, 7  ;;  %v610_v61 = vrot.slane %v609_v54, 7  ;;  %v617_v3 = vrot.slane %v616_v62, 7 }
  0x12   :  { %v2755_v59 = vrot.slane %v2753_v52, 4  ;;  %v2746_v0 = vor.u32 %v2745_v56, %v2742_v55  ;;  %v170_v8 = vsel %vm100_vm0, %v168_v4, %v10927_v1  ;;  %v195_v19 = vsel %vm100_vm0, %v193_v17, %v168_v4 }
  0x13   :  { %v2761_v2 = vrot.slane %v2759_v58, 5  ;;  %v587_v6 = vpack.c.bf16 %v10893_v15, %v585_v60  ;;  %v612_v7 = vpack.c.bf16 %v10893_v15, %v610_v61  ;;  %v619_v10 = vpack.c.bf16 %v10893_v15, %v617_v3 }
  0x14   :  { %v2756_v5 = vor.u32 %v2755_v59, %v2751_v57  ;;  %v2747_v9 = vrot.slane %v2746_v0, 4  ;;  %v171_v16 = vrot.slane %v170_v8, 7  ;;  %v11027_v24 = vsel %vm100_vm0, %v10927_v1, %v193_v17 }
  0x15   :  { %589 = vst [vmem:[#allocation10 + $0x60] sm:$0xf] %v587_v6  ;;  %614 = vst [vmem:[#allocation10 + $0x64] sm:$0xf] %v612_v7  ;;  %v136_v25 = vpack.c.bf16 %v10893_v15, %v134_v34  ;;  %v196_v28 = vrot.slane %v195_v19, 7  ;;  %v720_v20 = vsel %vm98_vm3, %v714_v21, %v10927_v1  ;;  %v203_v30 = vrot.slane %v11027_v24, 7 }
  0x16   :  { %v2757_v18 = vrot.slane %v2756_v5, 4  ;;  %v10733_v26 = vld [vmem:[#allocation10 + $0xc] sm:$0xff]   ;;  %v2752_v27 = vsel %vm11007_vm4, %v2747_v9, %v2751_v57  ;;  %621 = vst [vmem:[#allocation10 + $0x68] sm:$0xf] %v619_v10  ;;  %v173_v11 = vpack.c.bf16 %v10893_v15, %v171_v16  ;;  %v722_v32 = vsel %vm100_vm0, %v720_v20, %v10927_v1 }
  0x17   :  { %138 = vst [vmem:[#allocation10 + $0x14] sm:$0xf] %v136_v25  ;;  %v2643_v31 = vld [vmem:[#allocation10 + $0xc] sm:$0xf]  ;;  %v745_v33 = vsel %vm98_vm3, %v739_v22, %v10927_v1  ;;  %4536 = vrot.lane.b32.xlu0 %v10733_v26, %s10894_s28  ;;  %v198_v35 = vpack.c.bf16 %v10893_v15, %v196_v28  ;;  %v2644_v36 = vld [vmem:[#allocation10 + $0x10] sm:$0xf]  ;;  %v688_v47 = vpack.c.bf16 %v10893_v15, %v686_v46 }
  0x18   :  { %v2762_v29 = vsel %vm11007_vm4, %v2757_v18, %v2761_v2  ;;  %v10734_v21 = vld [vmem:[#allocation10 + $0x6c] sm:$0xff]   ;;  %175 = vst [vmem:[#allocation10 + $0x18] sm:$0xf] %v173_v11  ;;  %v2764_v38 = vshrl.u32 %v2643_v31, 16  ;;  %v747_v39 = vsel %vm100_vm0, %v745_v33, %v720_v20  ;;  %v2767_v40 = vshll.u32 %v2643_v31, 16 }
  0x19   :  { %v10008_v34 = vcombine.low %v2752_v27, %v2762_v29  ;;  %v2773_v41 = vshll.u32 %v2644_v36, 16  ;;  %v2777_v42 = vshrl.u32 %v2644_v36, 16  ;;  %v723_v43 = vrot.slane %v722_v32, 7  ;;  %v2667_v12 = vld [vmem:[#allocation10 + $0x6c] sm:$0xf]  ;;  %4552 = vrot.lane.b32.xlu1 %v10734_v21, %s10894_s28 }
  0x1a   :  { %200 = vst [vmem:[#allocation10 + $0x1c] sm:$0xf] %v198_v35  ;;  %v2766_v22 = vrot.slane %v2764_v38, 4  ;;  %v748_v44 = vrot.slane %v747_v39, 7  ;;  %v11054_v45 = vsel %vm100_vm0, %v10927_v1, %v745_v33  ;;  %v2769_v48 = vrot.slane %v2767_v40, 5 }
  0x1b   :  { %v2775_v49 = vrot.slane %v2773_v41, 5  ;;  %v2779_v50 = vrot.slane %v2777_v42, 4  ;;  %v725_v51 = vpack.c.bf16 %v10893_v15, %v723_v43  ;;  %3603 = vrot.lane.b32.xlu0 %v10008_v34, %s10894_s28  ;;  %v755_v55 = vrot.slane %v11054_v45, 7  ;;  %690 = vst [vmem:[#allocation10 + $0x74] sm:$0xf] %v688_v47  ;;  %v9918_v45 = vld [vmem:[%s13912_s2 + $0x18] sm:$0xff]  }
  0x1c   :  { %v2664_v52 = vld [vmem:[#allocation10 + $0x60] sm:$0xf]  ;;  %v2665_v53 = vld [vmem:[#allocation10 + $0x64] sm:$0xf]  ;;  %v750_v54 = vpack.c.bf16 %v10893_v15, %v748_v44  ;;  %v2668_v56 = vld [vmem:[#allocation10 + $0x70] sm:$0xf]  ;;  %v11068_v37 = vsel %vm98_vm3, %v231_v23, %v10927_v1  ;;  %v2770_v2 = vor.u32 %v2769_v48, %v2766_v22 }
  0x1d   :  { %v2956_v57 = vshrl.u32 %v2667_v12, 16  ;;  %v2666_v46 = vld [vmem:[#allocation10 + $0x68] sm:$0x1]  ;;  %v2932_v58 = vshrl.u32 %v2664_v52, 16  ;;  %v2935_v59 = vshll.u32 %v2664_v52, 16  ;;  %v2941_v60 = vshll.u32 %v2665_v53, 16 }
  0x1e   :  { %v2945_v61 = vshrl.u32 %v2665_v53, 16  ;;  %727 = vst [vmem:[#allocation10 + $0x78] sm:$0xf] %v725_v51  ;;  %v2951_v62 = vshll.u32 %v2666_v46, 16  ;;  %v2645_v0 = vld [vmem:[#allocation10 + $0x14] sm:$0x1]  ;;  %v2780_v3 = vor.u32 %v2779_v50, %v2775_v49  ;;  %v239_v20 = vsel %vm100_vm0, %v11068_v37, %v10927_v1 }
  0x1f   :  { %752 = vst [vmem:[#allocation10 + $0x7c] sm:$0xf] %v750_v54  ;;  %v2958_v4 = vrot.slane %v2956_v57, 4  ;;  %v2934_v5 = vrot.slane %v2932_v58, 4  ;;  %v2937_v6 = vrot.slane %v2935_v59, 5  ;;  %v2943_v7 = vrot.slane %v2941_v60, 5 }
  0x20   :  { %v2947_v8 = vrot.slane %v2945_v61, 4  ;;  %v2953_v9 = vrot.slane %v2951_v62, 5  ;;  %v2771_v10 = vrot.slane %v2770_v2, 4  ;;  %v2781_v23 = vrot.slane %v2780_v3, 4  ;;  %v2646_v29 = vld [vmem:[#allocation10 + $0x18] sm:$0xf] }
  0x21   :  { %v2783_v16 = vshll.u32 %v2645_v0, 16  ;;  %v2938_v17 = vor.u32 %v2937_v6, %v2934_v5  ;;  %v10735_v19 = vld [vmem:[#allocation10 + $0x18] sm:$0xff]   ;;  %v2959_v25 = vshll.u32 %v2667_v12, 16  ;;  %v2965_v26 = vshll.u32 %v2668_v56, 16  ;;  %v9932_v50 = vld [vmem:[%s13912_s2 + $0x50] sm:$0xff]  }
  0x22   :  { %v2948_v18 = vor.u32 %v2947_v8, %v2943_v7  ;;  %v2776_v27 = vsel %vm11007_vm4, %v2771_v10, %v2775_v49  ;;  %v2969_v28 = vshrl.u32 %v2668_v56, 16  ;;  %4538 = vrot.lane.b32.xlu0 %v10735_v19, %s10894_s28  ;;  %v2669_v33 = vld [vmem:[#allocation10 + $0x74] sm:$0x1]  ;;  %v240_v39 = vrot.slane %v239_v20, 7  ;;  %v2647_v22 = vld [vmem:[#allocation10 + $0x1c] sm:$0xf] }
  0x23   :  { %v2785_v11 = vrot.slane %v2783_v16, 5  ;;  %v2939_v31 = vrot.slane %v2938_v17, 4  ;;  %v2961_v21 = vrot.slane %v2959_v25, 5  ;;  %v2967_v34 = vrot.slane %v2965_v26, 5 }
  0x24   :  { %v2949_v32 = vrot.slane %v2948_v18, 4  ;;  %v2971_v36 = vrot.slane %v2969_v28, 4  ;;  %v2975_v38 = vshll.u32 %v2669_v33, 16  ;;  %v242_v49 = vpack.c.bf16 %v10893_v15, %v240_v39 }
  0x25   :  { %v2786_v35 = vsel %vm11007_vm4, %v2781_v23, %v2785_v11  ;;  %v2944_v40 = vsel %vm11007_vm4, %v2939_v31, %v2943_v7  ;;  %v2962_v12 = vor.u32 %v2961_v21, %v2958_v4  ;;  %v256_v52 = vunpack.c.h.bf16 %v10953_v13  ;;  %v2670_v61 = vld [vmem:[#allocation10 + $0x78] sm:$0xf] }
  0x26   :  { %v2954_v41 = vsel %vm11007_vm4, %v2949_v32, %v2953_v9  ;;  %v10009_v42 = vcombine.low %v2776_v27, %v2786_v35  ;;  %v10736_v43 = vld [vmem:[#allocation10 + $0x78] sm:$0xff]   ;;  %v2972_v47 = vor.u32 %v2971_v36, %v2967_v34  ;;  %v2977_v48 = vrot.slane %v2975_v38, 5  ;;  %244 = vst [vmem:[#allocation10 + $0x24] sm:$0xf] %v242_v49 }
  0x27   :  { %v10016_v44 = vcombine.low %v2944_v40, %v2954_v41  ;;  %4554 = vrot.lane.b32.xlu0 %v10736_v43, %s10894_s28  ;;  %v2963_v51 = vrot.slane %v2962_v12, 4  ;;  %v205_v53 = vpack.c.bf16 %v10893_v15, %v203_v30  ;;  %v2788_v54 = vshrl.u32 %v2646_v29, 16  ;;  %v2671_v23 = vld [vmem:[#allocation10 + $0x7c] sm:$0xf] }
  0x28   :  { %v2973_v56 = vrot.slane %v2972_v47, 4  ;;  %v2791_v57 = vshll.u32 %v2646_v29, 16  ;;  %v2797_v46 = vshll.u32 %v2647_v22, 16  ;;  %v2801_v58 = vshrl.u32 %v2647_v22, 16 }
  0x29   :  { %3619 = vrot.lane.b32.xlu1 %v10016_v44, %s10894_s28  ;;  %v2968_v59 = vsel %vm11007_vm4, %v2963_v51, %v2967_v34  ;;  %v262_v60 = vsel %vm98_vm3, %v256_v52, %v10927_v1  ;;  %207 = vst [vmem:[#allocation10 + $0x20] sm:$0xf] %v205_v53  ;;  %v2790_v13 = vrot.slane %v2788_v54, 4  ;;  %v783_v24 = vunpack.c.l.bf16 %v9932_v50 }
  0x2a   :  { %v2978_v30 = vsel %vm11007_vm4, %v2973_v56, %v2977_v48  ;;  %v264_v62 = vsel %vm100_vm0, %v262_v60, %v11068_v37  ;;  %v271_v0 = vsel %vm100_vm0, %v10927_v1, %v262_v60  ;;  %v2793_v2 = vrot.slane %v2791_v57, 5 }
  0x2b   :  { %v10017_v3 = vcombine.low %v2968_v59, %v2978_v30  ;;  %v265_v4 = vrot.slane %v264_v62, 7  ;;  %v272_v5 = vrot.slane %v271_v0, 7  ;;  %v2799_v6 = vrot.slane %v2797_v46, 5 }
  0x2c   :  { %v2794_v7 = vor.u32 %v2793_v2, %v2790_v13  ;;  %v2803_v8 = vrot.slane %v2801_v58, 4  ;;  %v789_v9 = vsel %vm98_vm3, %v783_v24, %v10927_v1  ;;  %v808_v10 = vunpack.c.h.bf16 %v9932_v50  ;;  %v9934_v2 = vld [vmem:[%s13912_s2 + $0x58] sm:$0xff]  }
  0x2d   :  { %3605 = vrot.lane.b32.xlu1 %v10009_v42, %s10894_s28  ;;  %v267_v37 = vpack.c.bf16 %v10893_v15, %v265_v4  ;;  %v791_v16 = vsel %vm100_vm0, %v789_v9, %v10927_v1  ;;  %v757_v17 = vpack.c.bf16 %v10893_v15, %v755_v55  ;;  %v2980_v18 = vshrl.u32 %v2670_v61, 16  ;;  %v2649_v39 = vld [vmem:[#allocation10 + $0x24] sm:$0xf] }
  0x2e   :  { %v2795_v19 = vrot.slane %v2794_v7, 4  ;;  %v2804_v25 = vor.u32 %v2803_v8, %v2799_v6  ;;  %v792_v26 = vrot.slane %v791_v16, 7  ;;  %v814_v27 = vsel %vm98_vm3, %v808_v10, %v10927_v1 }
  0x2f   :  { %269 = vst [vmem:[#allocation10 + $0x28] sm:$0xf] %v267_v37  ;;  %v816_v11 = vsel %vm100_vm0, %v814_v27, %v789_v9  ;;  %v823_v28 = vsel %vm100_vm0, %v10927_v1, %v814_v27  ;;  %759 = vst [vmem:[#allocation10 + $0x80] sm:$0xf] %v757_v17  ;;  %v2982_v20 = vrot.slane %v2980_v18, 4  ;;  %v2983_v29 = vshll.u32 %v2670_v61, 16 }
  0x30   :  { %v2648_v55 = vld [vmem:[#allocation10 + $0x20] sm:$0x1]  ;;  %v2800_v31 = vsel %vm11007_vm4, %v2795_v19, %v2799_v6  ;;  %v2805_v32 = vrot.slane %v2804_v25, 4  ;;  %v794_v33 = vpack.c.bf16 %v10893_v15, %v792_v26  ;;  %v817_v21 = vrot.slane %v816_v11, 7 }
  0x31   :  { %3621 = vrot.lane.b32.xlu1 %v10017_v3, %s10894_s28  ;;  %v2807_v34 = vshll.u32 %v2648_v55, 16  ;;  %v824_v35 = vrot.slane %v823_v28, 7  ;;  %v2985_v36 = vrot.slane %v2983_v29, 5  ;;  %v2989_v38 = vshll.u32 %v2671_v23, 16 }
  0x32   :  { %796 = vst [vmem:[#allocation10 + $0x84] sm:$0xf] %v794_v33  ;;  %v819_v40 = vpack.c.bf16 %v10893_v15, %v817_v21  ;;  %v2993_v41 = vshrl.u32 %v2671_v23, 16  ;;  %v300_v42 = vunpack.c.l.bf16 %v9918_v45  ;;  %v325_v43 = vunpack.c.h.bf16 %v9918_v45 }
  0x33   :  { %v2809_v12 = vrot.slane %v2807_v34, 5  ;;  %v2986_v22 = vor.u32 %v2985_v36, %v2982_v20  ;;  %v2991_v44 = vrot.slane %v2989_v38, 5  ;;  %v274_v47 = vpack.c.bf16 %v10893_v15, %v272_v5 }
  0x34   :  { %821 = vst [vmem:[#allocation10 + $0x88] sm:$0xf] %v819_v40  ;;  %v2995_v48 = vrot.slane %v2993_v41, 4  ;;  %v306_v49 = vsel %vm98_vm3, %v300_v42, %v10927_v1  ;;  %v331_v50 = vsel %vm98_vm3, %v325_v43, %v10927_v1  ;;  %v2812_v51 = vshrl.u32 %v2649_v39, 16  ;;  %v9920_v40 = vld [vmem:[%s13912_s2 + $0x20] sm:$0xff]  }
  0x35   :  { %v2810_v52 = vsel %vm11007_vm4, %v2805_v32, %v2809_v12  ;;  %v2987_v53 = vrot.slane %v2986_v22, 4  ;;  %v308_v54 = vsel %vm100_vm0, %v306_v49, %v10927_v1  ;;  %v333_v56 = vsel %vm100_vm0, %v331_v50, %v306_v49  ;;  %276 = vst [vmem:[#allocation10 + $0x2c] sm:$0xf] %v274_v47 }
  0x36   :  { %v10737_v57 = vld [vmem:[#allocation10 + $0x24] sm:$0xff]   ;;  %v10010_v46 = vcombine.low %v2800_v31, %v2810_v52  ;;  %v2672_v58 = vld [vmem:[#allocation10 + $0x80] sm:$0x1]  ;;  %v2996_v59 = vor.u32 %v2995_v48, %v2991_v44  ;;  %v309_v60 = vrot.slane %v308_v54, 7  ;;  %v11141_v13 = vsel %vm100_vm0, %v10927_v1, %v331_v50 }
  0x37   :  { %v2992_v24 = vsel %vm11007_vm4, %v2987_v53, %v2991_v44  ;;  %v2999_v61 = vshll.u32 %v2672_v58, 16  ;;  %v334_v30 = vrot.slane %v333_v56, 7  ;;  %v341_v62 = vrot.slane %v11141_v13, 7  ;;  %v2650_v0 = vld [vmem:[#allocation10 + $0x28] sm:$0xf]  ;;  %4540 = vrot.lane.b32.xlu0 %v10737_v57, %s10894_s28 }
  0x38   :  { %3607 = vrot.lane.b32.xlu1 %v10010_v46, %s10894_s28  ;;  %v2997_v3 = vrot.slane %v2996_v59, 4  ;;  %v311_v4 = vpack.c.bf16 %v10893_v15, %v309_v60  ;;  %v2814_v5 = vrot.slane %v2812_v51, 4  ;;  %v2815_v6 = vshll.u32 %v2649_v39, 16 }
  0x39   :  { %v3001_v7 = vrot.slane %v2999_v61, 5  ;;  %v336_v8 = vpack.c.bf16 %v10893_v15, %v334_v30  ;;  %v2821_v9 = vshll.u32 %v2650_v0, 16  ;;  %v2825_v10 = vshrl.u32 %v2650_v0, 16  ;;  %v2673_v18 = vld [vmem:[#allocation10 + $0x84] sm:$0xf] }
  0x3a   :  { %313 = vst [vmem:[#allocation10 + $0x30] sm:$0xf] %v311_v4  ;;  %v2817_v23 = vrot.slane %v2815_v6, 5  ;;  %v852_v37 = vunpack.c.l.bf16 %v9934_v2  ;;  %v877_v16 = vunpack.c.h.bf16 %v9934_v2  ;;  %v826_v17 = vpack.c.bf16 %v10893_v15, %v824_v35 }
  0x3b   :  { %v10738_v19 = vld [vmem:[#allocation10 + $0x84] sm:$0xff]   ;;  %v3002_v25 = vsel %vm11007_vm4, %v2997_v3, %v3001_v7  ;;  %338 = vst [vmem:[#allocation10 + $0x34] sm:$0xf] %v336_v8  ;;  %v2823_v26 = vrot.slane %v2821_v9, 5  ;;  %v2827_v27 = vrot.slane %v2825_v10, 4  ;;  %v3004_v11 = vshrl.u32 %v2673_v18, 16 }
  0x3c   :  { %v10018_v28 = vcombine.low %v2992_v24, %v3002_v25  ;;  %v2651_v20 = vld [vmem:[#allocation10 + $0x2c] sm:$0x1]  ;;  %v2818_v29 = vor.u32 %v2817_v23, %v2814_v5  ;;  %v858_v45 = vsel %vm98_vm3, %v852_v37, %v10927_v1  ;;  %v883_v55 = vsel %vm98_vm3, %v877_v16, %v10927_v1  ;;  %828 = vst [vmem:[#allocation10 + $0x8c] sm:$0xf] %v826_v17  ;;  %v2674_v34 = vld [vmem:[#allocation10 + $0x88] sm:$0xf] }
  0x3d   :  { %4556 = vrot.lane.b32.xlu0 %v10738_v19, %s10894_s28  ;;  %v2828_v31 = vor.u32 %v2827_v27, %v2823_v26  ;;  %v2831_v32 = vshll.u32 %v2651_v20, 16  ;;  %v860_v33 = vsel %vm100_vm0, %v858_v45, %v10927_v1  ;;  %v885_v21 = vsel %vm100_vm0, %v883_v55, %v858_v45  ;;  %v9936_v8 = vld [vmem:[%s13912_s2 + $0x60] sm:$0xff]  }
  0x3e   :  { %3623 = vrot.lane.b32.xlu1 %v10018_v28, %s10894_s28  ;;  %v2819_v35 = vrot.slane %v2818_v29, 4  ;;  %v861_v36 = vrot.slane %v860_v33, 7  ;;  %v886_v38 = vrot.slane %v885_v21, 7  ;;  %v11169_v39 = vsel %vm100_vm0, %v10927_v1, %v883_v55 }
  0x3f   :  { %v2829_v41 = vrot.slane %v2828_v31, 4  ;;  %v2833_v42 = vrot.slane %v2831_v32, 5  ;;  %v893_v43 = vrot.slane %v11169_v39, 7  ;;  %v3006_v12 = vrot.slane %v3004_v11, 4 }
  0x40   :  { %v2824_v22 = vsel %vm11007_vm4, %v2819_v35, %v2823_v26  ;;  %v863_v44 = vpack.c.bf16 %v10893_v15, %v861_v36  ;;  %v888_v47 = vpack.c.bf16 %v10893_v15, %v886_v38  ;;  %v3007_v48 = vshll.u32 %v2673_v18, 16 }
  0x41   :  { %v2834_v49 = vsel %vm11007_vm4, %v2829_v41, %v2833_v42  ;;  %v3013_v50 = vshll.u32 %v2674_v34, 16  ;;  %v3017_v51 = vshrl.u32 %v2674_v34, 16  ;;  %v369_v52 = vunpack.c.l.bf16 %v9920_v40  ;;  %v2652_v53 = vld [vmem:[#allocation10 + $0x30] sm:$0xf] }
  0x42   :  { %v10739_v54 = vld [vmem:[#allocation10 + $0x30] sm:$0xff]   ;;  %v10011_v56 = vcombine.low %v2824_v22, %v2834_v49  ;;  %865 = vst [vmem:[#allocation10 + $0x90] sm:$0xf] %v863_v44  ;;  %890 = vst [vmem:[#allocation10 + $0x94] sm:$0xf] %v888_v47  ;;  %v3009_v57 = vrot.slane %v3007_v48, 5  ;;  %v394_v46 = vunpack.c.h.bf16 %v9920_v40  ;;  %v343_v58 = vpack.c.bf16 %v10893_v15, %v341_v62 }
  0x43   :  { %v2675_v59 = vld [vmem:[#allocation10 + $0x8c] sm:$0x1]  ;;  %v3015_v60 = vrot.slane %v3013_v50, 5  ;;  %v3019_v13 = vrot.slane %v3017_v51, 4  ;;  %v375_v24 = vsel %vm98_vm3, %v369_v52, %v10927_v1  ;;  %v2836_v61 = vshrl.u32 %v2652_v53, 16  ;;  %4542 = vrot.lane.b32.xlu0 %v10739_v54, %s10894_s28 }
  0x44   :  { %3609 = vrot.lane.b32.xlu1 %v10011_v56, %s10894_s28  ;;  %v3010_v30 = vor.u32 %v3009_v57, %v3006_v12  ;;  %v3023_v0 = vshll.u32 %v2675_v59, 16  ;;  %v377_v2 = vsel %vm100_vm0, %v375_v24, %v10927_v1  ;;  %v400_v62 = vsel %vm98_vm3, %v394_v46, %v10927_v1  ;;  %345 = vst [vmem:[#allocation10 + $0x38] sm:$0xf] %v343_v58  ;;  %v2653_v7 = vld [vmem:[#allocation10 + $0x34] sm:$0xf]  ;;  %v9922_v50 = vld [vmem:[%s13912_s2 + $0x28] sm:$0xff]  }
  0x45   :  { %v3020_v3 = vor.u32 %v3019_v13, %v3015_v60  ;;  %v378_v4 = vrot.slane %v377_v2, 7  ;;  %v402_v5 = vsel %vm100_vm0, %v400_v62, %v375_v24  ;;  %v11195_v6 = vsel %vm100_vm0, %v10927_v1, %v400_v62 }
  0x46   :  { %v3011_v9 = vrot.slane %v3010_v30, 4  ;;  %v3025_v10 = vrot.slane %v3023_v0, 5  ;;  %v403_v23 = vrot.slane %v402_v5, 7  ;;  %v410_v37 = vrot.slane %v11195_v6, 7 }
  0x47   :  { %v3021_v16 = vrot.slane %v3020_v3, 4  ;;  %v380_v17 = vpack.c.bf16 %v10893_v15, %v378_v4  ;;  %v2838_v18 = vrot.slane %v2836_v61, 4  ;;  %v2839_v19 = vshll.u32 %v2652_v53, 16 }
  0x48   :  { %v3016_v25 = vsel %vm11007_vm4, %v3011_v9, %v3015_v60  ;;  %v405_v26 = vpack.c.bf16 %v10893_v15, %v403_v23  ;;  %v2845_v27 = vshll.u32 %v2653_v7, 16  ;;  %v2849_v11 = vshrl.u32 %v2653_v7, 16 }
  0x49   :  { %v10740_v28 = vld [vmem:[#allocation10 + $0x90] sm:$0xff]   ;;  %v3026_v20 = vsel %vm11007_vm4, %v3021_v16, %v3025_v10  ;;  %382 = vst [vmem:[#allocation10 + $0x3c] sm:$0xf] %v380_v17  ;;  %v2841_v29 = vrot.slane %v2839_v19, 5  ;;  %v921_v45 = vunpack.c.l.bf16 %v9936_v8  ;;  %v946_v55 = vunpack.c.h.bf16 %v9936_v8 }
  0x4a   :  { %v10019_v31 = vcombine.low %v3016_v25, %v3026_v20  ;;  %407 = vst [vmem:[#allocation10 + $0x40] sm:$0xf] %v405_v26  ;;  %v2847_v32 = vrot.slane %v2845_v27, 5  ;;  %v2851_v33 = vrot.slane %v2849_v11, 4  ;;  %v895_v21 = vpack.c.bf16 %v10893_v15, %v893_v43  ;;  %v2676_v34 = vld [vmem:[#allocation10 + $0x90] sm:$0xf]  ;;  %4558 = vrot.lane.b32.xlu0 %v10740_v28, %s10894_s28 }
  0x4b   :  { %v2654_v35 = vld [vmem:[#allocation10 + $0x38] sm:$0x1]  ;;  %v2842_v36 = vor.u32 %v2841_v29, %v2838_v18  ;;  %v927_v38 = vsel %vm98_vm3, %v921_v45, %v10927_v1  ;;  %v952_v39 = vsel %vm98_vm3, %v946_v55, %v10927_v1  ;;  %v3028_v40 = vshrl.u32 %v2676_v34, 16  ;;  %v2677_v22 = vld [vmem:[#allocation10 + $0x94] sm:$0xf]  ;;  %v9938_v20 = vld [vmem:[%s13912_s2 + $0x68] sm:$0xff]  }
  0x4c   :  { %3625 = vrot.lane.b32.xlu1 %v10019_v31, %s10894_s28  ;;  %v2852_v41 = vor.u32 %v2851_v33, %v2847_v32  ;;  %v2855_v42 = vshll.u32 %v2654_v35, 16  ;;  %v929_v43 = vsel %vm100_vm0, %v927_v38, %v10927_v1  ;;  %v954_v12 = vsel %vm100_vm0, %v952_v39, %v927_v38  ;;  %897 = vst [vmem:[#allocation10 + $0x98] sm:$0xf] %v895_v21 }
  0x4d   :  { %v2843_v44 = vrot.slane %v2842_v36, 4  ;;  %v930_v47 = vrot.slane %v929_v43, 7  ;;  %v955_v48 = vrot.slane %v954_v12, 7  ;;  %v11221_v49 = vsel %vm100_vm0, %v10927_v1, %v952_v39 }
  0x4e   :  { %v2853_v51 = vrot.slane %v2852_v41, 4  ;;  %v2857_v52 = vrot.slane %v2855_v42, 5  ;;  %v962_v53 = vrot.slane %v11221_v49, 7  ;;  %v3030_v54 = vrot.slane %v3028_v40, 4 }
  0x4f   :  { %v2848_v56 = vsel %vm11007_vm4, %v2843_v44, %v2847_v32  ;;  %v932_v57 = vpack.c.bf16 %v10893_v15, %v930_v47  ;;  %v957_v46 = vpack.c.bf16 %v10893_v15, %v955_v48  ;;  %v3031_v58 = vshll.u32 %v2676_v34, 16 }
  0x50   :  { %v2858_v59 = vsel %vm11007_vm4, %v2853_v51, %v2857_v52  ;;  %v3037_v60 = vshll.u32 %v2677_v22, 16  ;;  %v3041_v13 = vshrl.u32 %v2677_v22, 16  ;;  %v438_v24 = vunpack.c.l.bf16 %v9922_v50  ;;  %v2655_v61 = vld [vmem:[#allocation10 + $0x3c] sm:$0xf] }
  0x51   :  { %v10741_v30 = vld [vmem:[#allocation10 + $0x3c] sm:$0xff]   ;;  %v10012_v0 = vcombine.low %v2848_v56, %v2858_v59  ;;  %934 = vst [vmem:[#allocation10 + $0x9c] sm:$0xf] %v932_v57  ;;  %959 = vst [vmem:[#allocation10 + $0xa0] sm:$0xf] %v957_v46  ;;  %v3033_v2 = vrot.slane %v3031_v58, 5  ;;  %v463_v62 = vunpack.c.h.bf16 %v9922_v50  ;;  %v412_v3 = vpack.c.bf16 %v10893_v15, %v410_v37 }
  0x52   :  { %v3039_v4 = vrot.slane %v3037_v60, 5  ;;  %v3043_v5 = vrot.slane %v3041_v13, 4  ;;  %v444_v6 = vsel %vm98_vm3, %v438_v24, %v10927_v1  ;;  %v2860_v7 = vshrl.u32 %v2655_v61, 16  ;;  %4544 = vrot.lane.b32.xlu0 %v10741_v30, %s10894_s28  ;;  %v2656_v25 = vld [vmem:[#allocation10 + $0x40] sm:$0xf]  ;;  %v9924_v60 = vld [vmem:[%s13912_s2 + $0x30] sm:$0xff]  }
  0x53   :  { %3611 = vrot.lane.b32.xlu1 %v10012_v0, %s10894_s28  ;;  %v2678_v8 = vld [vmem:[#allocation10 + $0x98] sm:$0x1]  ;;  %v3034_v9 = vor.u32 %v3033_v2, %v3030_v54  ;;  %v446_v10 = vsel %vm100_vm0, %v444_v6, %v10927_v1  ;;  %v469_v23 = vsel %vm98_vm3, %v463_v62, %v10927_v1  ;;  %414 = vst [vmem:[#allocation10 + $0x44] sm:$0xf] %v412_v3  ;;  %v2863_v37 = vshll.u32 %v2655_v61, 16  ;;  %v11281_v0 = vld [vmem:[%s13912_s2 + $0x70] sm:$0xff]  }
  0x54   :  { %v3044_v16 = vor.u32 %v3043_v5, %v3039_v4  ;;  %v3047_v17 = vshll.u32 %v2678_v8, 16  ;;  %v447_v18 = vrot.slane %v446_v10, 7  ;;  %v471_v19 = vsel %vm100_vm0, %v469_v23, %v444_v6 }
  0x55   :  { %v3035_v26 = vrot.slane %v3034_v9, 4  ;;  %v472_v27 = vrot.slane %v471_v19, 7  ;;  %v478_v11 = vsel %vm100_vm0, %v10927_v1, %v469_v23  ;;  %v2862_v28 = vrot.slane %v2860_v7, 4 }
  0x56   :  { %v3045_v29 = vrot.slane %v3044_v16, 4  ;;  %v3049_v45 = vrot.slane %v3047_v17, 5  ;;  %v449_v55 = vpack.c.bf16 %v10893_v15, %v447_v18  ;;  %v479_v31 = vrot.slane %v478_v11, 7 }
  0x57   :  { %v3040_v32 = vsel %vm11007_vm4, %v3035_v26, %v3039_v4  ;;  %v474_v33 = vpack.c.bf16 %v10893_v15, %v472_v27  ;;  %v2865_v21 = vrot.slane %v2863_v37, 5  ;;  %v2869_v34 = vshll.u32 %v2656_v25, 16 }
  0x58   :  { %v10742_v35 = vld [vmem:[#allocation10 + $0x9c] sm:$0xff]   ;;  %v3050_v36 = vsel %vm11007_vm4, %v3045_v29, %v3049_v45  ;;  %451 = vst [vmem:[#allocation10 + $0x48] sm:$0xf] %v449_v55  ;;  %v2873_v38 = vshrl.u32 %v2656_v25, 16  ;;  %v990_v39 = vunpack.c.l.bf16 %v9938_v20  ;;  %v1015_v40 = vunpack.c.h.bf16 %v9938_v20 }
  0x59   :  { %v10020_v41 = vcombine.low %v3040_v32, %v3050_v36  ;;  %476 = vst [vmem:[#allocation10 + $0x4c] sm:$0xf] %v474_v33  ;;  %v2866_v42 = vor.u32 %v2865_v21, %v2862_v28  ;;  %v2871_v43 = vrot.slane %v2869_v34, 5  ;;  %v964_v12 = vpack.c.bf16 %v10893_v15, %v962_v53  ;;  %v2679_v22 = vld [vmem:[#allocation10 + $0x9c] sm:$0xf]  ;;  %4560 = vrot.lane.b32.xlu0 %v10742_v35, %s10894_s28 }
  0x5a   :  { %v2657_v44 = vld [vmem:[#allocation10 + $0x44] sm:$0x1]  ;;  %v2875_v47 = vrot.slane %v2873_v38, 4  ;;  %v996_v48 = vsel %vm98_vm3, %v990_v39, %v10927_v1  ;;  %v1021_v49 = vsel %vm98_vm3, %v1015_v40, %v10927_v1  ;;  %v3052_v50 = vshrl.u32 %v2679_v22, 16  ;;  %v2680_v59 = vld [vmem:[#allocation10 + $0xa0] sm:$0xf] }
  0x5b   :  { %3627 = vrot.lane.b32.xlu1 %v10020_v41, %s10894_s28  ;;  %v2867_v51 = vrot.slane %v2866_v42, 4  ;;  %v2879_v52 = vshll.u32 %v2657_v44, 16  ;;  %v998_v53 = vsel %vm100_vm0, %v996_v48, %v10927_v1  ;;  %v1023_v54 = vsel %vm100_vm0, %v1021_v49, %v996_v48  ;;  %966 = vst [vmem:[#allocation10 + $0xa4] sm:$0xf] %v964_v12 }
  0x5c   :  { %v2876_v56 = vor.u32 %v2875_v47, %v2871_v43  ;;  %v999_v57 = vrot.slane %v998_v53, 7  ;;  %v1024_v46 = vrot.slane %v1023_v54, 7  ;;  %v11270_v58 = vsel %vm100_vm0, %v10927_v1, %v1021_v49 }
  0x5d   :  { %v2872_v13 = vsel %vm11007_vm4, %v2867_v51, %v2871_v43  ;;  %v2881_v24 = vrot.slane %v2879_v52, 5  ;;  %v1031_v61 = vrot.slane %v11270_v58, 7  ;;  %v3054_v30 = vrot.slane %v3052_v50, 4 }
  0x5e   :  { %v2877_v2 = vrot.slane %v2876_v56, 4  ;;  %v1001_v62 = vpack.c.bf16 %v10893_v15, %v999_v57  ;;  %v1026_v3 = vpack.c.bf16 %v10893_v15, %v1024_v46  ;;  %v3055_v4 = vshll.u32 %v2679_v22, 16 }
  0x5f   :  { %v3061_v5 = vshll.u32 %v2680_v59, 16  ;;  %v3065_v6 = vshrl.u32 %v2680_v59, 16  ;;  %v507_v7 = vunpack.c.l.bf16 %v9924_v60  ;;  %v532_v8 = vunpack.c.h.bf16 %v9924_v60  ;;  %v2658_v9 = vld [vmem:[#allocation10 + $0x48] sm:$0xf] }
  0x60   :  { %v10743_v10 = vld [vmem:[#allocation10 + $0x48] sm:$0xff]   ;;  %v2882_v23 = vsel %vm11007_vm4, %v2877_v2, %v2881_v24  ;;  %1003 = vst [vmem:[#allocation10 + $0xa8] sm:$0xf] %v1001_v62  ;;  %1028 = vst [vmem:[#allocation10 + $0xac] sm:$0xf] %v1026_v3  ;;  %v3057_v37 = vrot.slane %v3055_v4, 5  ;;  %v481_v16 = vpack.c.bf16 %v10893_v15, %v479_v31  ;;  %v1059_v17 = vunpack.c.l.bf16 %v11281_v0 }
  0x61   :  { %v10013_v18 = vcombine.low %v2872_v13, %v2882_v23  ;;  %v3063_v19 = vrot.slane %v3061_v5, 5  ;;  %v3067_v25 = vrot.slane %v3065_v6, 4  ;;  %v513_v26 = vsel %vm98_vm3, %v507_v7, %v10927_v1  ;;  %4546 = vrot.lane.b32.xlu0 %v10743_v10, %s10894_s28  ;;  %v2659_v33 = vld [vmem:[#allocation10 + $0x4c] sm:$0xf] }
  0x62   :  { %v2681_v27 = vld [vmem:[#allocation10 + $0xa4] sm:$0x1]  ;;  %v3058_v11 = vor.u32 %v3057_v37, %v3054_v30  ;;  %v515_v28 = vsel %vm100_vm0, %v513_v26, %v10927_v1  ;;  %v538_v20 = vsel %vm98_vm3, %v532_v8, %v10927_v1  ;;  %483 = vst [vmem:[#allocation10 + $0x50] sm:$0xf] %v481_v16  ;;  %v2884_v29 = vshrl.u32 %v2658_v9, 16  ;;  %v9942_v16 = vld [vmem:[%s13912_s2 + $0x78] sm:$0xff]  }
  0x63   :  { %3613 = vrot.lane.b32.xlu1 %v10013_v18, %s10894_s28  ;;  %v3068_v45 = vor.u32 %v3067_v25, %v3063_v19  ;;  %v3071_v55 = vshll.u32 %v2681_v27, 16  ;;  %v516_v31 = vrot.slane %v515_v28, 7  ;;  %v540_v32 = vsel %vm100_vm0, %v538_v20, %v513_v26 }
  0x64   :  { %v3059_v21 = vrot.slane %v3058_v11, 4  ;;  %v541_v34 = vrot.slane %v540_v32, 7  ;;  %v547_v35 = vsel %vm100_vm0, %v10927_v1, %v538_v20  ;;  %v2886_v36 = vrot.slane %v2884_v29, 4 }
  0x65   :  { %v3069_v38 = vrot.slane %v3068_v45, 4  ;;  %v3073_v39 = vrot.slane %v3071_v55, 5  ;;  %v518_v40 = vpack.c.bf16 %v10893_v15, %v516_v31  ;;  %v548_v41 = vrot.slane %v547_v35, 7 }
  0x66   :  { %v3064_v42 = vsel %vm11007_vm4, %v3059_v21, %v3063_v19  ;;  %v543_v43 = vpack.c.bf16 %v10893_v15, %v541_v34  ;;  %v2887_v12 = vshll.u32 %v2658_v9, 16  ;;  %v2893_v22 = vshll.u32 %v2659_v33, 16 }
  0x67   :  { %v10744_v44 = vld [vmem:[#allocation10 + $0xa8] sm:$0xff]   ;;  %v3074_v47 = vsel %vm11007_vm4, %v3069_v38, %v3073_v39  ;;  %520 = vst [vmem:[#allocation10 + $0x54] sm:$0xf] %v518_v40  ;;  %v2897_v48 = vshrl.u32 %v2659_v33, 16  ;;  %v1065_v49 = vsel %vm98_vm3, %v1059_v17, %v10927_v1  ;;  %v1084_v50 = vunpack.c.h.bf16 %v11281_v0 }
  0x68   :  { %v10021_v51 = vcombine.low %v3064_v42, %v3074_v47  ;;  %545 = vst [vmem:[#allocation10 + $0x58] sm:$0xf] %v543_v43  ;;  %v2889_v52 = vrot.slane %v2887_v12, 5  ;;  %v2895_v53 = vrot.slane %v2893_v22, 5  ;;  %v1067_v54 = vsel %vm100_vm0, %v1065_v49, %v10927_v1  ;;  %4562 = vrot.lane.b32.xlu0 %v10744_v44, %s10894_s28  ;;  %v2682_v13 = vld [vmem:[#allocation10 + $0xa8] sm:$0xf] }
  0x69   :  { %v2660_v56 = vld [vmem:[#allocation10 + $0x50] sm:$0x1]  ;;  %v2899_v57 = vrot.slane %v2897_v48, 4  ;;  %v1068_v46 = vrot.slane %v1067_v54, 7  ;;  %v1090_v59 = vsel %vm98_vm3, %v1084_v50, %v10927_v1  ;;  %v1033_v60 = vpack.c.bf16 %v10893_v15, %v1031_v61  ;;  %v2683_v62 = vld [vmem:[#allocation10 + $0xac] sm:$0xf] }
  0x6a   :  { %3629 = vrot.lane.b32.xlu1 %v10021_v51, %s10894_s28  ;;  %v2890_v24 = vor.u32 %v2889_v52, %v2886_v36  ;;  %v2903_v30 = vshll.u32 %v2660_v56, 16  ;;  %v1092_v0 = vsel %vm100_vm0, %v1090_v59, %v1065_v49  ;;  %v11325_v2 = vsel %vm100_vm0, %v10927_v1, %v1090_v59  ;;  %v10749_v51 = vld [vmem:[%s13910_s0] sm:$0xff]   ;;  %v11357_v59 = vld [vmem:[#allocation10 + $0x1c] sm:$0xf] }
  0x6b   :  { %v2900_v3 = vor.u32 %v2899_v57, %v2895_v53  ;;  %v1070_v4 = vpack.c.bf16 %v10893_v15, %v1068_v46  ;;  %v1093_v5 = vrot.slane %v1092_v0, 7  ;;  %v1100_v58 = vrot.slane %v11325_v2, 7  ;;  %1035 = vst [vmem:[#allocation10 + $0xb0] sm:$0xf] %v1033_v60  ;;  %v6617_v46 = vld [vmem:[#allocation10 + $0x18] sm:$0xf] }
  0x6c   :  { %v2891_v61 = vrot.slane %v2890_v24, 4  ;;  %v2905_v6 = vrot.slane %v2903_v30, 5  ;;  %v3076_v7 = vshrl.u32 %v2682_v13, 16  ;;  %v3079_v8 = vshll.u32 %v2682_v13, 16  ;;  %v10750_v2 = vld [vmem:[%s13910_s0 + $0x8] sm:$0xff]  }
  0x6d   :  { %v2901_v9 = vrot.slane %v2900_v3, 4  ;;  %1072 = vst [vmem:[#allocation10 + $0xb4] sm:$0xf] %v1070_v4  ;;  %v1095_v10 = vpack.c.bf16 %v10893_v15, %v1093_v5  ;;  %v3085_v23 = vshll.u32 %v2683_v62, 16  ;;  %v3089_v37 = vshrl.u32 %v2683_v62, 16 }
  0x6e   :  { %v2896_v17 = vsel %vm11007_vm4, %v2891_v61, %v2895_v53  ;;  %v3078_v18 = vrot.slane %v3076_v7, 4  ;;  %v3081_v19 = vrot.slane %v3079_v8, 5  ;;  %v550_v25 = vpack.c.bf16 %v10893_v15, %v548_v41  ;;  %v2661_v26 = vld [vmem:[#allocation10 + $0x54] sm:$0xf]  ;;  %v10747_v8 = vld [vmem:[#allocation10 + $0x60] sm:$0xff]  }
  0x6f   :  { %v10745_v27 = vld [vmem:[#allocation10 + $0x54] sm:$0xff]   ;;  %v2906_v11 = vsel %vm11007_vm4, %v2901_v9, %v2905_v6  ;;  %1097 = vst [vmem:[#allocation10 + $0xb8] sm:$0xf] %v1095_v10  ;;  %v3087_v28 = vrot.slane %v3085_v23, 5  ;;  %v3091_v20 = vrot.slane %v3089_v37, 4  ;;  %v2908_v29 = vshrl.u32 %v2661_v26, 16 }
  0x70   :  { %v10014_v45 = vcombine.low %v2896_v17, %v2906_v11  ;;  %v3082_v55 = vor.u32 %v3081_v19, %v3078_v18  ;;  %552 = vst [vmem:[#allocation10 + $0x5c] sm:$0xf] %v550_v25  ;;  %v2662_v31 = vld [vmem:[#allocation10 + $0x58] sm:$0xf]  ;;  %v2911_v32 = vshll.u32 %v2661_v26, 16  ;;  %v1128_v33 = vunpack.c.l.bf16 %v9942_v16  ;;  %4548 = vrot.lane.b32.xlu0 %v10745_v27, %s10894_s28  ;;  %v9944_v27 = vld [vmem:[%s13912_s2 + $0x80] sm:$0xff]  }
  0x71   :  { %v3092_v21 = vor.u32 %v3091_v20, %v3087_v28  ;;  %v2910_v34 = vrot.slane %v2908_v29, 4  ;;  %v2917_v35 = vshll.u32 %v2662_v31, 16  ;;  %v2921_v36 = vshrl.u32 %v2662_v31, 16 }
  0x72   :  { %3615 = vrot.lane.b32.xlu1 %v10014_v45, %s10894_s28  ;;  %v2684_v38 = vld [vmem:[#allocation10 + $0xb0] sm:$0x1]  ;;  %v3083_v39 = vrot.slane %v3082_v55, 4  ;;  %v2913_v40 = vrot.slane %v2911_v32, 5  ;;  %v1134_v41 = vsel %vm98_vm3, %v1128_v33, %v10927_v1  ;;  %v1153_v42 = vunpack.c.h.bf16 %v9942_v16  ;;  %v6619_v45 = vld [vmem:[#allocation10 + $0x20] sm:$0x1] }
  0x73   :  { %v3093_v43 = vrot.slane %v3092_v21, 4  ;;  %v3095_v12 = vshll.u32 %v2684_v38, 16  ;;  %v11343_v22 = vrot.slane %v2917_v35, 5  ;;  %v2923_v44 = vrot.slane %v2921_v36, 4  ;;  %v10752_v21 = vld [vmem:[%s13910_s0 + $0x10] sm:$0xff]  }
  0x74   :  { %v3088_v47 = vsel %vm11007_vm4, %v3083_v39, %v3087_v28  ;;  %v2914_v48 = vor.u32 %v2913_v40, %v2910_v34  ;;  %v1136_v49 = vsel %vm100_vm0, %v1134_v41, %v10927_v1  ;;  %v1159_v50 = vsel %vm98_vm3, %v1153_v42, %v10927_v1  ;;  %v2685_v57 = vld [vmem:[#allocation10 + $0xb4] sm:$0xf] }
  0x75   :  { %v3097_v52 = vrot.slane %v3095_v12, 5  ;;  %v2924_v53 = vor.u32 %v2923_v44, %v11343_v22  ;;  %v1137_v54 = vrot.slane %v1136_v49, 7  ;;  %v1161_v56 = vsel %vm100_vm0, %v1159_v50, %v1134_v41 }
  0x76   :  { %v10746_v60 = vld [vmem:[#allocation10 + $0xb4] sm:$0xff]   ;;  %v2915_v13 = vrot.slane %v2914_v48, 4  ;;  %v1162_v24 = vrot.slane %v1161_v56, 7  ;;  %v11361_v30 = vsel %vm100_vm0, %v10927_v1, %v1159_v50  ;;  %v13915_v5 = vmov 0  }
  0x77   :  { %v3098_v0 = vsel %vm11007_vm4, %v3093_v43, %v3097_v52  ;;  %v2663_v62 = vld [vmem:[#allocation10 + $0x5c] sm:$0x1]  ;;  %v2925_v3 = vrot.slane %v2924_v53, 4  ;;  %v1139_v4 = vpack.c.bf16 %v10893_v15, %v1137_v54  ;;  %8800 = vmatprep.subr.bf16.mxu0 %v13915_v5  ;;  %v1102_v61 = vpack.c.bf16 %v10893_v15, %v1100_v58  ;;  %v2686_v6 = vld [vmem:[#allocation10 + $0xb8] sm:$0xf]  ;;  %10551 = vmatprep.subr.bf16.mxu1 %v13915_v5 }
  0x78   :  { %4564 = vrot.lane.b32.xlu0 %v10746_v60, %s10894_s28  ;;  %v10022_v7 = vcombine.low %v3088_v47, %v3098_v0  ;;  %v2920_v9 = vsel %vm11007_vm4, %v2915_v13, %v11343_v22  ;;  %v2927_v10 = vshll.u32 %v2663_v62, 16  ;;  %v1164_v23 = vpack.c.bf16 %v10893_v15, %v1162_v24  ;;  %8801 = vmatpush1.bf16.msra.mxu0 %v10749_v51  ;;  %v10753_v43 = vld [vmem:[%s13910_s0 + $0x18] sm:$0xff]   ;;  %v5688_v47 = vld [vmem:[#allocation10 + $0xc] sm:$0xe]  ;;  %v5690_v62 = vld [vmem:[#allocation10 + $0x14] sm:$0x1] }
  0x79   :  { %1141 = vst [vmem:[#allocation10 + $0xc0] sm:$0xf] %v1139_v4  ;;  %1104 = vst [vmem:[#allocation10 + $0xbc] sm:$0xf] %v1102_v61  ;;  %v3100_v58 = vshrl.u32 %v2685_v57, 16  ;;  %v3103_v37 = vshll.u32 %v2685_v57, 16  ;;  %10567 = vmatpush1.bf16.msra.mxu1 %v10749_v51  ;;  %8802 = vmatprep.subr.bf16.mxu0 %v13915_v5  ;;  %v1257_v41 = vunpack.c.l.bf16 %v9944_v27  ;;  %v1282_v42 = vunpack.c.h.bf16 %v9944_v27 }
  0x7a   :  { %v3109_v16 = vshll.u32 %v2686_v6, 16  ;;  %v3113_v17 = vshrl.u32 %v2686_v6, 16  ;;  %3631 = vrot.lane.b32.xlu1 %v10022_v7, %s10894_s28  ;;  %v2929_v18 = vrot.slane %v2927_v10, 5  ;;  %1166 = vst [vmem:[#allocation10 + $0xc4] sm:$0xf] %v1164_v23  ;;  %v6714_v19 = vshrl.u32 %v6617_v46, 16  ;;  %10552 = vmatprep.subr.bf16.mxu1 %v13915_v5 }
  0x7b   :  { %v6717_v25 = vshll.u32 %v6617_v46, 16  ;;  %v6723_v26 = vshll.u32 %v11357_v59, 16  ;;  %v3102_v11 = vrot.slane %v3100_v58, 4  ;;  %v3105_v28 = vrot.slane %v3103_v37, 5  ;;  %v2689_v4 = vld [vmem:[#allocation10 + $0xdc] sm:$0xf] }
  0x7c   :  { %v11386_v20 = vrot.slane %v3109_v16, 5  ;;  %v3115_v29 = vrot.slane %v3113_v17, 4  ;;  %4550 = vrot.lane.b32.xlu0 %v10747_v8, %s10894_s28  ;;  %v2930_v55 = vsel %vm11007_vm4, %v2925_v3, %v2929_v18  ;;  %v6716_v31 = vrot.slane %v6714_v19, 4  ;;  %8803 = vmatpush1.bf16.msra.mxu0 %v10750_v2  ;;  %v2688_v3 = vld [vmem:[#allocation10 + $0xd8] sm:$0xf]  ;;  %v10755_v58 = vld [vmem:[%s13910_s0 + $0x20] sm:$0xff]  }
  0x7d   :  { %v6719_v32 = vrot.slane %v6717_v25, 5  ;;  %v11391_v33 = vrot.slane %v6723_v26, 5  ;;  %v10015_v34 = vcombine.low %v2920_v9, %v2930_v55  ;;  %v3106_v35 = vor.u32 %v3105_v28, %v3102_v11  ;;  %10568 = vmatpush1.bf16.msra.mxu1 %v10750_v2  ;;  %8804 = vmatprep.subr.bf16.mxu0 %v13915_v5  ;;  %v2690_v9 = vld [vmem:[#allocation10 + $0xe0] sm:$0x1]  ;;  %v6620_v25 = vld [vmem:[#allocation10 + $0x24] sm:$0xf] }
  0x7e   :  { %v3116_v36 = vor.u32 %v3115_v29, %v11386_v20  ;;  %v6727_v38 = vshrl.u32 %v11357_v59, 16  ;;  %v6733_v40 = vshll.u32 %v6619_v45, 16  ;;  %10553 = vmatprep.subr.bf16.mxu1 %v13915_v5  ;;  %vm3924_vm5 = vcmask 1042432   ;;  %v5689_v59 = vld [vmem:[#allocation10 + $0x10] sm:$0xf] }
  0x7f   :  { %v6720_v39 = vor.u32 %v6719_v32, %v6716_v31  ;;  %3617 = vrot.lane.b32.xlu1 %v10015_v34, %s10894_s28  ;;  %v3107_v12 = vrot.slane %v3106_v35, 4  ;;  %v1263_v51 = vsel %vm98_vm3, %v1257_v41, %v10927_v1  ;;  %v1288_v52 = vsel %vm98_vm3, %v1282_v42, %v10927_v1  ;;  %v6621_v31 = vld [vmem:[#allocation10 + $0x28] sm:$0xf] }
  0x80   :  { %v3117_v22 = vrot.slane %v3116_v36, 4  ;;  %v6729_v44 = vrot.slane %v6727_v38, 4  ;;  %v2687_v48 = vld [vmem:[#allocation10 + $0xbc] sm:$0x1]  ;;  %v6735_v50 = vrot.slane %v6733_v40, 5  ;;  %8805 = vmatpush1.bf16.msra.mxu0 %v10752_v21  ;;  %v1265_v46 = vsel %vm100_vm0, %v1263_v51, %v10927_v1  ;;  %v9946_v41 = vld [vmem:[%s13912_s2 + $0x88] sm:$0xff]  }
  0x81   :  { %v6721_v49 = vrot.slane %v6720_v39, 4  ;;  %v10748_v53 = vld [vmem:[#allocation10 + $0xc0] sm:$0xff]   ;;  %v3112_v54 = vsel %vm11007_vm4, %v3107_v12, %v11386_v20  ;;  %v3119_v56 = vshll.u32 %v2687_v48, 16  ;;  %10569 = vmatpush1.bf16.msra.mxu1 %v10752_v21  ;;  %8806 = vmatprep.subr.bf16.mxu0 %v13915_v5  ;;  %v1266_v13 = vrot.slane %v1265_v46, 7  ;;  %v6622_v21 = vld [vmem:[#allocation10 + $0x2c] sm:$0x1] }
  0x82   :  { %v6730_v57 = vor.u32 %v6729_v44, %v11391_v33  ;;  %v1290_v24 = vsel %vm100_vm0, %v1288_v52, %v1263_v51  ;;  %v11423_v0 = vsel %vm100_vm0, %v10927_v1, %v1288_v52  ;;  %10554 = vmatprep.subr.bf16.mxu1 %v13915_v5  ;;  %4566 = vrot.lane.b32.xlu0 %v10748_v53, %s10894_s28  ;;  %vm3925_vm6 = vcmask 1046532   ;;  %v10756_v42 = vld [vmem:[%s13910_s0 + $0x28] sm:$0xff]  }
  0x83   :  { %v6726_v60 = vsel %vm11007_vm4, %v6721_v49, %v11391_v33  ;;  %v3121_v61 = vrot.slane %v3119_v56, 5  ;;  %v1291_v7 = vrot.slane %v1290_v24, 7  ;;  %v1298_v8 = vrot.slane %v11423_v0, 7  ;;  %vm11438_vm7 = vmor %vm3924_vm5, %vm3925_vm6  ;;  %v5691_v56 = vld [vmem:[#allocation10 + $0x18] sm:$0xe] }
  0x84   :  { %v6731_v6 = vrot.slane %v6730_v57, 4  ;;  %v1268_v10 = vpack.c.bf16 %v10893_v15, %v1266_v13  ;;  %v10168_v23 = vrot.slane %v5688_v47, 9  ;;  %v5882_v2 = vrot.slane %v5689_v59, 5  ;;  %8807 = vmatpush1.bf16.msra.mxu0 %v10753_v43  ;;  %v10758_v57 = vld [vmem:[%s13910_s0 + $0x30] sm:$0xff]   ;;  %v5692_v24 = vld [vmem:[#allocation10 + $0x1c] sm:$0xf] }
  0x85   :  { %v3122_v37 = vsel %vm11007_vm4, %v3117_v22, %v3121_v61  ;;  %v1293_v17 = vpack.c.bf16 %v10893_v15, %v1291_v7  ;;  %v5885_v19 = vrot.slane %v5690_v62, 5  ;;  %10570 = vmatpush1.bf16.msra.mxu1 %v10753_v43  ;;  %8808 = vmatprep.subr.bf16.mxu0 %v13915_v5  ;;  %v3124_v20 = vshrl.u32 %v2688_v3, 16 }
  0x86   :  { %v6736_v16 = vsel %vm11007_vm4, %v6731_v6, %v6735_v50  ;;  %v10023_v26 = vcombine.low %v3112_v54, %v3122_v37  ;;  %1270 = vst [vmem:[#allocation10 + $0xe4] sm:$0xf] %v1268_v10  ;;  %v5883_v11 = vsel %vm11438_vm7, %v10168_v23, %v5882_v2  ;;  %v5884_v28 = vrot.slane %v5882_v2, 4  ;;  %10555 = vmatprep.subr.bf16.mxu1 %v13915_v5  ;;  %v5693_v2 = vld [vmem:[#allocation10 + $0x20] sm:$0x1] }
  0x87   :  { %v10264_v27 = vcombine.low %v6726_v60, %v6736_v16  ;;  %1295 = vst [vmem:[#allocation10 + $0xe8] sm:$0xf] %v1293_v17  ;;  %v3127_v29 = vshll.u32 %v2688_v3, 16  ;;  %v3133_v45 = vshll.u32 %v2689_v4, 16  ;;  %v3137_v55 = vshrl.u32 %v2689_v4, 16 }
  0x88   :  { %3633 = vrot.lane.b32.xlu1 %v10023_v26, %s10894_s28  ;;  %v5886_v32 = vsel %vm11438_vm7, %v5884_v28, %v5885_v19  ;;  %v3143_v33 = vshll.u32 %v2690_v9, 16  ;;  %v6738_v34 = vshrl.u32 %v6620_v25, 16  ;;  %v6741_v35 = vshll.u32 %v6620_v25, 16  ;;  %8809 = vmatpush1.bf16.msra.mxu0 %v10755_v58  ;;  %v10759_v28 = vld [vmem:[%s13910_s0 + $0x38] sm:$0xff]  }
  0x89   :  { %7577 = vrot.lane.b32.xlu0 %v10264_v27, %s10894_s28  ;;  %v10200_v36 = vcombine.low %v5883_v11, %v5886_v32  ;;  %v3126_v38 = vrot.slane %v3124_v20, 4  ;;  %v3129_v39 = vrot.slane %v3127_v29, 5  ;;  %v3135_v40 = vrot.slane %v3133_v45, 5  ;;  %10571 = vmatpush1.bf16.msra.mxu1 %v10755_v58  ;;  %v6623_v32 = vld [vmem:[#allocation10 + $0x30] sm:$0xf] }
  0x8a   :  { %v3139_v43 = vrot.slane %v3137_v55, 4  ;;  %v3145_v12 = vrot.slane %v3143_v33, 5  ;;  %v6740_v22 = vrot.slane %v6738_v34, 4  ;;  %v6743_v44 = vrot.slane %v6741_v35, 5  ;;  %8810 = vmatprep.subr.bf16.mxu0 %v13915_v5  ;;  %10556 = vmatprep.subr.bf16.mxu1 %v13915_v5 }
  0x8b   :  { %v3130_v47 = vor.u32 %v3129_v39, %v3126_v38  ;;  %v6747_v48 = vshll.u32 %v6621_v31, 16  ;;  %v6751_v49 = vshrl.u32 %v6621_v31, 16  ;;  %v6757_v50 = vshll.u32 %v6622_v21, 16  ;;  %v10761_v38 = vld [vmem:[%s13910_s0 + $0x40] sm:$0xff]  }
  0x8c   :  { %v3140_v51 = vor.u32 %v3139_v43, %v3135_v40  ;;  %v6744_v52 = vor.u32 %v6743_v44, %v6740_v22  ;;  %v1326_v53 = vunpack.c.l.bf16 %v9946_v41  ;;  %v1351_v54 = vunpack.c.h.bf16 %v9946_v41  ;;  %8811 = vmatpush1.bf16.msra.mxu0 %v10756_v42  ;;  %v6625_v43 = vld [vmem:[#allocation10 + $0x38] sm:$0x1] }
  0x8d   :  { %6200 = vrot.lane.b32.xlu0 %v10200_v36, %s10894_s28  ;;  %v3131_v46 = vrot.slane %v3130_v47, 4  ;;  %v6749_v59 = vrot.slane %v6747_v48, 5  ;;  %v6753_v60 = vrot.slane %v6751_v49, 4  ;;  %v6759_v13 = vrot.slane %v6757_v50, 5  ;;  %10572 = vmatpush1.bf16.msra.mxu1 %v10756_v42  ;;  %v2691_v58 = vld [vmem:[#allocation10 + $0xe4] sm:$0xf] }
  0x8e   :  { %v10751_v62 = vld [vmem:[#allocation10 + $0xe4] sm:$0xff]   ;;  %v3141_v3 = vrot.slane %v3140_v51, 4  ;;  %v6745_v4 = vrot.slane %v6744_v52, 4  ;;  %v1332_v61 = vsel %vm98_vm3, %v1326_v53, %v10927_v1  ;;  %v1357_v6 = vsel %vm98_vm3, %v1351_v54, %v10927_v1  ;;  %8812 = vmatprep.subr.bf16.mxu0 %v13915_v5  ;;  %10557 = vmatprep.subr.bf16.mxu1 %v13915_v5  ;;  %v6624_v36 = vld [vmem:[#allocation10 + $0x34] sm:$0xf] }
  0x8f   :  { %v3136_v7 = vsel %vm11007_vm4, %v3131_v46, %v3135_v40  ;;  %v6754_v9 = vor.u32 %v6753_v60, %v6749_v59  ;;  %v1334_v10 = vsel %vm100_vm0, %v1332_v61, %v10927_v1  ;;  %v1359_v23 = vsel %vm100_vm0, %v1357_v6, %v1332_v61  ;;  %4568 = vrot.lane.b32.xlu1 %v10751_v62, %s10894_s28  ;;  %v2692_v31 = vld [vmem:[#allocation10 + $0xe8] sm:$0xf]  ;;  %v9948_v50 = vld [vmem:[%s13912_s2 + $0x90] sm:$0xff]  }
  0x90   :  { %v3146_v37 = vsel %vm11007_vm4, %v3141_v3, %v3145_v12  ;;  %v6750_v16 = vsel %vm11007_vm4, %v6745_v4, %v6749_v59  ;;  %v1335_v17 = vrot.slane %v1334_v10, 7  ;;  %v1360_v19 = vrot.slane %v1359_v23, 7  ;;  %8813 = vmatpush1.bf16.msra.mxu0 %v10758_v57  ;;  %v10762_v61 = vld [vmem:[%s13910_s0 + $0x48] sm:$0xff]  }
  0x91   :  { %v10024_v25 = vcombine.low %v3136_v7, %v3146_v37  ;;  %v6755_v26 = vrot.slane %v6754_v9, 4  ;;  %v11482_v27 = vsel %vm100_vm0, %v10927_v1, %v1357_v6  ;;  %v10169_v11 = vrot.slane %v5691_v56, 9  ;;  %10573 = vmatpush1.bf16.msra.mxu1 %v10758_v57  ;;  %8814 = vmatprep.subr.bf16.mxu0 %v13915_v5  ;;  %v11512_v56 = vld [vmem:[#allocation10 + $0x24] sm:$0xe]  ;;  %v5695_v10 = vld [vmem:[#allocation10 + $0x28] sm:$0xf] }
  0x92   :  { %v1337_v20 = vpack.c.bf16 %v10893_v15, %v1335_v17  ;;  %v1362_v29 = vpack.c.bf16 %v10893_v15, %v1360_v19  ;;  %v1367_v45 = vrot.slane %v11482_v27, 7  ;;  %v5889_v55 = vrot.slane %v5692_v24, 5  ;;  %10558 = vmatprep.subr.bf16.mxu1 %v13915_v5 }
  0x93   :  { %v6760_v33 = vsel %vm11007_vm4, %v6755_v26, %v6759_v13  ;;  %v5892_v21 = vrot.slane %v5693_v2, 5  ;;  %v1300_v34 = vpack.c.bf16 %v10893_v15, %v1298_v8  ;;  %v3148_v35 = vshrl.u32 %v2691_v58, 16  ;;  %3635 = vrot.lane.b32.xlu1 %v10024_v25, %s10894_s28  ;;  %v11515_v13 = vpop.permute.xlu1 %4552 }
  0x94   :  { %v10265_v39 = vcombine.low %v6750_v16, %v6760_v33  ;;  %1339 = vst [vmem:[#allocation10 + $0xf0] sm:$0xf] %v1337_v20  ;;  %1364 = vst [vmem:[#allocation10 + $0xf4] sm:$0xf] %v1362_v29  ;;  %v5890_v40 = vsel %vm11438_vm7, %v10169_v11, %v5889_v55  ;;  %v5891_v41 = vrot.slane %v5889_v55, 4  ;;  %v3151_v42 = vshll.u32 %v2691_v58, 16  ;;  %8815 = vmatpush1.bf16.msra.mxu0 %v10759_v28  ;;  %v11537_v29 = vpop.permute.xlu0 %4536 }
  0x95   :  { %1302 = vst [vmem:[#allocation10 + $0xec] sm:$0xf] %v1300_v34  ;;  %v3150_v0 = vrot.slane %v3148_v35, 4  ;;  %v3157_v8 = vshll.u32 %v2692_v31, 16  ;;  %v3161_v12 = vshrl.u32 %v2692_v31, 16  ;;  %v6762_v22 = vshrl.u32 %v6623_v32, 16  ;;  %10574 = vmatpush1.bf16.msra.mxu1 %v10759_v28  ;;  %8816 = vmatprep.subr.bf16.mxu0 %v13915_v5 }
  0x96   :  { %7579 = vrot.lane.b32.xlu0 %v10265_v39, %s10894_s28  ;;  %v5893_v44 = vsel %vm11438_vm7, %v5891_v41, %v5892_v21  ;;  %v3153_v47 = vrot.slane %v3151_v42, 5  ;;  %v6765_v48 = vshll.u32 %v6623_v32, 16  ;;  %v6771_v49 = vshll.u32 %v6624_v36, 16  ;;  %10559 = vmatprep.subr.bf16.mxu1 %v13915_v5  ;;  %v5696_v20 = vld [vmem:[#allocation10 + $0x2c] sm:$0x1]  ;;  %v10764_v21 = vld [vmem:[%s13910_s0 + $0x50] sm:$0xff]  }
  0x97   :  { %v10201_v51 = vcombine.low %v5890_v40, %v5893_v44  ;;  %v11510_v52 = vrot.slane %v3157_v8, 5  ;;  %v3163_v53 = vrot.slane %v3161_v12, 4  ;;  %v6764_v54 = vrot.slane %v6762_v22, 4  ;;  %v6626_v39 = vld [vmem:[#allocation10 + $0x3c] sm:$0xf] }
  0x98   :  { %v3154_v57 = vor.u32 %v3153_v47, %v3150_v0  ;;  %v6767_v46 = vrot.slane %v6765_v48, 5  ;;  %v6773_v59 = vrot.slane %v6771_v49, 5  ;;  %v6775_v60 = vshrl.u32 %v6624_v36, 16  ;;  %8817 = vmatpush1.bf16.msra.mxu0 %v10761_v38 }
  0x99   :  { %v3164_v24 = vor.u32 %v3163_v53, %v11510_v52  ;;  %v6781_v62 = vshll.u32 %v6625_v43, 16  ;;  %v1395_v3 = vunpack.c.l.bf16 %v9948_v50  ;;  %v1420_v4 = vunpack.c.h.bf16 %v9948_v50  ;;  %10575 = vmatpush1.bf16.msra.mxu1 %v10761_v38  ;;  %8818 = vmatprep.subr.bf16.mxu0 %v13915_v5 }
  0x9a   :  { %6202 = vrot.lane.b32.xlu0 %v10201_v51, %s10894_s28  ;;  %v3155_v6 = vrot.slane %v3154_v57, 4  ;;  %v6768_v7 = vor.u32 %v6767_v46, %v6764_v54  ;;  %v6777_v9 = vrot.slane %v6775_v60, 4  ;;  %v10170_v23 = vrot.slane %v11512_v56, 9  ;;  %10560 = vmatprep.subr.bf16.mxu1 %v13915_v5  ;;  %v6627_v51 = vld [vmem:[#allocation10 + $0x40] sm:$0xf]  ;;  %v11569_v46 = vpop.permute.xlu0 %3603 }
  0x9b   :  { %v10754_v2 = vld [vmem:[#allocation10 + $0xf0] sm:$0xff]   ;;  %v3165_v58 = vrot.slane %v3164_v24, 4  ;;  %v1401_v37 = vsel %vm98_vm3, %v1395_v3, %v10927_v1  ;;  %v1426_v16 = vsel %vm98_vm3, %v1420_v4, %v10927_v1  ;;  %v1369_v17 = vpack.c.bf16 %v10893_v15, %v1367_v45  ;;  %v11553_v40 = vpop.permute.xlu1 %3619  ;;  %v6628_v24 = vld [vmem:[#allocation10 + $0x44] sm:$0x1] }
  0x9c   :  { %v2693_v19 = vld [vmem:[#allocation10 + $0xec] sm:$0x1]  ;;  %v3160_v25 = vsel %vm11007_vm4, %v3155_v6, %v11510_v52  ;;  %v6769_v26 = vrot.slane %v6768_v7, 4  ;;  %v6778_v11 = vor.u32 %v6777_v9, %v6773_v59  ;;  %v6783_v28 = vrot.slane %v6781_v62, 5  ;;  %4570 = vrot.lane.b32.xlu1 %v10754_v2, %s10894_s28  ;;  %v2694_v32 = vld [vmem:[#allocation10 + $0xf0] sm:$0xf]  ;;  %8819 = vmatpush1.bf16.msra.mxu0 %v10762_v61 }
  0x9d   :  { %v3167_v55 = vshll.u32 %v2693_v19, 16  ;;  %v1403_v27 = vsel %vm100_vm0, %v1401_v37, %v10927_v1  ;;  %v1428_v45 = vsel %vm100_vm0, %v1426_v16, %v1401_v37  ;;  %v11545_v31 = vsel %vm100_vm0, %v10927_v1, %v1426_v16  ;;  %1371 = vst [vmem:[#allocation10 + $0xf8] sm:$0xf] %v1369_v17  ;;  %v2695_v33 = vld [vmem:[#allocation10 + $0xf4] sm:$0xf]  ;;  %10576 = vmatpush1.bf16.msra.mxu1 %v10762_v61  ;;  %v10765_v52 = vld [vmem:[%s13910_s0 + $0x58] sm:$0xff]  }
  0x9e   :  { %v6774_v34 = vsel %vm11007_vm4, %v6769_v26, %v6773_v59  ;;  %v6779_v35 = vrot.slane %v6778_v11, 4  ;;  %v1404_v36 = vrot.slane %v1403_v27, 7  ;;  %v1429_v38 = vrot.slane %v1428_v45, 7  ;;  %8820 = vmatprep.subr.bf16.mxu0 %v13915_v5  ;;  %10561 = vmatprep.subr.bf16.mxu1 %v13915_v5  ;;  %v10767_v17 = vld [vmem:[%s13910_s0 + $0x60] sm:$0xff]  }
  0x9f   :  { %v3169_v41 = vrot.slane %v3167_v55, 5  ;;  %v1436_v42 = vrot.slane %v11545_v31, 7  ;;  %v5896_v43 = vrot.slane %v5695_v10, 5  ;;  %v5899_v0 = vrot.slane %v5696_v20, 5  ;;  %v9950_v10 = vld [vmem:[%s13912_s2 + $0x98] sm:$0xff]   ;;  %v11591_v20 = vld [vmem:[%s13912_s2 + $0xa0] sm:$0xff]  }
  0xa0   :  { %v6784_v8 = vsel %vm11007_vm4, %v6779_v35, %v6783_v28  ;;  %v1406_v12 = vpack.c.bf16 %v10893_v15, %v1404_v36  ;;  %v1431_v22 = vpack.c.bf16 %v10893_v15, %v1429_v38  ;;  %v3172_v44 = vshrl.u32 %v2694_v32, 16  ;;  %8821 = vmatpush1.bf16.msra.mxu0 %v10764_v21  ;;  %v11586_v28 = vld [vmem:[#allocation10 + $0x30] sm:$0xe]  ;;  %v10768_v36 = vld [vmem:[%s13910_s0 + $0x68] sm:$0xff]   ;;  %v11599_v38 = vpop.permute.xlu0 %4538 }
  0xa1   :  { %v3170_v47 = vsel %vm11007_vm4, %v3165_v58, %v3169_v41  ;;  %v10266_v48 = vcombine.low %v6774_v34, %v6784_v8  ;;  %v5897_v49 = vsel %vm11438_vm7, %v10170_v23, %v5896_v43  ;;  %v5898_v50 = vrot.slane %v5896_v43, 4  ;;  %10577 = vmatpush1.bf16.msra.mxu1 %v10764_v21  ;;  %8822 = vmatprep.subr.bf16.mxu0 %v13915_v5  ;;  %v11579_v23 = vpop.permute.xlu1 %3605 }
  0xa2   :  { %v10025_v53 = vcombine.low %v3160_v25, %v3170_v47  ;;  %1408 = vst [vmem:[#allocation10 + $0xfc] sm:$0xf] %v1406_v12  ;;  %1433 = vst [vmem:[#allocation10 + $0x100] sm:$0xf] %v1431_v22  ;;  %v3174_v54 = vrot.slane %v3172_v44, 4  ;;  %v3175_v56 = vshll.u32 %v2694_v32, 16  ;;  %10562 = vmatprep.subr.bf16.mxu1 %v13915_v5  ;;  %v1464_v32 = vunpack.c.l.bf16 %v9950_v10 }
  0xa3   :  { %v3181_v57 = vshll.u32 %v2695_v33, 16  ;;  %7581 = vrot.lane.b32.xlu0 %v10266_v48, %s10894_s28  ;;  %v5900_v59 = vsel %vm11438_vm7, %v5898_v50, %v5899_v0  ;;  %v3185_v60 = vshrl.u32 %v2695_v33, 16  ;;  %v6786_v62 = vshrl.u32 %v6626_v39, 16  ;;  %v5698_v48 = vld [vmem:[#allocation10 + $0x34] sm:$0xf] }
  0xa4   :  { %v6789_v3 = vshll.u32 %v6626_v39, 16  ;;  %3637 = vrot.lane.b32.xlu1 %v10025_v53, %s10894_s28  ;;  %v10202_v4 = vcombine.low %v5897_v49, %v5900_v59  ;;  %v2696_v61 = vld [vmem:[#allocation10 + $0xf8] sm:$0x1]  ;;  %v3177_v6 = vrot.slane %v3175_v56, 5  ;;  %v6795_v9 = vshll.u32 %v6627_v51, 16  ;;  %8823 = vmatpush1.bf16.msra.mxu0 %v10765_v52 }
  0xa5   :  { %v3183_v7 = vrot.slane %v3181_v57, 5  ;;  %v3187_v2 = vrot.slane %v3185_v60, 4  ;;  %v3191_v58 = vshll.u32 %v2696_v61, 16  ;;  %v6788_v37 = vrot.slane %v6786_v62, 4  ;;  %10578 = vmatpush1.bf16.msra.mxu1 %v10765_v52  ;;  %8824 = vmatprep.subr.bf16.mxu0 %v13915_v5  ;;  %v5699_v49 = vld [vmem:[#allocation10 + $0x38] sm:$0x1]  ;;  %v11614_v31 = vpop.permute.xlu1 %3621 }
  0xa6   :  { %v6791_v16 = vrot.slane %v6789_v3, 5  ;;  %v3178_v19 = vor.u32 %v3177_v6, %v3174_v54  ;;  %v11584_v25 = vrot.slane %v6795_v9, 5  ;;  %v6799_v26 = vshrl.u32 %v6627_v51, 16  ;;  %10563 = vmatprep.subr.bf16.mxu1 %v13915_v5  ;;  %v6629_v60 = vld [vmem:[#allocation10 + $0x48] sm:$0xf]  ;;  %v10771_v6 = vld [vmem:[%s13910_s0 + $0x70] sm:$0xff]  }
  0xa7   :  { %v6805_v11 = vshll.u32 %v6628_v24, 16  ;;  %6204 = vrot.lane.b32.xlu0 %v10202_v4, %s10894_s28  ;;  %v3188_v55 = vor.u32 %v3187_v2, %v3183_v7  ;;  %v3193_v27 = vrot.slane %v3191_v58, 5  ;;  %v1489_v35 = vunpack.c.h.bf16 %v9950_v10  ;;  %v6630_v58 = vld [vmem:[#allocation10 + $0x4c] sm:$0xf] }
  0xa8   :  { %v6792_v45 = vor.u32 %v6791_v16, %v6788_v37  ;;  %v3179_v33 = vrot.slane %v3178_v19, 4  ;;  %v6801_v21 = vrot.slane %v6799_v26, 4  ;;  %v1470_v43 = vsel %vm98_vm3, %v1464_v32, %v10927_v1  ;;  %8825 = vmatpush1.bf16.msra.mxu0 %v10767_v17  ;;  %v11640_v37 = vpop.permute.xlu0 %4554  ;;  %v6631_v26 = vld [vmem:[#allocation10 + $0x50] sm:$0x1] }
  0xa9   :  { %v6807_v34 = vrot.slane %v6805_v11, 5  ;;  %v10757_v39 = vld [vmem:[#allocation10 + $0xfc] sm:$0xff]   ;;  %v3189_v41 = vrot.slane %v3188_v55, 4  ;;  %v1438_v0 = vpack.c.bf16 %v10893_v15, %v1436_v42  ;;  %v1533_v8 = vunpack.c.l.bf16 %v11591_v20  ;;  %10579 = vmatpush1.bf16.msra.mxu1 %v10767_v17  ;;  %8826 = vmatprep.subr.bf16.mxu0 %v13915_v5 }
  0xaa   :  { %v3184_v12 = vsel %vm11007_vm4, %v3179_v33, %v3183_v7  ;;  %v6793_v22 = vrot.slane %v6792_v45, 4  ;;  %v6802_v44 = vor.u32 %v6801_v21, %v11584_v25  ;;  %v1472_v47 = vsel %vm100_vm0, %v1470_v43, %v10927_v1  ;;  %4572 = vrot.lane.b32.xlu1 %v10757_v39, %s10894_s28  ;;  %v2697_v53 = vld [vmem:[#allocation10 + $0xfc] sm:$0xf]  ;;  %10564 = vmatprep.subr.bf16.mxu1 %v13915_v5  ;;  %v2698_v61 = vld [vmem:[#allocation10 + $0x100] sm:$0xf]  ;;  %v11647_v45 = vpop.permute.xlu1 %3607 }
  0xab   :  { %v3194_v42 = vsel %vm11007_vm4, %v3189_v41, %v3193_v27  ;;  %v1473_v50 = vrot.slane %v1472_v47, 7  ;;  %v1495_v51 = vsel %vm98_vm3, %v1489_v35, %v10927_v1  ;;  %v10171_v52 = vrot.slane %v11586_v28, 9  ;;  %1440 = vst [vmem:[#allocation10 + $0x104] sm:$0xf] %v1438_v0  ;;  %v10773_v35 = vld [vmem:[%s13910_s0 + $0x78] sm:$0xff]  }
  0xac   :  { %v10026_v54 = vcombine.low %v3184_v12, %v3194_v42  ;;  %v6798_v56 = vsel %vm11007_vm4, %v6793_v22, %v11584_v25  ;;  %v6803_v57 = vrot.slane %v6802_v44, 4  ;;  %v1497_v59 = vsel %vm100_vm0, %v1495_v51, %v1470_v43  ;;  %8827 = vmatpush1.bf16.msra.mxu0 %v10768_v36  ;;  %v11659_v12 = vld [vmem:[%s13910_s0 + $0x100] sm:$0xff]  }
  0xad   :  { %v1475_v24 = vpack.c.bf16 %v10893_v15, %v1473_v50  ;;  %v1498_v62 = vrot.slane %v1497_v59, 7  ;;  %v11631_v3 = vsel %vm100_vm0, %v10927_v1, %v1495_v51  ;;  %v5903_v4 = vrot.slane %v5698_v48, 5  ;;  %10580 = vmatpush1.bf16.msra.mxu1 %v10768_v36  ;;  %8828 = vmatprep.subr.bf16.mxu0 %v13915_v5 }
  0xae   :  { %v6808_v7 = vsel %vm11007_vm4, %v6803_v57, %v6807_v34  ;;  %v1505_v9 = vrot.slane %v11631_v3, 7  ;;  %v5906_v10 = vrot.slane %v5699_v49, 5  ;;  %v3196_v2 = vshrl.u32 %v2697_v53, 16  ;;  %3639 = vrot.lane.b32.xlu1 %v10026_v54, %s10894_s28  ;;  %10565 = vmatprep.subr.bf16.mxu1 %v13915_v5 }
  0xaf   :  { %v10267_v16 = vcombine.low %v6798_v56, %v6808_v7  ;;  %1477 = vst [vmem:[#allocation10 + $0x108] sm:$0xf] %v1475_v24  ;;  %v1500_v17 = vpack.c.bf16 %v10893_v15, %v1498_v62  ;;  %v5904_v19 = vsel %vm11438_vm7, %v10171_v52, %v5903_v4  ;;  %v5905_v25 = vrot.slane %v5903_v4, 4  ;;  %v5700_v52 = vld [vmem:[#allocation10 + $0x3c] sm:$0xe] }
  0xb0   :  { %v3198_v11 = vrot.slane %v3196_v2, 4  ;;  %v3199_v28 = vshll.u32 %v2697_v53, 16  ;;  %v3205_v55 = vshll.u32 %v2698_v61, 16  ;;  %v3209_v27 = vshrl.u32 %v2698_v61, 16  ;;  %8829 = vmatpush1.bf16.msra.mxu0 %v10771_v6  ;;  %v11662_v53 = vpop.permute.xlu0 %4540  ;;  %v11672_v61 = vpop.permute.xlu1 %3623 }
  0xb1   :  { %7583 = vrot.lane.b32.xlu0 %v10267_v16, %s10894_s28  ;;  %1502 = vst [vmem:[#allocation10 + $0x10c] sm:$0xf] %v1500_v17  ;;  %v5907_v32 = vsel %vm11438_vm7, %v5905_v25, %v5906_v10  ;;  %v6810_v33 = vshrl.u32 %v6629_v60, 16  ;;  %v6813_v21 = vshll.u32 %v6629_v60, 16  ;;  %v6819_v34 = vshll.u32 %v6630_v58, 16  ;;  %10581 = vmatpush1.bf16.msra.mxu1 %v10771_v6 }
  0xb2   :  { %v10203_v36 = vcombine.low %v5904_v19, %v5907_v32  ;;  %v2699_v39 = vld [vmem:[#allocation10 + $0x104] sm:$0x1]  ;;  %v3201_v41 = vrot.slane %v3199_v28, 5  ;;  %v3207_v43 = vrot.slane %v3205_v55, 5  ;;  %v3211_v0 = vrot.slane %v3209_v27, 4  ;;  %8830 = vmatprep.subr.bf16.mxu0 %v13915_v5  ;;  %10566 = vmatprep.subr.bf16.mxu1 %v13915_v5 }
  0xb3   :  { %v3215_v22 = vshll.u32 %v2699_v39, 16  ;;  %v6812_v44 = vrot.slane %v6810_v33, 4  ;;  %v6815_v47 = vrot.slane %v6813_v21, 5  ;;  %v6821_v48 = vrot.slane %v6819_v34, 5  ;;  %v5701_v10 = vld [vmem:[#allocation10 + $0x40] sm:$0xf] }
  0xb4   :  { %v3202_v49 = vor.u32 %v3201_v41, %v3198_v11  ;;  %v3212_v42 = vor.u32 %v3211_v0, %v3207_v43  ;;  %v6823_v50 = vshrl.u32 %v6630_v58, 16  ;;  %v6829_v51 = vshll.u32 %v6631_v26, 16  ;;  %8831 = vmatpush1.bf16.msra.mxu0 %v10773_v35  ;;  %v6632_v33 = vld [vmem:[#allocation10 + $0x54] sm:$0xf]  ;;  %v11694_v39 = vpop.permute.xlu0 %4556 }
  0xb5   :  { %6206 = vrot.lane.b32.xlu0 %v10203_v36, %s10894_s28  ;;  %v3217_v54 = vrot.slane %v3215_v22, 5  ;;  %v6816_v56 = vor.u32 %v6815_v47, %v6812_v44  ;;  %v1539_v57 = vsel %vm98_vm3, %v1533_v8, %v10927_v1  ;;  %v1558_v59 = vunpack.c.h.bf16 %v11591_v20  ;;  %10582 = vmatpush1.bf16.msra.mxu1 %v10773_v35  ;;  %v5702_v20 = vld [vmem:[#allocation10 + $0x44] sm:$0x1] }
  0xb6   :  { %v3203_v60 = vrot.slane %v3202_v49, 4  ;;  %v3213_v24 = vrot.slane %v3212_v42, 4  ;;  %v6825_v62 = vrot.slane %v6823_v50, 4  ;;  %v6831_v4 = vrot.slane %v6829_v51, 5  ;;  %9089 = vmatprep.subr.bf16.mxu0 %v13915_v5  ;;  %10471 = vmatprep.subr.bf16.mxu1 %v11659_v12  ;;  %v2700_v26 = vld [vmem:[#allocation10 + $0x108] sm:$0xf]  ;;  %v11702_v50 = vpop.permute.xlu1 %3609 }
  0xb7   :  { %v6817_v6 = vrot.slane %v6816_v56, 4  ;;  %v1541_v7 = vsel %vm100_vm0, %v1539_v57, %v10927_v1  ;;  %v1564_v8 = vsel %vm98_vm3, %v1558_v59, %v10927_v1  ;;  %v10172_v2 = vrot.slane %v5700_v52, 9  ;;  %v6633_v42 = vld [vmem:[#allocation10 + $0x58] sm:$0xf]  ;;  %v6634_v59 = vld [vmem:[#allocation10 + $0x5c] sm:$0x1] }
  0xb8   :  { %v10760_v58 = vld [vmem:[#allocation10 + $0x108] sm:$0xff]   ;;  %v3208_v16 = vsel %vm11007_vm4, %v3203_v60, %v3207_v43  ;;  %v3218_v17 = vsel %vm11007_vm4, %v3213_v24, %v3217_v54  ;;  %v6826_v19 = vor.u32 %v6825_v62, %v6821_v48  ;;  %v1542_v25 = vrot.slane %v1541_v7, 7 }
  0xb9   :  { %v10027_v11 = vcombine.low %v3208_v16, %v3218_v17  ;;  %v6822_v28 = vsel %vm11007_vm4, %v6817_v6, %v6821_v48  ;;  %v1566_v55 = vsel %vm100_vm0, %v1564_v8, %v1539_v57  ;;  %v11689_v27 = vsel %vm100_vm0, %v10927_v1, %v1564_v8  ;;  %v2701_v32 = vld [vmem:[#allocation10 + $0x10c] sm:$0xf]  ;;  %4574 = vrot.lane.b32.xlu1 %v10760_v58, %s10894_s28  ;;  %v5703_v58 = vld [vmem:[#allocation10 + $0x48] sm:$0xe]  ;;  %v11715_v16 = vpop.permute.xlu0 %4542 }
  0xba   :  { %v6827_v21 = vrot.slane %v6826_v19, 4  ;;  %v1544_v34 = vpack.c.bf16 %v10893_v15, %v1542_v25  ;;  %v1567_v35 = vrot.slane %v1566_v55, 7  ;;  %v1574_v36 = vrot.slane %v11689_v27, 7  ;;  %v9954_v7 = vld [vmem:[%s13912_s2 + $0xa8] sm:$0xff]  }
  0xbb   :  { %v5910_v41 = vrot.slane %v5701_v10, 5  ;;  %v5913_v43 = vrot.slane %v5702_v20, 5  ;;  %v1507_v0 = vpack.c.bf16 %v10893_v15, %v1505_v9  ;;  %v3220_v22 = vshrl.u32 %v2700_v26, 16 }
  0xbc   :  { %v6832_v44 = vsel %vm11007_vm4, %v6827_v21, %v6831_v4  ;;  %1546 = vst [vmem:[#allocation10 + $0x114] sm:$0xf] %v1544_v34  ;;  %v1569_v47 = vpack.c.bf16 %v10893_v15, %v1567_v35  ;;  %v3223_v48 = vshll.u32 %v2700_v26, 16  ;;  %v3229_v49 = vshll.u32 %v2701_v32, 16 }
  0xbd   :  { %v10268_v51 = vcombine.low %v6822_v28, %v6832_v44  ;;  %v5911_v52 = vsel %vm11438_vm7, %v10172_v2, %v5910_v41  ;;  %v5912_v54 = vrot.slane %v5910_v41, 4  ;;  %1509 = vst [vmem:[#allocation10 + $0x110] sm:$0xf] %v1507_v0  ;;  %v3222_v3 = vrot.slane %v3220_v22, 4  ;;  %3641 = vrot.lane.b32.xlu1 %v10027_v11, %s10894_s28  ;;  %v5704_v41 = vld [vmem:[#allocation10 + $0x4c] sm:$0xf] }
  0xbe   :  { %1571 = vst [vmem:[#allocation10 + $0x118] sm:$0xf] %v1569_v47  ;;  %v3225_v9 = vrot.slane %v3223_v48, 5  ;;  %v11707_v56 = vrot.slane %v3229_v49, 5  ;;  %v3233_v57 = vshrl.u32 %v2701_v32, 16  ;;  %v6834_v60 = vshrl.u32 %v6632_v33, 16 }
  0xbf   :  { %7585 = vrot.lane.b32.xlu0 %v10268_v51, %s10894_s28  ;;  %v5914_v24 = vsel %vm11438_vm7, %v5912_v54, %v5913_v43  ;;  %v6837_v62 = vshll.u32 %v6632_v33, 16  ;;  %v6843_v4 = vshll.u32 %v6633_v42, 16  ;;  %v6847_v6 = vshrl.u32 %v6633_v42, 16  ;;  %v11718_v33 = vpop.permute.xlu1 %3625 }
  0xc0   :  { %v10204_v8 = vcombine.low %v5911_v52, %v5914_v24  ;;  %v3226_v10 = vor.u32 %v3225_v9, %v3222_v3  ;;  %v3235_v20 = vrot.slane %v3233_v57, 4  ;;  %v6836_v2 = vrot.slane %v6834_v60, 4  ;;  %v5705_v57 = vld [vmem:[#allocation10 + $0x50] sm:$0x1]  ;;  %v11737_v60 = vpop.permute.xlu0 %4558 }
  0xc1   :  { %v6839_v17 = vrot.slane %v6837_v62, 5  ;;  %v6845_v19 = vrot.slane %v6843_v4, 5  ;;  %v6849_v25 = vrot.slane %v6847_v6, 4  ;;  %v6853_v26 = vshll.u32 %v6634_v59, 16 }
  0xc2   :  { %v3227_v11 = vrot.slane %v3226_v10, 4  ;;  %v3236_v28 = vor.u32 %v3235_v20, %v11707_v56  ;;  %v1602_v55 = vunpack.c.l.bf16 %v9954_v7  ;;  %v1627_v32 = vunpack.c.h.bf16 %v9954_v7 }
  0xc3   :  { %6208 = vrot.lane.b32.xlu0 %v10204_v8, %s10894_s28  ;;  %v6840_v21 = vor.u32 %v6839_v17, %v6836_v2  ;;  %v6850_v34 = vor.u32 %v6849_v25, %v6845_v19  ;;  %v6855_v35 = vrot.slane %v6853_v26, 5  ;;  %v10173_v43 = vrot.slane %v5703_v58, 9  ;;  %v2703_v7 = vld [vmem:[#allocation10 + $0x114] sm:$0xf]  ;;  %v6635_v8 = vld [vmem:[#allocation10 + $0x60] sm:$0xf] }
  0xc4   :  { %v2702_v0 = vld [vmem:[#allocation10 + $0x110] sm:$0x1]  ;;  %v3232_v22 = vsel %vm11007_vm4, %v3227_v11, %v11707_v56  ;;  %v3237_v44 = vrot.slane %v3236_v28, 4  ;;  %v1608_v47 = vsel %vm98_vm3, %v1602_v55, %v10927_v1  ;;  %v1633_v48 = vsel %vm98_vm3, %v1627_v32, %v10927_v1  ;;  %v6636_v25 = vld [vmem:[#allocation10 + $0x64] sm:$0xf] }
  0xc5   :  { %v10763_v49 = vld [vmem:[#allocation10 + $0x114] sm:$0xff]   ;;  %v3239_v42 = vshll.u32 %v2702_v0, 16  ;;  %v6841_v51 = vrot.slane %v6840_v21, 4  ;;  %v6851_v52 = vrot.slane %v6850_v34, 4  ;;  %v1610_v54 = vsel %vm100_vm0, %v1608_v47, %v10927_v1  ;;  %v11748_v26 = vpop.permute.xlu1 %3611  ;;  %v6637_v32 = vld [vmem:[#allocation10 + $0x68] sm:$0x1] }
  0xc6   :  { %v1611_v3 = vrot.slane %v1610_v54, 7  ;;  %v1635_v9 = vsel %vm100_vm0, %v1633_v48, %v1608_v47  ;;  %v11735_v56 = vsel %vm100_vm0, %v10927_v1, %v1633_v48  ;;  %v5917_v59 = vrot.slane %v5704_v41, 5  ;;  %4576 = vrot.lane.b32.xlu1 %v10763_v49, %s10894_s28  ;;  %v2704_v17 = vld [vmem:[#allocation10 + $0x118] sm:$0xf]  ;;  %v10772_v0 = vld [vmem:[#allocation10 + $0x60] sm:$0xff]   ;;  %v10775_v47 = vld [vmem:[#allocation10 + $0xc] sm:$0xff]  }
  0xc7   :  { %v3241_v24 = vrot.slane %v3239_v42, 5  ;;  %v6846_v62 = vsel %vm11007_vm4, %v6841_v51, %v6845_v19  ;;  %v6856_v4 = vsel %vm11007_vm4, %v6851_v52, %v6855_v35  ;;  %v1636_v6 = vrot.slane %v1635_v9, 7  ;;  %v10778_v48 = vld [vmem:[#allocation10 + $0x6c] sm:$0xff]   ;;  %v10783_v49 = vld [vmem:[#allocation10 + $0x78] sm:$0xff]   ;;  %v10786_v42 = vld [vmem:[#allocation10 + $0x24] sm:$0xff]  }
  0xc8   :  { %v10269_v10 = vcombine.low %v6846_v62, %v6856_v4  ;;  %v1613_v20 = vpack.c.bf16 %v10893_v15, %v1611_v3  ;;  %v1643_v2 = vrot.slane %v11735_v56, 7  ;;  %v5918_v58 = vsel %vm11438_vm7, %v10173_v43, %v5917_v59  ;;  %v10770_v43 = vld [vmem:[#allocation10] sm:$0xff]   ;;  %v10791_v52 = vld [vmem:[#allocation10 + $0x30] sm:$0xff]   ;;  %v11762_v4 = vpop.permute.xlu0 %4544 }
  0xc9   :  { %v3242_v19 = vsel %vm11007_vm4, %v3237_v44, %v3241_v24  ;;  %v1638_v11 = vpack.c.bf16 %v10893_v15, %v1636_v6  ;;  %v5919_v28 = vrot.slane %v5917_v59, 4  ;;  %v5920_v55 = vrot.slane %v5705_v57, 5  ;;  %v10781_v44 = vld [vmem:[#allocation10 + $0x18] sm:$0xff]   ;;  %v10788_v51 = vld [vmem:[#allocation10 + $0x84] sm:$0xff]   ;;  %v10794_v9 = vld [vmem:[#allocation10 + $0x90] sm:$0xff]  }
  0xca   :  { %v10028_v21 = vcombine.low %v3232_v22, %v3242_v19  ;;  %7587 = vrot.lane.b32.xlu0 %v10269_v10, %s10894_s28  ;;  %1615 = vst [vmem:[#allocation10 + $0x120] sm:$0xf] %v1613_v20  ;;  %v1576_v34 = vpack.c.bf16 %v10893_v15, %v1574_v36  ;;  %v3244_v35 = vshrl.u32 %v2703_v7, 16  ;;  %v3247_v41 = vshll.u32 %v2703_v7, 16  ;;  %v11760_v62 = vld [vmem:[#allocation10] sm:$0xe] }
  0xcb   :  { %1640 = vst [vmem:[#allocation10 + $0x124] sm:$0xf] %v1638_v11  ;;  %v5921_v22 = vsel %vm11438_vm7, %v5919_v28, %v5920_v55  ;;  %v3253_v54 = vshll.u32 %v2704_v17, 16  ;;  %v3257_v3 = vshrl.u32 %v2704_v17, 16  ;;  %v6858_v27 = vshrl.u32 %v6635_v8, 16  ;;  %v10797_v6 = vld [vmem:[#allocation10 + $0x3c] sm:$0xff]  }
  0xcc   :  { %3643 = vrot.lane.b32.xlu1 %v10028_v21, %s10894_s28  ;;  %v10205_v36 = vcombine.low %v5918_v58, %v5921_v22  ;;  %1578 = vst [vmem:[#allocation10 + $0x11c] sm:$0xf] %v1576_v34  ;;  %v3246_v57 = vrot.slane %v3244_v35, 4  ;;  %v3249_v59 = vrot.slane %v3247_v41, 5  ;;  %v6861_v24 = vshll.u32 %v6635_v8, 16  ;;  %v10799_v7 = vld [vmem:[#allocation10 + $0x9c] sm:$0xff]  }
  0xcd   :  { %v10802_v10 = vld [vmem:[#allocation10 + $0x48] sm:$0xff]   ;;  %v11764_v20 = vrot.slane %v3253_v54, 5  ;;  %v3259_v19 = vrot.slane %v3257_v3, 4  ;;  %v6860_v17 = vrot.slane %v6858_v27, 4  ;;  %v6867_v11 = vshll.u32 %v6636_v25, 16  ;;  %v3628_v35 = vpop.permute.xlu1 %3627  ;;  %v9956_v54 = vld [vmem:[%s13912_s2 + $0xb0] sm:$0xff]  }
  0xce   :  { %v3733_v28 = vld [vmem:[#allocation10 + $0x4] sm:$0xf]  ;;  %6210 = vrot.lane.b32.xlu0 %v10205_v36, %s10894_s28  ;;  %v3250_v58 = vor.u32 %v3249_v59, %v3246_v57  ;;  %v6863_v55 = vrot.slane %v6861_v24, 5  ;;  %v6871_v21 = vshrl.u32 %v6636_v25, 16  ;;  %v6877_v34 = vshll.u32 %v6637_v32, 16 }
  0xcf   :  { %v3734_v8 = vld [vmem:[#allocation10 + $0x8] sm:$0x1]  ;;  %v3260_v41 = vor.u32 %v3259_v19, %v11764_v20  ;;  %v11768_v22 = vrot.slane %v6867_v11, 5  ;;  %vm2607_vm8 = vcmask 523264   ;;  %vm3699_vm9 = vcmask 1048064  }
  0xd0   :  { %v11773_v3 = vrot.slane %v3250_v58, 4  ;;  %v6864_v27 = vor.u32 %v6863_v55, %v6860_v17  ;;  %v6873_v36 = vrot.slane %v6871_v21, 4  ;;  %v6879_v57 = vrot.slane %v6877_v34, 5  ;;  %v11775_v59 = vld [vmem:[#allocation10 + $0x54] sm:$0xe]  ;;  %2608 = vst.msk [vmem:[#allocation2] sm:$0xff] %vm2607_vm8, %v10770_v43 }
  0xd1   :  { %2616 = vst.msk [vmem:[#allocation2 + $0x140] sm:$0xff] %vm2607_vm8, %v10772_v0  ;;  %2609 = vst.msk [vmem:[#allocation2 + $0x28] sm:$0xff] %vm2607_vm8, %v10775_v47  ;;  %v3261_v25 = vrot.slane %v3260_v41, 4  ;;  %v10040_v32 = vrot.slane %v11760_v62, 9  ;;  %v3929_v43 = vrot.slane %v3733_v28, 5  ;;  %v3932_v0 = vrot.slane %v3734_v8, 5 }
  0xd2   :  { %2617 = vst.msk [vmem:[#allocation2 + $0x168] sm:$0xff] %vm2607_vm8, %v10778_v48  ;;  %2610 = vst.msk [vmem:[#allocation2 + $0x50] sm:$0xff] %vm2607_vm8, %v10781_v44  ;;  %v1696_v48 = vunpack.c.h.bf16 %v9956_v54  ;;  %v10174_v44 = vrot.slane %v11775_v59, 9  ;;  %v5708_v58 = vld [vmem:[#allocation10 + $0x5c] sm:$0x1] }
  0xd3   :  { %2618 = vst.msk [vmem:[#allocation2 + $0x190] sm:$0xff] %vm2607_vm8, %v10783_v49  ;;  %2611 = vst.msk [vmem:[#allocation2 + $0x78] sm:$0xff] %vm2607_vm8, %v10786_v42  ;;  %v2705_v47 = vld [vmem:[#allocation10 + $0x11c] sm:$0x1]  ;;  %v3758_v41 = vld [vmem:[#allocation10 + $0x68] sm:$0x1] }
  0xd4   :  { %2619 = vst.msk [vmem:[#allocation2 + $0x1b8] sm:$0xff] %vm2607_vm8, %v10788_v51  ;;  %2612 = vst.msk [vmem:[#allocation2 + $0xa0] sm:$0xff] %vm2607_vm8, %v10791_v52  ;;  %v3263_v49 = vshll.u32 %v2705_v47, 16  ;;  %v6639_v47 = vld [vmem:[#allocation10 + $0x70] sm:$0xf] }
  0xd5   :  { %2620 = vst.msk [vmem:[#allocation2 + $0x1e0] sm:$0xff] %vm2607_vm8, %v10794_v9  ;;  %2613 = vst.msk [vmem:[#allocation2 + $0xc8] sm:$0xff] %vm2607_vm8, %v10797_v6  ;;  %v3756_v9 = vld [vmem:[#allocation10 + $0x60] sm:$0xe]  ;;  %v1702_v6 = vsel %vm98_vm3, %v1696_v48, %v10927_v1  ;;  %v6640_v48 = vld [vmem:[#allocation10 + $0x74] sm:$0x1] }
  0xd6   :  { %2621 = vst.msk [vmem:[#allocation2 + $0x208] sm:$0xff] %vm2607_vm8, %v10799_v7  ;;  %2614 = vst.msk [vmem:[#allocation2 + $0xf0] sm:$0xff] %vm2607_vm8, %v10802_v10  ;;  %v3614_v10 = vpop.permute.xlu1 %3613  ;;  %v3265_v19 = vrot.slane %v3263_v49, 5  ;;  %v11840_v34 = vsel %vm100_vm0, %v10927_v1, %v1702_v6 }
  0xd7   :  { %3700 = vst.msk [vmem:[#allocation2] sm:$0xff] %vm3699_vm9, %v11569_v46  ;;  %3708 = vst.msk [vmem:[#allocation2 + $0x140] sm:$0xff] %vm3699_vm9, %v11553_v40  ;;  %v10766_v40 = vld [vmem:[#allocation10 + $0x120] sm:$0xff]   ;;  %v3256_v46 = vsel %vm11007_vm4, %v11773_v3, %v11764_v20  ;;  %v10804_v20 = vld [vmem:[#allocation10 + $0xa8] sm:$0xff]  }
  0xd8   :  { %3701 = vst.msk [vmem:[#allocation2 + $0x28] sm:$0xff] %vm3699_vm9, %v11579_v23  ;;  %3709 = vst.msk [vmem:[#allocation2 + $0x168] sm:$0xff] %vm3699_vm9, %v11614_v31  ;;  %v6865_v23 = vrot.slane %v6864_v27, 4  ;;  %v6874_v31 = vor.u32 %v6873_v36, %v11768_v22  ;;  %4578 = vrot.lane.b32.xlu1 %v10766_v40, %s10894_s28  ;;  %v1712_v27 = vrot.slane %v11840_v34, 7  ;;  %v2706_v36 = vld [vmem:[#allocation10 + $0x120] sm:$0xf] }
  0xd9   :  { %3702 = vst.msk [vmem:[#allocation2 + $0x50] sm:$0xff] %vm3699_vm9, %v11647_v45  ;;  %3710 = vst.msk [vmem:[#allocation2 + $0x190] sm:$0xff] %vm3699_vm9, %v11672_v61  ;;  %v1671_v45 = vunpack.c.l.bf16 %v9956_v54  ;;  %v5707_v61 = vld [vmem:[#allocation10 + $0x58] sm:$0xf] }
  0xda   :  { %3703 = vst.msk [vmem:[#allocation2 + $0x78] sm:$0xff] %vm3699_vm9, %v11702_v50  ;;  %3711 = vst.msk [vmem:[#allocation2 + $0x1b8] sm:$0xff] %vm3699_vm9, %v11718_v33  ;;  %v11815_v50 = vpop.permute.xlu0 %4560  ;;  %v3930_v33 = vsel %vm11438_vm7, %v10040_v32, %v3929_v43  ;;  %v6870_v42 = vsel %vm11007_vm4, %v6865_v23, %v11768_v22  ;;  %v6875_v51 = vrot.slane %v6874_v31, 4  ;;  %v5924_v7 = vrot.slane %v5707_v61, 5  ;;  %v6638_v61 = vld [vmem:[#allocation10 + $0x6c] sm:$0xf] }
  0xdb   :  { %3704 = vst.msk [vmem:[#allocation2 + $0xa0] sm:$0xff] %vm3699_vm9, %v11748_v26  ;;  %3712 = vst.msk [vmem:[#allocation2 + $0x1e0] sm:$0xff] %vm3699_vm9, %v3628_v35  ;;  %v3931_v26 = vrot.slane %v3929_v43, 4  ;;  %v1677_v52 = vsel %vm98_vm3, %v1671_v45, %v10927_v1  ;;  %v3757_v35 = vld [vmem:[#allocation10 + $0x64] sm:$0xf]  ;;  %v3266_v22 = vsel %vm11007_vm4, %v3261_v25, %v3265_v19  ;;  %v10048_v25 = vrot.slane %v3756_v9, 9 }
  0xdc   :  { %v1679_v62 = vsel %vm100_vm0, %v1677_v52, %v10927_v1  ;;  %v6880_v17 = vsel %vm11007_vm4, %v6875_v51, %v6879_v57  ;;  %3705 = vst.msk [vmem:[#allocation2 + $0xc8] sm:$0xff] %vm3699_vm9, %v3614_v10  ;;  %v1704_v21 = vsel %vm100_vm0, %v1702_v6, %v1677_v52  ;;  %v5925_v8 = vsel %vm11438_vm7, %v10174_v44, %v5924_v7  ;;  %v2707_v57 = vld [vmem:[#allocation10 + $0x124] sm:$0xf]  ;;  %v3736_v51 = vld [vmem:[#allocation10 + $0x10] sm:$0xf]  ;;  %v3630_v52 = vpop.permute.xlu1 %3629  ;;  %v10785_v34 = vld [vmem:[%s13910_s0 + $0x98] sm:$0xff]  }
  0xdd   :  { %v3933_v24 = vsel %vm11438_vm7, %v3931_v26, %v3932_v0  ;;  %v1680_v28 = vrot.slane %v1679_v62, 7  ;;  %v10270_v55 = vcombine.low %v6870_v42, %v6880_v17  ;;  %2622 = vst.msk [vmem:[#allocation2 + $0x230] sm:$0xff] %vm2607_vm8, %v10804_v20  ;;  %v1705_v3 = vrot.slane %v1704_v21, 7  ;;  %v10776_v20 = vld [vmem:[%s13910_s0 + $0x80] sm:$0xff]  }
  0xde   :  { %v10072_v11 = vcombine.low %v3930_v33, %v3933_v24  ;;  %v11850_v59 = vpop.permute.xlu0 %4546  ;;  %v10029_v32 = vcombine.low %v3256_v46, %v3266_v22  ;;  %v5926_v43 = vrot.slane %v5924_v7, 4  ;;  %v5927_v0 = vrot.slane %v5708_v58, 5  ;;  %v3737_v7 = vld [vmem:[#allocation10 + $0x14] sm:$0x1]  ;;  %v8313_v10 = vld [vmem:[#allocation2] sm:$0xff]  ;;  %3713 = vst.msk [vmem:[#allocation2 + $0x208] sm:$0xff] %vm3699_vm9, %v3630_v52 }
  0xdf   :  { %v1682_v54 = vpack.c.bf16 %v10893_v15, %v1680_v28  ;;  %7589 = vrot.lane.b32.xlu0 %v10270_v55, %s10894_s28  ;;  %v1707_v40 = vpack.c.bf16 %v10893_v15, %v1705_v3  ;;  %v3985_v23 = vrot.slane %v3757_v35, 5  ;;  %v3988_v31 = vrot.slane %v3758_v41, 5  ;;  %v10807_v55 = vld [vmem:[#allocation10 + $0x54] sm:$0xff]  }
  0xe0   :  { %4279 = vst.msk [vmem:[#allocation2 + $0x8] sm:$0xff] %vm2607_vm8, %v10072_v11  ;;  %v1645_v45 = vpack.c.bf16 %v10893_v15, %v1643_v2  ;;  %3645 = vrot.lane.b32.xlu1 %v10029_v32, %s10894_s28  ;;  %v5928_v46 = vsel %vm11438_vm7, %v5926_v43, %v5927_v0  ;;  %v3271_v33 = vshll.u32 %v2706_v36, 16  ;;  %v3277_v26 = vshll.u32 %v2707_v57, 16  ;;  %v3735_v2 = vld [vmem:[#allocation10 + $0xc] sm:$0xe]  ;;  %v9958_v22 = vld [vmem:[%s13912_s2 + $0xb8] sm:$0xff]  }
  0xe1   :  { %4632 = vst.msk [vmem:[#allocation2 + $0x8] sm:$0xff] %vm3699_vm9, %v11537_v29  ;;  %1684 = vst [vmem:[#allocation10 + $0x12c] sm:$0xf] %v1682_v54  ;;  %v3268_v29 = vshrl.u32 %v2706_v36, 16  ;;  %v10206_v44 = vcombine.low %v5925_v8, %v5928_v46  ;;  %v3986_v49 = vsel %vm11438_vm7, %v10048_v25, %v3985_v23  ;;  %v3987_v42 = vrot.slane %v3985_v23, 4 }
  0xe2   :  { %1709 = vst [vmem:[#allocation10 + $0x130] sm:$0xf] %v1707_v40  ;;  %1647 = vst [vmem:[#allocation10 + $0x128] sm:$0xf] %v1645_v45  ;;  %v3281_v56 = vshrl.u32 %v2707_v57, 16  ;;  %v3273_v24 = vrot.slane %v3271_v33, 5  ;;  %v11873_v58 = vpop.permute.xlu0 %4562 }
  0xe3   :  { %v3270_v9 = vrot.slane %v3268_v29, 4  ;;  %v11864_v62 = vrot.slane %v3277_v26, 5  ;;  %v6882_v6 = vshrl.u32 %v6638_v61, 16  ;;  %6212 = vrot.lane.b32.xlu0 %v10206_v44, %s10894_s28  ;;  %v3989_v19 = vsel %vm11438_vm7, %v3987_v42, %v3988_v31  ;;  %v5709_v32 = vld [vmem:[#allocation10 + $0x60] sm:$0xe]  ;;  %2615 = vst.msk [vmem:[#allocation2 + $0x118] sm:$0xff] %vm2607_vm8, %v10807_v55 }
  0xe4   :  { %v3283_v17 = vrot.slane %v3281_v56, 4  ;;  %v6885_v11 = vshll.u32 %v6638_v61, 16  ;;  %v6891_v28 = vshll.u32 %v6639_v47, 16  ;;  %v10080_v21 = vcombine.low %v3986_v49, %v3989_v19  ;;  %v5710_v46 = vld [vmem:[#allocation10 + $0x64] sm:$0xf]  ;;  %v10780_v29 = vld [vmem:[%s13910_s0 + $0x88] sm:$0xff]  }
  0xe5   :  { %v3274_v8 = vor.u32 %v3273_v24, %v3270_v9  ;;  %v6884_v35 = vrot.slane %v6882_v6, 4  ;;  %v6895_v41 = vshrl.u32 %v6639_v47, 16  ;;  %v6901_v57 = vshll.u32 %v6640_v48, 16  ;;  %v3616_v9 = vpop.permute.xlu1 %3615  ;;  %v5711_v6 = vld [vmem:[#allocation10 + $0x68] sm:$0x1] }
  0xe6   :  { %v3284_v54 = vor.u32 %v3283_v17, %v11864_v62  ;;  %v6887_v3 = vrot.slane %v6885_v11, 5  ;;  %v6893_v36 = vrot.slane %v6891_v28, 5  ;;  %4287 = vst.msk [vmem:[#allocation2 + $0x148] sm:$0xff] %vm2607_vm8, %v10080_v21  ;;  %v10041_v40 = vrot.slane %v3735_v2, 9  ;;  %v11892_v52 = vpop.permute.xlu0 %4548  ;;  %v11897_v19 = vld [vmem:[#allocation10 + $0x6c] sm:$0xe] }
  0xe7   :  { %v3275_v0 = vrot.slane %v3274_v8, 4  ;;  %v6897_v25 = vrot.slane %v6895_v41, 4  ;;  %v3936_v23 = vrot.slane %v3736_v51, 5  ;;  %4640 = vst.msk [vmem:[#allocation2 + $0x148] sm:$0xff] %vm3699_vm9, %v11515_v13  ;;  %v6903_v61 = vrot.slane %v6901_v57, 5  ;;  %3706 = vst.msk [vmem:[#allocation2 + $0xf0] sm:$0xff] %vm3699_vm9, %v3616_v9 }
  0xe8   :  { %v8314_v43 = vld [vmem:[#allocation2 + $0x8] sm:$0xff]  ;;  %v3285_v31 = vrot.slane %v3284_v54, 4  ;;  %v6888_v45 = vor.u32 %v6887_v3, %v6884_v35  ;;  %v3939_v47 = vrot.slane %v3737_v7, 5  ;;  %v1740_v2 = vunpack.c.l.bf16 %v9958_v22  ;;  %v3760_v55 = vld [vmem:[#allocation10 + $0x70] sm:$0xf] }
  0xe9   :  { %8832 = vmatprep.mubr.bf16.mxu0 %v8314_v43  ;;  %v10769_v33 = vld [vmem:[#allocation10 + $0x12c] sm:$0xff]   ;;  %v2708_v26 = vld [vmem:[#allocation10 + $0x128] sm:$0x1]  ;;  %v3280_v48 = vsel %vm11007_vm4, %v3275_v0, %v11864_v62  ;;  %v6898_v44 = vor.u32 %v6897_v25, %v6893_v36  ;;  %v3937_v13 = vsel %vm11438_vm7, %v10041_v40, %v3936_v23  ;;  %v3938_v49 = vrot.slane %v3936_v23, 4  ;;  %v11905_v21 = vld [vmem:[#allocation10 + $0x74] sm:$0x1] }
  0xea   :  { %8833 = vmatmul.mubr.bf16.vlgmr.msra.gmra.mrb[0].mxu0 %v8313_v10  ;;  %v3287_v42 = vshll.u32 %v2708_v26, 16  ;;  %v6889_v56 = vrot.slane %v6888_v45, 4  ;;  %v1765_v51 = vunpack.c.h.bf16 %v9958_v22  ;;  %4580 = vrot.lane.b32.xlu1 %v10769_v33, %s10894_s28  ;;  %v10175_v7 = vrot.slane %v5709_v32, 9  ;;  %v10782_v8 = vld [vmem:[%s13910_s0 + $0x90] sm:$0xff]   ;;  %v2709_v3 = vld [vmem:[#allocation10 + $0x12c] sm:$0xf] }
  0xeb   :  { %9090 = vmatpush1.bf16.msra.mxu0 %v10776_v20  ;;  %v6899_v24 = vrot.slane %v6898_v44, 4  ;;  %v3940_v62 = vsel %vm11438_vm7, %v3938_v49, %v3939_v47  ;;  %v5931_v10 = vrot.slane %v5710_v46, 5  ;;  %v1746_v28 = vsel %vm98_vm3, %v1740_v2, %v10927_v1  ;;  %v11926_v57 = vld [vmem:[%s13910_s0 + $0x108] sm:$0xff]   ;;  %v8353_v40 = vld [vmem:[#allocation2 + $0x140] sm:$0xff]  ;;  %v6641_v46 = vld [vmem:[#allocation10 + $0x78] sm:$0xf] }
  0xec   :  { %9091 = vmatprep.subr.bf16.mxu0 %v13915_v5  ;;  %v3289_v20 = vrot.slane %v3287_v42, 5  ;;  %v6894_v17 = vsel %vm11007_vm4, %v6889_v56, %v6893_v36  ;;  %v10073_v11 = vcombine.low %v3937_v13, %v3940_v62  ;;  %v1748_v41 = vsel %vm100_vm0, %v1746_v28, %v10927_v1  ;;  %v11921_v36 = vld [vmem:[#allocation10 + $0x130] sm:$0xf]  ;;  %v11945_v13 = vpop.permute.xlu0 %4564  ;;  %v10811_v49 = vld [vmem:[#allocation10 + $0x18] sm:$0xff]  }
  0xed   :  { %v6904_v35 = vsel %vm11007_vm4, %v6899_v24, %v6903_v61  ;;  %v1771_v22 = vsel %vm98_vm3, %v1765_v51, %v10927_v1  ;;  %v11919_v54 = vsel %vm11438_vm7, %v10175_v7, %v5931_v10  ;;  %v1749_v0 = vrot.slane %v1748_v41, 7  ;;  %v6643_v7 = vld [vmem:[#allocation10 + $0x80] sm:$0x1]  ;;  %6585 = vst.msk [vmem:[#allocation2 + $0x18] sm:$0xff] %vm2607_vm8, %v10811_v49 }
  0xee   :  { %v3290_v32 = vsel %vm11007_vm4, %v3285_v31, %v3289_v20  ;;  %v10271_v43 = vcombine.low %v6894_v17, %v6904_v35  ;;  %4280 = vst.msk [vmem:[#allocation2 + $0x30] sm:$0xff] %vm2607_vm8, %v10073_v11  ;;  %v1773_v25 = vsel %vm100_vm0, %v1771_v22, %v1746_v28  ;;  %v11937_v61 = vsel %vm100_vm0, %v10927_v1, %v1771_v22  ;;  %v8354_v31 = vld [vmem:[#allocation2 + $0x148] sm:$0xff]  ;;  %v3738_v11 = vld [vmem:[#allocation10 + $0x18] sm:$0xe]  ;;  %v10809_v28 = vld [vmem:[%s13910_s0 + $0x110] sm:$0xff]  }
  0xef   :  { %9092 = vmatpush1.bf16.msra.mxu0 %v10780_v29  ;;  %v10030_v23 = vcombine.low %v3280_v48, %v3290_v32  ;;  %4633 = vst.msk [vmem:[#allocation2 + $0x30] sm:$0xff] %vm3699_vm9, %v11599_v38  ;;  %v1774_v45 = vrot.slane %v1773_v25, 7  ;;  %v5933_v47 = vrot.slane %v5931_v10, 4  ;;  %v10810_v29 = vld [vmem:[#allocation10 + $0xb4] sm:$0xff]   ;;  %v1751_v33 = vpack.c.bf16 %v10893_v15, %v1749_v0  ;;  %8896 = vmatprep.mubr.bf16.mxu1 %v8354_v31  ;;  %v11943_v38 = vld [vmem:[#allocation10 + $0x7c] sm:$0xf] }
  0xf0   :  { %9093 = vmatprep.subr.bf16.mxu0 %v13915_v5  ;;  %7591 = vrot.lane.b32.xlu0 %v10271_v43, %s10894_s28  ;;  %v1781_v26 = vrot.slane %v11937_v61, 7  ;;  %v5934_v44 = vrot.slane %v5711_v6, 5  ;;  %v10049_v48 = vrot.slane %v11897_v19, 9  ;;  %v3992_v56 = vrot.slane %v3760_v55, 5  ;;  %2623 = vst.msk [vmem:[#allocation2 + $0x258] sm:$0xff] %vm2607_vm8, %v10810_v29  ;;  %v11978_v32 = vpop.permute.xlu0 %4550 }
  0xf1   :  { %3647 = vrot.lane.b32.xlu1 %v10030_v23, %s10894_s28  ;;  %v1776_v42 = vpack.c.bf16 %v10893_v15, %v1774_v45  ;;  %v3995_v2 = vrot.slane %v11905_v21, 5  ;;  %v1714_v51 = vpack.c.bf16 %v10893_v15, %v1712_v27  ;;  %8897 = vmatmul.mubr.bf16.vlgmr.msra.gmra.mrb[0].mxu1 %v8353_v40  ;;  %1753 = vst [vmem:[#allocation10 + $0x138] sm:$0xf] %v1751_v33  ;;  %v3292_v24 = vshrl.u32 %v2709_v3, 16  ;;  %v3632_v27 = vpop.permute.xlu1 %3631  ;;  %v3740_v23 = vld [vmem:[#allocation10 + $0x20] sm:$0x1] }
  0xf2   :  { %v5935_v9 = vsel %vm11438_vm7, %v5933_v47, %v5934_v44  ;;  %v3295_v62 = vshll.u32 %v2709_v3, 16  ;;  %v3301_v6 = vshll.u32 %v11921_v36, 16  ;;  %10472 = vmatpush3.bf16.msra.mxu1 %v11659_v12  ;;  %v3993_v19 = vsel %vm11438_vm7, %v10049_v48, %v3992_v56  ;;  %v3739_v12 = vld [vmem:[#allocation10 + $0x1c] sm:$0xf]  ;;  %3714 = vst.msk [vmem:[#allocation2 + $0x230] sm:$0xff] %vm3699_vm9, %v3632_v27  ;;  %v10787_v47 = vld [vmem:[%s13910_s0 + $0xa0] sm:$0xff]  }
  0xf3   :  { %9094 = vmatpush1.bf16.msra.mxu0 %v10782_v8  ;;  %1778 = vst [vmem:[#allocation10 + $0x13c] sm:$0xf] %v1776_v42  ;;  %v10207_v10 = vcombine.low %v11919_v54, %v5935_v9  ;;  %v3994_v20 = vrot.slane %v3992_v56, 4  ;;  %1716 = vst [vmem:[#allocation10 + $0x134] sm:$0xf] %v1714_v51  ;;  %v3305_v17 = vshrl.u32 %v11921_v36, 16  ;;  %10473 = vmatprep.subr.bf16.mxu1 %v11926_v57 }
  0xf4   :  { %9095 = vmatprep.subr.bf16.mxu0 %v13915_v5  ;;  %v3294_v55 = vrot.slane %v3292_v24, 4  ;;  %v3297_v21 = vrot.slane %v3295_v62, 5  ;;  %v11972_v8 = vrot.slane %v3301_v6, 5  ;;  %v6906_v35 = vshrl.u32 %v6641_v46, 16  ;;  %v8318_v36 = vld [vmem:[#allocation2 + $0x28] sm:$0xff]  ;;  %v9960_v44 = vld [vmem:[%s13912_s2 + $0xc0] sm:$0xff]  }
  0xf5   :  { %6214 = vrot.lane.b32.xlu0 %v10207_v10, %s10894_s28  ;;  %v3996_v41 = vsel %vm11438_vm7, %v3994_v20, %v3995_v2  ;;  %v3307_v22 = vrot.slane %v3305_v17, 4  ;;  %v6909_v54 = vshll.u32 %v6641_v46, 16  ;;  %v6915_v3 = vshll.u32 %v11943_v38, 16  ;;  %v5712_v48 = vld [vmem:[#allocation10 + $0x6c] sm:$0xe] }
  0xf6   :  { %v10081_v43 = vcombine.low %v3993_v19, %v3996_v41  ;;  %v3298_v0 = vor.u32 %v3297_v21, %v3294_v55  ;;  %v6908_v25 = vrot.slane %v6906_v35, 4  ;;  %v6919_v40 = vshrl.u32 %v11943_v38, 16  ;;  %v8319_v45 = vld [vmem:[#allocation2 + $0x30] sm:$0xff]  ;;  %10474 = vmatpush3.bf16.msra.mxu1 %v11926_v57  ;;  %v3618_v38 = vpop.permute.xlu1 %3617  ;;  %v10790_v6 = vld [vmem:[%s13910_s0 + $0xa8] sm:$0xff]   ;;  %v12003_v55 = vpop.permute.xlu0 %4566 }
  0xf7   :  { %9096 = vmatpush1.bf16.msra.mxu0 %v10785_v34  ;;  %v3308_v31 = vor.u32 %v3307_v22, %v11972_v8  ;;  %v6911_v46 = vrot.slane %v6909_v54, 5  ;;  %v6917_v29 = vrot.slane %v6915_v3, 5  ;;  %v6925_v33 = vshll.u32 %v6643_v7, 16  ;;  %8840 = vmatprep.mubr.bf16.mxu0 %v8319_v45  ;;  %v5713_v2 = vld [vmem:[#allocation10 + $0x70] sm:$0xf]  ;;  %3707 = vst.msk [vmem:[#allocation2 + $0x118] sm:$0xff] %vm3699_vm9, %v3618_v38 }
  0xf8   :  { %9097 = vmatprep.subr.bf16.mxu0 %v13915_v5  ;;  %4288 = vst.msk [vmem:[#allocation2 + $0x170] sm:$0xff] %vm2607_vm8, %v10081_v43  ;;  %v3299_v49 = vrot.slane %v3298_v0, 4  ;;  %v6921_v42 = vrot.slane %v6919_v40, 4  ;;  %v10042_v56 = vrot.slane %v3738_v11, 9  ;;  %v3943_v57 = vrot.slane %v3739_v12, 5  ;;  %8841 = vmatmul.mubr.bf16.gmra.mrb[4].mxu0 %v8318_v36  ;;  %v10792_v40 = vld [vmem:[%s13910_s0 + $0xb0] sm:$0xff]  }
  0xf9   :  { %10475 = vmatprep.subr.bf16.mxu1 %v10809_v28  ;;  %4641 = vst.msk [vmem:[#allocation2 + $0x170] sm:$0xff] %vm3699_vm9, %v11640_v37  ;;  %v3309_v51 = vrot.slane %v3308_v31, 4  ;;  %v6912_v9 = vor.u32 %v6911_v46, %v6908_v25  ;;  %v6927_v24 = vrot.slane %v6925_v33, 5  ;;  %v3946_v62 = vrot.slane %v3740_v23, 5  ;;  %v5714_v35 = vld [vmem:[#allocation10 + $0x74] sm:$0x1] }
  0xfa   :  { %v10774_v7 = vld [vmem:[#allocation10 + $0x138] sm:$0xff]   ;;  %v2711_v34 = vld [vmem:[#allocation10 + $0x134] sm:$0x1]  ;;  %v3304_v27 = vsel %vm11007_vm4, %v3299_v49, %v11972_v8  ;;  %v6922_v10 = vor.u32 %v6921_v42, %v6917_v29  ;;  %v3944_v19 = vsel %vm11438_vm7, %v10042_v56, %v3943_v57  ;;  %v3945_v20 = vrot.slane %v3943_v57, 4  ;;  %10476 = vmatpush3.bf16.msra.mxu1 %v10809_v28  ;;  %v12013_v25 = vld [vmem:[#allocation10 + $0x80] sm:$0x1] }
  0xfb   :  { %9098 = vmatpush1.bf16.msra.mxu0 %v10787_v47  ;;  %v3311_v37 = vshll.u32 %v2711_v34, 16  ;;  %v6913_v17 = vrot.slane %v6912_v9, 4  ;;  %v1809_v11 = vunpack.c.l.bf16 %v9960_v44  ;;  %v1834_v12 = vunpack.c.h.bf16 %v9960_v44  ;;  %4582 = vrot.lane.b32.xlu1 %v10774_v7, %s10894_s28  ;;  %v3762_v54 = vld [vmem:[#allocation10 + $0x78] sm:$0xe]  ;;  %v3763_v0 = vld [vmem:[#allocation10 + $0x7c] sm:$0xf] }
  0xfc   :  { %9099 = vmatprep.subr.bf16.mxu0 %v13915_v5  ;;  %v6923_v21 = vrot.slane %v6922_v10, 4  ;;  %v3947_v8 = vsel %vm11438_vm7, %v3945_v20, %v3946_v62  ;;  %v10176_v41 = vrot.slane %v5712_v48, 9  ;;  %v5938_v22 = vrot.slane %v5713_v2, 5  ;;  %v10815_v23 = vld [vmem:[#allocation10 + $0xd8] sm:$0xff]   ;;  %v8358_v42 = vld [vmem:[#allocation2 + $0x168] sm:$0xff]  ;;  %v3634_v62 = vpop.permute.xlu1 %3633 }
  0xfd   :  { %v3313_v3 = vrot.slane %v3311_v37, 5  ;;  %v6918_v28 = vsel %vm11007_vm4, %v6913_v17, %v6917_v29  ;;  %v10074_v36 = vcombine.low %v3944_v19, %v3947_v8  ;;  %v1815_v43 = vsel %vm98_vm3, %v1809_v11, %v10927_v1  ;;  %v2712_v29 = vld [vmem:[#allocation10 + $0x138] sm:$0xf]  ;;  %v2713_v33 = vld [vmem:[#allocation10 + $0x13c] sm:$0xf]  ;;  %2624 = vst.msk [vmem:[#allocation2 + $0x280] sm:$0xff] %vm2607_vm8, %v10815_v23 }
  0xfe   :  { %v6928_v45 = vsel %vm11007_vm4, %v6923_v21, %v6927_v24  ;;  %v1817_v47 = vsel %vm100_vm0, %v1815_v43, %v10927_v1  ;;  %v1840_v31 = vsel %vm98_vm3, %v1834_v12, %v10927_v1  ;;  %v5939_v46 = vsel %vm11438_vm7, %v10176_v41, %v5938_v22  ;;  %v6644_v9 = vld [vmem:[#allocation10 + $0x84] sm:$0xf]  ;;  %3715 = vst.msk [vmem:[#allocation2 + $0x258] sm:$0xff] %vm3699_vm9, %v3634_v62  ;;  %v6645_v11 = vld [vmem:[#allocation10 + $0x88] sm:$0xf] }
  0xff   :  { %9100 = vmatpush1.bf16.msra.mxu0 %v10790_v6  ;;  %v3314_v44 = vsel %vm11007_vm4, %v3309_v51, %v3313_v3  ;;  %v10272_v48 = vcombine.low %v6918_v28, %v6928_v45  ;;  %4281 = vst.msk [vmem:[#allocation2 + $0x58] sm:$0xff] %vm2607_vm8, %v10074_v36  ;;  %v1818_v38 = vrot.slane %v1817_v47, 7  ;;  %v1842_v49 = vsel %vm100_vm0, %v1840_v31, %v1815_v43  ;;  %v7578_v6 = vpop.permute.xlu0 %7577  ;;  %v10816_v7 = vld [vmem:[#allocation10 + $0x24] sm:$0xff]   ;;  %v6646_v41 = vld [vmem:[#allocation10 + $0x8c] sm:$0x1] }
 0x100   :  { %9101 = vmatprep.subr.bf16.mxu0 %v13915_v5  ;;  %v10031_v56 = vcombine.low %v3304_v27, %v3314_v44  ;;  %4634 = vst.msk [vmem:[#allocation2 + $0x58] sm:$0xff] %vm3699_vm9, %v11662_v53  ;;  %v1843_v57 = vrot.slane %v1842_v49, 7  ;;  %v12037_v2 = vsel %vm100_vm0, %v10927_v1, %v1840_v31  ;;  %v5940_v51 = vrot.slane %v5938_v22, 4  ;;  %v8359_v24 = vld [vmem:[#allocation2 + $0x170] sm:$0xff]  ;;  %7673 = vst.msk [vmem:[#allocation2 + $0x18] sm:$0xff] %vm3699_vm9, %v7578_v6  ;;  %v10796_v22 = vld [vmem:[%s13910_s0 + $0xb8] sm:$0xff]  }
 0x101   :  { %7593 = vrot.lane.b32.xlu0 %v10272_v48, %s10894_s28  ;;  %v1820_v34 = vpack.c.bf16 %v10893_v15, %v1818_v38  ;;  %v1850_v27 = vrot.slane %v12037_v2, 7  ;;  %v5941_v10 = vrot.slane %v5714_v35, 5  ;;  %v10050_v19 = vrot.slane %v3762_v54, 9  ;;  %8904 = vmatprep.mubr.bf16.mxu1 %v8359_v24  ;;  %6586 = vst.msk [vmem:[#allocation2 + $0x40] sm:$0xff] %vm2607_vm8, %v10816_v7  ;;  %v3742_v31 = vld [vmem:[#allocation10 + $0x28] sm:$0xf]  ;;  %v12072_v6 = vpop.permute.xlu1 %4568 }
 0x102   :  { %3649 = vrot.lane.b32.xlu1 %v10031_v56, %s10894_s28  ;;  %v1845_v53 = vpack.c.bf16 %v10893_v15, %v1843_v57  ;;  %v3999_v20 = vrot.slane %v3763_v0, 5  ;;  %v4002_v37 = vrot.slane %v12013_v25, 5  ;;  %v1783_v17 = vpack.c.bf16 %v10893_v15, %v1781_v26  ;;  %8905 = vmatmul.mubr.bf16.gmra.mrb[4].mxu1 %v8358_v42  ;;  %v3741_v25 = vld [vmem:[#allocation10 + $0x24] sm:$0xe]  ;;  %v3743_v38 = vld [vmem:[#allocation10 + $0x2c] sm:$0x1] }
 0x103   :  { %1822 = vst [vmem:[#allocation10 + $0x144] sm:$0xf] %v1820_v34  ;;  %v5942_v12 = vsel %vm11438_vm7, %v5940_v51, %v5941_v10  ;;  %v3316_v21 = vshrl.u32 %v2712_v29, 16  ;;  %v3319_v8 = vshll.u32 %v2712_v29, 16  ;;  %v3325_v35 = vshll.u32 %v2713_v33, 16  ;;  %9102 = vmatpush1.bf16.msra.mxu0 %v10792_v40  ;;  %v10798_v42 = vld [vmem:[%s13910_s0 + $0xc0] sm:$0xff]   ;;  %v12074_v7 = vpop.permute.xlu0 %6200 }
 0x104   :  { %1847 = vst [vmem:[#allocation10 + $0x148] sm:$0xf] %v1845_v53  ;;  %v10208_v61 = vcombine.low %v5939_v46, %v5942_v12  ;;  %v4000_v26 = vsel %vm11438_vm7, %v10050_v19, %v3999_v20  ;;  %v4001_v54 = vrot.slane %v3999_v20, 4  ;;  %1785 = vst [vmem:[#allocation10 + $0x140] sm:$0xf] %v1783_v17  ;;  %v3329_v3 = vshrl.u32 %v2713_v33, 16  ;;  %9103 = vmatprep.subr.bf16.mxu0 %v13915_v5 }
 0x105   :  { %v3318_v28 = vrot.slane %v3316_v21, 4  ;;  %v3321_v36 = vrot.slane %v3319_v8, 5  ;;  %v12059_v43 = vrot.slane %v3325_v35, 5  ;;  %v6930_v0 = vshrl.u32 %v6644_v9, 16  ;;  %v8323_v46 = vld [vmem:[#allocation2 + $0x50] sm:$0xff]  ;;  %v10801_v21 = vld [vmem:[%s13910_s0 + $0xc8] sm:$0xff]  }
 0x106   :  { %6216 = vrot.lane.b32.xlu0 %v10208_v61, %s10894_s28  ;;  %v4003_v40 = vsel %vm11438_vm7, %v4001_v54, %v4002_v37  ;;  %v3331_v23 = vrot.slane %v3329_v3, 4  ;;  %v6933_v45 = vshll.u32 %v6644_v9, 16  ;;  %v6939_v47 = vshll.u32 %v6645_v11, 16  ;;  %v9962_v9 = vld [vmem:[%s13912_s2 + $0xc8] sm:$0xff]   ;;  %v5715_v62 = vld [vmem:[#allocation10 + $0x78] sm:$0xe] }
 0x107   :  { %v10082_v29 = vcombine.low %v4000_v26, %v4003_v40  ;;  %v3322_v33 = vor.u32 %v3321_v36, %v3318_v28  ;;  %v6932_v44 = vrot.slane %v6930_v0, 4  ;;  %v6943_v48 = vshrl.u32 %v6645_v11, 16  ;;  %v8324_v49 = vld [vmem:[#allocation2 + $0x58] sm:$0xff]  ;;  %9104 = vmatpush1.bf16.msra.mxu0 %v10796_v22  ;;  %v3636_v36 = vpop.permute.xlu1 %3635 }
 0x108   :  { %v3332_v56 = vor.u32 %v3331_v23, %v12059_v43  ;;  %v6935_v57 = vrot.slane %v6933_v45, 5  ;;  %v6941_v51 = vrot.slane %v6939_v47, 5  ;;  %v6949_v24 = vshll.u32 %v6646_v41, 16  ;;  %8848 = vmatprep.mubr.bf16.mxu0 %v8324_v49  ;;  %9105 = vmatprep.subr.bf16.mxu0 %v13915_v5  ;;  %v5716_v20 = vld [vmem:[#allocation10 + $0x7c] sm:$0xf]  ;;  %3716 = vst.msk [vmem:[#allocation2 + $0x280] sm:$0xff] %vm3699_vm9, %v3636_v36 }
 0x109   :  { %4289 = vst.msk [vmem:[#allocation2 + $0x198] sm:$0xff] %vm2607_vm8, %v10082_v29  ;;  %v3323_v34 = vrot.slane %v3322_v33, 4  ;;  %v6945_v10 = vrot.slane %v6943_v48, 4  ;;  %v10043_v19 = vrot.slane %v3741_v25, 9  ;;  %v3950_v53 = vrot.slane %v3742_v31, 5  ;;  %8849 = vmatmul.mubr.bf16.gmra.mrb[8].mxu0 %v8323_v46  ;;  %v10803_v48 = vld [vmem:[%s13910_s0 + $0xd0] sm:$0xff]  }
 0x10a   :  { %4642 = vst.msk [vmem:[#allocation2 + $0x198] sm:$0xff] %vm3699_vm9, %v11694_v39  ;;  %v3333_v37 = vrot.slane %v3332_v56, 4  ;;  %v6936_v17 = vor.u32 %v6935_v57, %v6932_v44  ;;  %v6951_v11 = vrot.slane %v6949_v24, 5  ;;  %v3953_v12 = vrot.slane %v3743_v38, 5  ;;  %v3765_v45 = vld [vmem:[#allocation10 + $0x84] sm:$0xe]  ;;  %v7580_v38 = vpop.permute.xlu0 %7579 }
 0x10b   :  { %v10779_v8 = vld [vmem:[#allocation10 + $0x144] sm:$0xff]   ;;  %v2714_v35 = vld [vmem:[#allocation10 + $0x140] sm:$0x1]  ;;  %v3328_v41 = vsel %vm11007_vm4, %v3323_v34, %v12059_v43  ;;  %v6946_v22 = vor.u32 %v6945_v10, %v6941_v51  ;;  %v3951_v61 = vsel %vm11438_vm7, %v10043_v19, %v3950_v53  ;;  %v3952_v26 = vrot.slane %v3950_v53, 4  ;;  %9106 = vmatpush1.bf16.msra.mxu0 %v10798_v42  ;;  %v12097_v44 = vld [vmem:[#allocation10 + $0x8c] sm:$0x1] }
 0x10c   :  { %v3335_v39 = vshll.u32 %v2714_v35, 16  ;;  %v6937_v54 = vrot.slane %v6936_v17, 4  ;;  %v1878_v3 = vunpack.c.l.bf16 %v9962_v9  ;;  %v1903_v28 = vunpack.c.h.bf16 %v9962_v9  ;;  %9107 = vmatprep.subr.bf16.mxu0 %v13915_v5  ;;  %4584 = vrot.lane.b32.xlu1 %v10779_v8, %s10894_s28  ;;  %v5717_v43 = vld [vmem:[#allocation10 + $0x80] sm:$0x1]  ;;  %v3766_v33 = vld [vmem:[#allocation10 + $0x88] sm:$0xf] }
 0x10d   :  { %v6947_v0 = vrot.slane %v6946_v22, 4  ;;  %v3954_v25 = vsel %vm11438_vm7, %v3952_v26, %v3953_v12  ;;  %v10177_v40 = vrot.slane %v5715_v62, 9  ;;  %v5945_v23 = vrot.slane %v5716_v20, 5  ;;  %7674 = vst.msk [vmem:[#allocation2 + $0x40] sm:$0xff] %vm3699_vm9, %v7580_v38  ;;  %v2715_v10 = vld [vmem:[#allocation10 + $0x144] sm:$0xf] }
 0x10e   :  { %v3337_v47 = vrot.slane %v3335_v39, 5  ;;  %v6942_v31 = vsel %vm11007_vm4, %v6937_v54, %v6941_v51  ;;  %v10075_v46 = vcombine.low %v3951_v61, %v3954_v25  ;;  %v1884_v29 = vsel %vm98_vm3, %v1878_v3, %v10927_v1  ;;  %v10819_v51 = vld [vmem:[#allocation10 + $0xe4] sm:$0xff]   ;;  %v8363_v19 = vld [vmem:[#allocation2 + $0x190] sm:$0xff] }
 0x10f   :  { %v6952_v49 = vsel %vm11007_vm4, %v6947_v0, %v6951_v11  ;;  %v1886_v42 = vsel %vm100_vm0, %v1884_v29, %v10927_v1  ;;  %v1909_v56 = vsel %vm98_vm3, %v1903_v28, %v10927_v1  ;;  %v5946_v57 = vsel %vm11438_vm7, %v10177_v40, %v5945_v23  ;;  %9108 = vmatpush1.bf16.msra.mxu0 %v10801_v21  ;;  %v10820_v53 = vld [vmem:[#allocation10 + $0x30] sm:$0xff]   ;;  %v2716_v12 = vld [vmem:[#allocation10 + $0x148] sm:$0xf] }
 0x110   :  { %v3338_v24 = vsel %vm11007_vm4, %v3333_v37, %v3337_v47  ;;  %v10273_v9 = vcombine.low %v6942_v31, %v6952_v49  ;;  %4282 = vst.msk [vmem:[#allocation2 + $0x80] sm:$0xff] %vm2607_vm8, %v10075_v46  ;;  %v1887_v62 = vrot.slane %v1886_v42, 7  ;;  %v1911_v34 = vsel %vm100_vm0, %v1909_v56, %v1884_v29  ;;  %9109 = vmatprep.subr.bf16.mxu0 %v13915_v5  ;;  %v6647_v54 = vld [vmem:[#allocation10 + $0x90] sm:$0xf]  ;;  %v6648_v25 = vld [vmem:[#allocation10 + $0x94] sm:$0xf]  ;;  %v12142_v47 = vpop.permute.xlu0 %6202 }
 0x111   :  { %v10032_v20 = vcombine.low %v3328_v41, %v3338_v24  ;;  %4635 = vst.msk [vmem:[#allocation2 + $0x80] sm:$0xff] %vm3699_vm9, %v11715_v16  ;;  %v1912_v17 = vrot.slane %v1911_v34, 7  ;;  %v12121_v11 = vsel %vm100_vm0, %v10927_v1, %v1909_v56  ;;  %v5947_v37 = vrot.slane %v5945_v23, 4  ;;  %v8364_v21 = vld [vmem:[#allocation2 + $0x198] sm:$0xff] }
 0x112   :  { %2625 = vst.msk [vmem:[#allocation2 + $0x2a8] sm:$0xff] %vm2607_vm8, %v10819_v51  ;;  %7595 = vrot.lane.b32.xlu0 %v10273_v9, %s10894_s28  ;;  %v1889_v8 = vpack.c.bf16 %v10893_v15, %v1887_v62  ;;  %v1919_v35 = vrot.slane %v12121_v11, 7  ;;  %v5948_v41 = vrot.slane %v5717_v43, 5  ;;  %v10051_v22 = vrot.slane %v3765_v45, 9  ;;  %8912 = vmatprep.mubr.bf16.mxu1 %v8364_v21  ;;  %6587 = vst.msk [vmem:[#allocation2 + $0x68] sm:$0xff] %vm2607_vm8, %v10820_v53  ;;  %v10806_v43 = vld [vmem:[%s13910_s0 + $0xd8] sm:$0xff]  }
 0x113   :  { %3651 = vrot.lane.b32.xlu1 %v10032_v20, %s10894_s28  ;;  %v1914_v16 = vpack.c.bf16 %v10893_v15, %v1912_v17  ;;  %v4006_v61 = vrot.slane %v3766_v33, 5  ;;  %v4009_v26 = vrot.slane %v12097_v44, 5  ;;  %v1852_v39 = vpack.c.bf16 %v10893_v15, %v1850_v27  ;;  %8913 = vmatmul.mubr.bf16.gmra.mrb[8].mxu1 %v8363_v19  ;;  %v6649_v45 = vld [vmem:[#allocation10 + $0x98] sm:$0x1]  ;;  %v3744_v44 = vld [vmem:[#allocation10 + $0x30] sm:$0xe] }
 0x114   :  { %1891 = vst [vmem:[#allocation10 + $0x150] sm:$0xf] %v1889_v8  ;;  %v5949_v3 = vsel %vm11438_vm7, %v5947_v37, %v5948_v41  ;;  %v3340_v28 = vshrl.u32 %v2715_v10, 16  ;;  %v3343_v36 = vshll.u32 %v2715_v10, 16  ;;  %v3349_v0 = vshll.u32 %v2716_v12, 16  ;;  %9110 = vmatpush1.bf16.msra.mxu0 %v10803_v48  ;;  %v12146_v48 = vpop.permute.xlu1 %4570  ;;  %v8328_v51 = vld [vmem:[#allocation2 + $0x78] sm:$0xff] }
 0x115   :  { %1916 = vst [vmem:[#allocation10 + $0x154] sm:$0xf] %v1914_v16  ;;  %v10209_v40 = vcombine.low %v5946_v57, %v5949_v3  ;;  %v4007_v2 = vsel %vm11438_vm7, %v10051_v22, %v4006_v61  ;;  %v4008_v27 = vrot.slane %v4006_v61, 4  ;;  %1854 = vst [vmem:[#allocation10 + $0x14c] sm:$0xf] %v1852_v39  ;;  %v3353_v23 = vshrl.u32 %v2716_v12, 16  ;;  %9111 = vmatprep.subr.bf16.mxu0 %v13915_v5 }
 0x116   :  { %v3342_v31 = vrot.slane %v3340_v28, 4  ;;  %v3345_v46 = vrot.slane %v3343_v36, 5  ;;  %v12144_v29 = vrot.slane %v3349_v0, 5  ;;  %v6954_v33 = vshrl.u32 %v6647_v54, 16  ;;  %v3745_v57 = vld [vmem:[#allocation10 + $0x34] sm:$0xf]  ;;  %v7582_v0 = vpop.permute.xlu0 %7581 }
 0x117   :  { %6218 = vrot.lane.b32.xlu0 %v10209_v40, %s10894_s28  ;;  %v4010_v38 = vsel %vm11438_vm7, %v4008_v27, %v4009_v26  ;;  %v3355_v49 = vrot.slane %v3353_v23, 4  ;;  %v6957_v42 = vshll.u32 %v6647_v54, 16  ;;  %v6963_v56 = vshll.u32 %v6648_v25, 16  ;;  %v3746_v10 = vld [vmem:[#allocation10 + $0x38] sm:$0x1]  ;;  %v10808_v53 = vld [vmem:[%s13910_s0 + $0xe0] sm:$0xff]  }
 0x118   :  { %v10083_v24 = vcombine.low %v4007_v2, %v4010_v38  ;;  %v3346_v9 = vor.u32 %v3345_v46, %v3342_v31  ;;  %v6956_v62 = vrot.slane %v6954_v33, 4  ;;  %v6967_v34 = vshrl.u32 %v6648_v25, 16  ;;  %v8329_v19 = vld [vmem:[#allocation2 + $0x80] sm:$0xff]  ;;  %9112 = vmatpush1.bf16.msra.mxu0 %v10806_v43  ;;  %v9964_v21 = vld [vmem:[%s13912_s2 + $0xd0] sm:$0xff]   ;;  %v12158_v41 = vld [vmem:[#allocation10 + $0x88] sm:$0xf] }
 0x119   :  { %v3356_v20 = vor.u32 %v3355_v49, %v12144_v29  ;;  %v6959_v17 = vrot.slane %v6957_v42, 5  ;;  %v6965_v37 = vrot.slane %v6963_v56, 5  ;;  %v6973_v12 = vshll.u32 %v6649_v45, 16  ;;  %v5718_v8 = vld [vmem:[#allocation10 + $0x84] sm:$0xe]  ;;  %8856 = vmatprep.mubr.bf16.mxu0 %v8329_v19  ;;  %9113 = vmatprep.subr.bf16.mxu0 %v13915_v5  ;;  %v10813_v39 = vld [vmem:[%s13910_s0 + $0xe8] sm:$0xff]   ;;  %v3638_v45 = vpop.permute.xlu1 %3637 }
 0x11a   :  { %4290 = vst.msk [vmem:[#allocation2 + $0x1c0] sm:$0xff] %vm2607_vm8, %v10083_v24  ;;  %v3347_v22 = vrot.slane %v3346_v9, 4  ;;  %v6969_v16 = vrot.slane %v6967_v34, 4  ;;  %v10044_v61 = vrot.slane %v3744_v44, 9  ;;  %v3957_v26 = vrot.slane %v3745_v57, 5  ;;  %8857 = vmatmul.mubr.bf16.gmra.mrb[12].mxu0 %v8328_v51  ;;  %v10821_v25 = vld [vmem:[%s13910_s0 + $0x118] sm:$0xff]  }
 0x11b   :  { %4643 = vst.msk [vmem:[#allocation2 + $0x1c0] sm:$0xff] %vm3699_vm9, %v11737_v60  ;;  %v3357_v54 = vrot.slane %v3356_v20, 4  ;;  %v6960_v3 = vor.u32 %v6959_v17, %v6956_v62  ;;  %v6975_v28 = vrot.slane %v6973_v12, 5  ;;  %v3960_v36 = vrot.slane %v3746_v10, 5  ;;  %7675 = vst.msk [vmem:[#allocation2 + $0x68] sm:$0xff] %vm3699_vm9, %v7582_v0  ;;  %10477 = vmatprep.subr.bf16.mxu1 %v10821_v25  ;;  %v10822_v51 = vld [vmem:[#allocation10 + $0xf0] sm:$0xff]  }
 0x11c   :  { %v10784_v43 = vld [vmem:[#allocation10 + $0x150] sm:$0xff]   ;;  %v2717_v40 = vld [vmem:[#allocation10 + $0x14c] sm:$0x1]  ;;  %v3352_v2 = vsel %vm11007_vm4, %v3347_v22, %v12144_v29  ;;  %v6970_v27 = vor.u32 %v6969_v16, %v6965_v37  ;;  %v3958_v23 = vsel %vm11438_vm7, %v10044_v61, %v3957_v26  ;;  %v3959_v60 = vrot.slane %v3957_v26, 4  ;;  %9114 = vmatpush1.bf16.msra.mxu0 %v10808_v53  ;;  %3717 = vst.msk [vmem:[#allocation2 + $0x2a8] sm:$0xff] %vm3699_vm9, %v3638_v45  ;;  %v10823_v10 = vld [vmem:[#allocation10 + $0x3c] sm:$0xff]  }
 0x11d   :  { %v3359_v31 = vshll.u32 %v2717_v40, 16  ;;  %v6961_v46 = vrot.slane %v6960_v3, 4  ;;  %v1947_v33 = vunpack.c.l.bf16 %v9964_v21  ;;  %v1972_v44 = vunpack.c.h.bf16 %v9964_v21  ;;  %9115 = vmatprep.subr.bf16.mxu0 %v13915_v5  ;;  %4586 = vrot.lane.b32.xlu1 %v10784_v43, %s10894_s28  ;;  %v5720_v49 = vld [vmem:[#allocation10 + $0x8c] sm:$0x1]  ;;  %v3768_v57 = vld [vmem:[#allocation10 + $0x90] sm:$0xe] }
 0x11e   :  { %v6971_v29 = vrot.slane %v6970_v27, 4  ;;  %v3961_v38 = vsel %vm11438_vm7, %v3959_v60, %v3960_v36  ;;  %v10178_v42 = vrot.slane %v5718_v8, 9  ;;  %v5952_v56 = vrot.slane %v12158_v41, 5  ;;  %10478 = vmatpush3.bf16.msra.mxu1 %v10821_v25  ;;  %v12198_v12 = vld [vmem:[#allocation10 + $0x98] sm:$0x1]  ;;  %2626 = vst.msk [vmem:[#allocation2 + $0x2d0] sm:$0xff] %vm2607_vm8, %v10822_v51 }
 0x11f   :  { %v3361_v24 = vrot.slane %v3359_v31, 5  ;;  %v6966_v9 = vsel %vm11007_vm4, %v6961_v46, %v6965_v37  ;;  %v10076_v62 = vcombine.low %v3958_v23, %v3961_v38  ;;  %v1953_v34 = vsel %vm98_vm3, %v1947_v33, %v10927_v1  ;;  %v3769_v37 = vld [vmem:[#allocation10 + $0x94] sm:$0xf]  ;;  %v2718_v16 = vld [vmem:[#allocation10 + $0x150] sm:$0xf]  ;;  %v8368_v61 = vld [vmem:[#allocation2 + $0x1b8] sm:$0xff] }
 0x120   :  { %v6976_v19 = vsel %vm11007_vm4, %v6971_v29, %v6975_v28  ;;  %v1955_v53 = vsel %vm100_vm0, %v1953_v34, %v10927_v1  ;;  %v1978_v20 = vsel %vm98_vm3, %v1972_v44, %v10927_v1  ;;  %v12196_v17 = vsel %vm11438_vm7, %v10178_v42, %v5952_v56  ;;  %9116 = vmatpush1.bf16.msra.mxu0 %v10813_v39  ;;  %v10814_v26 = vld [vmem:[%s13910_s0 + $0xf0] sm:$0xff]   ;;  %v6650_v46 = vld [vmem:[#allocation10 + $0x9c] sm:$0xf]  ;;  %v6651_v33 = vld [vmem:[#allocation10 + $0xa0] sm:$0xf] }
 0x121   :  { %v3362_v21 = vsel %vm11007_vm4, %v3357_v54, %v3361_v24  ;;  %v10274_v8 = vcombine.low %v6966_v9, %v6976_v19  ;;  %4283 = vst.msk [vmem:[#allocation2 + $0xa8] sm:$0xff] %vm2607_vm8, %v10076_v62  ;;  %v1956_v41 = vrot.slane %v1955_v53, 7  ;;  %v1980_v22 = vsel %vm100_vm0, %v1978_v20, %v1953_v34  ;;  %9117 = vmatprep.subr.bf16.mxu0 %v13915_v5  ;;  %v2719_v36 = vld [vmem:[#allocation10 + $0x154] sm:$0xf]  ;;  %v6652_v42 = vld [vmem:[#allocation10 + $0xa4] sm:$0x1] }
 0x122   :  { %6588 = vst.msk [vmem:[#allocation2 + $0x90] sm:$0xff] %vm2607_vm8, %v10823_v10  ;;  %v10033_v39 = vcombine.low %v3352_v2, %v3362_v21  ;;  %v1981_v54 = vrot.slane %v1980_v22, 7  ;;  %v12214_v3 = vsel %vm100_vm0, %v10927_v1, %v1978_v20  ;;  %v5954_v28 = vrot.slane %v5952_v56, 4  ;;  %v8369_v0 = vld [vmem:[#allocation2 + $0x1c0] sm:$0xff]  ;;  %v12219_v2 = vpop.permute.xlu1 %4572  ;;  %v10818_v56 = vld [vmem:[%s13910_s0 + $0xf8] sm:$0xff]   ;;  %v10825_v22 = vld [vmem:[#allocation10 + $0x48] sm:$0xff]  }
 0x123   :  { %4636 = vst.msk [vmem:[#allocation2 + $0xa8] sm:$0xff] %vm3699_vm9, %v11762_v4  ;;  %7597 = vrot.lane.b32.xlu0 %v10274_v8, %s10894_s28  ;;  %v1958_v25 = vpack.c.bf16 %v10893_v15, %v1956_v41  ;;  %v1988_v43 = vrot.slane %v12214_v3, 7  ;;  %v5955_v40 = vrot.slane %v5720_v49, 5  ;;  %v10052_v27 = vrot.slane %v3768_v57, 9  ;;  %8920 = vmatprep.mubr.bf16.mxu1 %v8369_v0  ;;  %v12221_v4 = vpop.permute.xlu0 %6204  ;;  %v10824_v57 = vld [vmem:[#allocation10 + $0xfc] sm:$0xff]  }
 0x124   :  { %3653 = vrot.lane.b32.xlu1 %v10033_v39, %s10894_s28  ;;  %v1983_v23 = vpack.c.bf16 %v10893_v15, %v1981_v54  ;;  %v4013_v60 = vrot.slane %v3769_v37, 5  ;;  %v4016_v45 = vrot.slane %v12198_v12, 5  ;;  %v1921_v31 = vpack.c.bf16 %v10893_v15, %v1919_v35  ;;  %8921 = vmatmul.mubr.bf16.gmra.mrb[12].mxu1 %v8368_v61  ;;  %v3747_v9 = vld [vmem:[#allocation10 + $0x3c] sm:$0xe]  ;;  %v3748_v62 = vld [vmem:[#allocation10 + $0x40] sm:$0xf] }
 0x125   :  { %1960 = vst [vmem:[#allocation10 + $0x15c] sm:$0xf] %v1958_v25  ;;  %v5956_v44 = vsel %vm11438_vm7, %v5954_v28, %v5955_v40  ;;  %v3364_v29 = vshrl.u32 %v2718_v16, 16  ;;  %v3367_v38 = vshll.u32 %v2718_v16, 16  ;;  %v3373_v49 = vshll.u32 %v2719_v36, 16  ;;  %9118 = vmatpush1.bf16.msra.mxu0 %v10814_v26  ;;  %2627 = vst.msk [vmem:[#allocation2 + $0x2f8] sm:$0xff] %vm2607_vm8, %v10824_v57 }
 0x126   :  { %1985 = vst [vmem:[#allocation10 + $0x160] sm:$0xf] %v1983_v23  ;;  %v10210_v11 = vcombine.low %v12196_v17, %v5956_v44  ;;  %v4014_v35 = vsel %vm11438_vm7, %v10052_v27, %v4013_v60  ;;  %v4015_v51 = vrot.slane %v4013_v60, 4  ;;  %1923 = vst [vmem:[#allocation10 + $0x158] sm:$0xf] %v1921_v31  ;;  %v3377_v24 = vshrl.u32 %v2719_v36, 16  ;;  %9119 = vmatprep.subr.bf16.mxu0 %v13915_v5  ;;  %v3640_v37 = vpop.permute.xlu1 %3639 }
 0x127   :  { %v3366_v34 = vrot.slane %v3364_v29, 4  ;;  %v3369_v10 = vrot.slane %v3367_v38, 5  ;;  %v12238_v19 = vrot.slane %v3373_v49, 5  ;;  %v6978_v53 = vshrl.u32 %v6650_v46, 16  ;;  %v3749_v20 = vld [vmem:[#allocation10 + $0x44] sm:$0x1]  ;;  %v7584_v28 = vpop.permute.xlu0 %7583 }
 0x128   :  { %6220 = vrot.lane.b32.xlu0 %v10210_v11, %s10894_s28  ;;  %v4017_v17 = vsel %vm11438_vm7, %v4015_v51, %v4016_v45  ;;  %v3379_v12 = vrot.slane %v3377_v24, 4  ;;  %v6981_v21 = vshll.u32 %v6650_v46, 16  ;;  %v6987_v8 = vshll.u32 %v6651_v33, 16  ;;  %v8333_v41 = vld [vmem:[#allocation2 + $0xa0] sm:$0xff]  ;;  %3718 = vst.msk [vmem:[#allocation2 + $0x2d0] sm:$0xff] %vm3699_vm9, %v3640_v37  ;;  %v9966_v27 = vld [vmem:[%s13912_s2 + $0xd8] sm:$0xff]  }
 0x129   :  { %v10084_v16 = vcombine.low %v4014_v35, %v4017_v17  ;;  %v3370_v61 = vor.u32 %v3369_v10, %v3366_v34  ;;  %v6980_v26 = vrot.slane %v6978_v53, 4  ;;  %v6991_v39 = vshrl.u32 %v6651_v33, 16  ;;  %9120 = vmatpush1.bf16.msra.mxu0 %v10818_v56  ;;  %v5721_v23 = vld [vmem:[#allocation10 + $0x90] sm:$0xe]  ;;  %v5722_v60 = vld [vmem:[#allocation10 + $0x94] sm:$0xf] }
 0x12a   :  { %v8334_v54 = vld [vmem:[#allocation2 + $0xa8] sm:$0xff]  ;;  %v3380_v36 = vor.u32 %v3379_v12, %v12238_v19  ;;  %v6983_v0 = vrot.slane %v6981_v21, 5  ;;  %v6989_v25 = vrot.slane %v6987_v8, 5  ;;  %v6997_v40 = vshll.u32 %v6652_v42, 16  ;;  %7676 = vst.msk [vmem:[#allocation2 + $0x90] sm:$0xff] %vm3699_vm9, %v7584_v28 }
 0x12b   :  { %8864 = vmatprep.mubr.bf16.mxu0 %v8334_v54  ;;  %6589 = vst.msk [vmem:[#allocation2 + $0xb8] sm:$0xff] %vm2607_vm8, %v10825_v22  ;;  %4291 = vst.msk [vmem:[#allocation2 + $0x1e8] sm:$0xff] %vm2607_vm8, %v10084_v16  ;;  %v3371_v45 = vrot.slane %v3370_v61, 4  ;;  %v6993_v31 = vrot.slane %v6991_v39, 4  ;;  %v10045_v46 = vrot.slane %v3747_v9, 9  ;;  %v3964_v33 = vrot.slane %v3748_v62, 5  ;;  %v12276_v39 = vpop.permute.xlu0 %6206 }
 0x12c   :  { %8865 = vmatmul.mubr.bf16.gmra.mrb[16].mxu0 %v8333_v41  ;;  %4644 = vst.msk [vmem:[#allocation2 + $0x1e8] sm:$0xff] %vm3699_vm9, %v11815_v50  ;;  %v3381_v44 = vrot.slane %v3380_v36, 4  ;;  %v6984_v29 = vor.u32 %v6983_v0, %v6980_v26  ;;  %v6999_v38 = vrot.slane %v6997_v40, 5  ;;  %v3967_v49 = vrot.slane %v3749_v20, 5  ;;  %v5723_v22 = vld [vmem:[#allocation10 + $0x98] sm:$0x1] }
 0x12d   :  { %v10789_v42 = vld [vmem:[#allocation10 + $0x15c] sm:$0xff]   ;;  %v2720_v56 = vld [vmem:[#allocation10 + $0x158] sm:$0x1]  ;;  %v3376_v57 = vsel %vm11007_vm4, %v3371_v45, %v12238_v19  ;;  %v6994_v11 = vor.u32 %v6993_v31, %v6989_v25  ;;  %v3965_v35 = vsel %vm11438_vm7, %v10045_v46, %v3964_v33  ;;  %v3966_v51 = vrot.slane %v3964_v33, 4 }
 0x12e   :  { %v3383_v24 = vshll.u32 %v2720_v56, 16  ;;  %v6985_v9 = vrot.slane %v6984_v29, 4  ;;  %v2016_v62 = vunpack.c.l.bf16 %v9966_v27  ;;  %v2041_v34 = vunpack.c.h.bf16 %v9966_v27  ;;  %4588 = vrot.lane.b32.xlu1 %v10789_v42, %s10894_s28  ;;  %v3771_v61 = vld [vmem:[#allocation10 + $0x9c] sm:$0xe]  ;;  %v3772_v26 = vld [vmem:[#allocation10 + $0xa0] sm:$0xf] }
 0x12f   :  { %v6995_v50 = vrot.slane %v6994_v11, 4  ;;  %v3968_v10 = vsel %vm11438_vm7, %v3966_v51, %v3967_v49  ;;  %v10179_v53 = vrot.slane %v5721_v23, 9  ;;  %v5959_v20 = vrot.slane %v5722_v60, 5  ;;  %v2721_v40 = vld [vmem:[#allocation10 + $0x15c] sm:$0xf]  ;;  %v8373_v27 = vld [vmem:[#allocation2 + $0x1e0] sm:$0xff]  ;;  %v12282_v23 = vpop.permute.xlu1 %4574 }
 0x130   :  { %v3385_v37 = vrot.slane %v3383_v24, 5  ;;  %v6990_v19 = vsel %vm11007_vm4, %v6985_v9, %v6989_v25  ;;  %v10077_v17 = vcombine.low %v3965_v35, %v3968_v10  ;;  %v2022_v12 = vsel %vm98_vm3, %v2016_v62, %v10927_v1  ;;  %v3773_v25 = vld [vmem:[#allocation10 + $0xa4] sm:$0x1]  ;;  %v2722_v33 = vld [vmem:[#allocation10 + $0x160] sm:$0xf]  ;;  %v10826_v29 = vld [vmem:[#allocation10 + $0x108] sm:$0xff]  }
 0x131   :  { %v7000_v21 = vsel %vm11007_vm4, %v6995_v50, %v6999_v38  ;;  %v2024_v8 = vsel %vm100_vm0, %v2022_v12, %v10927_v1  ;;  %v2047_v41 = vsel %vm98_vm3, %v2041_v34, %v10927_v1  ;;  %v5960_v16 = vsel %vm11438_vm7, %v10179_v53, %v5959_v20  ;;  %v6653_v24 = vld [vmem:[#allocation10 + $0xa8] sm:$0xf]  ;;  %v6654_v9 = vld [vmem:[#allocation10 + $0xac] sm:$0xf]  ;;  %2628 = vst.msk [vmem:[#allocation2 + $0x320] sm:$0xff] %vm2607_vm8, %v10826_v29 }
 0x132   :  { %v3386_v54 = vsel %vm11007_vm4, %v3381_v44, %v3385_v37  ;;  %v10275_v28 = vcombine.low %v6990_v19, %v7000_v21  ;;  %4284 = vst.msk [vmem:[#allocation2 + $0xd0] sm:$0xff] %vm2607_vm8, %v10077_v17  ;;  %v2025_v36 = vrot.slane %v2024_v8, 7  ;;  %v2049_v0 = vsel %vm100_vm0, %v2047_v41, %v2022_v12  ;;  %v6655_v53 = vld [vmem:[#allocation10 + $0xb0] sm:$0x1]  ;;  %v3750_v17 = vld [vmem:[#allocation10 + $0x48] sm:$0xe]  ;;  %v7586_v21 = vpop.permute.xlu0 %7585 }
 0x133   :  { %v10034_v60 = vcombine.low %v3376_v57, %v3386_v54  ;;  %4637 = vst.msk [vmem:[#allocation2 + $0xd0] sm:$0xff] %vm3699_vm9, %v11850_v59  ;;  %v2050_v45 = vrot.slane %v2049_v0, 7  ;;  %v12288_v31 = vsel %vm100_vm0, %v10927_v1, %v2047_v41  ;;  %v5961_v46 = vrot.slane %v5959_v20, 4  ;;  %v8374_v44 = vld [vmem:[#allocation2 + $0x1e8] sm:$0xff]  ;;  %v10827_v57 = vld [vmem:[#allocation10 + $0x54] sm:$0xff]   ;;  %v3642_v20 = vpop.permute.xlu1 %3641  ;;  %7677 = vst.msk [vmem:[#allocation2 + $0xb8] sm:$0xff] %vm3699_vm9, %v7586_v21 }
 0x134   :  { %7599 = vrot.lane.b32.xlu0 %v10275_v28, %s10894_s28  ;;  %v2027_v38 = vpack.c.bf16 %v10893_v15, %v2025_v36  ;;  %v2057_v49 = vrot.slane %v12288_v31, 7  ;;  %v5962_v42 = vrot.slane %v5723_v22, 5  ;;  %v10053_v56 = vrot.slane %v3771_v61, 9  ;;  %8928 = vmatprep.mubr.bf16.mxu1 %v8374_v44  ;;  %6590 = vst.msk [vmem:[#allocation2 + $0xe0] sm:$0xff] %vm2607_vm8, %v10827_v57  ;;  %v3751_v12 = vld [vmem:[#allocation10 + $0x4c] sm:$0xf] }
 0x135   :  { %3655 = vrot.lane.b32.xlu1 %v10034_v60, %s10894_s28  ;;  %v2052_v59 = vpack.c.bf16 %v10893_v15, %v2050_v45  ;;  %v4020_v11 = vrot.slane %v3772_v26, 5  ;;  %v4023_v35 = vrot.slane %v3773_v25, 5  ;;  %v1990_v51 = vpack.c.bf16 %v10893_v15, %v1988_v43  ;;  %8929 = vmatmul.mubr.bf16.gmra.mrb[16].mxu1 %v8373_v27  ;;  %3719 = vst.msk [vmem:[#allocation2 + $0x2f8] sm:$0xff] %vm3699_vm9, %v3642_v20  ;;  %v8338_v36 = vld [vmem:[#allocation2 + $0xc8] sm:$0xff]  ;;  %v3752_v60 = vld [vmem:[#allocation10 + $0x50] sm:$0x1] }
 0x136   :  { %2029 = vst [vmem:[#allocation10 + $0x168] sm:$0xf] %v2027_v38  ;;  %v5963_v62 = vsel %vm11438_vm7, %v5961_v46, %v5962_v42  ;;  %v3388_v34 = vshrl.u32 %v2721_v40, 16  ;;  %v3391_v50 = vshll.u32 %v2721_v40, 16  ;;  %v3397_v10 = vshll.u32 %v2722_v33, 16  ;;  %v9968_v38 = vld [vmem:[%s13912_s2 + $0xe0] sm:$0xff]  }
 0x137   :  { %2054 = vst [vmem:[#allocation10 + $0x16c] sm:$0xf] %v2052_v59  ;;  %v10211_v3 = vcombine.low %v5960_v16, %v5963_v62  ;;  %v4021_v43 = vsel %vm11438_vm7, %v10053_v56, %v4020_v11  ;;  %v4022_v37 = vrot.slane %v4020_v11, 4  ;;  %1992 = vst [vmem:[#allocation10 + $0x164] sm:$0xf] %v1990_v51  ;;  %v3401_v19 = vshrl.u32 %v2722_v33, 16  ;;  %v12316_v51 = vpop.permute.xlu0 %6208 }
 0x138   :  { %v3390_v8 = vrot.slane %v3388_v34, 4  ;;  %v3393_v41 = vrot.slane %v3391_v50, 5  ;;  %v12305_v22 = vrot.slane %v3397_v10, 5  ;;  %v7002_v61 = vshrl.u32 %v6653_v24, 16  ;;  %v5724_v42 = vld [vmem:[#allocation10 + $0x9c] sm:$0xe] }
 0x139   :  { %6222 = vrot.lane.b32.xlu0 %v10211_v3, %s10894_s28  ;;  %v4024_v16 = vsel %vm11438_vm7, %v4022_v37, %v4023_v35  ;;  %v3403_v26 = vrot.slane %v3401_v19, 4  ;;  %v7005_v54 = vshll.u32 %v6653_v24, 16  ;;  %v7011_v28 = vshll.u32 %v6654_v9, 16  ;;  %v5725_v35 = vld [vmem:[#allocation10 + $0xa0] sm:$0xf] }
 0x13a   :  { %v10085_v0 = vcombine.low %v4021_v43, %v4024_v16  ;;  %v3394_v25 = vor.u32 %v3393_v41, %v3390_v8  ;;  %v7004_v40 = vrot.slane %v7002_v61, 4  ;;  %v7015_v27 = vshrl.u32 %v6654_v9, 16  ;;  %v8339_v45 = vld [vmem:[#allocation2 + $0xd0] sm:$0xff] }
 0x13b   :  { %v3404_v46 = vor.u32 %v3403_v26, %v12305_v22  ;;  %v7007_v33 = vrot.slane %v7005_v54, 5  ;;  %v7013_v44 = vrot.slane %v7011_v28, 5  ;;  %v7021_v29 = vshll.u32 %v6655_v53, 16  ;;  %8872 = vmatprep.mubr.bf16.mxu0 %v8339_v45  ;;  %v5726_v28 = vld [vmem:[#allocation10 + $0xa4] sm:$0x1] }
 0x13c   :  { %4292 = vst.msk [vmem:[#allocation2 + $0x210] sm:$0xff] %vm2607_vm8, %v10085_v0  ;;  %v3395_v56 = vrot.slane %v3394_v25, 4  ;;  %v7017_v57 = vrot.slane %v7015_v27, 4  ;;  %v10046_v59 = vrot.slane %v3750_v17, 9  ;;  %v3971_v11 = vrot.slane %v3751_v12, 5  ;;  %8873 = vmatmul.mubr.bf16.gmra.mrb[20].mxu0 %v8338_v36 }
 0x13d   :  { %4645 = vst.msk [vmem:[#allocation2 + $0x210] sm:$0xff] %vm3699_vm9, %v11873_v58  ;;  %v3405_v24 = vrot.slane %v3404_v46, 4  ;;  %v7008_v9 = vor.u32 %v7007_v33, %v7004_v40  ;;  %v7023_v62 = vrot.slane %v7021_v29, 5  ;;  %v3974_v34 = vrot.slane %v3752_v60, 5  ;;  %v12325_v58 = vpop.permute.xlu1 %4576  ;;  %v3774_v27 = vld [vmem:[#allocation10 + $0xa8] sm:$0xe]  ;;  %v7588_v46 = vpop.permute.xlu0 %7587 }
 0x13e   :  { %v10795_v50 = vld [vmem:[#allocation10 + $0x168] sm:$0xff]   ;;  %v2723_v10 = vld [vmem:[#allocation10 + $0x164] sm:$0x1]  ;;  %v3400_v53 = vsel %vm11007_vm4, %v3395_v56, %v12305_v22  ;;  %v7018_v20 = vor.u32 %v7017_v57, %v7013_v44  ;;  %v3972_v3 = vsel %vm11438_vm7, %v10046_v59, %v3971_v11  ;;  %v3973_v43 = vrot.slane %v3971_v11, 4  ;;  %v3776_v45 = vld [vmem:[#allocation10 + $0xb0] sm:$0x1] }
 0x13f   :  { %v3407_v37 = vshll.u32 %v2723_v10, 16  ;;  %v7009_v19 = vrot.slane %v7008_v9, 4  ;;  %v2085_v17 = vunpack.c.l.bf16 %v9968_v38  ;;  %v2110_v12 = vunpack.c.h.bf16 %v9968_v38  ;;  %4590 = vrot.lane.b32.xlu1 %v10795_v50, %s10894_s28  ;;  %v3775_v60 = vld [vmem:[#allocation10 + $0xac] sm:$0xf]  ;;  %7678 = vst.msk [vmem:[#allocation2 + $0xe0] sm:$0xff] %vm3699_vm9, %v7588_v46  ;;  %v10828_v57 = vld [vmem:[%s13910_s0 + $0x120] sm:$0xff]  }
 0x140   :  { %v7019_v21 = vrot.slane %v7018_v20, 4  ;;  %v3975_v8 = vsel %vm11438_vm7, %v3973_v43, %v3974_v34  ;;  %v10180_v41 = vrot.slane %v5724_v42, 9  ;;  %v5966_v61 = vrot.slane %v5725_v35, 5  ;;  %v2724_v42 = vld [vmem:[#allocation10 + $0x168] sm:$0xf]  ;;  %v10829_v10 = vld [vmem:[#allocation10 + $0x114] sm:$0xff]   ;;  %10479 = vmatprep.subr.bf16.mxu1 %v10828_v57 }
 0x141   :  { %v3409_v22 = vrot.slane %v3407_v37, 5  ;;  %v7014_v16 = vsel %vm11007_vm4, %v7009_v19, %v7013_v44  ;;  %v10078_v26 = vcombine.low %v3972_v3, %v3975_v8  ;;  %v2091_v54 = vsel %vm98_vm3, %v2085_v17, %v10927_v1  ;;  %v8378_v56 = vld [vmem:[#allocation2 + $0x208] sm:$0xff]  ;;  %v3644_v50 = vpop.permute.xlu1 %3643  ;;  %v10830_v37 = vld [vmem:[#allocation10 + $0x60] sm:$0xff]   ;;  %2629 = vst.msk [vmem:[#allocation2 + $0x348] sm:$0xff] %vm2607_vm8, %v10829_v10  ;;  %10480 = vmatpush3.bf16.msra.mxu1 %v10828_v57  ;;  %v3755_v57 = vld [vmem:[#allocation10 + $0x5c] sm:$0x1] }
 0x142   :  { %v7024_v36 = vsel %vm11007_vm4, %v7019_v21, %v7023_v62  ;;  %v2093_v0 = vsel %vm100_vm0, %v2091_v54, %v10927_v1  ;;  %v2116_v25 = vsel %vm98_vm3, %v2110_v12, %v10927_v1  ;;  %v5967_v40 = vsel %vm11438_vm7, %v10180_v41, %v5966_v61  ;;  %v2725_v9 = vld [vmem:[#allocation10 + $0x16c] sm:$0xf]  ;;  %v6656_v62 = vld [vmem:[#allocation10 + $0xb4] sm:$0xf]  ;;  %3720 = vst.msk [vmem:[#allocation2 + $0x320] sm:$0xff] %vm3699_vm9, %v3644_v50 }
 0x143   :  { %v3410_v33 = vsel %vm11007_vm4, %v3405_v24, %v3409_v22  ;;  %v10276_v44 = vcombine.low %v7014_v16, %v7024_v36  ;;  %4285 = vst.msk [vmem:[#allocation2 + $0xf8] sm:$0xff] %vm2607_vm8, %v10078_v26  ;;  %v2094_v29 = vrot.slane %v2093_v0, 7  ;;  %v2118_v38 = vsel %vm100_vm0, %v2116_v25, %v2091_v54  ;;  %v6658_v16 = vld [vmem:[#allocation10 + $0xbc] sm:$0x1]  ;;  %6591 = vst.msk [vmem:[#allocation2 + $0x108] sm:$0xff] %vm2607_vm8, %v10830_v37 }
 0x144   :  { %v10035_v59 = vcombine.low %v3400_v53, %v3410_v33  ;;  %4638 = vst.msk [vmem:[#allocation2 + $0xf8] sm:$0xff] %vm3699_vm9, %v11892_v52  ;;  %v2119_v11 = vrot.slane %v2118_v38, 7  ;;  %v12356_v35 = vsel %vm100_vm0, %v10927_v1, %v2116_v25  ;;  %v5968_v24 = vrot.slane %v5966_v61, 4  ;;  %v8379_v34 = vld [vmem:[#allocation2 + $0x210] sm:$0xff]  ;;  %v6657_v52 = vld [vmem:[#allocation10 + $0xb8] sm:$0xf] }
 0x145   :  { %7601 = vrot.lane.b32.xlu0 %v10276_v44, %s10894_s28  ;;  %v2096_v20 = vpack.c.bf16 %v10893_v15, %v2094_v29  ;;  %v2126_v53 = vrot.slane %v12356_v35, 7  ;;  %v5969_v3 = vrot.slane %v5726_v28, 5  ;;  %v10054_v43 = vrot.slane %v3774_v27, 9  ;;  %8936 = vmatprep.mubr.bf16.mxu1 %v8379_v34  ;;  %v3753_v27 = vld [vmem:[#allocation10 + $0x54] sm:$0xe] }
 0x146   :  { %3657 = vrot.lane.b32.xlu1 %v10035_v59, %s10894_s28  ;;  %v2121_v19 = vpack.c.bf16 %v10893_v15, %v2119_v11  ;;  %v4027_v17 = vrot.slane %v3775_v60, 5  ;;  %v4030_v12 = vrot.slane %v3776_v45, 5  ;;  %v2059_v21 = vpack.c.bf16 %v10893_v15, %v2057_v49  ;;  %8937 = vmatmul.mubr.bf16.gmra.mrb[20].mxu1 %v8378_v56  ;;  %v3754_v33 = vld [vmem:[#allocation10 + $0x58] sm:$0xf]  ;;  %v8343_v44 = vld [vmem:[#allocation2 + $0xf0] sm:$0xff]  ;;  %v12378_v11 = vpop.permute.xlu0 %6210 }
 0x147   :  { %2098 = vst [vmem:[#allocation10 + $0x174] sm:$0xf] %v2096_v20  ;;  %v5970_v8 = vsel %vm11438_vm7, %v5968_v24, %v5969_v3  ;;  %v3412_v41 = vshrl.u32 %v2724_v42, 16  ;;  %v3415_v61 = vshll.u32 %v2724_v42, 16  ;;  %v3421_v22 = vshll.u32 %v2725_v9, 16  ;;  %v10831_v24 = vld [vmem:[#allocation10 + $0x120] sm:$0xff]  }
 0x148   :  { %2123 = vst [vmem:[#allocation10 + $0x178] sm:$0xf] %v2121_v19  ;;  %v10212_v26 = vcombine.low %v5967_v40, %v5970_v8  ;;  %v4028_v31 = vsel %vm11438_vm7, %v10054_v43, %v4027_v17  ;;  %v4029_v49 = vrot.slane %v4027_v17, 4  ;;  %2061 = vst [vmem:[#allocation10 + $0x170] sm:$0xf] %v2059_v21  ;;  %v3425_v54 = vshrl.u32 %v2725_v9, 16 }
 0x149   :  { %v3414_v28 = vrot.slane %v3412_v41, 4  ;;  %v3417_v36 = vrot.slane %v3415_v61, 5  ;;  %v12373_v0 = vrot.slane %v3421_v22, 5  ;;  %v7026_v25 = vshrl.u32 %v6656_v62, 16  ;;  %v5727_v20 = vld [vmem:[#allocation10 + $0xa8] sm:$0xe] }
 0x14a   :  { %6224 = vrot.lane.b32.xlu0 %v10212_v26, %s10894_s28  ;;  %v4031_v60 = vsel %vm11438_vm7, %v4029_v49, %v4030_v12  ;;  %v3427_v45 = vrot.slane %v3425_v54, 4  ;;  %v7029_v40 = vshll.u32 %v6656_v62, 16  ;;  %v7035_v46 = vshll.u32 %v6657_v52, 16  ;;  %v9970_v62 = vld [vmem:[%s13912_s2 + $0xe8] sm:$0xff]   ;;  %v12385_v17 = vpop.permute.xlu1 %4578  ;;  %2630 = vst.msk [vmem:[#allocation2 + $0x370] sm:$0xff] %vm2607_vm8, %v10831_v24 }
 0x14b   :  { %v10086_v29 = vcombine.low %v4028_v31, %v4031_v60  ;;  %v3418_v38 = vor.u32 %v3417_v36, %v3414_v28  ;;  %v7028_v42 = vrot.slane %v7026_v25, 4  ;;  %v7039_v56 = vshrl.u32 %v6657_v52, 16  ;;  %v8344_v59 = vld [vmem:[#allocation2 + $0xf8] sm:$0xff]  ;;  %v5728_v19 = vld [vmem:[#allocation10 + $0xac] sm:$0xf] }
 0x14c   :  { %v3428_v9 = vor.u32 %v3427_v45, %v12373_v0  ;;  %v7031_v34 = vrot.slane %v7029_v40, 5  ;;  %v7037_v50 = vrot.slane %v7035_v46, 5  ;;  %v7045_v10 = vshll.u32 %v6658_v16, 16  ;;  %8880 = vmatprep.mubr.bf16.mxu0 %v8344_v59  ;;  %v10832_v61 = vld [vmem:[#allocation10 + $0x6c] sm:$0xff]  }
 0x14d   :  { %4293 = vst.msk [vmem:[#allocation2 + $0x238] sm:$0xff] %vm2607_vm8, %v10086_v29  ;;  %v3419_v3 = vrot.slane %v3418_v38, 4  ;;  %v7041_v43 = vrot.slane %v7039_v56, 4  ;;  %v10047_v52 = vrot.slane %v3753_v27, 9  ;;  %v3978_v37 = vrot.slane %v3754_v33, 5  ;;  %8881 = vmatmul.mubr.bf16.gmra.mrb[24].mxu0 %v8343_v44  ;;  %6592 = vst.msk [vmem:[#allocation2 + $0x130] sm:$0xff] %vm2607_vm8, %v10832_v61 }
 0x14e   :  { %4646 = vst.msk [vmem:[#allocation2 + $0x238] sm:$0xff] %vm3699_vm9, %v11945_v13  ;;  %v3429_v12 = vrot.slane %v3428_v9, 4  ;;  %v7032_v21 = vor.u32 %v7031_v34, %v7028_v42  ;;  %v7047_v8 = vrot.slane %v7045_v10, 5  ;;  %v3981_v41 = vrot.slane %v3755_v57, 5  ;;  %v5729_v38 = vld [vmem:[#allocation10 + $0xb0] sm:$0x1] }
 0x14f   :  { %v10800_v22 = vld [vmem:[#allocation10 + $0x174] sm:$0xff]   ;;  %v2726_v16 = vld [vmem:[#allocation10 + $0x170] sm:$0x1]  ;;  %v3424_v26 = vsel %vm11007_vm4, %v3419_v3, %v12373_v0  ;;  %v7042_v31 = vor.u32 %v7041_v43, %v7037_v50  ;;  %v3979_v49 = vsel %vm11438_vm7, %v10047_v52, %v3978_v37  ;;  %v3980_v54 = vrot.slane %v3978_v37, 4  ;;  %v3779_v34 = vld [vmem:[#allocation10 + $0xbc] sm:$0x1] }
 0x150   :  { %v3431_v28 = vshll.u32 %v2726_v16, 16  ;;  %v7033_v36 = vrot.slane %v7032_v21, 4  ;;  %v2154_v25 = vunpack.c.l.bf16 %v9970_v62  ;;  %v2179_v13 = vunpack.c.h.bf16 %v9970_v62  ;;  %4592 = vrot.lane.b32.xlu1 %v10800_v22, %s10894_s28  ;;  %v3777_v42 = vld [vmem:[#allocation10 + $0xb4] sm:$0xe]  ;;  %v3778_v9 = vld [vmem:[#allocation10 + $0xb8] sm:$0xf] }
 0x151   :  { %v7043_v27 = vrot.slane %v7042_v31, 4  ;;  %v3982_v60 = vsel %vm11438_vm7, %v3980_v54, %v3981_v41  ;;  %v10181_v45 = vrot.slane %v5727_v20, 9  ;;  %v5973_v40 = vrot.slane %v5728_v19, 5  ;;  %v7590_v0 = vpop.permute.xlu0 %7589  ;;  %v2728_v52 = vld [vmem:[#allocation10 + $0x178] sm:$0xf]  ;;  %v8383_v37 = vld [vmem:[#allocation2 + $0x230] sm:$0xff] }
 0x152   :  { %v3433_v46 = vrot.slane %v3431_v28, 5  ;;  %v7038_v33 = vsel %vm11007_vm4, %v7033_v36, %v7037_v50  ;;  %v10079_v44 = vcombine.low %v3979_v49, %v3982_v60  ;;  %v2160_v29 = vsel %vm98_vm3, %v2154_v25, %v10927_v1  ;;  %7679 = vst.msk [vmem:[#allocation2 + $0x108] sm:$0xff] %vm3699_vm9, %v7590_v0  ;;  %v2727_v50 = vld [vmem:[#allocation10 + $0x174] sm:$0xf]  ;;  %v3646_v10 = vpop.permute.xlu1 %3645  ;;  %v10833_v61 = vld [vmem:[#allocation10 + $0x12c] sm:$0xff]  }
 0x153   :  { %v7048_v56 = vsel %vm11007_vm4, %v7043_v27, %v7047_v8  ;;  %v2162_v57 = vsel %vm100_vm0, %v2160_v29, %v10927_v1  ;;  %v2185_v59 = vsel %vm98_vm3, %v2179_v13, %v10927_v1  ;;  %v5974_v24 = vsel %vm11438_vm7, %v10181_v45, %v5973_v40  ;;  %3721 = vst.msk [vmem:[#allocation2 + $0x348] sm:$0xff] %vm3699_vm9, %v3646_v10  ;;  %v6659_v45 = vld [vmem:[#allocation10 + $0xc0] sm:$0xf] }
 0x154   :  { %v3434_v62 = vsel %vm11007_vm4, %v3429_v12, %v3433_v46  ;;  %v10277_v20 = vcombine.low %v7038_v33, %v7048_v56  ;;  %4286 = vst.msk [vmem:[#allocation2 + $0x120] sm:$0xff] %vm2607_vm8, %v10079_v44  ;;  %v2163_v3 = vrot.slane %v2162_v57, 7  ;;  %v2187_v43 = vsel %vm100_vm0, %v2185_v59, %v2160_v29  ;;  %2631 = vst.msk [vmem:[#allocation2 + $0x398] sm:$0xff] %vm2607_vm8, %v10833_v61  ;;  %v6660_v46 = vld [vmem:[#allocation10 + $0xc4] sm:$0xf] }
 0x155   :  { %v10036_v19 = vcombine.low %v3424_v26, %v3434_v62  ;;  %4639 = vst.msk [vmem:[#allocation2 + $0x120] sm:$0xff] %vm3699_vm9, %v11978_v32  ;;  %v2188_v21 = vrot.slane %v2187_v43, 7  ;;  %v12423_v8 = vsel %vm100_vm0, %v10927_v1, %v2185_v59  ;;  %v5975_v12 = vrot.slane %v5973_v40, 4  ;;  %v8384_v41 = vld [vmem:[#allocation2 + $0x238] sm:$0xff]  ;;  %v12449_v43 = vpop.permute.xlu0 %6212 }
 0x156   :  { %7603 = vrot.lane.b32.xlu0 %v10277_v20, %s10894_s28  ;;  %v2165_v22 = vpack.c.bf16 %v10893_v15, %v2163_v3  ;;  %v2195_v16 = vrot.slane %v12423_v8, 7  ;;  %v5976_v31 = vrot.slane %v5729_v38, 5  ;;  %v10055_v49 = vrot.slane %v3777_v42, 9  ;;  %8944 = vmatprep.mubr.bf16.mxu1 %v8384_v41  ;;  %v10834_v26 = vld [vmem:[#allocation10 + $0x78] sm:$0xff]   ;;  %v5730_v20 = vld [vmem:[#allocation10 + $0xb4] sm:$0xe] }
 0x157   :  { %3659 = vrot.lane.b32.xlu1 %v10036_v19, %s10894_s28  ;;  %v2190_v32 = vpack.c.bf16 %v10893_v15, %v2188_v21  ;;  %v4034_v54 = vrot.slane %v3778_v9, 5  ;;  %v4037_v28 = vrot.slane %v3779_v34, 5  ;;  %v2128_v36 = vpack.c.bf16 %v10893_v15, %v2126_v53  ;;  %8945 = vmatmul.mubr.bf16.gmra.mrb[24].mxu1 %v8383_v37  ;;  %6593 = vst.msk [vmem:[#allocation2 + $0x158] sm:$0xff] %vm2607_vm8, %v10834_v26  ;;  %v8348_v9 = vld [vmem:[#allocation2 + $0x118] sm:$0xff] }
 0x158   :  { %2167 = vst [vmem:[#allocation10 + $0x180] sm:$0xf] %v2165_v22  ;;  %v5977_v25 = vsel %vm11438_vm7, %v5975_v12, %v5976_v31  ;;  %v3436_v13 = vshrl.u32 %v2727_v50, 16  ;;  %v3439_v27 = vshll.u32 %v2727_v50, 16  ;;  %v3445_v60 = vshll.u32 %v2728_v52, 16  ;;  %v8316_v3 = vld [vmem:[#allocation2 + $0x18] sm:$0xff] }
 0x159   :  { %2192 = vst [vmem:[#allocation10 + $0x184] sm:$0xf] %v2190_v32  ;;  %v10213_v40 = vcombine.low %v5974_v24, %v5977_v25  ;;  %v4035_v35 = vsel %vm11438_vm7, %v10055_v49, %v4034_v54  ;;  %v4036_v0 = vrot.slane %v4034_v54, 4  ;;  %2130 = vst [vmem:[#allocation10 + $0x17c] sm:$0xf] %v2128_v36  ;;  %v3449_v53 = vshrl.u32 %v2728_v52, 16 }
 0x15a   :  { %v3438_v33 = vrot.slane %v3436_v13, 4  ;;  %v3441_v44 = vrot.slane %v3439_v27, 5  ;;  %v12439_v29 = vrot.slane %v3445_v60, 5  ;;  %v1169_v38 = vrot.slane %v11361_v30, 7  ;;  %v9972_v24 = vld [vmem:[%s13912_s2 + $0xf0] sm:$0xff]   ;;  %v12518_v8 = vld [vmem:[%s13912_s2 + $0xf8] sm:$0xff]  }
 0x15b   :  { %6226 = vrot.lane.b32.xlu0 %v10213_v40, %s10894_s28  ;;  %v4038_v42 = vsel %vm11438_vm7, %v4036_v0, %v4037_v28  ;;  %v3451_v56 = vrot.slane %v3449_v53, 4  ;;  %v7050_v57 = vshrl.u32 %v6659_v45, 16  ;;  %v7053_v59 = vshll.u32 %v6659_v45, 16  ;;  %v5731_v12 = vld [vmem:[#allocation10 + $0xb8] sm:$0xf] }
 0x15c   :  { %v10087_v34 = vcombine.low %v4035_v35, %v4038_v42  ;;  %v3442_v50 = vor.u32 %v3441_v44, %v3438_v33  ;;  %v10409_v10 = vpack.c.bf16 %v10927_v1, %v1169_v38  ;;  %v7059_v62 = vshll.u32 %v6660_v46, 16  ;;  %v8349_v30 = vld [vmem:[#allocation2 + $0x120] sm:$0xff]  ;;  %v12452_v41 = vpop.permute.xlu1 %4580  ;;  %v5732_v28 = vld [vmem:[#allocation10 + $0xbc] sm:$0x1]  ;;  %v3780_v40 = vld [vmem:[#allocation10 + $0xd8] sm:$0xe] }
 0x15d   :  { %v3452_v52 = vor.u32 %v3451_v56, %v12439_v29  ;;  %v7052_v37 = vrot.slane %v7050_v57, 4  ;;  %v7055_v19 = vrot.slane %v7053_v59, 5  ;;  %v7063_v21 = vshrl.u32 %v6660_v46, 16  ;;  %8888 = vmatprep.mubr.bf16.mxu0 %v8349_v30  ;;  %v3781_v33 = vld [vmem:[#allocation10 + $0xdc] sm:$0xf] }
 0x15e   :  { %4294 = vst.msk [vmem:[#allocation2 + $0x260] sm:$0xff] %vm2607_vm8, %v10087_v34  ;;  %v3443_v61 = vrot.slane %v3442_v50, 4  ;;  %10410 = vst [vmem:[#allocation10 + $0xc8] sm:$0xff] %v10409_v10   ;;  %v12455_v22 = vrot.slane %v7059_v62, 5  ;;  %v2223_v31 = vunpack.c.l.bf16 %v9972_v24  ;;  %v2248_v49 = vunpack.c.h.bf16 %v9972_v24  ;;  %8889 = vmatmul.mubr.bf16.gmra.mrb[28].mxu0 %v8348_v9  ;;  %v3782_v44 = vld [vmem:[#allocation10 + $0xe0] sm:$0x1] }
 0x15f   :  { %4647 = vst.msk [vmem:[#allocation2 + $0x260] sm:$0xff] %vm3699_vm9, %v12003_v55  ;;  %v3453_v26 = vrot.slane %v3452_v52, 4  ;;  %v7056_v32 = vor.u32 %v7055_v19, %v7052_v37  ;;  %v7065_v54 = vrot.slane %v7063_v21, 4  ;;  %v10182_v36 = vrot.slane %v5730_v20, 9  ;;  %9121 = vmatprep.mubr.bf16.mxu0 %v8316_v3  ;;  %v4664_v57 = vld [vmem:[#allocation10 + $0xc] sm:$0xf] }
 0x160   :  { %v10805_v25 = vld [vmem:[#allocation10 + $0x180] sm:$0xff]   ;;  %v2729_v13 = vld [vmem:[#allocation10 + $0x17c] sm:$0x1]  ;;  %v3448_v27 = vsel %vm11007_vm4, %v3443_v61, %v12439_v29  ;;  %v2229_v60 = vsel %vm98_vm3, %v2223_v31, %v10927_v1  ;;  %v2254_v55 = vsel %vm98_vm3, %v2248_v49, %v10927_v1  ;;  %v5980_v45 = vrot.slane %v5731_v12, 5  ;;  %v10835_v24 = vld [vmem:[%s13910_s0 + $0x128] sm:$0xff]  }
 0x161   :  { %v3455_v35 = vshll.u32 %v2729_v13, 16  ;;  %v12468_v0 = vrot.slane %v7056_v32, 4  ;;  %v7066_v53 = vor.u32 %v7065_v54, %v12455_v22  ;;  %v2231_v46 = vsel %vm100_vm0, %v2229_v60, %v10927_v1  ;;  %4594 = vrot.lane.b32.xlu1 %v10805_v25, %s10894_s28  ;;  %v4665_v62 = vld [vmem:[#allocation10 + $0x10] sm:$0xf]  ;;  %v10836_v30 = vld [vmem:[#allocation10 + $0x138] sm:$0xff]   ;;  %10481 = vmatprep.subr.bf16.mxu1 %v10835_v24  ;;  %v10837_v21 = vld [vmem:[#allocation10 + $0x84] sm:$0xff]  }
 0x162   :  { %v2232_v29 = vrot.slane %v2231_v46, 7  ;;  %v2256_v38 = vsel %vm100_vm0, %v2254_v55, %v2229_v60  ;;  %v12477_v42 = vsel %vm100_vm0, %v10927_v1, %v2254_v55  ;;  %v12481_v56 = vsel %vm11438_vm7, %v10182_v36, %v5980_v45  ;;  %v7592_v59 = vpop.permute.xlu0 %7591  ;;  %v8388_v32 = vld [vmem:[#allocation2 + $0x258] sm:$0xff]  ;;  %2632 = vst.msk [vmem:[#allocation2 + $0x3c0] sm:$0xff] %vm2607_vm8, %v10836_v30  ;;  %10482 = vmatpush3.bf16.msra.mxu1 %v10835_v24  ;;  %v4666_v13 = vld [vmem:[#allocation10 + $0x14] sm:$0x1] }
 0x163   :  { %v3457_v9 = vrot.slane %v3455_v35, 5  ;;  %v7062_v34 = vsel %vm11007_vm4, %v12468_v0, %v12455_v22  ;;  %v7067_v50 = vrot.slane %v7066_v53, 4  ;;  %v2257_v10 = vrot.slane %v2256_v38, 7  ;;  %v3648_v20 = vpop.permute.xlu1 %3647  ;;  %7680 = vst.msk [vmem:[#allocation2 + $0x130] sm:$0xff] %vm3699_vm9, %v7592_v59  ;;  %v2730_v46 = vld [vmem:[#allocation10 + $0x180] sm:$0xf] }
 0x164   :  { %v2234_v3 = vpack.c.bf16 %v10893_v15, %v2232_v29  ;;  %v2264_v52 = vrot.slane %v12477_v42, 7  ;;  %v5982_v37 = vrot.slane %v5980_v45, 4  ;;  %v5983_v19 = vrot.slane %v5732_v28, 5  ;;  %3722 = vst.msk [vmem:[#allocation2 + $0x370] sm:$0xff] %vm3699_vm9, %v3648_v20 }
 0x165   :  { %v3458_v12 = vsel %vm11007_vm4, %v3453_v26, %v3457_v9  ;;  %v6661_v61 = vld [vmem:[#allocation10 + $0xc8] sm:$0x1]  ;;  %v2259_v22 = vpack.c.bf16 %v10893_v15, %v2257_v10  ;;  %v10056_v31 = vrot.slane %v3780_v40, 9  ;;  %v4041_v49 = vrot.slane %v3781_v33, 5  ;;  %6594 = vst.msk [vmem:[#allocation2 + $0x180] sm:$0xff] %vm2607_vm8, %v10837_v21 }
 0x166   :  { %v10037_v54 = vcombine.low %v3448_v27, %v3458_v12  ;;  %v7069_v36 = vshll.u32 %v6661_v61, 16  ;;  %2236 = vst [vmem:[#allocation10 + $0x18c] sm:$0xf] %v2234_v3  ;;  %v12500_v28 = vsel %vm11438_vm7, %v5982_v37, %v5983_v19  ;;  %v4044_v25 = vrot.slane %v3782_v44, 5  ;;  %v8389_v60 = vld [vmem:[#allocation2 + $0x260] sm:$0xff] }
 0x167   :  { %2261 = vst [vmem:[#allocation10 + $0x190] sm:$0xf] %v2259_v22  ;;  %v10214_v26 = vcombine.low %v12481_v56, %v12500_v28  ;;  %v4042_v55 = vsel %vm11438_vm7, %v10056_v31, %v4041_v49  ;;  %v4043_v45 = vrot.slane %v4041_v49, 4  ;;  %v4761_v27 = vshrl.u32 %v4664_v57, 16  ;;  %8952 = vmatprep.mubr.bf16.mxu1 %v8389_v60  ;;  %v2731_v56 = vld [vmem:[#allocation10 + $0x184] sm:$0xf]  ;;  %v12524_v49 = vpop.permute.xlu0 %6214 }
 0x168   :  { %3661 = vrot.lane.b32.xlu1 %v10037_v54, %s10894_s28  ;;  %v7071_v40 = vrot.slane %v7069_v36, 5  ;;  %v4764_v35 = vshll.u32 %v4664_v57, 16  ;;  %v4770_v0 = vshll.u32 %v4665_v62, 16  ;;  %v4774_v53 = vshrl.u32 %v4665_v62, 16  ;;  %8953 = vmatmul.mubr.bf16.gmra.mrb[28].mxu1 %v8388_v32  ;;  %v6662_v10 = vld [vmem:[#allocation10 + $0xcc] sm:$0xf] }
 0x169   :  { %v4045_v33 = vsel %vm11438_vm7, %v4043_v45, %v4044_v25  ;;  %v4763_v44 = vrot.slane %v4761_v27, 4  ;;  %v4780_v29 = vshll.u32 %v4666_v13, 16  ;;  %v2197_v38 = vpack.c.bf16 %v10893_v15, %v2195_v16  ;;  %v6663_v37 = vld [vmem:[#allocation10 + $0xd0] sm:$0xf]  ;;  %v6664_v12 = vld [vmem:[#allocation10 + $0xd4] sm:$0x1] }
 0x16a   :  { %v7072_v59 = vsel %vm11007_vm4, %v7067_v50, %v7071_v40  ;;  %v10088_v24 = vcombine.low %v4042_v55, %v4045_v33  ;;  %v4766_v9 = vrot.slane %v4764_v35, 5  ;;  %v4772_v57 = vrot.slane %v4770_v0, 5  ;;  %v10838_v32 = vld [vmem:[#allocation10 + $0x144] sm:$0xff]  }
 0x16b   :  { %v10278_v62 = vcombine.low %v7062_v34, %v7072_v59  ;;  %v4776_v20 = vrot.slane %v4774_v53, 4  ;;  %v4782_v30 = vrot.slane %v4780_v29, 5  ;;  %2199 = vst [vmem:[#allocation10 + $0x188] sm:$0xf] %v2197_v38  ;;  %v3460_v3 = vshrl.u32 %v2730_v46, 16  ;;  %2633 = vst.msk [vmem:[#allocation2 + $0x3e8] sm:$0xff] %vm2607_vm8, %v10838_v32 }
 0x16c   :  { %4295 = vst.msk [vmem:[#allocation2 + $0x288] sm:$0xff] %vm2607_vm8, %v10088_v24  ;;  %v4767_v16 = vor.u32 %v4766_v9, %v4763_v44  ;;  %v3463_v19 = vshll.u32 %v2730_v46, 16  ;;  %v3469_v50 = vshll.u32 %v2731_v56, 16  ;;  %v3473_v21 = vshrl.u32 %v2731_v56, 16  ;;  %v5733_v38 = vld [vmem:[#allocation10 + $0xc0] sm:$0xe] }
 0x16d   :  { %7605 = vrot.lane.b32.xlu0 %v10278_v62, %s10894_s28  ;;  %4648 = vst.msk [vmem:[#allocation2 + $0x288] sm:$0xff] %vm3699_vm9, %v12072_v6  ;;  %v4777_v34 = vor.u32 %v4776_v20, %v4772_v57  ;;  %v3462_v61 = vrot.slane %v3460_v3, 4  ;;  %v7074_v22 = vshrl.u32 %v6662_v10, 16  ;;  %v7077_v31 = vshll.u32 %v6662_v10, 16  ;;  %v12527_v60 = vpop.permute.xlu1 %4582  ;;  %v5734_v56 = vld [vmem:[#allocation10 + $0xc4] sm:$0xf] }
 0x16e   :  { %v10812_v54 = vld [vmem:[#allocation10 + $0x18c] sm:$0xff]   ;;  %v4768_v36 = vrot.slane %v4767_v16, 4  ;;  %v3465_v28 = vrot.slane %v3463_v19, 5  ;;  %v3471_v25 = vrot.slane %v3469_v50, 5  ;;  %v2292_v13 = vunpack.c.l.bf16 %v12518_v8 }
 0x16f   :  { %v4778_v55 = vrot.slane %v4777_v34, 4  ;;  %v3475_v45 = vrot.slane %v3473_v21, 4  ;;  %v7076_v27 = vrot.slane %v7074_v22, 4  ;;  %v7079_v40 = vrot.slane %v7077_v31, 5  ;;  %4596 = vrot.lane.b32.xlu1 %v10812_v54, %s10894_s28  ;;  %v10839_v59 = vld [vmem:[#allocation10 + $0x90] sm:$0xff]  }
 0x170   :  { %v4773_v6 = vsel %vm11007_vm4, %v4768_v36, %v4772_v57  ;;  %v3466_v35 = vor.u32 %v3465_v28, %v3462_v61  ;;  %v7083_v0 = vshll.u32 %v6663_v37, 16  ;;  %v7087_v53 = vshrl.u32 %v6663_v37, 16  ;;  %v8393_v57 = vld [vmem:[#allocation2 + $0x280] sm:$0xff]  ;;  %6595 = vst.msk [vmem:[#allocation2 + $0x1a8] sm:$0xff] %vm2607_vm8, %v10839_v59  ;;  %v4668_v59 = vld [vmem:[#allocation10 + $0x1c] sm:$0xf] }
 0x171   :  { %6228 = vrot.lane.b32.xlu0 %v10214_v26, %s10894_s28  ;;  %v4783_v46 = vsel %vm11007_vm4, %v4778_v55, %v4782_v30  ;;  %v3476_v33 = vor.u32 %v3475_v45, %v3471_v25  ;;  %v7080_v44 = vor.u32 %v7079_v40, %v7076_v27  ;;  %v7093_v29 = vshll.u32 %v6664_v12, 16  ;;  %v5735_v26 = vld [vmem:[#allocation10 + $0xc8] sm:$0x1]  ;;  %v3783_v28 = vld [vmem:[#allocation10 + $0xe4] sm:$0xe] }
 0x172   :  { %v10136_v24 = vcombine.low %v4773_v6, %v4783_v46  ;;  %v2732_v9 = vld [vmem:[#allocation10 + $0x188] sm:$0x1]  ;;  %v3467_v10 = vrot.slane %v3466_v35, 4  ;;  %v7085_v62 = vrot.slane %v7083_v0, 5  ;;  %v7089_v20 = vrot.slane %v7087_v53, 4 }
 0x173   :  { %v3477_v3 = vrot.slane %v3476_v33, 4  ;;  %v3479_v16 = vshll.u32 %v2732_v9, 16  ;;  %v7081_v37 = vrot.slane %v7080_v44, 4  ;;  %v7095_v19 = vrot.slane %v7093_v29, 5  ;;  %v7594_v50 = vpop.permute.xlu0 %7593  ;;  %v3785_v35 = vld [vmem:[#allocation10 + $0xec] sm:$0x1] }
 0x174   :  { %5656 = vst.msk [vmem:[#allocation2 + $0x10] sm:$0xff] %vm2607_vm8, %v10136_v24  ;;  %v3472_v30 = vsel %vm11007_vm4, %v3467_v10, %v3471_v25  ;;  %v7090_v21 = vor.u32 %v7089_v20, %v7085_v62  ;;  %v2298_v12 = vsel %vm98_vm3, %v2292_v13, %v10927_v1  ;;  %v2317_v34 = vunpack.c.h.bf16 %v12518_v8  ;;  %v8394_v61 = vld [vmem:[#allocation2 + $0x288] sm:$0xff]  ;;  %v3650_v22 = vpop.permute.xlu1 %3649  ;;  %v4667_v33 = vld [vmem:[#allocation10 + $0x18] sm:$0xf]  ;;  %v4669_v20 = vld [vmem:[#allocation10 + $0x20] sm:$0x1] }
 0x175   :  { %7681 = vst.msk [vmem:[#allocation2 + $0x158] sm:$0xff] %vm3699_vm9, %v7594_v50  ;;  %6296 = vst.msk [vmem:[#allocation2 + $0x10] sm:$0xff] %vm3699_vm9, %v12074_v7  ;;  %v3481_v31 = vrot.slane %v3479_v16, 5  ;;  %v7086_v32 = vsel %vm11007_vm4, %v7081_v37, %v7085_v62  ;;  %v2300_v54 = vsel %vm100_vm0, %v2298_v12, %v10927_v1  ;;  %v10183_v36 = vrot.slane %v5733_v38, 9  ;;  %v3784_v25 = vld [vmem:[#allocation10 + $0xe8] sm:$0xf]  ;;  %8960 = vmatprep.mubr.bf16.mxu1 %v8394_v61 }
 0x176   :  { %3723 = vst.msk [vmem:[#allocation2 + $0x398] sm:$0xff] %vm3699_vm9, %v3650_v22  ;;  %v7091_v8 = vrot.slane %v7090_v21, 4  ;;  %v2301_v13 = vrot.slane %v2300_v54, 7  ;;  %v2323_v55 = vsel %vm98_vm3, %v2317_v34, %v10927_v1  ;;  %v5987_v7 = vrot.slane %v5734_v56, 5  ;;  %8961 = vmatmul.mubr.bf16.gmra.mrb[32].mxu1 %v8393_v57  ;;  %v10840_v57 = vld [vmem:[#allocation10 + $0x150] sm:$0xff]   ;;  %v8321_v50 = vld [vmem:[#allocation2 + $0x40] sm:$0xff] }
 0x177   :  { %v3482_v45 = vsel %vm11007_vm4, %v3477_v3, %v3481_v31  ;;  %v2325_v27 = vsel %vm100_vm0, %v2323_v55, %v2298_v12  ;;  %v2332_v40 = vsel %vm100_vm0, %v10927_v1, %v2323_v55  ;;  %v5990_v6 = vrot.slane %v5735_v26, 5  ;;  %v2733_v26 = vld [vmem:[#allocation10 + $0x18c] sm:$0xf]  ;;  %2634 = vst.msk [vmem:[#allocation2 + $0x410] sm:$0xff] %vm2607_vm8, %v10840_v57  ;;  %v2734_v54 = vld [vmem:[#allocation10 + $0x190] sm:$0xf] }
 0x178   :  { %v10038_v0 = vcombine.low %v3472_v30, %v3482_v45  ;;  %v7096_v53 = vsel %vm11007_vm4, %v7091_v8, %v7095_v19  ;;  %v2303_v46 = vpack.c.bf16 %v10893_v15, %v2301_v13  ;;  %v2326_v14 = vrot.slane %v2325_v27, 7  ;;  %v6665_v13 = vld [vmem:[#allocation10 + $0xf0] sm:$0xf]  ;;  %v6666_v55 = vld [vmem:[#allocation10 + $0xf4] sm:$0xf] }
 0x179   :  { %v10279_v44 = vcombine.low %v7086_v32, %v7096_v53  ;;  %v2333_v29 = vrot.slane %v2332_v40, 7  ;;  %v5988_v38 = vsel %vm11438_vm7, %v10183_v36, %v5987_v7  ;;  %v5989_v56 = vrot.slane %v5987_v7, 4  ;;  %v12579_v7 = vpop.permute.xlu0 %6216 }
 0x17a   :  { %3663 = vrot.lane.b32.xlu1 %v10038_v0, %s10894_s28  ;;  %2305 = vst [vmem:[#allocation10 + $0x198] sm:$0xf] %v2303_v46  ;;  %v2328_v24 = vpack.c.bf16 %v10893_v15, %v2326_v14  ;;  %v10057_v9 = vrot.slane %v3783_v28, 9  ;;  %v4048_v10 = vrot.slane %v3784_v25, 5  ;;  %v4051_v62 = vrot.slane %v3785_v35, 5  ;;  %v10841_v0 = vld [vmem:[#allocation10 + $0x9c] sm:$0xff]  }
 0x17b   :  { %7607 = vrot.lane.b32.xlu0 %v10279_v44, %s10894_s28  ;;  %v10424_v3 = vpack.c.bf16 %v10927_v1, %v2333_v29  ;;  %v5991_v16 = vsel %vm11438_vm7, %v5989_v56, %v5990_v6  ;;  %v4785_v37 = vshrl.u32 %v4667_v33, 16  ;;  %v4788_v19 = vshll.u32 %v4667_v33, 16  ;;  %v5736_v14 = vld [vmem:[#allocation10 + $0xe4] sm:$0xe]  ;;  %6596 = vst.msk [vmem:[#allocation2 + $0x1d0] sm:$0xff] %vm2607_vm8, %v10841_v0 }
 0x17c   :  { %2330 = vst [vmem:[#allocation10 + $0x19c] sm:$0xf] %v2328_v24  ;;  %v10215_v30 = vcombine.low %v5988_v38, %v5991_v16  ;;  %v4049_v21 = vsel %vm11438_vm7, %v10057_v9, %v4048_v10  ;;  %v4050_v12 = vrot.slane %v4048_v10, 4  ;;  %v4794_v34 = vshll.u32 %v4668_v59, 16  ;;  %v8315_v61 = vld [vmem:[#allocation2 + $0x10] sm:$0xff] }
 0x17d   :  { %10425 = vst [vmem:[#allocation10 + $0x1a0] sm:$0xff] %v10424_v3   ;;  %v4787_v22 = vrot.slane %v4785_v37, 4  ;;  %v4790_v1 = vrot.slane %v4788_v19, 5  ;;  %v4798_v31 = vshrl.u32 %v4668_v59, 16  ;;  %v4804_v32 = vshll.u32 %v4669_v20, 16  ;;  %9122 = vmatmul.mubr.bf16.vlgmr.msra.gmra.mrb[0].mxu0 %v8315_v61 }
 0x17e   :  { %v4052_v36 = vsel %vm11438_vm7, %v4050_v12, %v4051_v62  ;;  %v4796_v28 = vrot.slane %v4794_v34, 5  ;;  %v2266_v25 = vpack.c.bf16 %v10893_v15, %v2264_v52  ;;  %v3484_v8 = vshrl.u32 %v2733_v26, 16  ;;  %9129 = vmatprep.mubr.bf16.mxu0 %v8321_v50  ;;  %v12582_v35 = vpop.permute.xlu1 %4584  ;;  %v6667_v52 = vld [vmem:[#allocation10 + $0xf8] sm:$0x1]  ;;  %v5737_v10 = vld [vmem:[#allocation10 + $0xe8] sm:$0xf] }
 0x17f   :  { %6230 = vrot.lane.b32.xlu0 %v10215_v30, %s10894_s28  ;;  %v10089_v45 = vcombine.low %v4049_v21, %v4052_v36  ;;  %v4791_v27 = vor.u32 %v4790_v1, %v4787_v22  ;;  %v4800_v40 = vrot.slane %v4798_v31, 4  ;;  %v4806_v6 = vrot.slane %v4804_v32, 5  ;;  %v5738_v62 = vld [vmem:[#allocation10 + $0xec] sm:$0x1]  ;;  %v3787_v1 = vld [vmem:[#allocation10 + $0xf4] sm:$0xf] }
 0x180   :  { %2268 = vst [vmem:[#allocation10 + $0x194] sm:$0xf] %v2266_v25  ;;  %v3486_v53 = vrot.slane %v3484_v8, 4  ;;  %v3487_v42 = vshll.u32 %v2733_v26, 16  ;;  %v3493_v46 = vshll.u32 %v2734_v54, 16  ;;  %v3497_v15 = vshrl.u32 %v2734_v54, 16 }
 0x181   :  { %4296 = vst.msk [vmem:[#allocation2 + $0x2b0] sm:$0xff] %vm2607_vm8, %v10089_v45  ;;  %v4792_v33 = vrot.slane %v4791_v27, 4  ;;  %v4801_v44 = vor.u32 %v4800_v40, %v4796_v28  ;;  %v7098_v29 = vshrl.u32 %v6665_v13, 16  ;;  %v7101_v38 = vshll.u32 %v6665_v13, 16  ;;  %v3788_v31 = vld [vmem:[#allocation10 + $0xf8] sm:$0x1] }
 0x182   :  { %4649 = vst.msk [vmem:[#allocation2 + $0x2b0] sm:$0xff] %vm3699_vm9, %v12146_v48  ;;  %v3489_v56 = vrot.slane %v3487_v42, 5  ;;  %v12588_v59 = vrot.slane %v3493_v46, 5  ;;  %v3499_v24 = vrot.slane %v3497_v15, 4  ;;  %v7107_v9 = vshll.u32 %v6666_v55, 16  ;;  %v10842_v13 = vld [vmem:[%s13910_s0 + $0x130] sm:$0xff]  }
 0x183   :  { %v10817_v20 = vld [vmem:[#allocation10 + $0x198] sm:$0xff]   ;;  %v4797_v57 = vsel %vm11007_vm4, %v4792_v33, %v4796_v28  ;;  %v4802_v3 = vrot.slane %v4801_v44, 4  ;;  %v7100_v16 = vrot.slane %v7098_v29, 4  ;;  %v7103_v37 = vrot.slane %v7101_v38, 5  ;;  %v3786_v48 = vld [vmem:[#allocation10 + $0xf0] sm:$0xe]  ;;  %10483 = vmatprep.subr.bf16.mxu1 %v10842_v13 }
 0x184   :  { %v3490_v19 = vor.u32 %v3489_v56, %v3486_v53  ;;  %v3500_v26 = vor.u32 %v3499_v24, %v12588_v59  ;;  %v7109_v50 = vrot.slane %v7107_v9, 5  ;;  %v7111_v30 = vshrl.u32 %v6666_v55, 16  ;;  %v7596_v21 = vpop.permute.xlu0 %7595  ;;  %4598 = vrot.lane.b32.xlu1 %v10817_v20, %s10894_s28  ;;  %v4670_v8 = vld [vmem:[#allocation10 + $0x24] sm:$0xf]  ;;  %v8398_v15 = vld [vmem:[#allocation2 + $0x2a8] sm:$0xff]  ;;  %v10843_v38 = vld [vmem:[#allocation10 + $0x15c] sm:$0xff]   ;;  %10484 = vmatpush3.bf16.msra.mxu1 %v10842_v13 }
 0x185   :  { %v4807_v12 = vsel %vm11007_vm4, %v4802_v3, %v4806_v6  ;;  %v7104_v34 = vor.u32 %v7103_v37, %v7100_v16  ;;  %v7117_v61 = vshll.u32 %v6667_v52, 16  ;;  %v10184_v22 = vrot.slane %v5736_v14, 9  ;;  %v3652_v32 = vpop.permute.xlu1 %3651  ;;  %7682 = vst.msk [vmem:[#allocation2 + $0x180] sm:$0xff] %vm3699_vm9, %v7596_v21  ;;  %v4671_v20 = vld [vmem:[#allocation10 + $0x28] sm:$0xf] }
 0x186   :  { %v10137_v54 = vcombine.low %v4797_v57, %v4807_v12  ;;  %v3491_v36 = vrot.slane %v3490_v19, 4  ;;  %v3501_v28 = vrot.slane %v3500_v26, 4  ;;  %v7113_v25 = vrot.slane %v7111_v30, 4  ;;  %3724 = vst.msk [vmem:[#allocation2 + $0x3c0] sm:$0xff] %vm3699_vm9, %v3652_v32  ;;  %v4672_v57 = vld [vmem:[#allocation10 + $0x2c] sm:$0x1] }
 0x187   :  { %v2735_v55 = vld [vmem:[#allocation10 + $0x194] sm:$0x1]  ;;  %v7105_v45 = vrot.slane %v7104_v34, 4  ;;  %v7119_v27 = vrot.slane %v7117_v61, 5  ;;  %v5994_v40 = vrot.slane %v5737_v10, 5  ;;  %v5997_v6 = vrot.slane %v5738_v62, 5 }
 0x188   :  { %5657 = vst.msk [vmem:[#allocation2 + $0x38] sm:$0xff] %vm2607_vm8, %v10137_v54  ;;  %v3496_v0 = vsel %vm11007_vm4, %v3491_v36, %v12588_v59  ;;  %v3503_v53 = vshll.u32 %v2735_v55, 16  ;;  %v7114_v42 = vor.u32 %v7113_v25, %v7109_v50  ;;  %v10058_v46 = vrot.slane %v3786_v48, 9  ;;  %2635 = vst.msk [vmem:[#allocation2 + $0x438] sm:$0xff] %vm2607_vm8, %v10843_v38  ;;  %v6669_v30 = vld [vmem:[#allocation10 + $0x100] sm:$0xf] }
 0x189   :  { %6297 = vst.msk [vmem:[#allocation2 + $0x38] sm:$0xff] %vm3699_vm9, %v12142_v47  ;;  %v7110_v52 = vsel %vm11007_vm4, %v7105_v45, %v7109_v50  ;;  %v12611_v14 = vsel %vm11438_vm7, %v10184_v22, %v5994_v40  ;;  %v5996_v33 = vrot.slane %v5994_v40, 4  ;;  %v4055_v44 = vrot.slane %v3787_v1, 5  ;;  %v8399_v29 = vld [vmem:[#allocation2 + $0x2b0] sm:$0xff]  ;;  %v6668_v50 = vld [vmem:[#allocation10 + $0xfc] sm:$0xf]  ;;  %v12629_v40 = vpop.permute.xlu0 %6218 }
 0x18a   :  { %v3505_v56 = vrot.slane %v3503_v53, 5  ;;  %v7115_v59 = vrot.slane %v7114_v42, 4  ;;  %v4058_v24 = vrot.slane %v3788_v31, 5  ;;  %v4809_v9 = vshrl.u32 %v4670_v8, 16  ;;  %8968 = vmatprep.mubr.bf16.mxu1 %v8399_v29  ;;  %v6670_v61 = vld [vmem:[#allocation10 + $0x104] sm:$0x1] }
 0x18b   :  { %v5998_v47 = vsel %vm11438_vm7, %v5996_v33, %v5997_v6  ;;  %v4056_v10 = vsel %vm11438_vm7, %v10058_v46, %v4055_v44  ;;  %v4057_v62 = vrot.slane %v4055_v44, 4  ;;  %v4812_v3 = vshll.u32 %v4670_v8, 16  ;;  %8969 = vmatmul.mubr.bf16.gmra.mrb[36].mxu1 %v8398_v15  ;;  %v5739_v22 = vld [vmem:[#allocation10 + $0xf0] sm:$0xe]  ;;  %v5740_v36 = vld [vmem:[#allocation10 + $0xf4] sm:$0xf] }
 0x18c   :  { %v3506_v16 = vsel %vm11007_vm4, %v3501_v28, %v3505_v56  ;;  %v7120_v37 = vsel %vm11007_vm4, %v7115_v59, %v7119_v27  ;;  %v10216_v19 = vcombine.low %v12611_v14, %v5998_v47  ;;  %v4811_v26 = vrot.slane %v4809_v9, 4  ;;  %v12625_v28 = vld [vmem:[#allocation10 + $0xf8] sm:$0x1]  ;;  %v10844_v25 = vld [vmem:[#allocation10 + $0xa8] sm:$0xff]   ;;  %v3789_v29 = vld [vmem:[#allocation10 + $0xfc] sm:$0xe] }
 0x18d   :  { %v10039_v48 = vcombine.low %v3496_v0, %v3506_v16  ;;  %v10280_v21 = vcombine.low %v7110_v52, %v7120_v37  ;;  %v4059_v12 = vsel %vm11438_vm7, %v4057_v62, %v4058_v24  ;;  %v4814_v34 = vrot.slane %v4812_v3, 5  ;;  %v8326_v27 = vld [vmem:[#allocation2 + $0x68] sm:$0xff]  ;;  %6597 = vst.msk [vmem:[#allocation2 + $0x1f8] sm:$0xff] %vm2607_vm8, %v10844_v25  ;;  %v3790_v9 = vld [vmem:[#allocation10 + $0x100] sm:$0xf] }
 0x18e   :  { %v10090_v1 = vcombine.low %v4056_v10, %v4059_v12  ;;  %v4818_v31 = vshll.u32 %v4671_v20, 16  ;;  %v4822_v32 = vshrl.u32 %v4671_v20, 16  ;;  %v4828_v54 = vshll.u32 %v4672_v57, 16  ;;  %v10845_v47 = vld [vmem:[#allocation10 + $0x168] sm:$0xff]   ;;  %v3791_v57 = vld [vmem:[#allocation10 + $0x104] sm:$0x1] }
 0x18f   :  { %3665 = vrot.lane.b32.xlu1 %v10039_v48, %s10894_s28  ;;  %7609 = vrot.lane.b32.xlu0 %v10280_v21, %s10894_s28  ;;  %v4815_v8 = vor.u32 %v4814_v34, %v4811_v26  ;;  %v7122_v13 = vshrl.u32 %v6668_v50, 16  ;;  %v7125_v55 = vshll.u32 %v6668_v50, 16  ;;  %v7131_v45 = vshll.u32 %v6669_v30, 16  ;;  %v12632_v15 = vpop.permute.xlu1 %4586  ;;  %v4673_v3 = vld [vmem:[#allocation10 + $0x30] sm:$0xf]  ;;  %2636 = vst.msk [vmem:[#allocation2 + $0x460] sm:$0xff] %vm2607_vm8, %v10845_v47 }
 0x190   :  { %4297 = vst.msk [vmem:[#allocation2 + $0x2d8] sm:$0xff] %vm2607_vm8, %v10090_v1  ;;  %v4820_v6 = vrot.slane %v4818_v31, 5  ;;  %v4824_v0 = vrot.slane %v4822_v32, 4  ;;  %v4830_v53 = vrot.slane %v4828_v54, 5  ;;  %v8320_v42 = vld [vmem:[#allocation2 + $0x38] sm:$0xff]  ;;  %v7135_v46 = vshrl.u32 %v6669_v30, 16 }
 0x191   :  { %4650 = vst.msk [vmem:[#allocation2 + $0x2d8] sm:$0xff] %vm3699_vm9, %v12219_v2  ;;  %v4816_v52 = vrot.slane %v4815_v8, 4  ;;  %9130 = vmatmul.mubr.bf16.gmra.mrb[4].mxu0 %v8320_v42  ;;  %v7124_v14 = vrot.slane %v7122_v13, 4  ;;  %v7127_v33 = vrot.slane %v7125_v55, 5  ;;  %v7133_v44 = vrot.slane %v7131_v45, 5  ;;  %v10846_v30 = vld [vmem:[#allocation10 + $0xb4] sm:$0xff]  }
 0x192   :  { %v4825_v38 = vor.u32 %v4824_v0, %v4820_v6  ;;  %v7137_v56 = vrot.slane %v7135_v46, 4  ;;  %v7141_v59 = vshll.u32 %v6670_v61, 16  ;;  %v10185_v24 = vrot.slane %v5739_v22, 9  ;;  %9137 = vmatprep.mubr.bf16.mxu0 %v8326_v27  ;;  %v4674_v34 = vld [vmem:[#allocation10 + $0x34] sm:$0xf]  ;;  %6598 = vst.msk [vmem:[#allocation2 + $0x220] sm:$0xff] %vm2607_vm8, %v10846_v30 }
 0x193   :  { %6232 = vrot.lane.b32.xlu1 %v10216_v19, %s10894_s28  ;;  %v4821_v10 = vsel %vm11007_vm4, %v4816_v52, %v4820_v6  ;;  %v7128_v62 = vor.u32 %v7127_v33, %v7124_v14  ;;  %v6001_v2 = vrot.slane %v5740_v36, 5  ;;  %v6004_v20 = vrot.slane %v12625_v28, 5  ;;  %v4675_v32 = vld [vmem:[#allocation10 + $0x38] sm:$0x1]  ;;  %v6671_v55 = vld [vmem:[#allocation10 + $0x108] sm:$0xf] }
 0x194   :  { %v4826_v16 = vrot.slane %v4825_v38, 4  ;;  %v7138_v37 = vor.u32 %v7137_v56, %v7133_v44  ;;  %v7143_v26 = vrot.slane %v7141_v59, 5  ;;  %v10059_v50 = vrot.slane %v3789_v29, 9  ;;  %v6672_v45 = vld [vmem:[#allocation10 + $0x10c] sm:$0xf]  ;;  %v8403_v27 = vld [vmem:[#allocation2 + $0x2d0] sm:$0xff] }
 0x195   :  { %v7129_v48 = vrot.slane %v7128_v62, 4  ;;  %v6002_v19 = vsel %vm11438_vm7, %v10185_v24, %v6001_v2  ;;  %v6003_v21 = vrot.slane %v6001_v2, 4  ;;  %v4062_v12 = vrot.slane %v3790_v9, 5  ;;  %v7598_v61 = vpop.permute.xlu0 %7597  ;;  %v6673_v52 = vld [vmem:[#allocation10 + $0x110] sm:$0x1] }
 0x196   :  { %v4831_v22 = vsel %vm11007_vm4, %v4826_v16, %v4830_v53  ;;  %v7139_v1 = vrot.slane %v7138_v37, 4  ;;  %v4065_v31 = vrot.slane %v3791_v57, 5  ;;  %v4833_v54 = vshrl.u32 %v4673_v3, 16  ;;  %v3654_v36 = vpop.permute.xlu1 %3653  ;;  %7683 = vst.msk [vmem:[#allocation2 + $0x1a8] sm:$0xff] %vm3699_vm9, %v7598_v61  ;;  %v5742_v38 = vld [vmem:[#allocation10 + $0xfc] sm:$0xe] }
 0x197   :  { %v10138_v28 = vcombine.low %v4821_v10, %v4831_v22  ;;  %v7134_v25 = vsel %vm11007_vm4, %v7129_v48, %v7133_v44  ;;  %v6005_v8 = vsel %vm11438_vm7, %v6003_v21, %v6004_v20  ;;  %v4063_v13 = vsel %vm11438_vm7, %v10059_v50, %v4062_v12  ;;  %3725 = vst.msk [vmem:[#allocation2 + $0x3e8] sm:$0xff] %vm3699_vm9, %v3654_v36  ;;  %v5743_v56 = vld [vmem:[#allocation10 + $0x100] sm:$0xf]  ;;  %v5744_v57 = vld [vmem:[#allocation10 + $0x104] sm:$0x1] }
 0x198   :  { %v7144_v6 = vsel %vm11007_vm4, %v7139_v1, %v7143_v26  ;;  %v10217_v0 = vcombine.low %v6002_v19, %v6005_v8  ;;  %v4064_v53 = vrot.slane %v4062_v12, 4  ;;  %v4835_v42 = vrot.slane %v4833_v54, 4  ;;  %v8404_v46 = vld [vmem:[#allocation2 + $0x2d8] sm:$0xff]  ;;  %v3792_v26 = vld [vmem:[#allocation10 + $0x108] sm:$0xe] }
 0x199   :  { %5658 = vst.msk [vmem:[#allocation2 + $0x60] sm:$0xff] %vm2607_vm8, %v10138_v28  ;;  %v10281_v14 = vcombine.low %v7134_v25, %v7144_v6  ;;  %v4836_v33 = vshll.u32 %v4673_v3, 16  ;;  %v4842_v44 = vshll.u32 %v4674_v34, 16  ;;  %v4846_v29 = vshrl.u32 %v4674_v34, 16  ;;  %8976 = vmatprep.mubr.bf16.mxu1 %v8404_v46  ;;  %v3793_v21 = vld [vmem:[#allocation10 + $0x10c] sm:$0xf] }
 0x19a   :  { %6298 = vst.msk [vmem:[#allocation2 + $0x60] sm:$0xff] %vm3699_vm9, %v12221_v4  ;;  %6234 = vrot.lane.b32.xlu1 %v10217_v0, %s10894_s28  ;;  %v4066_v59 = vsel %vm11438_vm7, %v4064_v53, %v4065_v31  ;;  %v4852_v24 = vshll.u32 %v4675_v32, 16  ;;  %v7146_v9 = vshrl.u32 %v6671_v55, 16  ;;  %v7149_v47 = vshll.u32 %v6671_v55, 16  ;;  %8977 = vmatmul.mubr.bf16.gmra.mrb[40].mxu1 %v8403_v27  ;;  %v10847_v12 = vld [vmem:[#allocation10 + $0x174] sm:$0xff]   ;;  %v10848_v6 = vld [vmem:[#allocation10 + $0xc0] sm:$0xff]  }
 0x19b   :  { %7611 = vrot.lane.b32.xlu0 %v10281_v14, %s10894_s28  ;;  %v10091_v10 = vcombine.low %v4063_v13, %v4066_v59  ;;  %v4838_v62 = vrot.slane %v4836_v33, 5  ;;  %v4844_v2 = vrot.slane %v4842_v44, 5  ;;  %v4848_v20 = vrot.slane %v4846_v29, 4  ;;  %v3794_v31 = vld [vmem:[#allocation10 + $0x110] sm:$0x1]  ;;  %2637 = vst.msk [vmem:[#allocation2 + $0x488] sm:$0xff] %vm2607_vm8, %v10847_v12 }
 0x19c   :  { %v4854_v3 = vrot.slane %v4852_v24, 5  ;;  %v7148_v16 = vrot.slane %v7146_v9, 4  ;;  %v7151_v37 = vrot.slane %v7149_v47, 5  ;;  %v7155_v4 = vshll.u32 %v6672_v45, 16  ;;  %v8331_v32 = vld [vmem:[#allocation2 + $0x90] sm:$0xff]  ;;  %6599 = vst.msk [vmem:[#allocation2 + $0x248] sm:$0xff] %vm2607_vm8, %v10848_v6 }
 0x19d   :  { %4298 = vst.msk [vmem:[#allocation2 + $0x300] sm:$0xff] %vm2607_vm8, %v10091_v10  ;;  %v4839_v50 = vor.u32 %v4838_v62, %v4835_v42  ;;  %v4849_v30 = vor.u32 %v4848_v20, %v4844_v2  ;;  %v7159_v48 = vshrl.u32 %v6672_v45, 16  ;;  %v7165_v19 = vshll.u32 %v6673_v52, 16  ;;  %v4676_v27 = vld [vmem:[#allocation10 + $0x3c] sm:$0xf] }
 0x19e   :  { %4651 = vst.msk [vmem:[#allocation2 + $0x300] sm:$0xff] %vm3699_vm9, %v12282_v23  ;;  %v7152_v34 = vor.u32 %v7151_v37, %v7148_v16  ;;  %v7157_v61 = vrot.slane %v7155_v4, 5  ;;  %v10186_v22 = vrot.slane %v5742_v38, 9  ;;  %v6008_v1 = vrot.slane %v5743_v56, 5  ;;  %v12670_v23 = vpop.permute.xlu0 %6220  ;;  %v4677_v14 = vld [vmem:[#allocation10 + $0x40] sm:$0xf] }
 0x19f   :  { %v4840_v54 = vrot.slane %v4839_v50, 4  ;;  %v4850_v36 = vrot.slane %v4849_v30, 4  ;;  %v7161_v28 = vrot.slane %v7159_v48, 4  ;;  %v7167_v25 = vrot.slane %v7165_v19, 5  ;;  %v4678_v59 = vld [vmem:[#allocation10 + $0x44] sm:$0x1] }
 0x1a0   :  { %v7153_v8 = vrot.slane %v7152_v34, 4  ;;  %v6009_v13 = vsel %vm11438_vm7, %v10186_v22, %v6008_v1  ;;  %v6010_v55 = vrot.slane %v6008_v1, 4  ;;  %v6011_v45 = vrot.slane %v5744_v57, 5  ;;  %v12676_v33 = vpop.permute.xlu1 %4588  ;;  %v6674_v24 = vld [vmem:[#allocation10 + $0x114] sm:$0xf]  ;;  %v8408_v4 = vld [vmem:[#allocation2 + $0x2f8] sm:$0xff] }
 0x1a1   :  { %v4845_v0 = vsel %vm11007_vm4, %v4840_v54, %v4844_v2  ;;  %v4855_v53 = vsel %vm11007_vm4, %v4850_v36, %v4854_v3  ;;  %v8325_v42 = vld [vmem:[#allocation2 + $0x60] sm:$0xff]  ;;  %v7162_v46 = vor.u32 %v7161_v28, %v7157_v61  ;;  %v10060_v52 = vrot.slane %v3792_v26, 9  ;;  %v6675_v2 = vld [vmem:[#allocation10 + $0x118] sm:$0xf]  ;;  %v6676_v37 = vld [vmem:[#allocation10 + $0x11c] sm:$0x1] }
 0x1a2   :  { %v10139_v44 = vcombine.low %v4845_v0, %v4855_v53  ;;  %9138 = vmatmul.mubr.bf16.gmra.mrb[8].mxu0 %v8325_v42  ;;  %v7158_v29 = vsel %vm11007_vm4, %v7153_v8, %v7157_v61  ;;  %v6012_v38 = vsel %vm11438_vm7, %v6010_v55, %v6011_v45  ;;  %v4069_v56 = vrot.slane %v3793_v21, 5  ;;  %v5745_v21 = vld [vmem:[#allocation10 + $0x108] sm:$0xe]  ;;  %v5746_v1 = vld [vmem:[#allocation10 + $0x10c] sm:$0xf] }
 0x1a3   :  { %v7163_v9 = vrot.slane %v7162_v46, 4  ;;  %v10218_v47 = vcombine.low %v6009_v13, %v6012_v38  ;;  %v4072_v10 = vrot.slane %v3794_v31, 5  ;;  %v4857_v62 = vshrl.u32 %v4676_v27, 16  ;;  %9145 = vmatprep.mubr.bf16.mxu0 %v8331_v32  ;;  %v5747_v31 = vld [vmem:[#allocation10 + $0x110] sm:$0x1] }
 0x1a4   :  { %5659 = vst.msk [vmem:[#allocation2 + $0x88] sm:$0xff] %vm2607_vm8, %v10139_v44  ;;  %v4070_v20 = vsel %vm11438_vm7, %v10060_v52, %v4069_v56  ;;  %v4071_v57 = vrot.slane %v4069_v56, 4  ;;  %v4860_v3 = vshll.u32 %v4676_v27, 16  ;;  %v4866_v16 = vshll.u32 %v4677_v14, 16  ;;  %v3796_v6 = vld [vmem:[#allocation10 + $0x118] sm:$0xf] }
 0x1a5   :  { %6299 = vst.msk [vmem:[#allocation2 + $0x88] sm:$0xff] %vm3699_vm9, %v12276_v39  ;;  %v7168_v26 = vsel %vm11007_vm4, %v7163_v9, %v7167_v25  ;;  %6236 = vrot.lane.b32.xlu1 %v10218_v47, %s10894_s28  ;;  %v4859_v50 = vrot.slane %v4857_v62, 4  ;;  %v4870_v30 = vshrl.u32 %v4677_v14, 16  ;;  %v4876_v48 = vshll.u32 %v4678_v59, 16  ;;  %v8409_v19 = vld [vmem:[#allocation2 + $0x300] sm:$0xff]  ;;  %v8336_v14 = vld [vmem:[#allocation2 + $0xb8] sm:$0xff] }
 0x1a6   :  { %v10282_v12 = vcombine.low %v7158_v29, %v7168_v26  ;;  %v4073_v34 = vsel %vm11438_vm7, %v4071_v57, %v4072_v10  ;;  %v4862_v61 = vrot.slane %v4860_v3, 5  ;;  %v4868_v22 = vrot.slane %v4866_v16, 5  ;;  %8984 = vmatprep.mubr.bf16.mxu1 %v8409_v19  ;;  %v7600_v39 = vpop.permute.xlu0 %7599  ;;  %v3795_v25 = vld [vmem:[#allocation10 + $0x114] sm:$0xe]  ;;  %v3797_v52 = vld [vmem:[#allocation10 + $0x11c] sm:$0x1] }
 0x1a7   :  { %v10092_v32 = vcombine.low %v4070_v20, %v4073_v34  ;;  %v4872_v54 = vrot.slane %v4870_v30, 4  ;;  %v4878_v36 = vrot.slane %v4876_v48, 5  ;;  %v7170_v28 = vshrl.u32 %v6674_v24, 16  ;;  %8985 = vmatmul.mubr.bf16.gmra.mrb[44].mxu1 %v8408_v4  ;;  %v3656_v8 = vpop.permute.xlu1 %3655  ;;  %7684 = vst.msk [vmem:[#allocation2 + $0x1d0] sm:$0xff] %vm3699_vm9, %v7600_v39  ;;  %v4679_v3 = vld [vmem:[#allocation10 + $0x48] sm:$0xf] }
 0x1a8   :  { %7613 = vrot.lane.b32.xlu0 %v10282_v12, %s10894_s28  ;;  %v4863_v13 = vor.u32 %v4862_v61, %v4859_v50  ;;  %v7173_v55 = vshll.u32 %v6674_v24, 16  ;;  %v7179_v45 = vshll.u32 %v6675_v2, 16  ;;  %v7183_v27 = vshrl.u32 %v6675_v2, 16  ;;  %3726 = vst.msk [vmem:[#allocation2 + $0x410] sm:$0xff] %vm3699_vm9, %v3656_v8  ;;  %v4680_v26 = vld [vmem:[#allocation10 + $0x4c] sm:$0xf] }
 0x1a9   :  { %4299 = vst.msk [vmem:[#allocation2 + $0x328] sm:$0xff] %vm2607_vm8, %v10092_v32  ;;  %v4873_v0 = vor.u32 %v4872_v54, %v4868_v22  ;;  %v7172_v53 = vrot.slane %v7170_v28, 4  ;;  %v7189_v42 = vshll.u32 %v6676_v37, 16  ;;  %v10187_v46 = vrot.slane %v5745_v21, 9  ;;  %v4681_v50 = vld [vmem:[#allocation10 + $0x50] sm:$0x1] }
 0x1aa   :  { %4652 = vst.msk [vmem:[#allocation2 + $0x328] sm:$0xff] %vm3699_vm9, %v12325_v58  ;;  %v4864_v44 = vrot.slane %v4863_v13, 4  ;;  %v7175_v29 = vrot.slane %v7173_v55, 5  ;;  %v7181_v38 = vrot.slane %v7179_v45, 5  ;;  %v7185_v56 = vrot.slane %v7183_v27, 4  ;;  %v10849_v39 = vld [vmem:[%s13910_s0 + $0x138] sm:$0xff]  }
 0x1ab   :  { %v4874_v59 = vrot.slane %v4873_v0, 4  ;;  %v7191_v24 = vrot.slane %v7189_v42, 5  ;;  %v6015_v9 = vrot.slane %v5746_v1, 5  ;;  %v6018_v47 = vrot.slane %v5747_v31, 5  ;;  %v6677_v12 = vld [vmem:[#allocation10 + $0x120] sm:$0xf]  ;;  %v12721_v42 = vpop.permute.xlu0 %6222  ;;  %10485 = vmatprep.subr.bf16.mxu1 %v10849_v39 }
 0x1ac   :  { %v4869_v10 = vsel %vm11007_vm4, %v4864_v44, %v4868_v22  ;;  %v8330_v62 = vld [vmem:[#allocation2 + $0x88] sm:$0xff]  ;;  %v7176_v2 = vor.u32 %v7175_v29, %v7172_v53  ;;  %v7186_v20 = vor.u32 %v7185_v56, %v7181_v38  ;;  %v10061_v57 = vrot.slane %v3795_v25, 9  ;;  %v6678_v31 = vld [vmem:[#allocation10 + $0x124] sm:$0xf]  ;;  %v5748_v53 = vld [vmem:[#allocation10 + $0x114] sm:$0xe]  ;;  %10486 = vmatpush3.bf16.msra.mxu1 %v10849_v39 }
 0x1ad   :  { %v4879_v16 = vsel %vm11007_vm4, %v4874_v59, %v4878_v36  ;;  %9146 = vmatmul.mubr.bf16.gmra.mrb[12].mxu0 %v8330_v62  ;;  %v6016_v58 = vsel %vm11438_vm7, %v10187_v46, %v6015_v9  ;;  %v6017_v37 = vrot.slane %v6015_v9, 4  ;;  %v4076_v4 = vrot.slane %v3796_v6, 5  ;;  %v6679_v25 = vld [vmem:[#allocation10 + $0x128] sm:$0x1]  ;;  %v8413_v8 = vld [vmem:[#allocation2 + $0x320] sm:$0xff]  ;;  %v10851_v46 = vld [vmem:[#allocation10 + $0xcc] sm:$0xff]  }
 0x1ae   :  { %v10140_v30 = vcombine.low %v4869_v10, %v4879_v16  ;;  %v7177_v48 = vrot.slane %v7176_v2, 4  ;;  %v7187_v19 = vrot.slane %v7186_v20, 4  ;;  %v4079_v21 = vrot.slane %v3797_v52, 5  ;;  %9153 = vmatprep.mubr.bf16.mxu0 %v8336_v14  ;;  %v10850_v13 = vld [vmem:[#allocation10 + $0x180] sm:$0xff]   ;;  %6600 = vst.msk [vmem:[#allocation2 + $0x270] sm:$0xff] %vm2607_vm8, %v10851_v46 }
 0x1af   :  { %v6019_v34 = vsel %vm11438_vm7, %v6017_v37, %v6018_v47  ;;  %v4077_v61 = vsel %vm11438_vm7, %v10061_v57, %v4076_v4  ;;  %v4078_v22 = vrot.slane %v4076_v4, 4  ;;  %v4881_v1 = vshrl.u32 %v4679_v3, 16  ;;  %2638 = vst.msk [vmem:[#allocation2 + $0x4b0] sm:$0xff] %vm2607_vm8, %v10850_v13  ;;  %v3798_v10 = vld [vmem:[#allocation10 + $0x120] sm:$0xe] }
 0x1b0   :  { %5660 = vst.msk [vmem:[#allocation2 + $0xb0] sm:$0xff] %vm2607_vm8, %v10140_v30  ;;  %v7182_v32 = vsel %vm11007_vm4, %v7177_v48, %v7181_v38  ;;  %v7192_v54 = vsel %vm11007_vm4, %v7187_v19, %v7191_v24  ;;  %v10219_v36 = vcombine.low %v6016_v58, %v6019_v34  ;;  %v4884_v28 = vshll.u32 %v4679_v3, 16  ;;  %v5750_v38 = vld [vmem:[#allocation10 + $0x11c] sm:$0x1]  ;;  %v3799_v3 = vld [vmem:[#allocation10 + $0x124] sm:$0xf] }
 0x1b1   :  { %6300 = vst.msk [vmem:[#allocation2 + $0xb0] sm:$0xff] %vm3699_vm9, %v12316_v51  ;;  %v10283_v55 = vcombine.low %v7182_v32, %v7192_v54  ;;  %v4080_v45 = vsel %vm11438_vm7, %v4078_v22, %v4079_v21  ;;  %v4883_v27 = vrot.slane %v4881_v1, 4  ;;  %v4890_v6 = vshll.u32 %v4680_v26, 16  ;;  %v8414_v0 = vld [vmem:[#allocation2 + $0x328] sm:$0xff]  ;;  %v5749_v51 = vld [vmem:[#allocation10 + $0x118] sm:$0xf]  ;;  %v12724_v56 = vpop.permute.xlu1 %4590 }
 0x1b2   :  { %6238 = vrot.lane.b32.xlu1 %v10219_v36, %s10894_s28  ;;  %v10093_v52 = vcombine.low %v4077_v61, %v4080_v45  ;;  %v4886_v14 = vrot.slane %v4884_v28, 5  ;;  %v4894_v44 = vshrl.u32 %v4680_v26, 16  ;;  %v4900_v29 = vshll.u32 %v4681_v50, 16  ;;  %8992 = vmatprep.mubr.bf16.mxu1 %v8414_v0  ;;  %v3800_v26 = vld [vmem:[#allocation10 + $0x128] sm:$0x1] }
 0x1b3   :  { %7615 = vrot.lane.b32.xlu0 %v10283_v55, %s10894_s28  ;;  %v4892_v59 = vrot.slane %v4890_v6, 5  ;;  %v7194_v24 = vshrl.u32 %v6677_v12, 16  ;;  %v7197_v9 = vshll.u32 %v6677_v12, 16  ;;  %v7203_v47 = vshll.u32 %v6678_v31, 16  ;;  %8993 = vmatmul.mubr.bf16.gmra.mrb[48].mxu1 %v8413_v8  ;;  %v12732_v50 = vld [vmem:[#allocation10 + $0x54] sm:$0xf] }
 0x1b4   :  { %4300 = vst.msk [vmem:[#allocation2 + $0x350] sm:$0xff] %vm2607_vm8, %v10093_v52  ;;  %v4887_v62 = vor.u32 %v4886_v14, %v4883_v27  ;;  %v4896_v2 = vrot.slane %v4894_v44, 4  ;;  %v4902_v20 = vrot.slane %v4900_v29, 5  ;;  %v7207_v57 = vshrl.u32 %v6678_v31, 16  ;;  %v10852_v12 = vld [vmem:[#allocation10 + $0x18c] sm:$0xff]   ;;  %v8341_v31 = vld [vmem:[#allocation2 + $0xe0] sm:$0xff] }
 0x1b5   :  { %4653 = vst.msk [vmem:[#allocation2 + $0x350] sm:$0xff] %vm3699_vm9, %v12385_v17  ;;  %v7196_v16 = vrot.slane %v7194_v24, 4  ;;  %v7199_v58 = vrot.slane %v7197_v9, 5  ;;  %v7205_v37 = vrot.slane %v7203_v47, 5  ;;  %v7213_v4 = vshll.u32 %v6679_v25, 16  ;;  %v10853_v8 = vld [vmem:[#allocation10 + $0xf0] sm:$0xff]  }
 0x1b6   :  { %v4888_v30 = vrot.slane %v4887_v62, 4  ;;  %v4897_v48 = vor.u32 %v4896_v2, %v4892_v59  ;;  %v7209_v19 = vrot.slane %v7207_v57, 4  ;;  %v10188_v21 = vrot.slane %v5748_v53, 9  ;;  %2639 = vst.msk [vmem:[#allocation2 + $0x4d8] sm:$0xff] %vm2607_vm8, %v10852_v12  ;;  %v4683_v46 = vld [vmem:[#allocation10 + $0x58] sm:$0xf] }
 0x1b7   :  { %v7200_v34 = vor.u32 %v7199_v58, %v7196_v16  ;;  %v7215_v61 = vrot.slane %v7213_v4, 5  ;;  %v6022_v22 = vrot.slane %v5749_v51, 5  ;;  %v6025_v1 = vrot.slane %v5750_v38, 5  ;;  %v7602_v39 = vpop.permute.xlu0 %7601  ;;  %6601 = vst.msk [vmem:[#allocation2 + $0x298] sm:$0xff] %vm2607_vm8, %v10853_v8  ;;  %v4684_v38 = vld [vmem:[#allocation10 + $0x5c] sm:$0x1] }
 0x1b8   :  { %v4893_v17 = vsel %vm11007_vm4, %v4888_v30, %v4892_v59  ;;  %v4898_v32 = vrot.slane %v4897_v48, 4  ;;  %v8335_v54 = vld [vmem:[#allocation2 + $0xb0] sm:$0xff]  ;;  %v7210_v36 = vor.u32 %v7209_v19, %v7205_v37  ;;  %v10062_v28 = vrot.slane %v3798_v10, 9  ;;  %v3658_v25 = vpop.permute.xlu1 %3657  ;;  %7685 = vst.msk [vmem:[#allocation2 + $0x1f8] sm:$0xff] %vm3699_vm9, %v7602_v39  ;;  %v6680_v59 = vld [vmem:[#allocation10 + $0x12c] sm:$0xf] }
 0x1b9   :  { %9154 = vmatmul.mubr.bf16.gmra.mrb[16].mxu0 %v8335_v54  ;;  %v7201_v13 = vrot.slane %v7200_v34, 4  ;;  %v6023_v55 = vsel %vm11438_vm7, %v10188_v21, %v6022_v22  ;;  %v6024_v45 = vrot.slane %v6022_v22, 4  ;;  %v4083_v27 = vrot.slane %v3799_v3, 5  ;;  %3727 = vst.msk [vmem:[#allocation2 + $0x438] sm:$0xff] %vm3699_vm9, %v3658_v25  ;;  %v8418_v24 = vld [vmem:[#allocation2 + $0x348] sm:$0xff] }
 0x1ba   :  { %v4903_v6 = vsel %vm11007_vm4, %v4898_v32, %v4902_v20  ;;  %v7211_v0 = vrot.slane %v7210_v36, 4  ;;  %v4086_v53 = vrot.slane %v3800_v26, 5  ;;  %v4905_v52 = vshrl.u32 %v12732_v50, 16  ;;  %9161 = vmatprep.mubr.bf16.mxu0 %v8341_v31  ;;  %v6681_v20 = vld [vmem:[#allocation10 + $0x130] sm:$0xf] }
 0x1bb   :  { %v10141_v14 = vcombine.low %v4893_v17, %v4903_v6  ;;  %v7206_v44 = vsel %vm11007_vm4, %v7201_v13, %v7205_v37  ;;  %v6026_v29 = vsel %vm11438_vm7, %v6024_v45, %v6025_v1  ;;  %v4084_v51 = vsel %vm11438_vm7, %v10062_v28, %v4083_v27  ;;  %v6682_v37 = vld [vmem:[#allocation10 + $0x134] sm:$0x1]  ;;  %v5751_v19 = vld [vmem:[#allocation10 + $0x120] sm:$0xe]  ;;  %v5753_v39 = vld [vmem:[#allocation10 + $0x128] sm:$0x1] }
 0x1bc   :  { %v7216_v9 = vsel %vm11007_vm4, %v7211_v0, %v7215_v61  ;;  %v10220_v47 = vcombine.low %v6023_v55, %v6026_v29  ;;  %v4085_v10 = vrot.slane %v4083_v27, 4  ;;  %v4907_v62 = vrot.slane %v4905_v52, 4  ;;  %v8419_v2 = vld [vmem:[#allocation2 + $0x350] sm:$0xff]  ;;  %v5752_v61 = vld [vmem:[#allocation10 + $0x124] sm:$0xf]  ;;  %v12764_v0 = vpop.permute.xlu0 %6224 }
 0x1bd   :  { %5661 = vst.msk [vmem:[#allocation2 + $0xd8] sm:$0xff] %vm2607_vm8, %v10141_v14  ;;  %v10284_v57 = vcombine.low %v7206_v44, %v7216_v9  ;;  %v4908_v3 = vshll.u32 %v12732_v50, 16  ;;  %v4914_v16 = vshll.u32 %v4683_v46, 16  ;;  %v4918_v58 = vshrl.u32 %v4683_v46, 16  ;;  %9000 = vmatprep.mubr.bf16.mxu1 %v8419_v2  ;;  %v3801_v28 = vld [vmem:[#allocation10 + $0x12c] sm:$0xe] }
 0x1be   :  { %6301 = vst.msk [vmem:[#allocation2 + $0xd8] sm:$0xff] %vm3699_vm9, %v12378_v11  ;;  %6240 = vrot.lane.b32.xlu1 %v10220_v47, %s10894_s28  ;;  %v4087_v4 = vsel %vm11438_vm7, %v4085_v10, %v4086_v53  ;;  %v4924_v26 = vshll.u32 %v4684_v38, 16  ;;  %v7218_v30 = vshrl.u32 %v6680_v59, 16  ;;  %v7221_v48 = vshll.u32 %v6680_v59, 16  ;;  %9001 = vmatmul.mubr.bf16.gmra.mrb[52].mxu1 %v8418_v24  ;;  %v3802_v25 = vld [vmem:[#allocation10 + $0x130] sm:$0xf] }
 0x1bf   :  { %7617 = vrot.lane.b32.xlu0 %v10284_v57, %s10894_s28  ;;  %v10094_v50 = vcombine.low %v4084_v51, %v4087_v4  ;;  %v4910_v21 = vrot.slane %v4908_v3, 5  ;;  %v4916_v12 = vrot.slane %v4914_v16, 5  ;;  %v4920_v34 = vrot.slane %v4918_v58, 4  ;;  %v3803_v27 = vld [vmem:[#allocation10 + $0x134] sm:$0x1]  ;;  %v10854_v53 = vld [vmem:[#allocation10 + $0xfc] sm:$0xff]  }
 0x1c0   :  { %v4926_v22 = vrot.slane %v4924_v26, 5  ;;  %v7220_v1 = vrot.slane %v7218_v30, 4  ;;  %v7223_v11 = vrot.slane %v7221_v48, 5  ;;  %v7227_v31 = vshll.u32 %v6681_v20, 16  ;;  %v4685_v6 = vld [vmem:[#allocation10 + $0x60] sm:$0xf] }
 0x1c1   :  { %4301 = vst.msk [vmem:[#allocation2 + $0x378] sm:$0xff] %vm2607_vm8, %v10094_v50  ;;  %v4911_v17 = vor.u32 %v4910_v21, %v4907_v62  ;;  %v4921_v32 = vor.u32 %v4920_v34, %v4916_v12  ;;  %v7231_v54 = vshrl.u32 %v6681_v20, 16  ;;  %v7237_v36 = vshll.u32 %v6682_v37, 16  ;;  %v4686_v29 = vld [vmem:[#allocation10 + $0x64] sm:$0xf]  ;;  %v8346_v47 = vld [vmem:[#allocation2 + $0x108] sm:$0xff] }
 0x1c2   :  { %4654 = vst.msk [vmem:[#allocation2 + $0x378] sm:$0xff] %vm3699_vm9, %v12452_v41  ;;  %v7224_v8 = vor.u32 %v7223_v11, %v7220_v1  ;;  %v7229_v13 = vrot.slane %v7227_v31, 5  ;;  %v10189_v55 = vrot.slane %v5751_v19, 9  ;;  %v6029_v45 = vrot.slane %v5752_v61, 5  ;;  %v12766_v51 = vpop.permute.xlu1 %4592  ;;  %v4687_v9 = vld [vmem:[#allocation10 + $0x68] sm:$0x1] }
 0x1c3   :  { %v4912_v46 = vrot.slane %v4911_v17, 4  ;;  %v4922_v52 = vrot.slane %v4921_v32, 4  ;;  %v7233_v14 = vrot.slane %v7231_v54, 4  ;;  %v7239_v44 = vrot.slane %v7237_v36, 5  ;;  %6602 = vst.msk [vmem:[#allocation2 + $0x2c0] sm:$0xff] %vm2607_vm8, %v10854_v53 }
 0x1c4   :  { %v7225_v38 = vrot.slane %v7224_v8, 4  ;;  %v6030_v41 = vsel %vm11438_vm7, %v10189_v55, %v6029_v45  ;;  %v6031_v59 = vrot.slane %v6029_v45, 4  ;;  %v6032_v24 = vrot.slane %v5753_v39, 5  ;;  %v6683_v4 = vld [vmem:[#allocation10 + $0x138] sm:$0xf] }
 0x1c5   :  { %v4917_v10 = vsel %vm11007_vm4, %v4912_v46, %v4916_v12  ;;  %v4927_v62 = vsel %vm11007_vm4, %v4922_v52, %v4926_v22  ;;  %v8340_v2 = vld [vmem:[#allocation2 + $0xd8] sm:$0xff]  ;;  %v7234_v20 = vor.u32 %v7233_v14, %v7229_v13  ;;  %v10063_v57 = vrot.slane %v3801_v28, 9  ;;  %v8423_v22 = vld [vmem:[#allocation2 + $0x370] sm:$0xff]  ;;  %v6685_v54 = vld [vmem:[#allocation10 + $0x140] sm:$0x1] }
 0x1c6   :  { %v10142_v3 = vcombine.low %v4917_v10, %v4927_v62  ;;  %9162 = vmatmul.mubr.bf16.gmra.mrb[20].mxu0 %v8340_v2  ;;  %v7230_v16 = vsel %vm11007_vm4, %v7225_v38, %v7229_v13  ;;  %v6033_v58 = vsel %vm11438_vm7, %v6031_v59, %v6032_v24  ;;  %v4090_v37 = vrot.slane %v3802_v25, 5  ;;  %v6684_v61 = vld [vmem:[#allocation10 + $0x13c] sm:$0xf]  ;;  %v5755_v55 = vld [vmem:[#allocation10 + $0x130] sm:$0xf] }
 0x1c7   :  { %v7235_v26 = vrot.slane %v7234_v20, 4  ;;  %v10221_v30 = vcombine.low %v6030_v41, %v6033_v58  ;;  %v4093_v48 = vrot.slane %v3803_v27, 5  ;;  %v4929_v19 = vshrl.u32 %v4685_v6, 16  ;;  %9169 = vmatprep.mubr.bf16.mxu0 %v8346_v47  ;;  %v5756_v46 = vld [vmem:[#allocation10 + $0x134] sm:$0x1] }
 0x1c8   :  { %5662 = vst.msk [vmem:[#allocation2 + $0x100] sm:$0xff] %vm2607_vm8, %v10142_v3  ;;  %v4091_v50 = vsel %vm11438_vm7, %v10063_v57, %v4090_v37  ;;  %v4092_v21 = vrot.slane %v4090_v37, 4  ;;  %v4932_v12 = vshll.u32 %v4685_v6, 16  ;;  %v4938_v34 = vshll.u32 %v4686_v29, 16  ;;  %v7604_v1 = vpop.permute.xlu0 %7603  ;;  %v3804_v38 = vld [vmem:[#allocation10 + $0x138] sm:$0xe] }
 0x1c9   :  { %6302 = vst.msk [vmem:[#allocation2 + $0x100] sm:$0xff] %vm3699_vm9, %v12449_v43  ;;  %v7240_v11 = vsel %vm11007_vm4, %v7235_v26, %v7239_v44  ;;  %6242 = vrot.lane.b32.xlu1 %v10221_v30, %s10894_s28  ;;  %v4931_v31 = vrot.slane %v4929_v19, 4  ;;  %v4942_v39 = vshrl.u32 %v4686_v29, 16  ;;  %v4948_v17 = vshll.u32 %v4687_v9, 16  ;;  %v8424_v32 = vld [vmem:[#allocation2 + $0x378] sm:$0xff]  ;;  %v3660_v36 = vpop.permute.xlu1 %3659  ;;  %7686 = vst.msk [vmem:[#allocation2 + $0x220] sm:$0xff] %vm3699_vm9, %v7604_v1 }
 0x1ca   :  { %v10285_v28 = vcombine.low %v7230_v16, %v7240_v11  ;;  %v4094_v25 = vsel %vm11438_vm7, %v4092_v21, %v4093_v48  ;;  %v4934_v8 = vrot.slane %v4932_v12, 5  ;;  %v4940_v13 = vrot.slane %v4938_v34, 5  ;;  %9008 = vmatprep.mubr.bf16.mxu1 %v8424_v32  ;;  %v5754_v43 = vld [vmem:[#allocation10 + $0x12c] sm:$0xe]  ;;  %3728 = vst.msk [vmem:[#allocation2 + $0x460] sm:$0xff] %vm3699_vm9, %v3660_v36  ;;  %v8351_v57 = vld [vmem:[#allocation2 + $0x130] sm:$0xff] }
 0x1cb   :  { %v10095_v45 = vcombine.low %v4091_v50, %v4094_v25  ;;  %v4944_v27 = vrot.slane %v4942_v39, 4  ;;  %v4950_v6 = vrot.slane %v4948_v17, 5  ;;  %v7242_v53 = vshrl.u32 %v6683_v4, 16  ;;  %9009 = vmatmul.mubr.bf16.gmra.mrb[56].mxu1 %v8423_v22  ;;  %v3805_v47 = vld [vmem:[#allocation10 + $0x13c] sm:$0xf] }
 0x1cc   :  { %7619 = vrot.lane.b32.xlu0 %v10285_v28, %s10894_s28  ;;  %v4935_v52 = vor.u32 %v4934_v8, %v4931_v31  ;;  %v7245_v14 = vshll.u32 %v6683_v4, 16  ;;  %v7251_v44 = vshll.u32 %v6684_v61, 16  ;;  %v7255_v29 = vshrl.u32 %v6684_v61, 16  ;;  %v3806_v4 = vld [vmem:[#allocation10 + $0x140] sm:$0x1] }
 0x1cd   :  { %4302 = vst.msk [vmem:[#allocation2 + $0x3a0] sm:$0xff] %vm2607_vm8, %v10095_v45  ;;  %v4945_v41 = vor.u32 %v4944_v27, %v4940_v13  ;;  %v7244_v59 = vrot.slane %v7242_v53, 4  ;;  %v7261_v24 = vshll.u32 %v6685_v54, 16  ;;  %v10190_v9 = vrot.slane %v5754_v43, 9  ;;  %v4688_v21 = vld [vmem:[#allocation10 + $0x6c] sm:$0xf] }
 0x1ce   :  { %4655 = vst.msk [vmem:[#allocation2 + $0x3a0] sm:$0xff] %vm3699_vm9, %v12527_v60  ;;  %v4936_v10 = vrot.slane %v4935_v52, 4  ;;  %v7247_v62 = vrot.slane %v7245_v14, 5  ;;  %v7253_v2 = vrot.slane %v7251_v44, 5  ;;  %v7257_v20 = vrot.slane %v7255_v29, 4 }
 0x1cf   :  { %v4946_v3 = vrot.slane %v4945_v41, 4  ;;  %v7263_v16 = vrot.slane %v7261_v24, 5  ;;  %v6036_v58 = vrot.slane %v5755_v55, 5  ;;  %v6039_v37 = vrot.slane %v5756_v46, 5  ;;  %v4689_v22 = vld [vmem:[#allocation10 + $0x70] sm:$0xf] }
 0x1d0   :  { %v4941_v26 = vsel %vm11007_vm4, %v4936_v10, %v4940_v13  ;;  %v8345_v30 = vld [vmem:[#allocation2 + $0x100] sm:$0xff]  ;;  %v7248_v48 = vor.u32 %v7247_v62, %v7244_v59  ;;  %v7258_v19 = vor.u32 %v7257_v20, %v7253_v2  ;;  %v10064_v50 = vrot.slane %v3804_v38, 9  ;;  %v4690_v1 = vld [vmem:[#allocation10 + $0x74] sm:$0x1]  ;;  %v6687_v54 = vld [vmem:[#allocation10 + $0x148] sm:$0xf] }
 0x1d1   :  { %v4951_v60 = vsel %vm11007_vm4, %v4946_v3, %v4950_v6  ;;  %9170 = vmatmul.mubr.bf16.gmra.mrb[24].mxu0 %v8345_v30  ;;  %v6037_v12 = vsel %vm11438_vm7, %v10190_v9, %v6036_v58  ;;  %v6038_v34 = vrot.slane %v6036_v58, 4  ;;  %v4097_v61 = vrot.slane %v3805_v47, 5  ;;  %v6686_v32 = vld [vmem:[#allocation10 + $0x144] sm:$0xf]  ;;  %v6688_v27 = vld [vmem:[#allocation10 + $0x14c] sm:$0x1] }
 0x1d2   :  { %v10143_v11 = vcombine.low %v4941_v26, %v4951_v60  ;;  %v7249_v31 = vrot.slane %v7248_v48, 4  ;;  %v7259_v39 = vrot.slane %v7258_v19, 4  ;;  %v4100_v17 = vrot.slane %v3806_v4, 5  ;;  %9177 = vmatprep.mubr.bf16.mxu0 %v8351_v57  ;;  %v8428_v6 = vld [vmem:[#allocation2 + $0x398] sm:$0xff]  ;;  %v10855_v46 = vld [vmem:[#allocation10 + $0x108] sm:$0xff]  }
 0x1d3   :  { %v6040_v36 = vsel %vm11438_vm7, %v6038_v34, %v6039_v37  ;;  %v4098_v28 = vsel %vm11438_vm7, %v10064_v50, %v4097_v61  ;;  %v4099_v25 = vrot.slane %v4097_v61, 4  ;;  %v4953_v8 = vshrl.u32 %v4688_v21, 16  ;;  %v12810_v53 = vpop.permute.xlu1 %4594  ;;  %v5757_v41 = vld [vmem:[#allocation10 + $0x138] sm:$0xe]  ;;  %v5758_v10 = vld [vmem:[#allocation10 + $0x13c] sm:$0xf] }
 0x1d4   :  { %5663 = vst.msk [vmem:[#allocation2 + $0x128] sm:$0xff] %vm2607_vm8, %v10143_v11  ;;  %v7254_v13 = vsel %vm11007_vm4, %v7249_v31, %v7253_v2  ;;  %v7264_v43 = vsel %vm11007_vm4, %v7259_v39, %v7263_v16  ;;  %v10222_v55 = vcombine.low %v6037_v12, %v6040_v36  ;;  %v4956_v45 = vshll.u32 %v4688_v21, 16  ;;  %v5759_v62 = vld [vmem:[#allocation10 + $0x140] sm:$0x1]  ;;  %6603 = vst.msk [vmem:[#allocation2 + $0x2e8] sm:$0xff] %vm2607_vm8, %v10855_v46  ;;  %v12824_v12 = vpop.permute.xlu0 %6226 }
 0x1d5   :  { %6303 = vst.msk [vmem:[#allocation2 + $0x128] sm:$0xff] %vm3699_vm9, %v12524_v49  ;;  %v10286_v52 = vcombine.low %v7254_v13, %v7264_v43  ;;  %v4101_v14 = vsel %vm11438_vm7, %v4099_v25, %v4100_v17  ;;  %v4955_v44 = vrot.slane %v4953_v8, 4  ;;  %v4962_v29 = vshll.u32 %v4689_v22, 16  ;;  %v8429_v38 = vld [vmem:[#allocation2 + $0x3a0] sm:$0xff]  ;;  %v3808_v26 = vld [vmem:[#allocation10 + $0x148] sm:$0xf] }
 0x1d6   :  { %6244 = vrot.lane.b32.xlu1 %v10222_v55, %s10894_s28  ;;  %v10096_v59 = vcombine.low %v4098_v28, %v4101_v14  ;;  %v4958_v24 = vrot.slane %v4956_v45, 5  ;;  %v4966_v9 = vshrl.u32 %v4689_v22, 16  ;;  %v4972_v47 = vshll.u32 %v4690_v1, 16  ;;  %9016 = vmatprep.mubr.bf16.mxu1 %v8429_v38  ;;  %v3807_v3 = vld [vmem:[#allocation10 + $0x144] sm:$0xe] }
 0x1d7   :  { %7621 = vrot.lane.b32.xlu0 %v10286_v52, %s10894_s28  ;;  %v4964_v49 = vrot.slane %v4962_v29, 5  ;;  %v7266_v2 = vshrl.u32 %v6686_v32, 16  ;;  %v7269_v20 = vshll.u32 %v6686_v32, 16  ;;  %v7275_v57 = vshll.u32 %v6687_v54, 16  ;;  %9017 = vmatmul.mubr.bf16.gmra.mrb[60].mxu1 %v8428_v6  ;;  %v3809_v21 = vld [vmem:[#allocation10 + $0x14c] sm:$0x1] }
 0x1d8   :  { %4303 = vst.msk [vmem:[#allocation2 + $0x3c8] sm:$0xff] %vm2607_vm8, %v10096_v59  ;;  %v4959_v16 = vor.u32 %v4958_v24, %v4955_v44  ;;  %v4968_v58 = vrot.slane %v4966_v9, 4  ;;  %v4974_v37 = vrot.slane %v4972_v47, 5  ;;  %v7279_v4 = vshrl.u32 %v6687_v54, 16  ;;  %v12822_v60 = vld [vmem:[#allocation10 + $0x78] sm:$0xf] }
 0x1d9   :  { %4656 = vst.msk [vmem:[#allocation2 + $0x3c8] sm:$0xff] %vm3699_vm9, %v12582_v35  ;;  %v7268_v30 = vrot.slane %v7266_v2, 4  ;;  %v7271_v48 = vrot.slane %v7269_v20, 5  ;;  %v7277_v19 = vrot.slane %v7275_v57, 5  ;;  %v7285_v50 = vshll.u32 %v6688_v27, 16  ;;  %v8356_v54 = vld [vmem:[#allocation2 + $0x158] sm:$0xff] }
 0x1da   :  { %v4960_v34 = vrot.slane %v4959_v16, 4  ;;  %v4969_v61 = vor.u32 %v4968_v58, %v4964_v49  ;;  %v7281_v22 = vrot.slane %v7279_v4, 4  ;;  %v10191_v1 = vrot.slane %v5757_v41, 9  ;;  %v3662_v11 = vpop.permute.xlu1 %3661  ;;  %v10856_v35 = vld [vmem:[#allocation10 + $0x114] sm:$0xff]   ;;  %v4692_v6 = vld [vmem:[#allocation10 + $0x7c] sm:$0xf] }
 0x1db   :  { %v7272_v31 = vor.u32 %v7271_v48, %v7268_v30  ;;  %v7287_v39 = vrot.slane %v7285_v50, 5  ;;  %v6043_v17 = vrot.slane %v5758_v10, 5  ;;  %v6046_v32 = vrot.slane %v5759_v62, 5  ;;  %3729 = vst.msk [vmem:[#allocation2 + $0x488] sm:$0xff] %vm3699_vm9, %v3662_v11  ;;  %v4693_v44 = vld [vmem:[#allocation10 + $0x80] sm:$0x1] }
 0x1dc   :  { %v4965_v36 = vsel %vm11007_vm4, %v4960_v34, %v4964_v49  ;;  %v4970_v28 = vrot.slane %v4969_v61, 4  ;;  %v8350_v25 = vld [vmem:[#allocation2 + $0x128] sm:$0xff]  ;;  %v7282_v8 = vor.u32 %v7281_v22, %v7277_v19  ;;  %v10065_v13 = vrot.slane %v3807_v3, 9  ;;  %6604 = vst.msk [vmem:[#allocation2 + $0x310] sm:$0xff] %vm2607_vm8, %v10856_v35  ;;  %v6689_v9 = vld [vmem:[#allocation10 + $0x150] sm:$0xf] }
 0x1dd   :  { %9178 = vmatmul.mubr.bf16.gmra.mrb[28].mxu0 %v8350_v25  ;;  %v7273_v43 = vrot.slane %v7272_v31, 4  ;;  %v6044_v55 = vsel %vm11438_vm7, %v10191_v1, %v6043_v17  ;;  %v6045_v45 = vrot.slane %v6043_v17, 4  ;;  %v4104_v27 = vrot.slane %v3808_v26, 5  ;;  %v6690_v47 = vld [vmem:[#allocation10 + $0x154] sm:$0xf]  ;;  %v8433_v10 = vld [vmem:[#allocation2 + $0x3c0] sm:$0xff] }
 0x1de   :  { %v4975_v46 = vsel %vm11007_vm4, %v4970_v28, %v4974_v37  ;;  %v7283_v52 = vrot.slane %v7282_v8, 4  ;;  %v4107_v14 = vrot.slane %v3809_v21, 5  ;;  %v4977_v29 = vshrl.u32 %v12822_v60, 16  ;;  %9185 = vmatprep.mubr.bf16.mxu0 %v8356_v54  ;;  %v6691_v16 = vld [vmem:[#allocation10 + $0x158] sm:$0x1]  ;;  %v10857_v11 = vld [vmem:[#allocation10 + $0x120] sm:$0xff]  }
 0x1df   :  { %v10144_v38 = vcombine.low %v4965_v36, %v4975_v46  ;;  %v7278_v41 = vsel %vm11007_vm4, %v7273_v43, %v7277_v19  ;;  %v6047_v59 = vsel %vm11438_vm7, %v6045_v45, %v6046_v32  ;;  %v4105_v24 = vsel %vm11438_vm7, %v10065_v13, %v4104_v27  ;;  %v7606_v62 = vpop.permute.xlu0 %7605  ;;  %v5760_v30 = vld [vmem:[#allocation10 + $0x144] sm:$0xe]  ;;  %v5761_v48 = vld [vmem:[#allocation10 + $0x148] sm:$0xf]  ;;  %v5762_v32 = vld [vmem:[#allocation10 + $0x14c] sm:$0x1] }
 0x1e0   :  { %v7288_v49 = vsel %vm11007_vm4, %v7283_v52, %v7287_v39  ;;  %v10223_v2 = vcombine.low %v6044_v55, %v6047_v59  ;;  %v4106_v20 = vrot.slane %v4104_v27, 4  ;;  %v4979_v57 = vrot.slane %v4977_v29, 4  ;;  %v8434_v3 = vld [vmem:[#allocation2 + $0x3c8] sm:$0xff]  ;;  %7687 = vst.msk [vmem:[#allocation2 + $0x248] sm:$0xff] %vm3699_vm9, %v7606_v62  ;;  %v3810_v25 = vld [vmem:[#allocation10 + $0x150] sm:$0xe] }
 0x1e1   :  { %5664 = vst.msk [vmem:[#allocation2 + $0x150] sm:$0xff] %vm2607_vm8, %v10144_v38  ;;  %v10287_v58 = vcombine.low %v7278_v41, %v7288_v49  ;;  %v4980_v37 = vshll.u32 %v12822_v60, 16  ;;  %v4986_v4 = vshll.u32 %v4692_v6, 16  ;;  %v4990_v26 = vshrl.u32 %v4692_v6, 16  ;;  %9024 = vmatprep.mubr.bf16.mxu1 %v8434_v3  ;;  %v3811_v8 = vld [vmem:[#allocation10 + $0x154] sm:$0xf]  ;;  %v12856_v46 = vpop.permute.xlu1 %4596 }
 0x1e2   :  { %6304 = vst.msk [vmem:[#allocation2 + $0x150] sm:$0xff] %vm3699_vm9, %v12579_v7  ;;  %6246 = vrot.lane.b32.xlu1 %v10223_v2, %s10894_s28  ;;  %v4108_v19 = vsel %vm11438_vm7, %v4106_v20, %v4107_v14  ;;  %v4996_v50 = vshll.u32 %v4693_v44, 16  ;;  %v7290_v21 = vshrl.u32 %v6689_v9, 16  ;;  %v7293_v34 = vshll.u32 %v6689_v9, 16  ;;  %9025 = vmatmul.mubr.bf16.gmra.mrb[64].mxu1 %v8433_v10  ;;  %v3812_v27 = vld [vmem:[#allocation10 + $0x158] sm:$0x1] }
 0x1e3   :  { %7623 = vrot.lane.b32.xlu0 %v10287_v58, %s10894_s28  ;;  %v10097_v60 = vcombine.low %v4105_v24, %v4108_v19  ;;  %v4982_v61 = vrot.slane %v4980_v37, 5  ;;  %v4988_v22 = vrot.slane %v4986_v4, 5  ;;  %v4992_v1 = vrot.slane %v4990_v26, 4  ;;  %6605 = vst.msk [vmem:[#allocation2 + $0x338] sm:$0xff] %vm2607_vm8, %v10857_v11  ;;  %v4694_v6 = vld [vmem:[#allocation10 + $0x84] sm:$0xf]  ;;  %v12860_v41 = vpop.permute.xlu0 %6228 }
 0x1e4   :  { %v4998_v31 = vrot.slane %v4996_v50, 5  ;;  %v7292_v39 = vrot.slane %v7290_v21, 4  ;;  %v7295_v17 = vrot.slane %v7293_v34, 5  ;;  %v7299_v7 = vshll.u32 %v6690_v47, 16  ;;  %v12858_v52 = vpop.f32.mrb[0].mxu1  ;;  %v8361_v10 = vld [vmem:[#allocation2 + $0x180] sm:$0xff] }
 0x1e5   :  { %4304 = vst.msk [vmem:[#allocation2 + $0x3f0] sm:$0xff] %vm2607_vm8, %v10097_v60  ;;  %v4983_v54 = vor.u32 %v4982_v61, %v4979_v57  ;;  %v4993_v35 = vor.u32 %v4992_v1, %v4988_v22  ;;  %v7303_v36 = vshrl.u32 %v6690_v47, 16  ;;  %v7309_v28 = vshll.u32 %v6691_v16, 16  ;;  %v8900_v59 = vpop.f32.mrb[1].mxu1  ;;  %v4695_v16 = vld [vmem:[#allocation10 + $0x88] sm:$0xf] }
 0x1e6   :  { %4657 = vst.msk [vmem:[#allocation2 + $0x3f0] sm:$0xff] %vm3699_vm9, %v12632_v15  ;;  %v7296_v13 = vor.u32 %v7295_v17, %v7292_v39  ;;  %v7301_v43 = vrot.slane %v7299_v7, 5  ;;  %v10192_v55 = vrot.slane %v5760_v30, 9  ;;  %v6050_v45 = vrot.slane %v5761_v48, 5  ;;  %v12864_v62 = vpop.f32.mrb[2].mxu1  ;;  %v8438_v19 = vld [vmem:[#allocation2 + $0x3e8] sm:$0xff] }
 0x1e7   :  { %v4984_v14 = vrot.slane %v4983_v54, 4  ;;  %v4994_v44 = vrot.slane %v4993_v35, 4  ;;  %v7305_v29 = vrot.slane %v7303_v36, 4  ;;  %v7311_v38 = vrot.slane %v7309_v28, 5  ;;  %v4696_v58 = vld [vmem:[#allocation10 + $0x8c] sm:$0x1] }
 0x1e8   :  { %v7297_v24 = vrot.slane %v7296_v13, 4  ;;  %v6051_v15 = vsel %vm11438_vm7, %v10192_v55, %v6050_v45  ;;  %v6052_v9 = vrot.slane %v6050_v45, 4  ;;  %v6053_v47 = vrot.slane %v5762_v32, 5  ;;  %v6692_v48 = vld [vmem:[#allocation10 + $0x15c] sm:$0xf]  ;;  %v8903_v50 = vpop.f32.mrb[3].mxu1 }
 0x1e9   :  { %v4989_v49 = vsel %vm11007_vm4, %v4984_v14, %v4988_v22  ;;  %v4999_v2 = vsel %vm11007_vm4, %v4994_v44, %v4998_v31  ;;  %v8355_v20 = vld [vmem:[#allocation2 + $0x150] sm:$0xff]  ;;  %v7306_v57 = vor.u32 %v7305_v29, %v7301_v43  ;;  %v10066_v3 = vrot.slane %v3810_v25, 9  ;;  %v6693_v22 = vld [vmem:[#allocation10 + $0x160] sm:$0xf]  ;;  %v6694_v7 = vld [vmem:[#allocation10 + $0x164] sm:$0x1] }
 0x1ea   :  { %v10145_v37 = vcombine.low %v4989_v49, %v4999_v2  ;;  %9186 = vmatmul.mubr.bf16.gmra.mrb[32].mxu0 %v8355_v20  ;;  %v7302_v4 = vsel %vm11007_vm4, %v7297_v24, %v7301_v43  ;;  %v6054_v26 = vsel %vm11438_vm7, %v6052_v9, %v6053_v47  ;;  %v4111_v30 = vrot.slane %v3811_v8, 5  ;;  %v10858_v1 = vld [vmem:[#allocation10 + $0x12c] sm:$0xff]   ;;  %v12877_v54 = vpop.f32.mrb[4].mxu1  ;;  %v5765_v14 = vld [vmem:[#allocation10 + $0x158] sm:$0x1] }
 0x1eb   :  { %v7307_v21 = vrot.slane %v7306_v57, 4  ;;  %v10224_v34 = vcombine.low %v6051_v15, %v6054_v26  ;;  %v4114_v60 = vrot.slane %v3812_v27, 5  ;;  %v5001_v61 = vshrl.u32 %v4694_v6, 16  ;;  %9193 = vmatprep.mubr.bf16.mxu0 %v8361_v10  ;;  %v5763_v13 = vld [vmem:[#allocation10 + $0x150] sm:$0xe]  ;;  %6606 = vst.msk [vmem:[#allocation2 + $0x360] sm:$0xff] %vm2607_vm8, %v10858_v1 }
 0x1ec   :  { %5665 = vst.msk [vmem:[#allocation2 + $0x178] sm:$0xff] %vm2607_vm8, %v10145_v37  ;;  %v4112_v11 = vsel %vm11438_vm7, %v10066_v3, %v4111_v30  ;;  %v4113_v31 = vrot.slane %v4111_v30, 4  ;;  %v5004_v39 = vshll.u32 %v4694_v6, 16  ;;  %v5010_v17 = vshll.u32 %v4695_v16, 16  ;;  %v3664_v32 = vpop.permute.xlu1 %3663  ;;  %v5764_v6 = vld [vmem:[#allocation10 + $0x154] sm:$0xf] }
 0x1ed   :  { %6305 = vst.msk [vmem:[#allocation2 + $0x178] sm:$0xff] %vm3699_vm9, %v12629_v40  ;;  %v7312_v35 = vsel %vm11007_vm4, %v7307_v21, %v7311_v38  ;;  %6248 = vrot.lane.b32.xlu1 %v10224_v34, %s10894_s28  ;;  %v5003_v36 = vrot.slane %v5001_v61, 4  ;;  %v5014_v28 = vshrl.u32 %v4695_v16, 16  ;;  %v5020_v25 = vshll.u32 %v4696_v58, 16  ;;  %v8439_v8 = vld [vmem:[#allocation2 + $0x3f0] sm:$0xff]  ;;  %3730 = vst.msk [vmem:[#allocation2 + $0x4b0] sm:$0xff] %vm3699_vm9, %v3664_v32  ;;  %v7608_v43 = vpop.permute.xlu0 %7607 }
 0x1ee   :  { %v10288_v55 = vcombine.low %v7302_v4, %v7312_v35  ;;  %v4115_v45 = vsel %vm11438_vm7, %v4113_v31, %v4114_v60  ;;  %v5006_v40 = vrot.slane %v5004_v39, 5  ;;  %v5012_v27 = vrot.slane %v5010_v17, 5  ;;  %9032 = vmatprep.mubr.bf16.mxu1 %v8439_v8  ;;  %7688 = vst.msk [vmem:[#allocation2 + $0x270] sm:$0xff] %vm3699_vm9, %v7608_v43  ;;  %v3813_v24 = vld [vmem:[#allocation10 + $0x15c] sm:$0xe]  ;;  %v8908_v15 = vpop.f32.mrb[5].mxu1 }
 0x1ef   :  { %v10098_v44 = vcombine.low %v4112_v11, %v4115_v45  ;;  %v5016_v29 = vrot.slane %v5014_v28, 4  ;;  %v5022_v38 = vrot.slane %v5020_v25, 5  ;;  %v7314_v59 = vshrl.u32 %v6692_v48, 16  ;;  %9033 = vmatmul.mubr.bf16.gmra.mrb[68].mxu1 %v8438_v19  ;;  %v3814_v2 = vld [vmem:[#allocation10 + $0x160] sm:$0xf]  ;;  %v12890_v20 = vpop.f32.mrb[6].mxu1 }
 0x1f0   :  { %7625 = vrot.lane.b32.xlu0 %v10288_v55, %s10894_s28  ;;  %v5007_v9 = vor.u32 %v5006_v40, %v5003_v36  ;;  %v7317_v47 = vshll.u32 %v6692_v48, 16  ;;  %v7323_v10 = vshll.u32 %v6693_v22, 16  ;;  %v7327_v49 = vshrl.u32 %v6693_v22, 16  ;;  %v3815_v37 = vld [vmem:[#allocation10 + $0x164] sm:$0x1]  ;;  %v8911_v4 = vpop.f32.mrb[7].mxu1 }
 0x1f1   :  { %4305 = vst.msk [vmem:[#allocation2 + $0x418] sm:$0xff] %vm2607_vm8, %v10098_v44  ;;  %v5017_v57 = vor.u32 %v5016_v29, %v5012_v27  ;;  %v7316_v3 = vrot.slane %v7314_v59, 4  ;;  %v7333_v16 = vshll.u32 %v6694_v7, 16  ;;  %v10193_v58 = vrot.slane %v5763_v13, 9  ;;  %v4697_v50 = vld [vmem:[#allocation10 + $0x90] sm:$0xf] }
 0x1f2   :  { %4658 = vst.msk [vmem:[#allocation2 + $0x418] sm:$0xff] %vm3699_vm9, %v12676_v33  ;;  %v5008_v26 = vrot.slane %v5007_v9, 4  ;;  %v7319_v30 = vrot.slane %v7317_v47, 5  ;;  %v7325_v19 = vrot.slane %v7323_v10, 5  ;;  %v7329_v48 = vrot.slane %v7327_v49, 4  ;;  %v8366_v22 = vld [vmem:[#allocation2 + $0x1a8] sm:$0xff] }
 0x1f3   :  { %v5018_v21 = vrot.slane %v5017_v57, 4  ;;  %v7335_v34 = vrot.slane %v7333_v16, 5  ;;  %v6057_v60 = vrot.slane %v5764_v6, 5  ;;  %v6060_v61 = vrot.slane %v5765_v14, 5  ;;  %v4698_v7 = vld [vmem:[#allocation10 + $0x94] sm:$0xf] }
 0x1f4   :  { %v5013_v1 = vsel %vm11007_vm4, %v5008_v26, %v5012_v27  ;;  %v8360_v11 = vld [vmem:[#allocation2 + $0x178] sm:$0xff]  ;;  %v7320_v31 = vor.u32 %v7319_v30, %v7316_v3  ;;  %v7330_v39 = vor.u32 %v7329_v48, %v7325_v19  ;;  %v10067_v17 = vrot.slane %v3813_v24, 9  ;;  %v12897_v32 = vpop.f32.mrb[8].mxu1  ;;  %v6695_v29 = vld [vmem:[#allocation10 + $0x168] sm:$0xf]  ;;  %v8443_v10 = vld [vmem:[#allocation2 + $0x410] sm:$0xff] }
 0x1f5   :  { %v5023_v33 = vsel %vm11007_vm4, %v5018_v21, %v5022_v38  ;;  %9194 = vmatmul.mubr.bf16.gmra.mrb[36].mxu0 %v8360_v11  ;;  %v6058_v35 = vsel %vm11438_vm7, %v10193_v58, %v6057_v60  ;;  %v6059_v36 = vrot.slane %v6057_v60, 4  ;;  %v4118_v28 = vrot.slane %v3814_v2, 5  ;;  %v4699_v25 = vld [vmem:[#allocation10 + $0x98] sm:$0x1]  ;;  %v8916_v40 = vpop.f32.mrb[9].mxu1 }
 0x1f6   :  { %v10859_v8 = vld [vmem:[#allocation10 + $0x138] sm:$0xff]   ;;  %v10146_v13 = vcombine.low %v5013_v1, %v5023_v33  ;;  %v7321_v43 = vrot.slane %v7320_v31, 4  ;;  %v7331_v55 = vrot.slane %v7330_v39, 4  ;;  %v4121_v45 = vrot.slane %v3815_v37, 5  ;;  %9201 = vmatprep.mubr.bf16.mxu0 %v8366_v22  ;;  %v6696_v38 = vld [vmem:[#allocation10 + $0x16c] sm:$0xf]  ;;  %v12923_v1 = vpop.permute.xlu1 %4598 }
 0x1f7   :  { %v6061_v27 = vsel %vm11438_vm7, %v6059_v36, %v6060_v61  ;;  %v4119_v6 = vsel %vm11438_vm7, %v10067_v17, %v4118_v28  ;;  %v4120_v14 = vrot.slane %v4118_v28, 4  ;;  %v5025_v44 = vshrl.u32 %v4697_v50, 16  ;;  %6607 = vst.msk [vmem:[#allocation2 + $0x388] sm:$0xff] %vm2607_vm8, %v10859_v8  ;;  %v6697_v47 = vld [vmem:[#allocation10 + $0x170] sm:$0x1]  ;;  %v12913_v49 = vpop.f32.mrb[10].mxu1 }
 0x1f8   :  { %5666 = vst.msk [vmem:[#allocation2 + $0x1a0] sm:$0xff] %vm2607_vm8, %v10146_v13  ;;  %v7326_v59 = vsel %vm11007_vm4, %v7321_v43, %v7325_v19  ;;  %v7336_v24 = vsel %vm11007_vm4, %v7331_v55, %v7335_v34  ;;  %v10225_v15 = vcombine.low %v6058_v35, %v6061_v27  ;;  %v5028_v9 = vshll.u32 %v4697_v50, 16  ;;  %v5766_v37 = vld [vmem:[#allocation10 + $0x15c] sm:$0xe]  ;;  %v8919_v4 = vpop.f32.mrb[11].mxu1  ;;  %v10860_v33 = vld [vmem:[#allocation10 + $0x144] sm:$0xff]   ;;  %v12932_v55 = vpop.permute.xlu0 %6230 }
 0x1f9   :  { %6306 = vst.msk [vmem:[#allocation2 + $0x1a0] sm:$0xff] %vm3699_vm9, %v12670_v23  ;;  %v10289_v2 = vcombine.low %v7326_v59, %v7336_v24  ;;  %v4122_v57 = vsel %vm11438_vm7, %v4120_v14, %v4121_v45  ;;  %v5027_v3 = vrot.slane %v5025_v44, 4  ;;  %v5034_v16 = vshll.u32 %v4698_v7, 16  ;;  %v8444_v58 = vld [vmem:[#allocation2 + $0x418] sm:$0xff]  ;;  %v5767_v50 = vld [vmem:[#allocation10 + $0x160] sm:$0xf] }
 0x1fa   :  { %6250 = vrot.lane.b32.xlu1 %v10225_v15, %s10894_s28  ;;  %v10099_v26 = vcombine.low %v4119_v6, %v4122_v57  ;;  %v5030_v30 = vrot.slane %v5028_v9, 5  ;;  %v5038_v19 = vshrl.u32 %v4698_v7, 16  ;;  %v5044_v48 = vshll.u32 %v4699_v25, 16  ;;  %9040 = vmatprep.mubr.bf16.mxu1 %v8444_v58  ;;  %v12920_v21 = vld [vmem:[#allocation10 + $0x164] sm:$0x1]  ;;  %v8371_v43 = vld [vmem:[#allocation2 + $0x1d0] sm:$0xff] }
 0x1fb   :  { %7627 = vrot.lane.b32.xlu0 %v10289_v2, %s10894_s28  ;;  %v5036_v23 = vrot.slane %v5034_v16, 5  ;;  %v7338_v34 = vshrl.u32 %v6695_v29, 16  ;;  %v7341_v60 = vshll.u32 %v6695_v29, 16  ;;  %v7347_v61 = vshll.u32 %v6696_v38, 16  ;;  %9041 = vmatmul.mubr.bf16.gmra.mrb[72].mxu1 %v8443_v10  ;;  %v3816_v22 = vld [vmem:[#allocation10 + $0x168] sm:$0xe] }
 0x1fc   :  { %4306 = vst.msk [vmem:[#allocation2 + $0x440] sm:$0xff] %vm2607_vm8, %v10099_v26  ;;  %v5031_v11 = vor.u32 %v5030_v30, %v5027_v3  ;;  %v5040_v31 = vrot.slane %v5038_v19, 4  ;;  %v5046_v39 = vrot.slane %v5044_v48, 5  ;;  %v7351_v17 = vshrl.u32 %v6696_v38, 16  ;;  %v3817_v7 = vld [vmem:[#allocation10 + $0x16c] sm:$0xf] }
 0x1fd   :  { %4659 = vst.msk [vmem:[#allocation2 + $0x440] sm:$0xff] %vm3699_vm9, %v12724_v56  ;;  %v7340_v35 = vrot.slane %v7338_v34, 4  ;;  %v7343_v36 = vrot.slane %v7341_v60, 5  ;;  %v7349_v28 = vrot.slane %v7347_v61, 5  ;;  %v7357_v25 = vshll.u32 %v6697_v47, 16  ;;  %v12935_v14 = vpop.f32.mrb[12].mxu1 }
 0x1fe   :  { %v12928_v8 = vld [vmem:[#allocation10 + $0x170] sm:$0x1]  ;;  %v12930_v13 = vld [vmem:[#allocation10 + $0x9c] sm:$0xf]  ;;  %v5032_v45 = vrot.slane %v5031_v11, 4  ;;  %v5041_v40 = vor.u32 %v5040_v31, %v5036_v23  ;;  %v7353_v27 = vrot.slane %v7351_v17, 4 }
 0x1ff   :  { %v10194_v6 = vrot.slane %v5766_v37, 9  ;;  %6608 = vst.msk [vmem:[#allocation2 + $0x3b0] sm:$0xff] %vm2607_vm8, %v10860_v33  ;;  %v7344_v56 = vor.u32 %v7343_v36, %v7340_v35  ;;  %v7359_v44 = vrot.slane %v7357_v25, 5  ;;  %v6064_v29 = vrot.slane %v5767_v50, 5  ;;  %v8924_v59 = vpop.f32.mrb[13].mxu1 }
 0x200   :  { %v6067_v38 = vrot.slane %v12920_v21, 5  ;;  %v5037_v24 = vsel %vm11007_vm4, %v5032_v45, %v5036_v23  ;;  %v5042_v15 = vrot.slane %v5041_v40, 4  ;;  %v8365_v9 = vld [vmem:[#allocation2 + $0x1a0] sm:$0xff]  ;;  %v7354_v47 = vor.u32 %v7353_v27, %v7349_v28  ;;  %v12940_v2 = vpop.f32.mrb[14].mxu1  ;;  %v6698_v11 = vld [vmem:[#allocation10 + $0x174] sm:$0xf] }
 0x201   :  { %v10068_v10 = vrot.slane %v3816_v22, 9  ;;  %9202 = vmatmul.mubr.bf16.gmra.mrb[40].mxu0 %v8365_v9  ;;  %v7345_v57 = vrot.slane %v7344_v56, 4  ;;  %v6065_v3 = vsel %vm11438_vm7, %v10194_v6, %v6064_v29  ;;  %v6066_v16 = vrot.slane %v6064_v29, 4  ;;  %v4701_v37 = vld [vmem:[#allocation10 + $0xa0] sm:$0xf]  ;;  %v3666_v4 = vpop.permute.xlu1 %3665  ;;  %v7610_v26 = vpop.permute.xlu0 %7609 }
 0x202   :  { %v4125_v58 = vrot.slane %v3817_v7, 5  ;;  %v5047_v30 = vsel %vm11007_vm4, %v5042_v15, %v5046_v39  ;;  %v7355_v19 = vrot.slane %v7354_v47, 4  ;;  %v4128_v48 = vrot.slane %v12928_v8, 5  ;;  %v4702_v50 = vld [vmem:[#allocation10 + $0xa4] sm:$0x1]  ;;  %9209 = vmatprep.mubr.bf16.mxu0 %v8371_v43  ;;  %3731 = vst.msk [vmem:[#allocation2 + $0x4d8] sm:$0xff] %vm3699_vm9, %v3666_v4 }
 0x203   :  { %v5049_v21 = vshrl.u32 %v12930_v13, 16  ;;  %7689 = vst.msk [vmem:[#allocation2 + $0x298] sm:$0xff] %vm3699_vm9, %v7610_v26  ;;  %v8927_v23 = vpop.f32.mrb[15].mxu1  ;;  %v10147_v34 = vcombine.low %v5037_v24, %v5047_v30  ;;  %v7350_v60 = vsel %vm11007_vm4, %v7345_v57, %v7349_v28  ;;  %v6068_v61 = vsel %vm11438_vm7, %v6066_v16, %v6067_v38  ;;  %v6699_v31 = vld [vmem:[#allocation10 + $0x178] sm:$0xf]  ;;  %v10861_v8 = vld [vmem:[#allocation10 + $0x150] sm:$0xff]  }
 0x204   :  { %v4126_v22 = vsel %vm11438_vm7, %v10068_v10, %v4125_v58  ;;  %v8448_v39 = vld [vmem:[#allocation2 + $0x438] sm:$0xff]  ;;  %v7360_v17 = vsel %vm11007_vm4, %v7355_v19, %v7359_v44  ;;  %v10226_v7 = vcombine.low %v6065_v3, %v6068_v61  ;;  %v4127_v33 = vrot.slane %v4125_v58, 4  ;;  %v8449_v36 = vld [vmem:[#allocation2 + $0x440] sm:$0xff]  ;;  %v5769_v27 = vld [vmem:[#allocation10 + $0x168] sm:$0xe]  ;;  %6609 = vst.msk [vmem:[#allocation2 + $0x3d8] sm:$0xff] %vm2607_vm8, %v10861_v8 }
 0x205   :  { %v5051_v35 = vrot.slane %v5049_v21, 4  ;;  %v6700_v25 = vld [vmem:[#allocation10 + $0x17c] sm:$0x1]  ;;  %5667 = vst.msk [vmem:[#allocation2 + $0x1c8] sm:$0xff] %vm2607_vm8, %v10147_v34  ;;  %v10290_v28 = vcombine.low %v7350_v60, %v7360_v17  ;;  %v5052_v43 = vshll.u32 %v12930_v13, 16  ;;  %v5058_v45 = vshll.u32 %v4701_v37, 16  ;;  %9048 = vmatprep.mubr.bf16.mxu1 %v8449_v36 }
 0x206   :  { %v5062_v40 = vshrl.u32 %v4701_v37, 16  ;;  %6307 = vst.msk [vmem:[#allocation2 + $0x1c8] sm:$0xff] %vm3699_vm9, %v12721_v42  ;;  %6252 = vrot.lane.b32.xlu1 %v10226_v7, %s10894_s28  ;;  %v4129_v6 = vsel %vm11438_vm7, %v4127_v33, %v4128_v48  ;;  %v5068_v56 = vshll.u32 %v4702_v50, 16  ;;  %v7362_v44 = vshrl.u32 %v6698_v11, 16  ;;  %9049 = vmatmul.mubr.bf16.gmra.mrb[76].mxu1 %v8448_v39  ;;  %v5770_v38 = vld [vmem:[#allocation10 + $0x16c] sm:$0xf] }
 0x207   :  { %v7365_v29 = vshll.u32 %v6698_v11, 16  ;;  %7629 = vrot.lane.b32.xlu0 %v10290_v28, %s10894_s28  ;;  %v10100_v13 = vcombine.low %v4126_v22, %v4129_v6  ;;  %v5054_v59 = vrot.slane %v5052_v43, 5  ;;  %v5060_v24 = vrot.slane %v5058_v45, 5  ;;  %v5771_v9 = vld [vmem:[#allocation10 + $0x170] sm:$0x1]  ;;  %v8376_v33 = vld [vmem:[#allocation2 + $0x1f8] sm:$0xff] }
 0x208   :  { %v5064_v15 = vrot.slane %v5062_v40, 4  ;;  %v5070_v42 = vrot.slane %v5068_v56, 5  ;;  %v7364_v47 = vrot.slane %v7362_v44, 4  ;;  %v7371_v57 = vshll.u32 %v6699_v31, 16  ;;  %v3819_v3 = vld [vmem:[#allocation10 + $0x174] sm:$0xe] }
 0x209   :  { %v7367_v10 = vrot.slane %v7365_v29, 5  ;;  %4307 = vst.msk [vmem:[#allocation2 + $0x468] sm:$0xff] %vm2607_vm8, %v10100_v13  ;;  %v5055_v16 = vor.u32 %v5054_v59, %v5051_v35  ;;  %v7375_v37 = vshrl.u32 %v6699_v31, 16  ;;  %v7381_v4 = vshll.u32 %v6700_v25, 16  ;;  %v3820_v26 = vld [vmem:[#allocation10 + $0x178] sm:$0xf] }
 0x20a   :  { %v5065_v58 = vor.u32 %v5064_v15, %v5060_v24  ;;  %4660 = vst.msk [vmem:[#allocation2 + $0x468] sm:$0xff] %vm3699_vm9, %v12766_v51  ;;  %v7373_v19 = vrot.slane %v7371_v57, 5  ;;  %v10195_v48 = vrot.slane %v5769_v27, 9  ;;  %v6071_v50 = vrot.slane %v5770_v38, 5  ;;  %v3821_v21 = vld [vmem:[#allocation10 + $0x17c] sm:$0x1] }
 0x20b   :  { %v7368_v30 = vor.u32 %v7367_v10, %v7364_v47  ;;  %v12970_v23 = vpop.f32.mrb[16].mxu1  ;;  %v5056_v34 = vrot.slane %v5055_v16, 4  ;;  %v7377_v61 = vrot.slane %v7375_v37, 4  ;;  %v7383_v22 = vrot.slane %v7381_v4, 5  ;;  %v4703_v11 = vld [vmem:[#allocation10 + $0xa8] sm:$0xf] }
 0x20c   :  { %v5066_v60 = vrot.slane %v5065_v58, 4  ;;  %v6072_v31 = vsel %vm11438_vm7, %v10195_v48, %v6071_v50  ;;  %v6073_v17 = vrot.slane %v6071_v50, 4  ;;  %v6074_v7 = vrot.slane %v5771_v9, 5  ;;  %v8932_v51 = vpop.f32.mrb[17].mxu1  ;;  %v4704_v43 = vld [vmem:[#allocation10 + $0xac] sm:$0xf] }
 0x20d   :  { %v7369_v39 = vrot.slane %v7368_v30, 4  ;;  %v5061_v35 = vsel %vm11007_vm4, %v5056_v34, %v5060_v24  ;;  %v8370_v25 = vld [vmem:[#allocation2 + $0x1c8] sm:$0xff]  ;;  %v7378_v8 = vor.u32 %v7377_v61, %v7373_v19  ;;  %v10069_v28 = vrot.slane %v3819_v3, 9  ;;  %v7612_v45 = vpop.permute.xlu0 %7611  ;;  %v4705_v44 = vld [vmem:[#allocation10 + $0xb0] sm:$0x1]  ;;  %v12983_v38 = vpop.f32.mrb[18].mxu1 }
 0x20e   :  { %v5071_v36 = vsel %vm11007_vm4, %v5066_v60, %v5070_v42  ;;  %9210 = vmatmul.mubr.bf16.gmra.mrb[44].mxu0 %v8370_v25  ;;  %v6075_v6 = vsel %vm11438_vm7, %v6073_v17, %v6074_v7  ;;  %v4132_v56 = vrot.slane %v3820_v26, 5  ;;  %v6701_v29 = vld [vmem:[#allocation10 + $0x180] sm:$0xf]  ;;  %7690 = vst.msk [vmem:[#allocation2 + $0x2c0] sm:$0xff] %vm3699_vm9, %v7612_v45  ;;  %v4135_v24 = vrot.slane %v3821_v21, 5  ;;  %v8935_v42 = vpop.f32.mrb[19].mxu1 }
 0x20f   :  { %v10148_v40 = vcombine.low %v5061_v35, %v5071_v36  ;;  %v7374_v27 = vsel %vm11007_vm4, %v7369_v39, %v7373_v19  ;;  %v7379_v13 = vrot.slane %v7378_v8, 4  ;;  %v10227_v59 = vcombine.low %v6072_v31, %v6075_v6  ;;  %9217 = vmatprep.mubr.bf16.mxu0 %v8376_v33  ;;  %v6702_v9 = vld [vmem:[#allocation10 + $0x184] sm:$0xf]  ;;  %v6703_v16 = vld [vmem:[#allocation10 + $0x188] sm:$0x1]  ;;  %v10862_v4 = vld [vmem:[#allocation10 + $0x15c] sm:$0xff]  }
 0x210   :  { %v5073_v15 = vshrl.u32 %v4703_v11, 16  ;;  %v4133_v47 = vsel %vm11438_vm7, %v10069_v28, %v4132_v56  ;;  %v4134_v10 = vrot.slane %v4132_v56, 4  ;;  %v5076_v57 = vshll.u32 %v4703_v11, 16  ;;  %v8453_v58 = vld [vmem:[#allocation2 + $0x460] sm:$0xff]  ;;  %v5772_v37 = vld [vmem:[#allocation10 + $0x174] sm:$0xe] }
 0x211   :  { %5668 = vst.msk [vmem:[#allocation2 + $0x1f0] sm:$0xff] %vm2607_vm8, %v10148_v40  ;;  %v5082_v3 = vshll.u32 %v4704_v43, 16  ;;  %v7384_v26 = vsel %vm11007_vm4, %v7379_v13, %v7383_v22  ;;  %6254 = vrot.lane.b32.xlu1 %v10227_v59, %s10894_s28  ;;  %v5086_v19 = vshrl.u32 %v4704_v43, 16  ;;  %v5092_v48 = vshll.u32 %v4705_v44, 16  ;;  %v8454_v50 = vld [vmem:[#allocation2 + $0x468] sm:$0xff]  ;;  %6610 = vst.msk [vmem:[#allocation2 + $0x400] sm:$0xff] %vm2607_vm8, %v10862_v4 }
 0x212   :  { %6308 = vst.msk [vmem:[#allocation2 + $0x1f0] sm:$0xff] %vm3699_vm9, %v12764_v0  ;;  %v5075_v30 = vrot.slane %v5073_v15, 4  ;;  %v10291_v21 = vcombine.low %v7374_v27, %v7384_v26  ;;  %v4136_v34 = vsel %vm11438_vm7, %v4134_v10, %v4135_v24  ;;  %v5078_v60 = vrot.slane %v5076_v57, 5  ;;  %9056 = vmatprep.mubr.bf16.mxu1 %v8454_v50  ;;  %v5773_v11 = vld [vmem:[#allocation10 + $0x178] sm:$0xf]  ;;  %v10863_v7 = vld [vmem:[#allocation10 + $0x168] sm:$0xff]  }
 0x213   :  { %v5084_v61 = vrot.slane %v5082_v3, 5  ;;  %v10101_v0 = vcombine.low %v4133_v47, %v4136_v34  ;;  %v5088_v39 = vrot.slane %v5086_v19, 4  ;;  %v5094_v31 = vrot.slane %v5092_v48, 5  ;;  %9057 = vmatmul.mubr.bf16.gmra.mrb[80].mxu1 %v8453_v58  ;;  %v5774_v17 = vld [vmem:[#allocation10 + $0x17c] sm:$0x1]  ;;  %6611 = vst.msk [vmem:[#allocation2 + $0x428] sm:$0xff] %vm2607_vm8, %v10863_v7 }
 0x214   :  { %v7386_v22 = vshrl.u32 %v6701_v29, 16  ;;  %7631 = vrot.lane.b32.xlu0 %v10291_v21, %s10894_s28  ;;  %v5079_v33 = vor.u32 %v5078_v60, %v5075_v30  ;;  %v7389_v51 = vshll.u32 %v6701_v29, 16  ;;  %v7395_v35 = vshll.u32 %v6702_v9, 16  ;;  %v3822_v25 = vld [vmem:[#allocation10 + $0x180] sm:$0xe] }
 0x215   :  { %v7399_v36 = vshrl.u32 %v6702_v9, 16  ;;  %4308 = vst.msk [vmem:[#allocation2 + $0x490] sm:$0xff] %vm2607_vm8, %v10101_v0  ;;  %v5089_v8 = vor.u32 %v5088_v39, %v5084_v61  ;;  %v7405_v43 = vshll.u32 %v6703_v16, 16  ;;  %v10196_v45 = vrot.slane %v5772_v37, 9  ;;  %v3823_v40 = vld [vmem:[#allocation10 + $0x184] sm:$0xf] }
 0x216   :  { %v7388_v28 = vrot.slane %v7386_v22, 4  ;;  %4661 = vst.msk [vmem:[#allocation2 + $0x490] sm:$0xff] %vm3699_vm9, %v12810_v53  ;;  %v5080_v27 = vrot.slane %v5079_v33, 4  ;;  %v7391_v6 = vrot.slane %v7389_v51, 5  ;;  %v7397_v56 = vrot.slane %v7395_v35, 5  ;;  %v8381_v9 = vld [vmem:[#allocation2 + $0x220] sm:$0xff] }
 0x217   :  { %v7401_v44 = vrot.slane %v7399_v36, 4  ;;  %v3824_v29 = vld [vmem:[#allocation10 + $0x188] sm:$0x1]  ;;  %v5090_v13 = vrot.slane %v5089_v8, 4  ;;  %v7407_v59 = vrot.slane %v7405_v43, 5  ;;  %v6078_v24 = vrot.slane %v5773_v11, 5 }
 0x218   :  { %v6081_v15 = vrot.slane %v5774_v17, 5  ;;  %v5085_v42 = vsel %vm11007_vm4, %v5080_v27, %v5084_v61  ;;  %v7392_v10 = vor.u32 %v7391_v6, %v7388_v28  ;;  %v10070_v3 = vrot.slane %v3822_v25, 9  ;;  %v4706_v16 = vld [vmem:[#allocation10 + $0xb4] sm:$0xf]  ;;  %v4707_v58 = vld [vmem:[#allocation10 + $0xb8] sm:$0xf] }
 0x219   :  { %v8375_v47 = vld [vmem:[#allocation2 + $0x1f0] sm:$0xff]  ;;  %v7402_v57 = vor.u32 %v7401_v44, %v7397_v56  ;;  %v5095_v53 = vsel %vm11007_vm4, %v5090_v13, %v5094_v31  ;;  %v6079_v37 = vsel %vm11438_vm7, %v10196_v45, %v6078_v24  ;;  %v6080_v4 = vrot.slane %v6078_v24, 4  ;;  %v4708_v30 = vld [vmem:[#allocation10 + $0xbc] sm:$0x1]  ;;  %v13007_v60 = vpop.f32.mrb[20].mxu1  ;;  %v8458_v36 = vld [vmem:[#allocation2 + $0x488] sm:$0xff] }
 0x21a   :  { %9218 = vmatmul.mubr.bf16.gmra.mrb[48].mxu0 %v8375_v47  ;;  %v4139_v26 = vrot.slane %v3823_v40, 5  ;;  %v10149_v19 = vcombine.low %v5085_v42, %v5095_v53  ;;  %v7393_v48 = vrot.slane %v7392_v10, 4  ;;  %v4142_v21 = vrot.slane %v3824_v29, 5  ;;  %v7614_v34 = vpop.permute.xlu0 %7613  ;;  %v6704_v31 = vld [vmem:[#allocation10 + $0x18c] sm:$0xf]  ;;  %v8940_v25 = vpop.f32.mrb[21].mxu1 }
 0x21b   :  { %v7403_v50 = vrot.slane %v7402_v57, 4  ;;  %9225 = vmatprep.mubr.bf16.mxu0 %v8381_v9  ;;  %v6082_v61 = vsel %vm11438_vm7, %v6080_v4, %v6081_v15  ;;  %v5097_v39 = vshrl.u32 %v4706_v16, 16  ;;  %v6705_v22 = vld [vmem:[#allocation10 + $0x190] sm:$0xf]  ;;  %7691 = vst.msk [vmem:[#allocation2 + $0x2e8] sm:$0xff] %vm3699_vm9, %v7614_v34  ;;  %v5100_v51 = vshll.u32 %v4706_v16, 16 }
 0x21c   :  { %v4140_v11 = vsel %vm11438_vm7, %v10070_v3, %v4139_v26  ;;  %v4141_v0 = vrot.slane %v4139_v26, 4  ;;  %5669 = vst.msk [vmem:[#allocation2 + $0x218] sm:$0xff] %vm2607_vm8, %v10149_v19  ;;  %v7398_v17 = vsel %vm11007_vm4, %v7393_v48, %v7397_v56  ;;  %v10228_v33 = vcombine.low %v6079_v37, %v6082_v61  ;;  %v6706_v35 = vld [vmem:[#allocation10 + $0x194] sm:$0x1]  ;;  %v5775_v27 = vld [vmem:[#allocation10 + $0x180] sm:$0xe] }
 0x21d   :  { %v7408_v7 = vsel %vm11007_vm4, %v7403_v50, %v7407_v59  ;;  %6309 = vst.msk [vmem:[#allocation2 + $0x218] sm:$0xff] %vm3699_vm9, %v12824_v12  ;;  %v5099_v43 = vrot.slane %v5097_v39, 4  ;;  %v5106_v45 = vshll.u32 %v4707_v58, 16  ;;  %v8459_v40 = vld [vmem:[#allocation2 + $0x490] sm:$0xff]  ;;  %v13023_v6 = vpop.f32.mrb[22].mxu1  ;;  %v5102_v44 = vrot.slane %v5100_v51, 5 }
 0x21e   :  { %v10292_v8 = vcombine.low %v7398_v17, %v7408_v7  ;;  %v4143_v28 = vsel %vm11438_vm7, %v4141_v0, %v4142_v21  ;;  %6256 = vrot.lane.b32.xlu1 %v10228_v33, %s10894_s28  ;;  %v5110_v29 = vshrl.u32 %v4707_v58, 16  ;;  %v5116_v13 = vshll.u32 %v4708_v30, 16  ;;  %9064 = vmatprep.mubr.bf16.mxu1 %v8459_v40  ;;  %v5776_v59 = vld [vmem:[#allocation10 + $0x184] sm:$0xf]  ;;  %v5777_v24 = vld [vmem:[#allocation10 + $0x188] sm:$0x1] }
 0x21f   :  { %v10102_v56 = vcombine.low %v4140_v11, %v4143_v28  ;;  %v8943_v12 = vpop.f32.mrb[23].mxu1  ;;  %v5108_v15 = vrot.slane %v5106_v45, 5  ;;  %v7410_v9 = vshrl.u32 %v6704_v31, 16  ;;  %v7413_v42 = vshll.u32 %v6704_v31, 16  ;;  %9065 = vmatmul.mubr.bf16.gmra.mrb[84].mxu1 %v8458_v36  ;;  %v3825_v10 = vld [vmem:[#allocation10 + $0x18c] sm:$0xe] }
 0x220   :  { %7633 = vrot.lane.b32.xlu0 %v10292_v8, %s10894_s28  ;;  %v7419_v47 = vshll.u32 %v6705_v22, 16  ;;  %v5103_v57 = vor.u32 %v5102_v44, %v5099_v43  ;;  %v5112_v3 = vrot.slane %v5110_v29, 4  ;;  %v5118_v16 = vrot.slane %v5116_v13, 5  ;;  %v3826_v58 = vld [vmem:[#allocation10 + $0x190] sm:$0xf]  ;;  %v10864_v37 = vld [vmem:[#allocation10 + $0x174] sm:$0xff]  }
 0x221   :  { %4309 = vst.msk [vmem:[#allocation2 + $0x4b8] sm:$0xff] %vm2607_vm8, %v10102_v56  ;;  %v7423_v53 = vshrl.u32 %v6705_v22, 16  ;;  %v7412_v4 = vrot.slane %v7410_v9, 4  ;;  %v7415_v26 = vrot.slane %v7413_v42, 5  ;;  %v7429_v19 = vshll.u32 %v6706_v35, 16  ;;  %v8386_v0 = vld [vmem:[#allocation2 + $0x248] sm:$0xff] }
 0x222   :  { %4662 = vst.msk [vmem:[#allocation2 + $0x4b8] sm:$0xff] %vm3699_vm9, %v12856_v46  ;;  %v7421_v30 = vrot.slane %v7419_v47, 5  ;;  %v3827_v48 = vld [vmem:[#allocation10 + $0x194] sm:$0x1]  ;;  %v13030_v50 = vld [vmem:[#allocation10 + $0xc0] sm:$0xf]  ;;  %v5113_v34 = vor.u32 %v5112_v3, %v5108_v15 }
 0x223   :  { %v5104_v21 = vrot.slane %v5103_v57, 4  ;;  %v7425_v61 = vrot.slane %v7423_v53, 4  ;;  %v10197_v11 = vrot.slane %v5775_v27, 9  ;;  %6612 = vst.msk [vmem:[#allocation2 + $0x450] sm:$0xff] %vm2607_vm8, %v10864_v37  ;;  %v7416_v39 = vor.u32 %v7415_v26, %v7412_v4  ;;  %v10865_v7 = vld [vmem:[#allocation10 + $0x180] sm:$0xff]   ;;  %v8463_v47 = vld [vmem:[#allocation2 + $0x4b0] sm:$0xff] }
 0x224   :  { %v7431_v31 = vrot.slane %v7429_v19, 5  ;;  %v6085_v22 = vrot.slane %v5776_v59, 5  ;;  %v6088_v17 = vrot.slane %v5777_v24, 5  ;;  %v5114_v33 = vrot.slane %v5113_v34, 4  ;;  %v8380_v51 = vld [vmem:[#allocation2 + $0x218] sm:$0xff]  ;;  %6613 = vst.msk [vmem:[#allocation2 + $0x478] sm:$0xff] %vm2607_vm8, %v10865_v7 }
 0x225   :  { %v5109_v46 = vsel %vm11007_vm4, %v5104_v21, %v5108_v15  ;;  %v7426_v35 = vor.u32 %v7425_v61, %v7421_v30  ;;  %v10071_v36 = vrot.slane %v3825_v10, 9  ;;  %9226 = vmatmul.mubr.bf16.gmra.mrb[52].mxu0 %v8380_v51  ;;  %v7417_v25 = vrot.slane %v7416_v39, 4  ;;  %v4710_v45 = vld [vmem:[#allocation10 + $0xc4] sm:$0xf]  ;;  %v7616_v40 = vpop.permute.xlu0 %7615  ;;  %v4711_v29 = vld [vmem:[#allocation10 + $0xc8] sm:$0x1] }
 0x226   :  { %v6086_v8 = vsel %vm11438_vm7, %v10197_v11, %v6085_v22  ;;  %v6087_v28 = vrot.slane %v6085_v22, 4  ;;  %v4146_v43 = vrot.slane %v3826_v58, 5  ;;  %v5119_v27 = vsel %vm11007_vm4, %v5114_v33, %v5118_v16  ;;  %9233 = vmatprep.mubr.bf16.mxu0 %v8386_v0  ;;  %7692 = vst.msk [vmem:[#allocation2 + $0x310] sm:$0xff] %vm3699_vm9, %v7616_v40  ;;  %v6707_v9 = vld [vmem:[#allocation10 + $0x198] sm:$0xf] }
 0x227   :  { %v7427_v56 = vrot.slane %v7426_v35, 4  ;;  %v4149_v44 = vrot.slane %v3827_v48, 5  ;;  %v5121_v13 = vshrl.u32 %v13030_v50, 16  ;;  %v10150_v59 = vcombine.low %v5109_v46, %v5119_v27  ;;  %v6708_v42 = vld [vmem:[#allocation10 + $0x19c] sm:$0xf] }
 0x228   :  { %v7422_v24 = vsel %vm11007_vm4, %v7417_v25, %v7421_v30  ;;  %v6089_v12 = vsel %vm11438_vm7, %v6087_v28, %v6088_v17  ;;  %v4147_v15 = vsel %vm11438_vm7, %v10071_v36, %v4146_v43  ;;  %v4148_v3 = vrot.slane %v4146_v43, 4  ;;  %v6709_v58 = vld [vmem:[#allocation10 + $0x1a0] sm:$0x1]  ;;  %v5778_v19 = vld [vmem:[#allocation10 + $0x18c] sm:$0xe] }
 0x229   :  { %v7432_v10 = vsel %vm11007_vm4, %v7427_v56, %v7431_v31  ;;  %v10229_v57 = vcombine.low %v6086_v8, %v6089_v12  ;;  %v5123_v16 = vrot.slane %v5121_v13, 4  ;;  %v8464_v53 = vld [vmem:[#allocation2 + $0x4b8] sm:$0xff]  ;;  %5670 = vst.msk [vmem:[#allocation2 + $0x240] sm:$0xff] %vm2607_vm8, %v10150_v59  ;;  %v5124_v4 = vshll.u32 %v13030_v50, 16  ;;  %v5779_v11 = vld [vmem:[#allocation10 + $0x190] sm:$0xf] }
 0x22a   :  { %v10293_v37 = vcombine.low %v7422_v24, %v7432_v10  ;;  %v5130_v26 = vshll.u32 %v4710_v45, 16  ;;  %v5134_v30 = vshrl.u32 %v4710_v45, 16  ;;  %9072 = vmatprep.mubr.bf16.mxu1 %v8464_v53  ;;  %6310 = vst.msk [vmem:[#allocation2 + $0x240] sm:$0xff] %vm3699_vm9, %v12860_v41  ;;  %v4150_v48 = vsel %vm11438_vm7, %v4148_v3, %v4149_v44  ;;  %v13057_v0 = vpop.f32.mrb[24].mxu1  ;;  %v5780_v8 = vld [vmem:[#allocation10 + $0x194] sm:$0x1] }
 0x22b   :  { %6258 = vrot.lane.b32.xlu1 %v10229_v57, %s10894_s28  ;;  %v5140_v21 = vshll.u32 %v4711_v29, 16  ;;  %v7434_v34 = vshrl.u32 %v6707_v9, 16  ;;  %v7437_v61 = vshll.u32 %v6707_v9, 16  ;;  %9073 = vmatmul.mubr.bf16.gmra.mrb[88].mxu1 %v8463_v47  ;;  %v10103_v50 = vcombine.low %v4147_v15, %v4150_v48  ;;  %v8948_v17 = vpop.f32.mrb[25].mxu1  ;;  %v4712_v56 = vld [vmem:[#allocation10 + $0xe4] sm:$0xf] }
 0x22c   :  { %7635 = vrot.lane.b32.xlu0 %v10293_v37, %s10894_s28  ;;  %v5126_v39 = vrot.slane %v5124_v4, 5  ;;  %v5132_v31 = vrot.slane %v5130_v26, 5  ;;  %v5136_v22 = vrot.slane %v5134_v30, 4  ;;  %v7443_v33 = vshll.u32 %v6708_v42, 16  ;;  %v13061_v28 = vpop.f32.mrb[26].mxu1  ;;  %v8391_v10 = vld [vmem:[#allocation2 + $0x270] sm:$0xff] }
 0x22d   :  { %v5142_v41 = vrot.slane %v5140_v21, 5  ;;  %v7436_v7 = vrot.slane %v7434_v34, 4  ;;  %v7439_v46 = vrot.slane %v7437_v61, 5  ;;  %4310 = vst.msk [vmem:[#allocation2 + $0x4e0] sm:$0xff] %vm2607_vm8, %v10103_v50  ;;  %v7447_v36 = vshrl.u32 %v6708_v42, 16  ;;  %v8951_v44 = vpop.f32.mrb[27].mxu1 }
 0x22e   :  { %v5127_v51 = vor.u32 %v5126_v39, %v5123_v16  ;;  %v5137_v35 = vor.u32 %v5136_v22, %v5132_v31  ;;  %v7453_v25 = vshll.u32 %v6709_v58, 16  ;;  %4663 = vst.msk [vmem:[#allocation2 + $0x4e0] sm:$0xff] %vm3699_vm9, %v12923_v1  ;;  %v7445_v45 = vrot.slane %v7443_v33, 5  ;;  %v4713_v12 = vld [vmem:[#allocation10 + $0xe8] sm:$0xf]  ;;  %v10866_v57 = vld [vmem:[#allocation10 + $0x18c] sm:$0xff]  }
 0x22f   :  { %v7440_v43 = vor.u32 %v7439_v46, %v7436_v7  ;;  %v10198_v40 = vrot.slane %v5778_v19, 9  ;;  %v6092_v27 = vrot.slane %v5779_v11, 5  ;;  %v7449_v59 = vrot.slane %v7447_v36, 4  ;;  %v4714_v58 = vld [vmem:[#allocation10 + $0xec] sm:$0x1]  ;;  %6614 = vst.msk [vmem:[#allocation2 + $0x4a0] sm:$0xff] %vm2607_vm8, %v10866_v57 }
 0x230   :  { %v5128_v29 = vrot.slane %v5127_v51, 4  ;;  %v5138_v13 = vrot.slane %v5137_v35, 4  ;;  %v7455_v24 = vrot.slane %v7453_v25, 5  ;;  %v6095_v47 = vrot.slane %v5780_v8, 5  ;;  %v6710_v4 = vld [vmem:[#allocation10 + $0x1a4] sm:$0xf] }
 0x231   :  { %v7441_v15 = vrot.slane %v7440_v43, 4  ;;  %v6093_v9 = vsel %vm11438_vm7, %v10198_v40, %v6092_v27  ;;  %v6094_v42 = vrot.slane %v6092_v27, 4  ;;  %v8385_v16 = vld [vmem:[#allocation2 + $0x240] sm:$0xff]  ;;  %v7450_v53 = vor.u32 %v7449_v59, %v7445_v45  ;;  %v7618_v26 = vpop.permute.xlu0 %7617  ;;  %v6711_v34 = vld [vmem:[#allocation10 + $0x1a8] sm:$0xf]  ;;  %v8468_v22 = vld [vmem:[#allocation2 + $0x4d8] sm:$0xff] }
 0x232   :  { %v5133_v1 = vsel %vm11007_vm4, %v5128_v29, %v5132_v31  ;;  %v5143_v3 = vsel %vm11007_vm4, %v5138_v13, %v5142_v41  ;;  %v5145_v37 = vshrl.u32 %v4712_v56, 16  ;;  %9234 = vmatmul.mubr.bf16.gmra.mrb[56].mxu0 %v8385_v16  ;;  %v5148_v21 = vshll.u32 %v4712_v56, 16  ;;  %7693 = vst.msk [vmem:[#allocation2 + $0x338] sm:$0xff] %vm3699_vm9, %v7618_v26  ;;  %v6712_v31 = vld [vmem:[#allocation10 + $0x1ac] sm:$0x1] }
 0x233   :  { %v10151_v30 = vcombine.low %v5133_v1, %v5143_v3  ;;  %v7446_v19 = vsel %vm11007_vm4, %v7441_v15, %v7445_v45  ;;  %v6096_v48 = vsel %vm11438_vm7, %v6094_v42, %v6095_v47  ;;  %v7451_v61 = vrot.slane %v7450_v53, 4  ;;  %9241 = vmatprep.mubr.bf16.mxu0 %v8391_v10  ;;  %v5781_v17 = vld [vmem:[#allocation10 + $0x198] sm:$0xe]  ;;  %v5782_v56 = vld [vmem:[#allocation10 + $0x19c] sm:$0xf] }
 0x234   :  { %v10230_v11 = vcombine.low %v6093_v9, %v6096_v48  ;;  %v5147_v50 = vrot.slane %v5145_v37, 4  ;;  %v5154_v39 = vshll.u32 %v4713_v12, 16  ;;  %v5150_v41 = vrot.slane %v5148_v21, 5  ;;  %v5783_v44 = vld [vmem:[#allocation10 + $0x1a0] sm:$0x1]  ;;  %v10867_v47 = vld [vmem:[#allocation10 + $0x198] sm:$0xff]  }
 0x235   :  { %5671 = vst.msk [vmem:[#allocation2 + $0x268] sm:$0xff] %vm2607_vm8, %v10151_v30  ;;  %v5158_v7 = vshrl.u32 %v4713_v12, 16  ;;  %v5164_v46 = vshll.u32 %v4714_v58, 16  ;;  %v7458_v33 = vshrl.u32 %v6710_v4, 16  ;;  %v7456_v51 = vsel %vm11007_vm4, %v7451_v61, %v7455_v24  ;;  %v8469_v36 = vld [vmem:[#allocation2 + $0x4e0] sm:$0xff]  ;;  %6615 = vst.msk [vmem:[#allocation2 + $0x4c8] sm:$0xff] %vm2607_vm8, %v10867_v47 }
 0x236   :  { %6311 = vst.msk [vmem:[#allocation2 + $0x268] sm:$0xff] %vm3699_vm9, %v12932_v55  ;;  %6260 = vrot.lane.b32.xlu1 %v10230_v11, %s10894_s28  ;;  %v5156_v35 = vrot.slane %v5154_v39, 5  ;;  %v7461_v25 = vshll.u32 %v6710_v4, 16  ;;  %v7467_v8 = vshll.u32 %v6711_v34, 16  ;;  %v10294_v43 = vcombine.low %v7446_v19, %v7456_v51  ;;  %9080 = vmatprep.mubr.bf16.mxu1 %v8469_v36  ;;  %v4715_v12 = vld [vmem:[#allocation10 + $0xf0] sm:$0xf] }
 0x237   :  { %v5151_v45 = vor.u32 %v5150_v41, %v5147_v50  ;;  %v5160_v40 = vrot.slane %v5158_v7, 4  ;;  %v5166_v27 = vrot.slane %v5164_v46, 5  ;;  %v7460_v29 = vrot.slane %v7458_v33, 4  ;;  %9081 = vmatmul.mubr.bf16.gmra.mrb[92].mxu1 %v8468_v22  ;;  %v4716_v16 = vld [vmem:[#allocation10 + $0xf4] sm:$0xf]  ;;  %v8396_v11 = vld [vmem:[#allocation2 + $0x298] sm:$0xff]  ;;  %v6233_v33 = vpop.permute.xlu1 %6232 }
 0x238   :  { %v7463_v13 = vrot.slane %v7461_v25, 5  ;;  %v7469_v59 = vrot.slane %v7467_v8, 5  ;;  %v7471_v55 = vshrl.u32 %v6711_v34, 16  ;;  %7637 = vrot.lane.b32.xlu0 %v10294_v43, %s10894_s28  ;;  %v7477_v9 = vshll.u32 %v6712_v31, 16  ;;  %v4717_v4 = vld [vmem:[#allocation10 + $0xf8] sm:$0x1] }
 0x239   :  { %v5152_v24 = vrot.slane %v5151_v45, 4  ;;  %v5161_v15 = vor.u32 %v5160_v40, %v5156_v35  ;;  %v10199_v42 = vrot.slane %v5781_v17, 9  ;;  %v6099_v1 = vrot.slane %v5782_v56, 5  ;;  %v7705_v30 = vld [vmem:[#allocation10 + $0x18] sm:$0xe] }
 0x23a   :  { %v7464_v10 = vor.u32 %v7463_v13, %v7460_v29  ;;  %v7473_v57 = vrot.slane %v7471_v55, 4  ;;  %v6102_v3 = vrot.slane %v5783_v44, 5  ;;  %v7479_v37 = vrot.slane %v7477_v9, 5  ;;  %v7706_v19 = vld [vmem:[#allocation10 + $0x1c] sm:$0xf] }
 0x23b   :  { %v5157_v53 = vsel %vm11007_vm4, %v5152_v24, %v5156_v35  ;;  %v5162_v58 = vrot.slane %v5161_v15, 4  ;;  %v5169_v26 = vshrl.u32 %v4715_v12, 16  ;;  %v6100_v34 = vsel %vm11438_vm7, %v10199_v42, %v6099_v1  ;;  %v7707_v50 = vld [vmem:[#allocation10 + $0x20] sm:$0x1]  ;;  %v7708_v7 = vld [vmem:[#allocation10 + $0x24] sm:$0xe] }
 0x23c   :  { %v7465_v48 = vrot.slane %v7464_v10, 4  ;;  %v7474_v21 = vor.u32 %v7473_v57, %v7469_v59  ;;  %v6101_v61 = vrot.slane %v6099_v1, 4  ;;  %v5172_v17 = vshll.u32 %v4715_v12, 16  ;;  %v7709_v25 = vld [vmem:[#allocation10 + $0x28] sm:$0xf]  ;;  %v13095_v8 = vpop.f32.mrb[28].mxu1 }
 0x23d   :  { %v5167_v39 = vsel %vm11007_vm4, %v5162_v58, %v5166_v27  ;;  %v8390_v31 = vld [vmem:[#allocation2 + $0x268] sm:$0xff]  ;;  %v5171_v22 = vrot.slane %v5169_v26, 4  ;;  %v5178_v41 = vshll.u32 %v4716_v16, 16  ;;  %v5182_v27 = vshrl.u32 %v4716_v16, 16  ;;  %v8956_v29 = vpop.f32.mrb[29].mxu1 }
 0x23e   :  { %v10152_v46 = vcombine.low %v5157_v53, %v5167_v39  ;;  %9242 = vmatmul.mubr.bf16.gmra.mrb[60].mxu0 %v8390_v31  ;;  %v7470_v51 = vsel %vm11007_vm4, %v7465_v48, %v7469_v59  ;;  %v7475_v35 = vrot.slane %v7474_v21, 4  ;;  %v6103_v36 = vsel %vm11438_vm7, %v6101_v61, %v6102_v3  ;;  %v7710_v56 = vld [vmem:[#allocation10 + $0x2c] sm:$0x1]  ;;  %v7620_v44 = vpop.permute.xlu0 %7619  ;;  %v4718_v24 = vld [vmem:[#allocation10 + $0xfc] sm:$0xf]  ;;  %v13101_v15 = vpop.f32.mrb[30].mxu1 }
 0x23f   :  { %v10231_v43 = vcombine.low %v6100_v34, %v6103_v36  ;;  %v5174_v45 = vrot.slane %v5172_v17, 5  ;;  %v5180_v40 = vrot.slane %v5178_v41, 5  ;;  %9249 = vmatprep.mubr.bf16.mxu0 %v8396_v11  ;;  %v5188_v59 = vshll.u32 %v4717_v4, 16  ;;  %7694 = vst.msk [vmem:[#allocation2 + $0x360] sm:$0xff] %vm3699_vm9, %v7620_v44  ;;  %v4719_v57 = vld [vmem:[#allocation10 + $0x100] sm:$0xf] }
 0x240   :  { %5672 = vst.msk [vmem:[#allocation2 + $0x290] sm:$0xff] %vm2607_vm8, %v10152_v46  ;;  %v7480_v13 = vsel %vm11007_vm4, %v7475_v35, %v7479_v37  ;;  %v10296_v55 = vrot.slane %v7705_v30, 9  ;;  %v7899_v12 = vrot.slane %v7706_v19, 5  ;;  %v5184_v47 = vrot.slane %v5182_v27, 4  ;;  %v8959_v1 = vpop.f32.mrb[31].mxu1  ;;  %v10868_v3 = vld [vmem:[#allocation10 + $0x1a4] sm:$0xff]  }
 0x241   :  { %6312 = vst.msk [vmem:[#allocation2 + $0x290] sm:$0xff] %vm3699_vm9, %v6233_v33  ;;  %v10295_v9 = vcombine.low %v7470_v51, %v7480_v13  ;;  %6262 = vrot.lane.b32.xlu1 %v10231_v43, %s10894_s28  ;;  %v5175_v42 = vor.u32 %v5174_v45, %v5171_v22  ;;  %v7902_v10 = vrot.slane %v7707_v50, 5  ;;  %v5190_v16 = vrot.slane %v5188_v59, 5  ;;  %v4720_v4 = vld [vmem:[#allocation10 + $0x104] sm:$0x1]  ;;  %v6235_v13 = vpop.permute.xlu1 %6234 }
 0x242   :  { %v7900_v53 = vsel %vm11438_vm7, %v10296_v55, %v7899_v12  ;;  %v7901_v58 = vrot.slane %v7899_v12, 4  ;;  %v10297_v37 = vrot.slane %v7708_v7, 9  ;;  %v5185_v30 = vor.u32 %v5184_v47, %v5180_v40  ;;  %v7711_v21 = vld [vmem:[#allocation10 + $0x30] sm:$0xe]  ;;  %6616 = vst.msk [vmem:[#allocation2 + $0x4f0] sm:$0xff] %vm2607_vm8, %v10868_v3 }
 0x243   :  { %7639 = vrot.lane.b32.xlu0 %v10295_v9, %s10894_s28  ;;  %v5176_v26 = vrot.slane %v5175_v42, 4  ;;  %v7906_v19 = vrot.slane %v7709_v25, 5  ;;  %v7909_v48 = vrot.slane %v7710_v56, 5  ;;  %v5193_v61 = vshrl.u32 %v4718_v24, 16  ;;  %v7712_v39 = vld [vmem:[#allocation10 + $0x34] sm:$0xf] }
 0x244   :  { %v7903_v34 = vsel %vm11438_vm7, %v7901_v58, %v7902_v10  ;;  %v5196_v11 = vshll.u32 %v4718_v24, 16  ;;  %v5202_v50 = vshll.u32 %v4719_v57, 16  ;;  %v5186_v22 = vrot.slane %v5185_v30, 4  ;;  %v7713_v7 = vld [vmem:[#allocation10 + $0x38] sm:$0x1]  ;;  %v8401_v56 = vld [vmem:[#allocation2 + $0x2c0] sm:$0xff] }
 0x245   :  { %v5181_v31 = vsel %vm11007_vm4, %v5176_v26, %v5180_v40  ;;  %v10328_v17 = vcombine.low %v7900_v53, %v7903_v34  ;;  %v7907_v41 = vsel %vm11438_vm7, %v10297_v37, %v7906_v19  ;;  %v7714_v46 = vld [vmem:[#allocation10 + $0x3c] sm:$0xe]  ;;  %v7908_v33 = vrot.slane %v7906_v19, 4  ;;  %v7715_v25 = vld [vmem:[#allocation10 + $0x40] sm:$0xf] }
 0x246   :  { %v5195_v51 = vrot.slane %v5193_v61, 4  ;;  %v5198_v35 = vrot.slane %v5196_v11, 5  ;;  %v13115_v36 = vrot.slane %v5202_v50, 5  ;;  %v13117_v43 = vld [vmem:[#allocation10 + $0x44] sm:$0x1]  ;;  %v5191_v45 = vsel %vm11007_vm4, %v5186_v22, %v5190_v16 }
 0x247   :  { %8249 = vst.msk [vmem:[#allocation2 + $0x20] sm:$0xff] %vm2607_vm8, %v10328_v17  ;;  %v5206_v40 = vshrl.u32 %v4719_v57, 16  ;;  %v5212_v27 = vshll.u32 %v4720_v4, 16  ;;  %v10298_v44 = vrot.slane %v7711_v21, 9  ;;  %v10153_v29 = vcombine.low %v5181_v31, %v5191_v45  ;;  %v4721_v9 = vld [vmem:[#allocation10 + $0x108] sm:$0xf] }
 0x248   :  { %v8395_v59 = vld [vmem:[#allocation2 + $0x290] sm:$0xff]  ;;  %8281 = vst.msk [vmem:[#allocation2 + $0x20] sm:$0xff] %vm3699_vm9, %v13915_v5  ;;  %v7910_v55 = vsel %vm11438_vm7, %v7908_v33, %v7909_v48  ;;  %v5199_v12 = vor.u32 %v5198_v35, %v5195_v51  ;;  %v7913_v24 = vrot.slane %v7712_v39, 5  ;;  %v7916_v57 = vrot.slane %v7713_v7, 5  ;;  %v4722_v1 = vld [vmem:[#allocation10 + $0x10c] sm:$0xf] }
 0x249   :  { %9250 = vmatmul.mubr.bf16.gmra.mrb[64].mxu0 %v8395_v59  ;;  %v10329_v42 = vcombine.low %v7907_v41, %v7910_v55  ;;  %v5208_v47 = vrot.slane %v5206_v40, 4  ;;  %v5214_v10 = vrot.slane %v5212_v27, 5  ;;  %5673 = vst.msk [vmem:[#allocation2 + $0x2b8] sm:$0xff] %vm2607_vm8, %v10153_v29  ;;  %v10299_v58 = vrot.slane %v7714_v46, 9  ;;  %v4723_v37 = vld [vmem:[#allocation10 + $0x110] sm:$0x1]  ;;  %v7622_v4 = vpop.permute.xlu0 %7621 }
 0x24a   :  { %v5200_v3 = vrot.slane %v5199_v12, 4  ;;  %9257 = vmatprep.mubr.bf16.mxu0 %v8401_v56  ;;  %v7914_v16 = vsel %vm11438_vm7, %v10298_v44, %v7913_v24  ;;  %v7915_v53 = vrot.slane %v7913_v24, 4  ;;  %v13129_v26 = vpop.f32.mrb[32].mxu1  ;;  %6313 = vst.msk [vmem:[#allocation2 + $0x2b8] sm:$0xff] %vm3699_vm9, %v6235_v13  ;;  %v7920_v19 = vrot.slane %v7715_v25, 5  ;;  %7695 = vst.msk [vmem:[#allocation2 + $0x388] sm:$0xff] %vm3699_vm9, %v7622_v4 }
 0x24b   :  { %8250 = vst.msk [vmem:[#allocation2 + $0x48] sm:$0xff] %vm2607_vm8, %v10329_v42  ;;  %v5209_v30 = vor.u32 %v5208_v47, %v13115_v36  ;;  %v7923_v48 = vrot.slane %v13117_v43, 5  ;;  %v5217_v21 = vshrl.u32 %v4721_v9, 16  ;;  %v7717_v34 = vld [vmem:[#allocation10 + $0x48] sm:$0xe]  ;;  %v8964_v61 = vpop.f32.mrb[33].mxu1 }
 0x24c   :  { %8282 = vst.msk [vmem:[#allocation2 + $0x48] sm:$0xff] %vm3699_vm9, %v13915_v5  ;;  %v5205_v11 = vsel %vm11007_vm4, %v5200_v3, %v13115_v36  ;;  %v7917_v50 = vsel %vm11438_vm7, %v7915_v53, %v7916_v57  ;;  %v5220_v39 = vshll.u32 %v4721_v9, 16  ;;  %v5226_v31 = vshll.u32 %v4722_v1, 16  ;;  %v7718_v22 = vld [vmem:[#allocation10 + $0x4c] sm:$0xf]  ;;  %v13145_v7 = vpop.f32.mrb[34].mxu1  ;;  %v6237_v9 = vpop.permute.xlu1 %6236 }
 0x24d   :  { %v13143_v17 = vld [vmem:[#allocation10 + $0x50] sm:$0x1]  ;;  %v7720_v41 = vld [vmem:[#allocation10 + $0x54] sm:$0xe]  ;;  %v5210_v46 = vrot.slane %v5209_v30, 4  ;;  %v10330_v33 = vcombine.low %v7914_v16, %v7917_v50  ;;  %v7921_v51 = vsel %vm11438_vm7, %v10299_v58, %v7920_v19  ;;  %v7922_v35 = vrot.slane %v7920_v19, 4 }
 0x24e   :  { %v7721_v25 = vld [vmem:[#allocation10 + $0x58] sm:$0xf]  ;;  %v8967_v43 = vpop.f32.mrb[35].mxu1  ;;  %v5219_v36 = vrot.slane %v5217_v21, 4  ;;  %v5222_v45 = vrot.slane %v5220_v39, 5  ;;  %v13149_v40 = vrot.slane %v5226_v31, 5 }
 0x24f   :  { %v5230_v27 = vshrl.u32 %v4722_v1, 16  ;;  %v7722_v56 = vld [vmem:[#allocation10 + $0x5c] sm:$0x1]  ;;  %v8317_v44 = vld [vmem:[#allocation2 + $0x20] sm:$0xff]  ;;  %v5215_v29 = vsel %vm11007_vm4, %v5210_v46, %v5214_v10  ;;  %8251 = vst.msk [vmem:[#allocation2 + $0x70] sm:$0xff] %vm2607_vm8, %v10330_v33  ;;  %v7924_v13 = vsel %vm11438_vm7, %v7922_v35, %v7923_v48  ;;  %v5236_v59 = vshll.u32 %v4723_v37, 16 }
 0x250   :  { %v10300_v55 = vrot.slane %v7717_v34, 9  ;;  %v4724_v12 = vld [vmem:[#allocation10 + $0x114] sm:$0xf]  ;;  %10487 = vmatprep.mubr.bf16.mxu1 %v8317_v44  ;;  %v10154_v24 = vcombine.low %v5205_v11, %v5215_v29  ;;  %8283 = vst.msk [vmem:[#allocation2 + $0x70] sm:$0xff] %vm3699_vm9, %v13915_v5  ;;  %v10331_v42 = vcombine.low %v7921_v51, %v7924_v13  ;;  %v5223_v47 = vor.u32 %v5222_v45, %v5219_v36  ;;  %v4725_v1 = vld [vmem:[#allocation10 + $0x118] sm:$0xf] }
 0x251   :  { %v5232_v57 = vrot.slane %v5230_v27, 4  ;;  %v5238_v3 = vrot.slane %v5236_v59, 5  ;;  %v8406_v10 = vld [vmem:[#allocation2 + $0x2e8] sm:$0xff]  ;;  %v7927_v16 = vrot.slane %v7718_v22, 5  ;;  %v7930_v53 = vrot.slane %v13143_v17, 5  ;;  %v13159_v4 = vpop.f32.mrb[0].mxu0 }
 0x252   :  { %v10301_v58 = vrot.slane %v7720_v41, 9  ;;  %5674 = vst.msk [vmem:[#allocation2 + $0x2e0] sm:$0xff] %vm2607_vm8, %v10154_v24  ;;  %v8400_v37 = vld [vmem:[#allocation2 + $0x2b8] sm:$0xff]  ;;  %8252 = vst.msk [vmem:[#allocation2 + $0x98] sm:$0xff] %vm2607_vm8, %v10331_v42  ;;  %v5224_v30 = vrot.slane %v5223_v47, 4  ;;  %v7934_v48 = vrot.slane %v7721_v25, 5  ;;  %v6239_v47 = vpop.permute.xlu1 %6238 }
 0x253   :  { %v5233_v19 = vor.u32 %v5232_v57, %v13149_v40  ;;  %v7937_v21 = vrot.slane %v7722_v56, 5  ;;  %v9125_v34 = vpop.f32.mrb[1].mxu0  ;;  %v8322_v61 = vld [vmem:[#allocation2 + $0x48] sm:$0xff]  ;;  %6314 = vst.msk [vmem:[#allocation2 + $0x2e0] sm:$0xff] %vm3699_vm9, %v6237_v9  ;;  %9258 = vmatmul.mubr.bf16.gmra.mrb[68].mxu0 %v8400_v37  ;;  %8284 = vst.msk [vmem:[#allocation2 + $0x98] sm:$0xff] %vm3699_vm9, %v13915_v5  ;;  %v7928_v11 = vsel %vm11438_vm7, %v10300_v55, %v7927_v16  ;;  %v7929_v50 = vrot.slane %v7927_v16, 4 }
 0x254   :  { %v4726_v39 = vld [vmem:[#allocation10 + $0x11c] sm:$0x1]  ;;  %v5241_v31 = vshrl.u32 %v4724_v12, 16  ;;  %v7723_v22 = vld [vmem:[#allocation10 + $0x60] sm:$0xe]  ;;  %v13169_v17 = vpop.f32.mrb[2].mxu0  ;;  %10488 = vmatmul.mubr.bf16.vlgmr.msra.gmra.mrb[96].mxu1 %v8322_v61  ;;  %v5229_v41 = vsel %vm11007_vm4, %v5224_v30, %v13149_v40  ;;  %9265 = vmatprep.mubr.bf16.mxu0 %v8406_v10  ;;  %v7935_v33 = vsel %vm11438_vm7, %v10301_v58, %v7934_v48 }
 0x255   :  { %v5234_v46 = vrot.slane %v5233_v19, 4  ;;  %v7936_v51 = vrot.slane %v7934_v48, 4  ;;  %v7724_v35 = vld [vmem:[#allocation10 + $0x64] sm:$0xf]  ;;  %v9128_v25 = vpop.f32.mrb[3].mxu0  ;;  %v7931_v43 = vsel %vm11438_vm7, %v7929_v50, %v7930_v53  ;;  %v5244_v45 = vshll.u32 %v4724_v12, 16  ;;  %v7624_v24 = vpop.permute.xlu0 %7623 }
 0x256   :  { %v5243_v36 = vrot.slane %v5241_v31, 4  ;;  %v5250_v27 = vshll.u32 %v4725_v1, 16  ;;  %v7725_v56 = vld [vmem:[#allocation10 + $0x68] sm:$0x1]  ;;  %v10332_v29 = vcombine.low %v7928_v11, %v7931_v43  ;;  %v5254_v13 = vshrl.u32 %v4725_v1, 16  ;;  %7696 = vst.msk [vmem:[#allocation2 + $0x3b0] sm:$0xff] %vm3699_vm9, %v7624_v24 }
 0x257   :  { %v5239_v44 = vsel %vm11007_vm4, %v5234_v46, %v5238_v3  ;;  %v7938_v40 = vsel %vm11438_vm7, %v7936_v51, %v7937_v21  ;;  %v7726_v59 = vld [vmem:[#allocation10 + $0x6c] sm:$0xe]  ;;  %v7727_v55 = vld [vmem:[#allocation10 + $0x70] sm:$0xf]  ;;  %v5246_v10 = vrot.slane %v5244_v45, 5  ;;  %v5260_v53 = vshll.u32 %v4726_v39, 16 }
 0x258   :  { %v8327_v9 = vld [vmem:[#allocation2 + $0x70] sm:$0xff]  ;;  %v10155_v42 = vcombine.low %v5229_v41, %v5239_v44  ;;  %v10333_v57 = vcombine.low %v7935_v33, %v7938_v40  ;;  %v5252_v16 = vrot.slane %v5250_v27, 5  ;;  %8253 = vst.msk [vmem:[#allocation2 + $0xc0] sm:$0xff] %vm2607_vm8, %v10332_v29  ;;  %v5256_v3 = vrot.slane %v5254_v13, 4  ;;  %v4727_v37 = vld [vmem:[#allocation10 + $0x120] sm:$0xf] }
 0x259   :  { %v7728_v12 = vld [vmem:[#allocation10 + $0x74] sm:$0x1]  ;;  %10491 = vmatprep.mubr.bf16.mxu1 %v8327_v9  ;;  %v10302_v58 = vrot.slane %v7723_v22, 9  ;;  %8285 = vst.msk [vmem:[#allocation2 + $0xc0] sm:$0xff] %vm3699_vm9, %v13915_v5  ;;  %v5247_v1 = vor.u32 %v5246_v10, %v5243_v36  ;;  %v7941_v19 = vrot.slane %v7724_v35, 5  ;;  %v7944_v48 = vrot.slane %v7725_v56, 5 }
 0x25a   :  { %5675 = vst.msk [vmem:[#allocation2 + $0x308] sm:$0xff] %vm2607_vm8, %v10155_v42  ;;  %8254 = vst.msk [vmem:[#allocation2 + $0xe8] sm:$0xff] %vm2607_vm8, %v10333_v57  ;;  %v8411_v30 = vld [vmem:[#allocation2 + $0x310] sm:$0xff]  ;;  %v10303_v21 = vrot.slane %v7726_v59, 9  ;;  %v4728_v34 = vld [vmem:[#allocation10 + $0x124] sm:$0xf]  ;;  %v5257_v50 = vor.u32 %v5256_v3, %v5252_v16  ;;  %v6241_v3 = vpop.permute.xlu1 %6240 }
 0x25b   :  { %v8332_v61 = vld [vmem:[#allocation2 + $0x98] sm:$0xff]  ;;  %6315 = vst.msk [vmem:[#allocation2 + $0x308] sm:$0xff] %vm3699_vm9, %v6239_v47  ;;  %v8405_v11 = vld [vmem:[#allocation2 + $0x2e0] sm:$0xff]  ;;  %8286 = vst.msk [vmem:[#allocation2 + $0xe8] sm:$0xff] %vm3699_vm9, %v13915_v5  ;;  %v5262_v39 = vrot.slane %v5260_v53, 5  ;;  %v7948_v31 = vrot.slane %v7727_v55, 5  ;;  %v7942_v46 = vsel %vm11438_vm7, %v10302_v58, %v7941_v19 }
 0x25c   :  { %v7951_v22 = vrot.slane %v7728_v12, 5  ;;  %9266 = vmatmul.mubr.bf16.gmra.mrb[72].mxu0 %v8405_v11  ;;  %v5248_v41 = vrot.slane %v5247_v1, 4  ;;  %v7943_v33 = vrot.slane %v7941_v19, 4  ;;  %v4729_v51 = vld [vmem:[#allocation10 + $0x128] sm:$0x1]  ;;  %v5265_v35 = vshrl.u32 %v4727_v37, 16  ;;  %10492 = vmatmul.mubr.bf16.gmra.mrb[100].mxu1 %v8332_v61 }
 0x25d   :  { %v5258_v25 = vrot.slane %v5257_v50, 4  ;;  %9273 = vmatprep.mubr.bf16.mxu0 %v8411_v30  ;;  %v7949_v43 = vsel %vm11438_vm7, %v10303_v21, %v7948_v31  ;;  %v7950_v36 = vrot.slane %v7948_v31, 4  ;;  %v5268_v45 = vshll.u32 %v4727_v37, 16  ;;  %v7729_v27 = vld [vmem:[#allocation10 + $0x78] sm:$0xe] }
 0x25e   :  { %v7730_v56 = vld [vmem:[#allocation10 + $0x7c] sm:$0xf]  ;;  %v13195_v44 = vld [vmem:[#allocation10 + $0x80] sm:$0x1]  ;;  %v5253_v29 = vsel %vm11007_vm4, %v5248_v41, %v5252_v16  ;;  %v7945_v40 = vsel %vm11438_vm7, %v7943_v33, %v7944_v48  ;;  %v5267_v13 = vrot.slane %v5265_v35, 4  ;;  %v5274_v59 = vshll.u32 %v4728_v34, 16 }
 0x25f   :  { %v7732_v55 = vld [vmem:[#allocation10 + $0x84] sm:$0xe]  ;;  %v5263_v24 = vsel %vm11007_vm4, %v5258_v25, %v5262_v39  ;;  %v10334_v9 = vcombine.low %v7942_v46, %v7945_v40  ;;  %v7952_v42 = vsel %vm11438_vm7, %v7950_v36, %v7951_v22  ;;  %v5270_v47 = vrot.slane %v5268_v45, 5  ;;  %v7733_v57 = vld [vmem:[#allocation10 + $0x88] sm:$0xf]  ;;  %v13207_v1 = vpop.f32.mrb[36].mxu1 }
 0x260   :  { %v7734_v10 = vld [vmem:[#allocation10 + $0x8c] sm:$0x1]  ;;  %v10156_v12 = vcombine.low %v5253_v29, %v5263_v24  ;;  %v10335_v53 = vcombine.low %v7949_v43, %v7952_v42  ;;  %v13205_v16 = vrot.slane %v5274_v59, 5  ;;  %v5278_v58 = vshrl.u32 %v4728_v34, 16  ;;  %v8337_v30 = vld [vmem:[#allocation2 + $0xc0] sm:$0xff]  ;;  %v8416_v21 = vld [vmem:[#allocation2 + $0x338] sm:$0xff] }
 0x261   :  { %v4730_v37 = vld [vmem:[#allocation10 + $0x12c] sm:$0xf]  ;;  %8255 = vst.msk [vmem:[#allocation2 + $0x110] sm:$0xff] %vm2607_vm8, %v10334_v9  ;;  %v5271_v19 = vor.u32 %v5270_v47, %v5267_v13  ;;  %v5284_v48 = vshll.u32 %v4729_v51, 16  ;;  %v4731_v61 = vld [vmem:[#allocation10 + $0x130] sm:$0xf]  ;;  %10495 = vmatprep.mubr.bf16.mxu1 %v8337_v30 }
 0x262   :  { %v8972_v11 = vpop.f32.mrb[37].mxu1  ;;  %v8342_v50 = vld [vmem:[#allocation2 + $0xe8] sm:$0xff]  ;;  %5676 = vst.msk [vmem:[#allocation2 + $0x330] sm:$0xff] %vm2607_vm8, %v10156_v12  ;;  %8256 = vst.msk [vmem:[#allocation2 + $0x138] sm:$0xff] %vm2607_vm8, %v10335_v53  ;;  %v5280_v34 = vrot.slane %v5278_v58, 4  ;;  %v10304_v31 = vrot.slane %v7729_v27, 9 }
 0x263   :  { %v8410_v39 = vld [vmem:[#allocation2 + $0x308] sm:$0xff]  ;;  %8287 = vst.msk [vmem:[#allocation2 + $0x110] sm:$0xff] %vm3699_vm9, %v13915_v5  ;;  %v7955_v22 = vrot.slane %v7730_v56, 5  ;;  %v7958_v41 = vrot.slane %v13195_v44, 5  ;;  %6316 = vst.msk [vmem:[#allocation2 + $0x330] sm:$0xff] %vm3699_vm9, %v6241_v3  ;;  %v5272_v46 = vrot.slane %v5271_v19, 4  ;;  %v7626_v44 = vpop.permute.xlu0 %7625 }
 0x264   :  { %8288 = vst.msk [vmem:[#allocation2 + $0x138] sm:$0xff] %vm3699_vm9, %v13915_v5  ;;  %v5286_v33 = vrot.slane %v5284_v48, 5  ;;  %v10305_v51 = vrot.slane %v7732_v55, 9  ;;  %v7962_v35 = vrot.slane %v7733_v57, 5  ;;  %v13218_v25 = vpop.f32.mrb[38].mxu1  ;;  %9274 = vmatmul.mubr.bf16.gmra.mrb[76].mxu0 %v8410_v39  ;;  %v5281_v43 = vor.u32 %v5280_v34, %v13205_v16  ;;  %10496 = vmatmul.mubr.bf16.gmra.mrb[104].mxu1 %v8342_v50  ;;  %7697 = vst.msk [vmem:[#allocation2 + $0x3d8] sm:$0xff] %vm3699_vm9, %v7626_v44 }
 0x265   :  { %v7956_v36 = vsel %vm11438_vm7, %v10304_v31, %v7955_v22  ;;  %v7957_v45 = vrot.slane %v7955_v22, 4  ;;  %v7965_v27 = vrot.slane %v7734_v10, 5  ;;  %v4732_v56 = vld [vmem:[#allocation10 + $0x134] sm:$0x1]  ;;  %v8975_v29 = vpop.f32.mrb[39].mxu1  ;;  %v5277_v40 = vsel %vm11007_vm4, %v5272_v46, %v13205_v16  ;;  %9281 = vmatprep.mubr.bf16.mxu0 %v8416_v21  ;;  %v13231_v53 = vpop.f32.mrb[4].mxu0 }
 0x266   :  { %v7963_v13 = vsel %vm11438_vm7, %v10305_v51, %v7962_v35  ;;  %v7964_v59 = vrot.slane %v7962_v35, 4  ;;  %v5289_v55 = vshrl.u32 %v4730_v37, 16  ;;  %v7735_v24 = vld [vmem:[#allocation10 + $0x90] sm:$0xe]  ;;  %v7736_v9 = vld [vmem:[#allocation10 + $0x94] sm:$0xf]  ;;  %v6243_v51 = vpop.permute.xlu1 %6242 }
 0x267   :  { %v5282_v42 = vrot.slane %v5281_v43, 4  ;;  %v7959_v47 = vsel %vm11438_vm7, %v7957_v45, %v7958_v41  ;;  %v5292_v57 = vshll.u32 %v4730_v37, 16  ;;  %v5298_v10 = vshll.u32 %v4731_v61, 16  ;;  %v7737_v12 = vld [vmem:[#allocation10 + $0x98] sm:$0x1]  ;;  %v9133_v21 = vpop.f32.mrb[5].mxu0 }
 0x268   :  { %v7738_v3 = vld [vmem:[#allocation10 + $0x9c] sm:$0xe]  ;;  %v10336_v16 = vcombine.low %v7956_v36, %v7959_v47  ;;  %v7966_v58 = vsel %vm11438_vm7, %v7964_v59, %v7965_v27  ;;  %v5291_v30 = vrot.slane %v5289_v55, 4  ;;  %v5302_v19 = vshrl.u32 %v4731_v61, 16  ;;  %v7739_v48 = vld [vmem:[#allocation10 + $0xa0] sm:$0xf] }
 0x269   :  { %v5287_v11 = vsel %vm11007_vm4, %v5282_v42, %v5286_v33  ;;  %v10337_v50 = vcombine.low %v7963_v13, %v7966_v58  ;;  %v5294_v39 = vrot.slane %v5292_v57, 5  ;;  %v5300_v34 = vrot.slane %v5298_v10, 5  ;;  %v7740_v37 = vld [vmem:[#allocation10 + $0xa4] sm:$0x1]  ;;  %v4733_v31 = vld [vmem:[#allocation10 + $0x138] sm:$0xf] }
 0x26a   :  { %v13237_v22 = vpop.f32.mrb[6].mxu0  ;;  %v8347_v41 = vld [vmem:[#allocation2 + $0x110] sm:$0xff]  ;;  %v10157_v46 = vcombine.low %v5277_v40, %v5287_v11  ;;  %8257 = vst.msk [vmem:[#allocation2 + $0x160] sm:$0xff] %vm2607_vm8, %v10336_v16  ;;  %v5304_v35 = vrot.slane %v5302_v19, 4  ;;  %v5308_v43 = vshll.u32 %v4732_v56, 16  ;;  %v8421_v27 = vld [vmem:[#allocation2 + $0x360] sm:$0xff] }
 0x26b   :  { %v9136_v61 = vpop.f32.mrb[7].mxu0  ;;  %10499 = vmatprep.mubr.bf16.mxu1 %v8347_v41  ;;  %v8352_v36 = vld [vmem:[#allocation2 + $0x138] sm:$0xff]  ;;  %v8415_v45 = vld [vmem:[#allocation2 + $0x330] sm:$0xff]  ;;  %8289 = vst.msk [vmem:[#allocation2 + $0x160] sm:$0xff] %vm3699_vm9, %v13915_v5  ;;  %v5295_v33 = vor.u32 %v5294_v39, %v5291_v30  ;;  %v10306_v44 = vrot.slane %v7735_v24, 9  ;;  %v7969_v29 = vrot.slane %v7736_v9, 5 }
 0x26c   :  { %8258 = vst.msk [vmem:[#allocation2 + $0x188] sm:$0xff] %vm2607_vm8, %v10337_v50  ;;  %5677 = vst.msk [vmem:[#allocation2 + $0x358] sm:$0xff] %vm2607_vm8, %v10157_v46  ;;  %v5305_v40 = vor.u32 %v5304_v35, %v5300_v34  ;;  %v5310_v56 = vrot.slane %v5308_v43, 5  ;;  %v7972_v13 = vrot.slane %v7737_v12, 5  ;;  %v10307_v59 = vrot.slane %v7738_v3, 9  ;;  %9282 = vmatmul.mubr.bf16.gmra.mrb[80].mxu0 %v8415_v45  ;;  %10500 = vmatmul.mubr.bf16.gmra.mrb[108].mxu1 %v8352_v36  ;;  %v6245_v61 = vpop.permute.xlu1 %6244 }
 0x26d   :  { %8290 = vst.msk [vmem:[#allocation2 + $0x188] sm:$0xff] %vm3699_vm9, %v13915_v5  ;;  %v4734_v55 = vld [vmem:[#allocation10 + $0x13c] sm:$0xf]  ;;  %6317 = vst.msk [vmem:[#allocation2 + $0x358] sm:$0xff] %vm3699_vm9, %v6243_v51  ;;  %v5296_v42 = vrot.slane %v5295_v33, 4  ;;  %v7970_v47 = vsel %vm11438_vm7, %v10306_v44, %v7969_v29  ;;  %v7971_v57 = vrot.slane %v7969_v29, 4  ;;  %9289 = vmatprep.mubr.bf16.mxu0 %v8421_v27  ;;  %v7628_v35 = vpop.permute.xlu0 %7627 }
 0x26e   :  { %v7976_v24 = vrot.slane %v7739_v48, 5  ;;  %v4735_v9 = vld [vmem:[#allocation10 + $0x140] sm:$0x1]  ;;  %v5306_v10 = vrot.slane %v5305_v40, 4  ;;  %v7979_v16 = vrot.slane %v7740_v37, 5  ;;  %v5313_v58 = vshrl.u32 %v4733_v31, 16 }
 0x26f   :  { %v5316_v30 = vshll.u32 %v4733_v31, 16  ;;  %v7741_v19 = vld [vmem:[#allocation10 + $0xa8] sm:$0xe]  ;;  %v5301_v12 = vsel %vm11007_vm4, %v5296_v42, %v5300_v34  ;;  %v7973_v3 = vsel %vm11438_vm7, %v7971_v57, %v7972_v13  ;;  %v7742_v50 = vld [vmem:[#allocation10 + $0xac] sm:$0xf]  ;;  %v13259_v34 = vpop.f32.mrb[40].mxu1 }
 0x270   :  { %v7977_v21 = vsel %vm11438_vm7, %v10307_v59, %v7976_v24  ;;  %v7978_v11 = vrot.slane %v7976_v24, 4  ;;  %v13255_v48 = vld [vmem:[#allocation10 + $0xb0] sm:$0x1]  ;;  %v5311_v39 = vsel %vm11007_vm4, %v5306_v10, %v5310_v56  ;;  %v10338_v37 = vcombine.low %v7970_v47, %v7973_v3  ;;  %v7744_v46 = vld [vmem:[#allocation10 + $0xb4] sm:$0xe]  ;;  %7698 = vst.msk [vmem:[#allocation2 + $0x400] sm:$0xff] %vm3699_vm9, %v7628_v35 }
 0x271   :  { %v5315_v41 = vrot.slane %v5313_v58, 4  ;;  %v5318_v31 = vrot.slane %v5316_v30, 5  ;;  %v7745_v51 = vld [vmem:[#allocation10 + $0xb8] sm:$0xf]  ;;  %v10158_v43 = vcombine.low %v5301_v12, %v5311_v39  ;;  %v5322_v45 = vshll.u32 %v4734_v55, 16  ;;  %v8980_v44 = vpop.f32.mrb[41].mxu1 }
 0x272   :  { %v7980_v36 = vsel %vm11438_vm7, %v7978_v11, %v7979_v16  ;;  %v5326_v33 = vshrl.u32 %v4734_v55, 16  ;;  %v7746_v27 = vld [vmem:[#allocation10 + $0xbc] sm:$0x1]  ;;  %v8357_v29 = vld [vmem:[#allocation2 + $0x160] sm:$0xff]  ;;  %8259 = vst.msk [vmem:[#allocation2 + $0x1b0] sm:$0xff] %vm2607_vm8, %v10338_v37  ;;  %v5332_v13 = vshll.u32 %v4735_v9, 16 }
 0x273   :  { %v10339_v40 = vcombine.low %v7977_v21, %v7980_v36  ;;  %v5319_v56 = vor.u32 %v5318_v31, %v5315_v41  ;;  %v4736_v59 = vld [vmem:[#allocation10 + $0x144] sm:$0xf]  ;;  %v13265_v42 = vpop.f32.mrb[42].mxu1  ;;  %10503 = vmatprep.mubr.bf16.mxu1 %v8357_v29  ;;  %5678 = vst.msk [vmem:[#allocation2 + $0x380] sm:$0xff] %vm2607_vm8, %v10158_v43  ;;  %v5324_v55 = vrot.slane %v5322_v45, 5  ;;  %v8426_v24 = vld [vmem:[#allocation2 + $0x388] sm:$0xff] }
 0x274   :  { %v8362_v47 = vld [vmem:[#allocation2 + $0x188] sm:$0xff]  ;;  %8291 = vst.msk [vmem:[#allocation2 + $0x1b0] sm:$0xff] %vm3699_vm9, %v13915_v5  ;;  %v5328_v57 = vrot.slane %v5326_v33, 4  ;;  %v10308_v10 = vrot.slane %v7741_v19, 9  ;;  %v8983_v16 = vpop.f32.mrb[43].mxu1  ;;  %6318 = vst.msk [vmem:[#allocation2 + $0x380] sm:$0xff] %vm3699_vm9, %v6245_v61 }
 0x275   :  { %v8420_v58 = vld [vmem:[#allocation2 + $0x358] sm:$0xff]  ;;  %8260 = vst.msk [vmem:[#allocation2 + $0x1d8] sm:$0xff] %vm2607_vm8, %v10339_v40  ;;  %v5320_v9 = vrot.slane %v5319_v56, 4  ;;  %v5334_v30 = vrot.slane %v5332_v13, 5  ;;  %v7983_v12 = vrot.slane %v7742_v50, 5  ;;  %v7986_v3 = vrot.slane %v13255_v48, 5  ;;  %10504 = vmatmul.mubr.bf16.gmra.mrb[112].mxu1 %v8362_v47 }
 0x276   :  { %9290 = vmatmul.mubr.bf16.gmra.mrb[84].mxu0 %v8420_v58  ;;  %8292 = vst.msk [vmem:[#allocation2 + $0x1d8] sm:$0xff] %vm3699_vm9, %v13915_v5  ;;  %v5329_v21 = vor.u32 %v5328_v57, %v5324_v55  ;;  %v10309_v11 = vrot.slane %v7744_v46, 9  ;;  %v7990_v39 = vrot.slane %v7745_v51, 5  ;;  %v7993_v37 = vrot.slane %v7746_v27, 5  ;;  %v4737_v19 = vld [vmem:[#allocation10 + $0x148] sm:$0xf] }
 0x277   :  { %v5325_v41 = vsel %vm11007_vm4, %v5320_v9, %v5324_v55  ;;  %9297 = vmatprep.mubr.bf16.mxu0 %v8426_v24  ;;  %v7984_v31 = vsel %vm11438_vm7, %v10308_v10, %v7983_v12  ;;  %v7985_v50 = vrot.slane %v7983_v12, 4  ;;  %v4738_v35 = vld [vmem:[#allocation10 + $0x14c] sm:$0x1]  ;;  %v5337_v48 = vshrl.u32 %v4736_v59, 16  ;;  %v7747_v51 = vld [vmem:[#allocation10 + $0xc0] sm:$0xe]  ;;  %v6247_v12 = vpop.permute.xlu1 %6246 }
 0x278   :  { %v5330_v43 = vrot.slane %v5329_v21, 4  ;;  %v7991_v61 = vsel %vm11438_vm7, %v10309_v11, %v7990_v39  ;;  %v7992_v36 = vrot.slane %v7990_v39, 4  ;;  %v5340_v46 = vshll.u32 %v4736_v59, 16  ;;  %v7748_v45 = vld [vmem:[#allocation10 + $0xc4] sm:$0xf]  ;;  %v13285_v13 = vpop.f32.mrb[8].mxu0 }
 0x279   :  { %v13281_v33 = vld [vmem:[#allocation10 + $0xc8] sm:$0x1]  ;;  %v7987_v27 = vsel %vm11438_vm7, %v7985_v50, %v7986_v3  ;;  %v5339_v44 = vrot.slane %v5337_v48, 4  ;;  %v5346_v29 = vshll.u32 %v4737_v19, 16  ;;  %v5350_v40 = vshrl.u32 %v4737_v19, 16  ;;  %v9141_v16 = vpop.f32.mrb[9].mxu0 }
 0x27a   :  { %v7750_v56 = vld [vmem:[#allocation10 + $0xcc] sm:$0xe]  ;;  %v5335_v47 = vsel %vm11007_vm4, %v5330_v43, %v5334_v30  ;;  %v10340_v55 = vcombine.low %v7984_v31, %v7987_v27  ;;  %v7994_v59 = vsel %vm11438_vm7, %v7992_v36, %v7993_v37  ;;  %v5342_v57 = vrot.slane %v5340_v46, 5  ;;  %v7751_v24 = vld [vmem:[#allocation10 + $0xd0] sm:$0xf]  ;;  %v13293_v39 = vpop.f32.mrb[10].mxu0 }
 0x27b   :  { %v13291_v10 = vld [vmem:[#allocation10 + $0xd4] sm:$0x1]  ;;  %v10159_v9 = vcombine.low %v5325_v41, %v5335_v47  ;;  %v10341_v3 = vcombine.low %v7991_v61, %v7994_v59  ;;  %v5348_v21 = vrot.slane %v5346_v29, 5  ;;  %v5352_v11 = vrot.slane %v5350_v40, 4 }
 0x27c   :  { %v8367_v58 = vld [vmem:[#allocation2 + $0x1b0] sm:$0xff] }
 0x27d   :  { %14 = vsyncpa [#allocation9], 0  ;;  %10507 = vmatprep.mubr.bf16.mxu1 %v8367_v58  ;;  %v8425_v30 = vld [vmem:[#allocation2 + $0x380] sm:$0xff]  ;;  %8261 = vst.msk [vmem:[#allocation2 + $0x200] sm:$0xff] %vm2607_vm8, %v10340_v55  ;;  %v5343_v19 = vor.u32 %v5342_v57, %v5339_v44  ;;  %v5356_v37 = vshll.u32 %v4738_v35, 16  ;;  %v8431_v31 = vld [vmem:[#allocation2 + $0x3b0] sm:$0xff]  ;;  %v5353_v41 = vor.u32 %v5352_v11, %v5348_v21  ;;  %v7630_v29 = vpop.permute.xlu0 %7629 }
 0x27e   :  { %v4739_v50 = vld [vmem:[#allocation10 + $0x150] sm:$0xf]  ;;  %v9144_v48 = vpop.f32.mrb[11].mxu0  ;;  %v8372_v43 = vld [vmem:[#allocation2 + $0x1d8] sm:$0xff]  ;;  %5679 = vst.msk [vmem:[#allocation2 + $0x3a8] sm:$0xff] %vm2607_vm8, %v10159_v9  ;;  %8262 = vst.msk [vmem:[#allocation2 + $0x228] sm:$0xff] %vm2607_vm8, %v10341_v3  ;;  %9298 = vmatmul.mubr.bf16.gmra.mrb[88].mxu0 %v8425_v30 }
 0x27f   :  { %8293 = vst.msk [vmem:[#allocation2 + $0x200] sm:$0xff] %vm3699_vm9, %v13915_v5  ;;  %v10310_v61 = vrot.slane %v7747_v51, 9  ;;  %v7997_v36 = vrot.slane %v7748_v45, 5  ;;  %v8000_v46 = vrot.slane %v13281_v33, 5  ;;  %v4740_v27 = vld [vmem:[#allocation10 + $0x154] sm:$0xf]  ;;  %10508 = vmatmul.mubr.bf16.gmra.mrb[116].mxu1 %v8372_v43  ;;  %9305 = vmatprep.mubr.bf16.mxu0 %v8431_v31 }
 0x280   :  { %6319 = vst.msk [vmem:[#allocation2 + $0x3a8] sm:$0xff] %vm3699_vm9, %v6247_v12  ;;  %8294 = vst.msk [vmem:[#allocation2 + $0x228] sm:$0xff] %vm3699_vm9, %v13915_v5  ;;  %v5344_v35 = vrot.slane %v5343_v19, 4  ;;  %v5358_v44 = vrot.slane %v5356_v37, 5  ;;  %v10311_v40 = vrot.slane %v7750_v56, 9  ;;  %v8004_v47 = vrot.slane %v7751_v24, 5 }
 0x281   :  { %7699 = vst.msk [vmem:[#allocation2 + $0x428] sm:$0xff] %vm3699_vm9, %v7630_v29  ;;  %v13305_v55 = vpop.f32.mrb[44].mxu1  ;;  %v5354_v51 = vrot.slane %v5353_v41, 4  ;;  %v7998_v45 = vsel %vm11438_vm7, %v10310_v61, %v7997_v36  ;;  %v7999_v33 = vrot.slane %v7997_v36, 4  ;;  %v8007_v59 = vrot.slane %v13291_v10, 5  ;;  %v6249_v41 = vpop.permute.xlu1 %6248 }
 0x282   :  { %13921 = vst [vmem:[#allocation12_spill] sm:$0xff] %v13305_v55  ;;  %v4741_v57 = vld [vmem:[#allocation10 + $0x158] sm:$0x1]  ;;  %v7753_v16 = vld [vmem:[#allocation10 + $0xf0] sm:$0xe]  ;;  %v8988_v58 = vpop.f32.mrb[45].mxu1  ;;  %v5349_v56 = vsel %vm11007_vm4, %v5344_v35, %v5348_v21  ;;  %v8005_v24 = vsel %vm11438_vm7, %v10311_v40, %v8004_v47 }
 0x283   :  { %v8006_v9 = vrot.slane %v8004_v47, 4  ;;  %v5361_v12 = vshrl.u32 %v4739_v50, 16  ;;  %v7754_v3 = vld [vmem:[#allocation10 + $0xf4] sm:$0xf]  ;;  %v13314_v11 = vld [vmem:[#allocation10 + $0xf8] sm:$0x1]  ;;  %v5359_v19 = vsel %vm11007_vm4, %v5354_v51, %v5358_v44  ;;  %v8001_v10 = vsel %vm11438_vm7, %v7999_v33, %v8000_v46 }
 0x284   :  { %v13316_v30 = vpop.f32.mrb[46].mxu1  ;;  %v5364_v37 = vshll.u32 %v4739_v50, 16  ;;  %v5370_v31 = vshll.u32 %v4740_v27, 16  ;;  %v7756_v48 = vld [vmem:[#allocation10 + $0xfc] sm:$0xe]  ;;  %v10160_v43 = vcombine.low %v5349_v56, %v5359_v19  ;;  %v10342_v61 = vcombine.low %v7998_v45, %v8001_v10  ;;  %v8441_v55 = vld [vmem:[#allocation2 + $0x400] sm:$0xff] }
 0x285   :  { %13922 = vst [vmem:[#allocation13_spill] sm:$0xff] %v13316_v30  ;;  %v8991_v21 = vpop.f32.mrb[47].mxu1  ;;  %v8008_v36 = vsel %vm11438_vm7, %v8006_v9, %v8007_v59  ;;  %v5363_v29 = vrot.slane %v5361_v12, 4  ;;  %v7757_v35 = vld [vmem:[#allocation10 + $0x100] sm:$0xf]  ;;  %v5374_v44 = vshrl.u32 %v4740_v27, 16 }
 0x286   :  { %v7758_v40 = vld [vmem:[#allocation10 + $0x104] sm:$0x1]  ;;  %v10343_v47 = vcombine.low %v8005_v24, %v8008_v36  ;;  %v5366_v58 = vrot.slane %v5364_v37, 5  ;;  %v13324_v5 = vrot.slane %v5370_v31, 5  ;;  %v4742_v51 = vld [vmem:[#allocation10 + $0x15c] sm:$0xf] }
 0x287   :  { %v8377_v46 = vld [vmem:[#allocation2 + $0x200] sm:$0xff]  ;;  %5680 = vst.msk [vmem:[#allocation2 + $0x3d0] sm:$0xff] %vm2607_vm8, %v10160_v43  ;;  %8263 = vst.msk [vmem:[#allocation2 + $0x250] sm:$0xff] %vm2607_vm8, %v10342_v61  ;;  %v5380_v50 = vshll.u32 %v4741_v57, 16  ;;  %v8436_v33 = vld [vmem:[#allocation2 + $0x3d8] sm:$0xff]  ;;  %v10312_v45 = vrot.slane %v7753_v16, 9 }
 0x288   :  { %v13328_v56 = vld [vmem:[#allocation10 + $0x160] sm:$0xf]  ;;  %v13330_v59 = vpop.f32.mrb[12].mxu0  ;;  %10511 = vmatprep.mubr.bf16.mxu1 %v8377_v46  ;;  %v8382_v9 = vld [vmem:[#allocation2 + $0x228] sm:$0xff]  ;;  %6320 = vst.msk [vmem:[#allocation2 + $0x3d0] sm:$0xff] %vm3699_vm9, %v6249_v41  ;;  %v13923_v12 = vmov 0   ;;  %v5367_v27 = vor.u32 %v5366_v58, %v5363_v29 }
 0x289   :  { %v8430_v24 = vld [vmem:[#allocation2 + $0x3a8] sm:$0xff]  ;;  %8295 = vst.msk [vmem:[#allocation2 + $0x250] sm:$0xff] %vm3699_vm9, %v13923_v12  ;;  %v5376_v19 = vrot.slane %v5374_v44, 4  ;;  %v8011_v10 = vrot.slane %v7754_v3, 5  ;;  %v8014_v57 = vrot.slane %v13314_v11, 5  ;;  %v5382_v16 = vrot.slane %v5380_v50, 5  ;;  %10512 = vmatmul.mubr.bf16.gmra.mrb[120].mxu1 %v8382_v9 }
 0x28a   :  { %8264 = vst.msk [vmem:[#allocation2 + $0x278] sm:$0xff] %vm2607_vm8, %v10343_v47  ;;  %9306 = vmatmul.mubr.bf16.gmra.mrb[92].mxu0 %v8430_v24  ;;  %v10313_v37 = vrot.slane %v7756_v48, 9  ;;  %v8018_v31 = vrot.slane %v7757_v35, 5  ;;  %v8021_v21 = vrot.slane %v7758_v40, 5  ;;  %v9149_v43 = vpop.f32.mrb[13].mxu0  ;;  %v5368_v41 = vrot.slane %v5367_v27, 4 }
 0x28b   :  { %8296 = vst.msk [vmem:[#allocation2 + $0x278] sm:$0xff] %vm3699_vm9, %v13923_v12  ;;  %v5377_v61 = vor.u32 %v5376_v19, %v13324_v5  ;;  %9313 = vmatprep.mubr.bf16.mxu0 %v8436_v33  ;;  %v8012_v36 = vsel %vm11438_vm7, %v10312_v45, %v8011_v10  ;;  %v8013_v3 = vrot.slane %v8011_v10, 4  ;;  %v4744_v29 = vld [vmem:[#allocation10 + $0x164] sm:$0x1]  ;;  %v13342_v11 = vpop.f32.mrb[14].mxu0  ;;  %v5385_v48 = vshrl.u32 %v4742_v51, 16  ;;  %v7632_v43 = vpop.permute.xlu0 %7631 }
 0x28c   :  { %v8019_v47 = vsel %vm11438_vm7, %v10313_v37, %v8018_v31  ;;  %v8020_v58 = vrot.slane %v8018_v31, 4  ;;  %v5388_v35 = vshll.u32 %v4742_v51, 16  ;;  %v7759_v40 = vld [vmem:[#allocation10 + $0x108] sm:$0xe]  ;;  %v7760_v44 = vld [vmem:[#allocation10 + $0x10c] sm:$0xf]  ;;  %v5373_v50 = vsel %vm11007_vm4, %v5368_v41, %v13324_v5 }
 0x28d   :  { %v9152_v46 = vpop.f32.mrb[15].mxu0  ;;  %v5378_v33 = vrot.slane %v5377_v61, 4  ;;  %v8015_v45 = vsel %vm11438_vm7, %v8013_v3, %v8014_v57  ;;  %v5394_v9 = vshll.u32 %v13328_v56, 16  ;;  %v7761_v24 = vld [vmem:[#allocation10 + $0x110] sm:$0x1]  ;;  %v5387_v51 = vrot.slane %v5385_v48, 4  ;;  %v6251_v48 = vpop.permute.xlu1 %6250 }
 0x28e   :  { %v7762_v27 = vld [vmem:[#allocation10 + $0x114] sm:$0xe]  ;;  %v10344_v19 = vcombine.low %v8012_v36, %v8015_v45  ;;  %v8022_v10 = vsel %vm11438_vm7, %v8020_v58, %v8021_v21  ;;  %v5390_v37 = vrot.slane %v5388_v35, 5  ;;  %v7763_v31 = vld [vmem:[#allocation10 + $0x118] sm:$0xf]  ;;  %v13354_v46 = vpop.f32.mrb[48].mxu1 }
 0x28f   :  { %13924 = vst [vmem:[#allocation14_spill] sm:$0xff] %v13354_v46  ;;  %v5383_v5 = vsel %vm11007_vm4, %v5378_v33, %v5382_v16  ;;  %v10345_v41 = vcombine.low %v8019_v47, %v8022_v10  ;;  %v13358_v61 = vrot.slane %v5394_v9, 5  ;;  %v5398_v57 = vshrl.u32 %v13328_v56, 16  ;;  %v7764_v3 = vld [vmem:[#allocation10 + $0x11c] sm:$0x1]  ;;  %7700 = vst.msk [vmem:[#allocation2 + $0x450] sm:$0xff] %vm3699_vm9, %v7632_v43 }
 0x290   :  { %v4745_v36 = vld [vmem:[#allocation10 + $0x168] sm:$0xf]  ;;  %v8996_v45 = vpop.f32.mrb[49].mxu1  ;;  %v8387_v21 = vld [vmem:[#allocation2 + $0x250] sm:$0xff]  ;;  %v10161_v58 = vcombine.low %v5373_v50, %v5383_v5  ;;  %8265 = vst.msk [vmem:[#allocation2 + $0x2a0] sm:$0xff] %vm2607_vm8, %v10344_v19  ;;  %v5391_v46 = vor.u32 %v5390_v37, %v5387_v51  ;;  %v5404_v30 = vshll.u32 %v4744_v29, 16 }
 0x291   :  { %v8435_v35 = vld [vmem:[#allocation2 + $0x3d0] sm:$0xff]  ;;  %v13363_v16 = vpop.f32.mrb[50].mxu1  ;;  %10515 = vmatprep.mubr.bf16.mxu1 %v8387_v21  ;;  %8297 = vst.msk [vmem:[#allocation2 + $0x2a0] sm:$0xff] %vm3699_vm9, %v13923_v12  ;;  %v5400_v56 = vrot.slane %v5398_v57, 4  ;;  %v10314_v33 = vrot.slane %v7759_v40, 9  ;;  %v8025_v9 = vrot.slane %v7760_v44, 5 }
 0x292   :  { %13925 = vst [vmem:[#allocation15_spill] sm:$0xff] %v13363_v16  ;;  %v8392_v47 = vld [vmem:[#allocation2 + $0x278] sm:$0xff]  ;;  %8266 = vst.msk [vmem:[#allocation2 + $0x2c8] sm:$0xff] %vm2607_vm8, %v10345_v41  ;;  %v8999_v50 = vpop.f32.mrb[51].mxu1  ;;  %9314 = vmatmul.mubr.bf16.gmra.mrb[96].mxu0 %v8435_v35  ;;  %v5392_v29 = vrot.slane %v5391_v46, 4  ;;  %v5406_v19 = vrot.slane %v5404_v30, 5 }
 0x293   :  { %5681 = vst.msk [vmem:[#allocation2 + $0x3f8] sm:$0xff] %vm2607_vm8, %v10161_v58  ;;  %v8028_v10 = vrot.slane %v7761_v24, 5  ;;  %v10315_v51 = vrot.slane %v7762_v27, 9  ;;  %10516 = vmatmul.mubr.bf16.gmra.mrb[124].mxu1 %v8392_v47  ;;  %v5401_v37 = vor.u32 %v5400_v56, %v13358_v61  ;;  %9321 = vmatprep.mubr.bf16.mxu0 %v8441_v55  ;;  %v8026_v40 = vsel %vm11438_vm7, %v10314_v33, %v8025_v9  ;;  %v4746_v5 = vld [vmem:[#allocation10 + $0x16c] sm:$0xf]  ;;  %v13378_v57 = vpop.f32.mrb[16].mxu0 }
 0x294   :  { %8298 = vst.msk [vmem:[#allocation2 + $0x2c8] sm:$0xff] %vm3699_vm9, %v13923_v12  ;;  %6321 = vst.msk [vmem:[#allocation2 + $0x3f8] sm:$0xff] %vm3699_vm9, %v6251_v48  ;;  %v8027_v44 = vrot.slane %v8025_v9, 4  ;;  %v8032_v43 = vrot.slane %v7763_v31, 5  ;;  %v5397_v41 = vsel %vm11007_vm4, %v5392_v29, %v13358_v61  ;;  %v8035_v46 = vrot.slane %v7764_v3, 5  ;;  %v9157_v35 = vpop.f32.mrb[17].mxu0 }
 0x295   :  { %v4747_v30 = vld [vmem:[#allocation10 + $0x170] sm:$0x1]  ;;  %v5409_v24 = vshrl.u32 %v4745_v36, 16  ;;  %v5412_v27 = vshll.u32 %v4745_v36, 16  ;;  %13926 = vst [vmem:[#allocation16_spill] sm:$0xff] %v13378_v57  ;;  %v5402_v45 = vrot.slane %v5401_v37, 4  ;;  %v6253_v35 = vpop.permute.xlu1 %6252 }
 0x296   :  { %v8029_v55 = vsel %vm11438_vm7, %v8027_v44, %v8028_v10  ;;  %v8033_v21 = vsel %vm11438_vm7, %v10315_v51, %v8032_v43  ;;  %v8034_v58 = vrot.slane %v8032_v43, 4  ;;  %v7765_v31 = vld [vmem:[#allocation10 + $0x120] sm:$0xe]  ;;  %v7766_v48 = vld [vmem:[#allocation10 + $0x124] sm:$0xf]  ;;  %v5418_v3 = vshll.u32 %v4746_v5, 16 }
 0x297   :  { %v10346_v47 = vcombine.low %v8026_v40, %v8029_v55  ;;  %v5411_v56 = vrot.slane %v5409_v24, 4  ;;  %v5414_v61 = vrot.slane %v5412_v27, 5  ;;  %v7767_v33 = vld [vmem:[#allocation10 + $0x128] sm:$0x1]  ;;  %v13384_v9 = vpop.f32.mrb[18].mxu0  ;;  %v5407_v36 = vsel %vm11007_vm4, %v5402_v45, %v5406_v19  ;;  %v13393_v45 = vpop.f32.mrb[52].mxu1 }
 0x298   :  { %13927 = vst [vmem:[#allocation17_spill] sm:$0xff] %v13384_v9  ;;  %v8036_v50 = vsel %vm11438_vm7, %v8034_v58, %v8035_v46  ;;  %v5422_v29 = vshrl.u32 %v4746_v5, 16  ;;  %v5428_v10 = vshll.u32 %v4747_v30, 16  ;;  %v7768_v51 = vld [vmem:[#allocation10 + $0x12c] sm:$0xe]  ;;  %v9160_v37 = vpop.f32.mrb[19].mxu0  ;;  %v10162_v43 = vcombine.low %v5397_v41, %v5407_v36  ;;  %v7634_v46 = vpop.permute.xlu0 %7633 }
 0x299   :  { %v8397_v44 = vld [vmem:[#allocation2 + $0x2a0] sm:$0xff]  ;;  %8267 = vst.msk [vmem:[#allocation2 + $0x2f0] sm:$0xff] %vm2607_vm8, %v10346_v47  ;;  %v10347_v40 = vcombine.low %v8033_v21, %v8036_v50  ;;  %v5415_v24 = vor.u32 %v5414_v61, %v5411_v56  ;;  %v5420_v27 = vrot.slane %v5418_v3, 5  ;;  %v7769_v55 = vld [vmem:[#allocation10 + $0x130] sm:$0xf]  ;;  %v8446_v5 = vld [vmem:[#allocation2 + $0x428] sm:$0xff] }
 0x29a   :  { %v7770_v16 = vld [vmem:[#allocation10 + $0x134] sm:$0x1]  ;;  %10519 = vmatprep.mubr.bf16.mxu1 %v8397_v44  ;;  %8299 = vst.msk [vmem:[#allocation2 + $0x2f0] sm:$0xff] %vm3699_vm9, %v13923_v12  ;;  %v5424_v19 = vrot.slane %v5422_v29, 4  ;;  %13928 = vst [vmem:[#allocation18_spill] sm:$0xff] %v13393_v45  ;;  %v5430_v58 = vrot.slane %v5428_v10, 5 }
 0x29b   :  { %v8402_v9 = vld [vmem:[#allocation2 + $0x2c8] sm:$0xff]  ;;  %v4748_v30 = vld [vmem:[#allocation10 + $0x174] sm:$0xf]  ;;  %5682 = vst.msk [vmem:[#allocation2 + $0x420] sm:$0xff] %vm2607_vm8, %v10162_v43  ;;  %v8440_v41 = vld [vmem:[#allocation2 + $0x3f8] sm:$0xff]  ;;  %v5416_v21 = vrot.slane %v5415_v24, 4 }
 0x29c   :  { %8268 = vst.msk [vmem:[#allocation2 + $0x318] sm:$0xff] %vm2607_vm8, %v10347_v40  ;;  %v10316_v47 = vrot.slane %v7765_v31, 9  ;;  %v8039_v56 = vrot.slane %v7766_v48, 5  ;;  %v9004_v61 = vpop.f32.mrb[53].mxu1  ;;  %10520 = vmatmul.mubr.bf16.gmra.mrb[128].mxu1 %v8402_v9  ;;  %9322 = vmatmul.mubr.bf16.gmra.mrb[100].mxu0 %v8440_v41  ;;  %v5425_v3 = vor.u32 %v5424_v19, %v5420_v27  ;;  %v8042_v36 = vrot.slane %v7767_v33, 5 }
 0x29d   :  { %7701 = vst.msk [vmem:[#allocation2 + $0x478] sm:$0xff] %vm3699_vm9, %v7634_v46  ;;  %6322 = vst.msk [vmem:[#allocation2 + $0x420] sm:$0xff] %vm3699_vm9, %v6253_v35  ;;  %v10317_v50 = vrot.slane %v7768_v51, 9  ;;  %v8046_v29 = vrot.slane %v7769_v55, 5  ;;  %v4749_v37 = vld [vmem:[#allocation10 + $0x178] sm:$0xf]  ;;  %9329 = vmatprep.mubr.bf16.mxu0 %v8446_v5  ;;  %v5421_v43 = vsel %vm11007_vm4, %v5416_v21, %v5420_v27 }
 0x29e   :  { %8300 = vst.msk [vmem:[#allocation2 + $0x318] sm:$0xff] %vm3699_vm9, %v13923_v12  ;;  %v13401_v44 = vpop.f32.mrb[54].mxu1  ;;  %v8040_v31 = vsel %vm11438_vm7, %v10316_v47, %v8039_v56  ;;  %v8041_v48 = vrot.slane %v8039_v56, 4  ;;  %v8049_v10 = vrot.slane %v7770_v16, 5  ;;  %v5426_v35 = vrot.slane %v5425_v3, 4 }
 0x29f   :  { %13929 = vst [vmem:[#allocation19_spill] sm:$0xff] %v13401_v44  ;;  %v9007_v9 = vpop.f32.mrb[55].mxu1  ;;  %v8047_v40 = vsel %vm11438_vm7, %v10317_v50, %v8046_v29  ;;  %v8048_v33 = vrot.slane %v8046_v29, 4  ;;  %v4750_v51 = vld [vmem:[#allocation10 + $0x17c] sm:$0x1]  ;;  %v5433_v19 = vshrl.u32 %v4748_v30, 16 }
 0x2a0   :  { %v7771_v24 = vld [vmem:[#allocation10 + $0x138] sm:$0xe]  ;;  %v8043_v55 = vsel %vm11438_vm7, %v8041_v48, %v8042_v36  ;;  %v5436_v5 = vshll.u32 %v4748_v30, 16  ;;  %v5442_v46 = vshll.u32 %v4749_v37, 16  ;;  %v7772_v41 = vld [vmem:[#allocation10 + $0x13c] sm:$0xf]  ;;  %v5431_v16 = vsel %vm11007_vm4, %v5426_v35, %v5430_v58  ;;  %v6255_v9 = vpop.permute.xlu1 %6254 }
 0x2a1   :  { %v7773_v47 = vld [vmem:[#allocation10 + $0x140] sm:$0x1]  ;;  %v10348_v56 = vcombine.low %v8040_v31, %v8043_v55  ;;  %v8050_v27 = vsel %vm11438_vm7, %v8048_v33, %v8049_v10  ;;  %v5446_v21 = vshrl.u32 %v4749_v37, 16  ;;  %v7774_v61 = vld [vmem:[#allocation10 + $0x144] sm:$0xe]  ;;  %v8407_v50 = vld [vmem:[#allocation2 + $0x2f0] sm:$0xff]  ;;  %v10163_v29 = vcombine.low %v5421_v43, %v5431_v16 }
 0x2a2   :  { %v7775_v3 = vld [vmem:[#allocation10 + $0x148] sm:$0xf]  ;;  %v10349_v44 = vcombine.low %v8047_v40, %v8050_v27  ;;  %v5435_v36 = vrot.slane %v5433_v19, 4  ;;  %v5438_v48 = vrot.slane %v5436_v5, 5  ;;  %v7776_v30 = vld [vmem:[#allocation10 + $0x14c] sm:$0x1]  ;;  %10523 = vmatprep.mubr.bf16.mxu1 %v8407_v50 }
 0x2a3   :  { %8269 = vst.msk [vmem:[#allocation2 + $0x340] sm:$0xff] %vm2607_vm8, %v10348_v56  ;;  %v5444_v45 = vrot.slane %v5442_v46, 5  ;;  %v5448_v57 = vrot.slane %v5446_v21, 4  ;;  %v5452_v58 = vshll.u32 %v4750_v51, 16  ;;  %v8451_v31 = vld [vmem:[#allocation2 + $0x450] sm:$0xff]  ;;  %v13416_v35 = vpop.f32.mrb[20].mxu0 }
 0x2a4   :  { %13930 = vst [vmem:[#allocation20_spill] sm:$0xff] %v13416_v35  ;;  %5683 = vst.msk [vmem:[#allocation2 + $0x448] sm:$0xff] %vm2607_vm8, %v10163_v29  ;;  %v8445_v37 = vld [vmem:[#allocation2 + $0x420] sm:$0xff]  ;;  %v5439_v43 = vor.u32 %v5438_v48, %v5435_v36  ;;  %v10318_v40 = vrot.slane %v7771_v24, 9  ;;  %v9165_v55 = vpop.f32.mrb[21].mxu0  ;;  %v8053_v5 = vrot.slane %v7772_v41, 5  ;;  %v7636_v48 = vpop.permute.xlu0 %7635 }
 0x2a5   :  { %v8412_v10 = vld [vmem:[#allocation2 + $0x318] sm:$0xff]  ;;  %8301 = vst.msk [vmem:[#allocation2 + $0x340] sm:$0xff] %vm3699_vm9, %v13923_v12  ;;  %v4751_v33 = vld [vmem:[#allocation10 + $0x180] sm:$0xf]  ;;  %6323 = vst.msk [vmem:[#allocation2 + $0x448] sm:$0xff] %vm3699_vm9, %v6255_v9  ;;  %9330 = vmatmul.mubr.bf16.gmra.mrb[104].mxu0 %v8445_v37  ;;  %v5449_v51 = vor.u32 %v5448_v57, %v5444_v45  ;;  %v5454_v19 = vrot.slane %v5452_v58, 5 }
 0x2a6   :  { %8270 = vst.msk [vmem:[#allocation2 + $0x368] sm:$0xff] %vm2607_vm8, %v10349_v44  ;;  %10524 = vmatmul.mubr.bf16.gmra.mrb[132].mxu1 %v8412_v10  ;;  %v8056_v46 = vrot.slane %v7773_v47, 5  ;;  %v4752_v16 = vld [vmem:[#allocation10 + $0x184] sm:$0xf]  ;;  %v13425_v56 = vpop.f32.mrb[22].mxu0  ;;  %v5440_v27 = vrot.slane %v5439_v43, 4  ;;  %9337 = vmatprep.mubr.bf16.mxu0 %v8451_v31  ;;  %v8054_v9 = vsel %vm11438_vm7, %v10318_v40, %v8053_v5 }
 0x2a7   :  { %8302 = vst.msk [vmem:[#allocation2 + $0x368] sm:$0xff] %vm3699_vm9, %v13923_v12  ;;  %13931 = vst [vmem:[#allocation21_spill] sm:$0xff] %v13425_v56  ;;  %v10319_v44 = vrot.slane %v7774_v61, 9  ;;  %v8060_v24 = vrot.slane %v7775_v3, 5  ;;  %v8063_v21 = vrot.slane %v7776_v30, 5  ;;  %v9168_v50 = vpop.f32.mrb[23].mxu0 }
 0x2a8   :  { %v5450_v29 = vrot.slane %v5449_v51, 4  ;;  %v8055_v36 = vrot.slane %v8053_v5, 4  ;;  %v4753_v10 = vld [vmem:[#allocation10 + $0x188] sm:$0x1]  ;;  %v5445_v57 = vsel %vm11007_vm4, %v5440_v27, %v5444_v45  ;;  %7702 = vst.msk [vmem:[#allocation2 + $0x4a0] sm:$0xff] %vm3699_vm9, %v7636_v48  ;;  %v5457_v61 = vshrl.u32 %v4751_v33, 16  ;;  %v6257_v5 = vpop.permute.xlu1 %6256 }
 0x2a9   :  { %v8061_v41 = vsel %vm11438_vm7, %v10319_v44, %v8060_v24  ;;  %v8062_v47 = vrot.slane %v8060_v24, 4  ;;  %v7777_v3 = vld [vmem:[#allocation10 + $0x150] sm:$0xe]  ;;  %v7778_v30 = vld [vmem:[#allocation10 + $0x154] sm:$0xf]  ;;  %v13434_v58 = vpop.f32.mrb[56].mxu1 }
 0x2aa   :  { %13932 = vst [vmem:[#allocation22_spill] sm:$0xff] %v13434_v58  ;;  %v5455_v31 = vsel %vm11007_vm4, %v5450_v29, %v5454_v19  ;;  %v8057_v37 = vsel %vm11438_vm7, %v8055_v36, %v8056_v46  ;;  %v5460_v43 = vshll.u32 %v4751_v33, 16  ;;  %v5466_v40 = vshll.u32 %v4752_v16, 16  ;;  %v7779_v45 = vld [vmem:[#allocation10 + $0x158] sm:$0x1]  ;;  %v9012_v55 = vpop.f32.mrb[57].mxu1 }
 0x2ab   :  { %v10164_v51 = vcombine.low %v5445_v57, %v5455_v31  ;;  %v10350_v27 = vcombine.low %v8054_v9, %v8057_v37  ;;  %v8064_v44 = vsel %vm11438_vm7, %v8062_v47, %v8063_v21  ;;  %v5459_v24 = vrot.slane %v5457_v61, 4  ;;  %v7780_v50 = vld [vmem:[#allocation10 + $0x15c] sm:$0xe]  ;;  %v7781_v48 = vld [vmem:[#allocation10 + $0x160] sm:$0xf]  ;;  %v13442_v58 = vpop.f32.mrb[58].mxu1 }
 0x2ac   :  { %13933 = vst [vmem:[#allocation23_spill] sm:$0xff] %v13442_v58  ;;  %v8417_v56 = vld [vmem:[#allocation2 + $0x340] sm:$0xff]  ;;  %v10351_v19 = vcombine.low %v8061_v41, %v8064_v44  ;;  %v5462_v29 = vrot.slane %v5460_v43, 5  ;;  %v5468_v35 = vrot.slane %v5466_v40, 5  ;;  %v5470_v46 = vshrl.u32 %v4752_v16, 16  ;;  %v8456_v33 = vld [vmem:[#allocation2 + $0x478] sm:$0xff] }
 0x2ad   :  { %v9015_v36 = vpop.f32.mrb[59].mxu1  ;;  %10527 = vmatprep.mubr.bf16.mxu1 %v8417_v56  ;;  %5684 = vst.msk [vmem:[#allocation2 + $0x470] sm:$0xff] %vm2607_vm8, %v10164_v51  ;;  %v8450_v9 = vld [vmem:[#allocation2 + $0x448] sm:$0xff]  ;;  %8271 = vst.msk [vmem:[#allocation2 + $0x390] sm:$0xff] %vm2607_vm8, %v10350_v27  ;;  %v5476_v21 = vshll.u32 %v4753_v10, 16  ;;  %v10320_v56 = vrot.slane %v7777_v3, 9 }
 0x2ae   :  { %v8422_v55 = vld [vmem:[#allocation2 + $0x368] sm:$0xff]  ;;  %v7782_v57 = vld [vmem:[#allocation10 + $0x164] sm:$0x1]  ;;  %6324 = vst.msk [vmem:[#allocation2 + $0x470] sm:$0xff] %vm3699_vm9, %v6257_v5  ;;  %9338 = vmatmul.mubr.bf16.gmra.mrb[108].mxu0 %v8450_v9  ;;  %8303 = vst.msk [vmem:[#allocation2 + $0x390] sm:$0xff] %vm3699_vm9, %v13923_v12  ;;  %v5463_v16 = vor.u32 %v5462_v29, %v5459_v24  ;;  %v5472_v41 = vrot.slane %v5470_v46, 4 }
 0x2af   :  { %10528 = vmatmul.mubr.bf16.gmra.mrb[136].mxu1 %v8422_v55  ;;  %8272 = vst.msk [vmem:[#allocation2 + $0x3b8] sm:$0xff] %vm2607_vm8, %v10351_v19  ;;  %v8067_v47 = vrot.slane %v7778_v30, 5  ;;  %v4754_v61 = vld [vmem:[#allocation10 + $0x18c] sm:$0xf]  ;;  %v5478_v31 = vrot.slane %v5476_v21, 5  ;;  %9345 = vmatprep.mubr.bf16.mxu0 %v8456_v33  ;;  %v8070_v10 = vrot.slane %v7779_v45, 5 }
 0x2b0   :  { %8304 = vst.msk [vmem:[#allocation2 + $0x3b8] sm:$0xff] %vm3699_vm9, %v13923_v12  ;;  %v10321_v37 = vrot.slane %v7780_v50, 9  ;;  %v8074_v43 = vrot.slane %v7781_v48, 5  ;;  %v13452_v40 = vpop.f32.mrb[24].mxu0  ;;  %v5464_v51 = vrot.slane %v5463_v16, 4  ;;  %v5473_v5 = vor.u32 %v5472_v41, %v5468_v35 }
 0x2b1   :  { %13934 = vst [vmem:[#allocation24_spill] sm:$0xff] %v13452_v40  ;;  %v8068_v27 = vsel %vm11438_vm7, %v10320_v56, %v8067_v47  ;;  %v8069_v44 = vrot.slane %v8067_v47, 4  ;;  %v4755_v24 = vld [vmem:[#allocation10 + $0x190] sm:$0xf]  ;;  %v9173_v3 = vpop.f32.mrb[25].mxu0  ;;  %v8077_v29 = vrot.slane %v7782_v57, 5 }
 0x2b2   :  { %v8075_v30 = vsel %vm11438_vm7, %v10321_v37, %v8074_v43  ;;  %v8076_v19 = vrot.slane %v8074_v43, 4  ;;  %v4756_v46 = vld [vmem:[#allocation10 + $0x194] sm:$0x1]  ;;  %v13458_v33 = vpop.f32.mrb[26].mxu0  ;;  %v5469_v45 = vsel %vm11007_vm4, %v5464_v51, %v5468_v35  ;;  %v5474_v50 = vrot.slane %v5473_v5, 4  ;;  %v6259_v35 = vpop.permute.xlu1 %6258 }
 0x2b3   :  { %13935 = vst [vmem:[#allocation25_spill] sm:$0xff] %v13458_v33  ;;  %v8071_v48 = vsel %vm11438_vm7, %v8069_v44, %v8070_v10  ;;  %v5481_v36 = vshrl.u32 %v4754_v61, 16  ;;  %v7783_v55 = vld [vmem:[#allocation10 + $0x168] sm:$0xe]  ;;  %v7784_v9 = vld [vmem:[#allocation10 + $0x16c] sm:$0xf] }
 0x2b4   :  { %v9176_v21 = vpop.f32.mrb[27].mxu0  ;;  %v10352_v16 = vcombine.low %v8068_v27, %v8071_v48  ;;  %v8078_v41 = vsel %vm11438_vm7, %v8076_v19, %v8077_v29  ;;  %v5484_v56 = vshll.u32 %v4754_v61, 16  ;;  %v5490_v57 = vshll.u32 %v4755_v24, 16  ;;  %v7785_v47 = vld [vmem:[#allocation10 + $0x170] sm:$0x1]  ;;  %v8461_v10 = vld [vmem:[#allocation2 + $0x4a0] sm:$0xff]  ;;  %v7638_v27 = vpop.permute.xlu0 %7637 }
 0x2b5   :  { %v7786_v37 = vld [vmem:[#allocation10 + $0x174] sm:$0xe]  ;;  %v5479_v43 = vsel %vm11007_vm4, %v5474_v50, %v5478_v31  ;;  %v10353_v51 = vcombine.low %v8075_v30, %v8078_v41  ;;  %v5483_v5 = vrot.slane %v5481_v36, 4  ;;  %v5494_v3 = vshrl.u32 %v4755_v24, 16  ;;  %v7787_v44 = vld [vmem:[#allocation10 + $0x178] sm:$0xf] }
 0x2b6   :  { %v8427_v58 = vld [vmem:[#allocation2 + $0x390] sm:$0xff]  ;;  %v10165_v33 = vcombine.low %v5469_v45, %v5479_v43  ;;  %8273 = vst.msk [vmem:[#allocation2 + $0x3e0] sm:$0xff] %vm2607_vm8, %v10352_v16  ;;  %v5486_v19 = vrot.slane %v5484_v56, 5  ;;  %v5492_v61 = vrot.slane %v5490_v57, 5  ;;  %v5500_v29 = vshll.u32 %v4756_v46, 16  ;;  %v13469_v48 = vpop.f32.mrb[60].mxu1 }
 0x2b7   :  { %v8455_v21 = vld [vmem:[#allocation2 + $0x470] sm:$0xff]  ;;  %13936 = vst [vmem:[#allocation26_spill] sm:$0xff] %v13469_v48  ;;  %10531 = vmatprep.mubr.bf16.mxu1 %v8427_v58  ;;  %v8432_v40 = vld [vmem:[#allocation2 + $0x3b8] sm:$0xff]  ;;  %8305 = vst.msk [vmem:[#allocation2 + $0x3e0] sm:$0xff] %vm3699_vm9, %v13923_v12  ;;  %v5496_v31 = vrot.slane %v5494_v3, 4  ;;  %v9020_v30 = vpop.f32.mrb[61].mxu1 }
 0x2b8   :  { %9346 = vmatmul.mubr.bf16.gmra.mrb[112].mxu0 %v8455_v21  ;;  %8274 = vst.msk [vmem:[#allocation2 + $0x408] sm:$0xff] %vm2607_vm8, %v10353_v51  ;;  %v7788_v24 = vld [vmem:[#allocation10 + $0x17c] sm:$0x1]  ;;  %10532 = vmatmul.mubr.bf16.gmra.mrb[140].mxu1 %v8432_v40  ;;  %5685 = vst.msk [vmem:[#allocation2 + $0x498] sm:$0xff] %vm2607_vm8, %v10165_v33  ;;  %v5487_v46 = vor.u32 %v5486_v19, %v5483_v5  ;;  %v5502_v58 = vrot.slane %v5500_v29, 5  ;;  %v10322_v45 = vrot.slane %v7783_v55, 9 }
 0x2b9   :  { %7703 = vst.msk [vmem:[#allocation2 + $0x4c8] sm:$0xff] %vm3699_vm9, %v7638_v27  ;;  %8306 = vst.msk [vmem:[#allocation2 + $0x408] sm:$0xff] %vm3699_vm9, %v13923_v12  ;;  %9353 = vmatprep.mubr.bf16.mxu0 %v8461_v10  ;;  %v8081_v50 = vrot.slane %v7784_v9, 5  ;;  %v13478_v36 = vpop.f32.mrb[62].mxu1  ;;  %v5497_v16 = vor.u32 %v5496_v31, %v5492_v61  ;;  %v8084_v41 = vrot.slane %v7785_v47, 5  ;;  %v10323_v56 = vrot.slane %v7786_v37, 9 }
 0x2ba   :  { %13937 = vst [vmem:[#allocation27_spill] sm:$0xff] %v13478_v36  ;;  %6325 = vst.msk [vmem:[#allocation2 + $0x498] sm:$0xff] %vm3699_vm9, %v6259_v35  ;;  %v8088_v57 = vrot.slane %v7787_v44, 5  ;;  %v4757_v43 = vld [vmem:[#allocation10 + $0x198] sm:$0xf]  ;;  %v9023_v40 = vpop.f32.mrb[63].mxu1 }
 0x2bb   :  { %v5488_v51 = vrot.slane %v5487_v46, 4  ;;  %v8082_v33 = vsel %vm11438_vm7, %v10322_v45, %v8081_v50  ;;  %v8083_v3 = vrot.slane %v8081_v50, 4  ;;  %v8091_v5 = vrot.slane %v7788_v24, 5  ;;  %v4758_v21 = vld [vmem:[#allocation10 + $0x19c] sm:$0xf]  ;;  %v13491_v24 = vpop.f32.mrb[28].mxu0  ;;  %v6261_v40 = vpop.permute.xlu1 %6260 }
 0x2bc   :  { %v5498_v10 = vrot.slane %v5497_v16, 4  ;;  %v8089_v55 = vsel %vm11438_vm7, %v10323_v56, %v8088_v57  ;;  %v8090_v9 = vrot.slane %v8088_v57, 4  ;;  %v4759_v27 = vld [vmem:[#allocation10 + $0x1a0] sm:$0x1]  ;;  %v7789_v35 = vld [vmem:[#allocation10 + $0x180] sm:$0xe] }
 0x2bd   :  { %v5493_v47 = vsel %vm11007_vm4, %v5488_v51, %v5492_v61  ;;  %v8085_v37 = vsel %vm11438_vm7, %v8083_v3, %v8084_v41  ;;  %v5505_v44 = vshrl.u32 %v4757_v43, 16  ;;  %v5508_v19 = vshll.u32 %v4757_v43, 16  ;;  %v7790_v29 = vld [vmem:[#allocation10 + $0x184] sm:$0xf]  ;;  %v13489_v31 = vld [vmem:[#allocation10 + $0x188] sm:$0x1] }
 0x2be   :  { %13938 = vst [vmem:[#allocation28_spill] sm:$0xff] %v13491_v24  ;;  %v5503_v30 = vsel %vm11007_vm4, %v5498_v10, %v5502_v58  ;;  %v10354_v46 = vcombine.low %v8082_v33, %v8085_v37  ;;  %v8092_v45 = vsel %vm11438_vm7, %v8090_v9, %v8091_v5  ;;  %v5514_v50 = vshll.u32 %v4758_v21, 16  ;;  %v7792_v16 = vld [vmem:[#allocation10 + $0x18c] sm:$0xe]  ;;  %v7793_v61 = vld [vmem:[#allocation10 + $0x190] sm:$0xf] }
 0x2bf   :  { %v9181_v56 = vpop.f32.mrb[29].mxu0  ;;  %v8437_v57 = vld [vmem:[#allocation2 + $0x3e0] sm:$0xff]  ;;  %v10166_v41 = vcombine.low %v5493_v47, %v5503_v30  ;;  %v10355_v43 = vcombine.low %v8089_v55, %v8092_v45  ;;  %v5507_v51 = vrot.slane %v5505_v44, 4  ;;  %v5510_v3 = vrot.slane %v5508_v19, 5  ;;  %v7794_v36 = vld [vmem:[#allocation10 + $0x194] sm:$0x1]  ;;  %v7640_v55 = vpop.permute.xlu0 %7639 }
 0x2c0   :  { %v13497_v48 = vpop.f32.mrb[30].mxu0  ;;  %10535 = vmatprep.mubr.bf16.mxu1 %v8437_v57  ;;  %v8442_v24 = vld [vmem:[#allocation2 + $0x408] sm:$0xff]  ;;  %8275 = vst.msk [vmem:[#allocation2 + $0x430] sm:$0xff] %vm2607_vm8, %v10354_v46  ;;  %v5516_v58 = vrot.slane %v5514_v50, 5  ;;  %v5518_v33 = vshrl.u32 %v4758_v21, 16  ;;  %v5524_v5 = vshll.u32 %v4759_v27, 16 }
 0x2c1   :  { %v8466_v10 = vld [vmem:[#allocation2 + $0x4c8] sm:$0xff]  ;;  %v9184_v9 = vpop.f32.mrb[31].mxu0  ;;  %10536 = vmatmul.mubr.bf16.gmra.mrb[144].mxu1 %v8442_v24  ;;  %5686 = vst.msk [vmem:[#allocation2 + $0x4c0] sm:$0xff] %vm2607_vm8, %v10166_v41  ;;  %v8460_v47 = vld [vmem:[#allocation2 + $0x498] sm:$0xff]  ;;  %8276 = vst.msk [vmem:[#allocation2 + $0x458] sm:$0xff] %vm2607_vm8, %v10355_v43  ;;  %v5511_v37 = vor.u32 %v5510_v3, %v5507_v51  ;;  %v10324_v44 = vrot.slane %v7789_v35, 9 }
 0x2c2   :  { %8307 = vst.msk [vmem:[#allocation2 + $0x430] sm:$0xff] %vm3699_vm9, %v13923_v12  ;;  %6326 = vst.msk [vmem:[#allocation2 + $0x4c0] sm:$0xff] %vm3699_vm9, %v6261_v40  ;;  %9354 = vmatmul.mubr.bf16.gmra.mrb[116].mxu0 %v8460_v47  ;;  %v5520_v21 = vrot.slane %v5518_v33, 4  ;;  %v8095_v27 = vrot.slane %v7790_v29, 5  ;;  %v8098_v19 = vrot.slane %v13489_v31, 5  ;;  %v13509_v30 = vpop.f32.mrb[64].mxu1 }
 0x2c3   :  { %8308 = vst.msk [vmem:[#allocation2 + $0x458] sm:$0xff] %vm3699_vm9, %v13923_v12  ;;  %7704 = vst.msk [vmem:[#allocation2 + $0x4f0] sm:$0xff] %vm3699_vm9, %v7640_v55  ;;  %v7795_v24 = vld [vmem:[#allocation10 + $0x198] sm:$0xe]  ;;  %v5512_v46 = vrot.slane %v5511_v37, 4  ;;  %9361 = vmatprep.mubr.bf16.mxu0 %v8466_v10  ;;  %v10325_v45 = vrot.slane %v7792_v16, 9 }
 0x2c4   :  { %v8102_v50 = vrot.slane %v7793_v61, 5  ;;  %v8105_v35 = vrot.slane %v7794_v36, 5  ;;  %v9028_v56 = vpop.f32.mrb[65].mxu1  ;;  %v5521_v57 = vor.u32 %v5520_v21, %v5516_v58  ;;  %v5526_v41 = vrot.slane %v5524_v5, 5  ;;  %v7796_v51 = vld [vmem:[#allocation10 + $0x19c] sm:$0xf] }
 0x2c5   :  { %v8096_v40 = vsel %vm11438_vm7, %v10324_v44, %v8095_v27  ;;  %v8097_v43 = vrot.slane %v8095_v27, 4  ;;  %v13513_v3 = vpop.f32.mrb[66].mxu1  ;;  %v7797_v33 = vld [vmem:[#allocation10 + $0x1a0] sm:$0x1]  ;;  %v7798_v9 = vld [vmem:[#allocation10 + $0x1a4] sm:$0xe]  ;;  %v5517_v36 = vsel %vm11007_vm4, %v5512_v46, %v5516_v58 }
 0x2c6   :  { %v8103_v29 = vsel %vm11438_vm7, %v10325_v45, %v8102_v50  ;;  %v8104_v31 = vrot.slane %v8102_v50, 4  ;;  %v9031_v10 = vpop.f32.mrb[67].mxu1  ;;  %v5522_v16 = vrot.slane %v5521_v57, 4  ;;  %v7799_v5 = vld [vmem:[#allocation10 + $0x1a8] sm:$0xf]  ;;  %v10326_v37 = vrot.slane %v7795_v24, 9 }
 0x2c7   :  { %v8099_v61 = vsel %vm11438_vm7, %v8097_v43, %v8098_v19  ;;  %v8109_v44 = vrot.slane %v7796_v51, 5  ;;  %v7800_v21 = vld [vmem:[#allocation10 + $0x1ac] sm:$0x1]  ;;  %v13526_v27 = vld [vmem:[%s13911_s1] ss:$0 sm:$0xff]  ;;  %v8112_v50 = vrot.slane %v7797_v33, 5 }
 0x2c8   :  { %v10356_v47 = vcombine.low %v8096_v40, %v8099_v61  ;;  %v8106_v55 = vsel %vm11438_vm7, %v8104_v31, %v8105_v35  ;;  %v5527_v58 = vsel %vm11007_vm4, %v5522_v16, %v5526_v41  ;;  %v10327_v19 = vrot.slane %v7798_v9, 9  ;;  %v6263_v40 = vpop.permute.xlu1 %6262  ;;  %v9187_v41 = vpop.f32.mrb[32].mxu0  ;;  %s10896_s1 = smov [#allocation8]  }
 0x2c9   :  { %v8447_v45 = vld [vmem:[#allocation2 + $0x430] sm:$0xff]  ;;  %v10357_v46 = vcombine.low %v8103_v29, %v8106_v55  ;;  %v10167_v57 = vcombine.low %v5517_v36, %v5527_v58  ;;  %v8465_v35 = vld [vmem:[#allocation2 + $0x4c0] sm:$0xff]  ;;  %v8110_v43 = vsel %vm11438_vm7, %v10326_v37, %v8109_v44  ;;  %v8111_v51 = vrot.slane %v8109_v44, 4  ;;  %v9189_v10 = vpop.f32.mrb[33].mxu0  ;;  %s9800_s30 = sshll.u32 %s10896_s1, 4  ;;  %s9801_s30 = int_to_ptr.vmem [resolvable:$true] %s9800_s30 }
 0x2ca   :  { %10539 = vmatprep.mubr.bf16.mxu1 %v8447_v45  ;;  %v8452_v56 = vld [vmem:[#allocation2 + $0x458] sm:$0xff]  ;;  %8277 = vst.msk [vmem:[#allocation2 + $0x480] sm:$0xff] %vm2607_vm8, %v10356_v47  ;;  %v8471_v24 = vld [vmem:[#allocation2 + $0x4f0] sm:$0xff]  ;;  %v8116_v31 = vrot.slane %v7799_v5, 5  ;;  %9362 = vmatmul.mubr.bf16.gmra.mrb[120].mxu0 %v8465_v35  ;;  %v8119_v63 = vrot.slane %v7800_v21, 5  ;;  %v8899_v36 = vadd.f32 %v13526_v27, %v12858_v52  ;;  %v8902_v16 = vadd.f32 %v13526_v27, %v12864_v62  ;;  %v9190_v5 = vpop.f32.mrb[34].mxu0  ;;  %p10874_p1 = scmp.lt.s32.totalorder %s9801_s30, %s9801_s30 }
 0x2cb   :  { %10540 = vmatmul.mubr.bf16.gmra.mrb[148].mxu1 %v8452_v56  ;;  %8309 = vst.msk [vmem:[#allocation2 + $0x480] sm:$0xff] %vm3699_vm9, %v13923_v12  ;;  %9369 = vmatprep.mubr.bf16.mxu0 %v8471_v24  ;;  %v8113_v29 = vsel %vm11438_vm7, %v8111_v51, %v8112_v50  ;;  %v9192_v55 = vpop.f32.mrb[35].mxu0  ;;  %v13557_v52 = vpop.f32.mrb[68].mxu1  ;;  %s10869_s5 = scalar_lea.vmem %s9801_s30, 8192 }
 0x2cc   :  { %8278 = vst.msk [vmem:[#allocation2 + $0x4a8] sm:$0xff] %vm2607_vm8, %v10357_v46  ;;  %5687 = vst.msk [vmem:[#allocation2 + $0x4e8] sm:$0xff] %vm2607_vm8, %v10167_v57  ;;  %v8117_v33 = vsel %vm11438_vm7, %v10327_v19, %v8116_v31  ;;  %v8118_v9 = vrot.slane %v8116_v31, 4  ;;  %v10358_v61 = vcombine.low %v8110_v43, %v8113_v29  ;;  %v13551_v44 = vadd.f32 %v9187_v41, %v8899_v36  ;;  %v9036_v62 = vpop.f32.mrb[69].mxu1  ;;  %v9195_v56 = vpop.f32.mrb[36].mxu0  ;;  %p10870_p0 = scmp.ne.s32.totalorder %s9801_s30, %s10869_s5  ;;  %p10875_p2 = scmp.lt.s32.totalorder %s10869_s5, %s10869_s5 }
 0x2cd   :  { %8310 = vst.msk [vmem:[#allocation2 + $0x4a8] sm:$0xff] %vm3699_vm9, %v13923_v12  ;;  %6327 = vst.msk [vmem:[#allocation2 + $0x4e8] sm:$0xff] %vm3699_vm9, %v6263_v40  ;;  %v13553_v21 = vadd.f32 %v9190_v5, %v8902_v16  ;;  %v13562_v18 = vpop.f32.mrb[70].mxu1  ;;  %v8907_v19 = vadd.f32 %v13526_v27, %v12877_v54  ;;  %v8910_v57 = vadd.f32 %v13526_v27, %v12890_v20  ;;  %v9197_v24 = vpop.f32.mrb[37].mxu0 }
 0x2ce   :  { %v8120_v47 = vsel %vm11438_vm7, %v8118_v9, %v8119_v63  ;;  %8279 = vst.msk [vmem:[#allocation2 + $0x4d0] sm:$0xff] %vm2607_vm8, %v10358_v61  ;;  %v9039_v46 = vpop.f32.mrb[71].mxu1  ;;  %v8915_v20 = vadd.f32 %v13526_v27, %v12897_v32  ;;  %v8918_v9 = vadd.f32 %v13526_v27, %v12913_v49  ;;  %v8923_v32 = vadd.f32 %v13526_v27, %v12935_v14  ;;  %p10876_p3 = por %p10875_p2, %p10874_p1 }
 0x2cf   :  { %v10359_v37 = vcombine.low %v8117_v33, %v8120_v47  ;;  %8311 = vst.msk [vmem:[#allocation2 + $0x4d0] sm:$0xff] %vm3699_vm9, %v13923_v12  ;;  %v13568_v35 = vadd.f32 %v9195_v56, %v8907_v19  ;;  %v13572_v63 = vpop.f32.mrb[72].mxu1  ;;  %v8926_v49 = vadd.f32 %v13526_v27, %v12940_v2  ;;  %v8931_v14 = vadd.f32 %v13526_v27, %v12970_v23 }
 0x2d0   :  { %v9044_v41 = vpop.f32.mrb[73].mxu1  ;;  %v8934_v2 = vadd.f32 %v13526_v27, %v12983_v38  ;;  %v8939_v23 = vadd.f32 %v13526_v27, %v13007_v60  ;;  %v8942_v38 = vadd.f32 %v13526_v27, %v13023_v6  ;;  %v8947_v60 = vadd.f32 %v13526_v27, %v13057_v0  ;;  %p10877_p4 = pnand %p10876_p3, %p10870_p0 }
 0x2d1   :  { %8280 = vst.msk [vmem:[#allocation2 + $0x4f8] sm:$0xff] %vm2607_vm8, %v10359_v37  ;;  %v13574_v54 = vpop.f32.mrb[74].mxu1  ;;  %v8950_v6 = vadd.f32 %v13526_v27, %v13061_v28  ;;  %v8955_v0 = vadd.f32 %v13526_v27, %v13095_v8  ;;  %v8958_v28 = vadd.f32 %v13526_v27, %v13101_v15 }
 0x2d2   :  { %v8457_v45 = vld [vmem:[#allocation2 + $0x480] sm:$0xff]  ;;  %8312 = vst.msk [vmem:[#allocation2 + $0x4f8] sm:$0xff] %vm3699_vm9, %v13923_v12  ;;  %v9198_v12 = vpop.f32.mrb[38].mxu0  ;;  %v9047_v29 = vpop.f32.mrb[75].mxu1 }
 0x2d3   :  { %10543 = vmatprep.mubr.bf16.mxu1 %v8457_v45  ;;  %v13570_v51 = vadd.f32 %v9198_v12, %v8910_v57  ;;  %v9200_v31 = vpop.f32.mrb[39].mxu0 }
 0x2d4   :  { %v8462_v58 = vld [vmem:[#allocation2 + $0x4a8] sm:$0xff]  ;;  %v9203_v33 = vpop.f32.mrb[40].mxu0 }
 0x2d5   :  { %10544 = vmatmul.mubr.bf16.gmra.mrb[152].mxu1 %v8462_v58  ;;  %v8470_v50 = vld [vmem:[#allocation2 + $0x4e8] sm:$0xff]  ;;  %v13580_v10 = vadd.f32 %v9203_v33, %v8915_v20  ;;  %v9205_v36 = vpop.f32.mrb[41].mxu0 }
 0x2d6   :  { %9370 = vmatmul.mubr.bf16.gmra.mrb[124].mxu0 %v8470_v50  ;;  %v8467_v40 = vld [vmem:[#allocation2 + $0x4d0] sm:$0xff]  ;;  %v9206_v16 = vpop.f32.mrb[42].mxu0 }
 0x2d7   :  { %10547 = vmatprep.mubr.bf16.mxu1 %v8467_v40  ;;  %v13582_v61 = vadd.f32 %v9206_v16, %v8918_v9  ;;  %v9208_v5 = vpop.f32.mrb[43].mxu0 }
 0x2d9   :  { %v8472_v43 = vld [vmem:[#allocation2 + $0x4f8] sm:$0xff]  ;;  %v13584_v47 = vpop.f32.mrb[76].mxu1 }
 0x2da   :  { %v9052_v55 = vpop.f32.mrb[77].mxu1 }
 0x2db   :  { %v13586_v37 = vpop.f32.mrb[78].mxu1 }
 0x2dc   :  { %v9055_v62 = vpop.f32.mrb[79].mxu1 }
 0x2dd   :  { %10548 = vmatmul.mubr.bf16.gmra.mrb[156].mxu1 %v8472_v43 }
 0x2e1   :  { %v9211_v45 = vpop.f32.mrb[44].mxu0 }
 0x2e2   :  { %v13592_v58 = vadd.f32 %v9211_v45, %v8923_v32  ;;  %v9213_v46 = vpop.f32.mrb[45].mxu0 }
 0x2e3   :  { %v9214_v50 = vpop.f32.mrb[46].mxu0 }
 0x2e4   :  { %v13594_v19 = vadd.f32 %v9214_v50, %v8926_v49  ;;  %v9216_v56 = vpop.f32.mrb[47].mxu0 }
 0x2e6   :  { %v13596_v57 = vpop.f32.mrb[80].mxu1 }
 0x2e7   :  { %v9060_v40 = vpop.f32.mrb[81].mxu1 }
 0x2e8   :  { %v13598_v24 = vpop.f32.mrb[82].mxu1 }
 0x2e9   :  { %v9063_v12 = vpop.f32.mrb[83].mxu1 }
 0x2ed   :  { %v9219_v43 = vpop.f32.mrb[48].mxu0 }
 0x2ee   :  { %v13604_v31 = vadd.f32 %v9219_v43, %v8931_v14  ;;  %v9221_v41 = vpop.f32.mrb[49].mxu0 }
 0x2ef   :  { %v9222_v29 = vpop.f32.mrb[50].mxu0 }
 0x2f0   :  { %v13606_v20 = vadd.f32 %v9222_v29, %v8934_v2  ;;  %v9224_v33 = vpop.f32.mrb[51].mxu0 }
 0x2f2   :  { %v13608_v9 = vpop.f32.mrb[84].mxu1 }
 0x2f3   :  { %v9068_v36 = vpop.f32.mrb[85].mxu1 }
 0x2f4   :  { %v13610_v16 = vpop.f32.mrb[86].mxu1 }
 0x2f5   :  { %v9071_v5 = vpop.f32.mrb[87].mxu1 }
 0x2f8   :  { %v9227_v55 = vpop.f32.mrb[52].mxu0 }
 0x2f9   :  { %v13616_v62 = vadd.f32 %v9227_v55, %v8939_v23  ;;  %v9229_v32 = vpop.f32.mrb[53].mxu0 }
 0x2fa   :  { %v9230_v45 = vpop.f32.mrb[54].mxu0 }
 0x2fb   :  { %v13618_v49 = vadd.f32 %v9230_v45, %v8942_v38  ;;  %v9232_v46 = vpop.f32.mrb[55].mxu0 }
 0x2fe   :  { %v13620_v50 = vpop.f32.mrb[88].mxu1 }
 0x2ff   :  { %v9076_v56 = vpop.f32.mrb[89].mxu1 }
 0x300   :  { %v13622_v40 = vpop.f32.mrb[90].mxu1 }
 0x301   :  { %v9079_v12 = vpop.f32.mrb[91].mxu1 }
 0x305   :  { %v9235_v14 = vpop.f32.mrb[56].mxu0 }
 0x306   :  { %v13628_v43 = vadd.f32 %v9235_v14, %v8947_v60  ;;  %v9237_v2 = vpop.f32.mrb[57].mxu0  ;;  %v8963_v60 = vadd.f32 %v13526_v27, %v13129_v26  ;;  %v10583_v26 = vadd.f32 %v13526_v27, %v13159_v4 }
 0x307   :  { %v9238_v41 = vpop.f32.mrb[58].mxu0 }
 0x308   :  { %v13630_v29 = vadd.f32 %v9238_v41, %v8950_v6  ;;  %v9240_v33 = vpop.f32.mrb[59].mxu0  ;;  %v8966_v6 = vadd.f32 %v13526_v27, %v13145_v7  ;;  %v8974_v7 = vadd.f32 %v13526_v27, %v13218_v25 }
 0x30a   :  { %v13632_v36 = vpop.f32.mrb[92].mxu1 }
 0x30b   :  { %v9084_v5 = vpop.f32.mrb[93].mxu1 }
 0x30c   :  { %v13634_v23 = vpop.f32.mrb[94].mxu1  ;;  %v8971_v5 = vadd.f32 %v13526_v27, %v13207_v1 }
 0x30d   :  { %v9087_v55 = vpop.f32.mrb[95].mxu1 }
 0x30e   :  { %v10585_v55 = vadd.f32 %v13526_v27, %v13231_v53  ;;  %v10584_v53 = vadd.f32 %v13526_v27, %v13169_v17  ;;  %v10589_v17 = vadd.f32 %v13526_v27, %v13330_v59 }
 0x311   :  { %v9243_v38 = vpop.f32.mrb[60].mxu0 }
 0x312   :  { %v13640_v32 = vadd.f32 %v9243_v38, %v8955_v0  ;;  %v9245_v45 = vpop.f32.mrb[61].mxu0 }
 0x313   :  { %v9246_v46 = vpop.f32.mrb[62].mxu0 }
 0x314   :  { %v13642_v56 = vadd.f32 %v9246_v46, %v8958_v28  ;;  %v9248_v12 = vpop.f32.mrb[63].mxu0  ;;  %v10586_v46 = vadd.f32 %v13526_v27, %v13237_v22  ;;  %v8979_v22 = vadd.f32 %v13526_v27, %v13259_v34 }
 0x31c   :  { %v9251_v14 = vpop.f32.mrb[64].mxu0 }
 0x31d   :  { %v13648_v2 = vadd.f32 %v9251_v14, %v8963_v60  ;;  %v9253_v8 = vpop.f32.mrb[65].mxu0 }
 0x31e   :  { %v9254_v41 = vpop.f32.mrb[66].mxu0 }
 0x31f   :  { %v13650_v33 = vadd.f32 %v9254_v41, %v8966_v6  ;;  %v9256_v15 = vpop.f32.mrb[67].mxu0 }
 0x326   :  { %v9259_v0 = vpop.f32.mrb[68].mxu0 }
 0x327   :  { %v10489_v38 = vpop.f32.mrb[96].mxu1  ;;  %v13660_v28 = vadd.f32 %v9259_v0, %v8971_v5  ;;  %v9261_v45 = vpop.f32.mrb[69].mxu0 }
 0x328   :  { %v9421_v12 = vadd.f32 %v10585_v55, %v10489_v38  ;;  %v9412_v60 = vpop.f32.mrb[97].mxu1  ;;  %v9262_v1 = vpop.f32.mrb[70].mxu0  ;;  %v8982_v38 = vadd.f32 %v13526_v27, %v13265_v42 }
 0x329   :  { %v9413_v14 = vadd.f32 %v10583_v26, %v9412_v60  ;;  %v10490_v6 = vpop.f32.mrb[98].mxu1  ;;  %v13666_v8 = vadd.f32 %v9262_v1, %v8974_v7  ;;  %v9264_v4 = vpop.f32.mrb[71].mxu0  ;;  %v10587_v7 = vadd.f32 %v13526_v27, %v13285_v13  ;;  %v10590_v60 = vadd.f32 %v13526_v27, %v13342_v11  ;;  %v13939_v11 = vld [vmem:[#allocation12_spill] sm:$0xff] }
 0x32a   :  { %v9669_v41 = vmax.f32 %v9421_v12, 0.0  ;;  %v9424_v25 = vadd.f32 %v10586_v46, %v10490_v6  ;;  %v9415_v15 = vpop.f32.mrb[99].mxu1 }
 0x32b   :  { %v9667_v5 = vmax.f32 %v9413_v14, 0.0  ;;  %v9416_v0 = vadd.f32 %v10584_v53, %v9415_v15  ;;  %v10588_v14 = vadd.f32 %v13526_v27, %v13293_v39  ;;  %v13940_v39 = vld [vmem:[#allocation20_spill] sm:$0xff] }
 0x32c   :  { %9733 = vst.msk [vmem:[#allocation8 + $0x10] sm:$0xff] %vm2607_vm8, %v9669_v41  ;;  %v9670_v45 = vmax.f32 %v9424_v25, 0.0 }
 0x32d   :  { %9731 = vst.msk [vmem:[#allocation8] sm:$0xff] %vm2607_vm8, %v9667_v5  ;;  %v9668_v55 = vmax.f32 %v9416_v0, 0.0 }
 0x32e   :  { %9734 = vst.msk [vmem:[#allocation8 + $0x18] sm:$0xff] %vm2607_vm8, %v9670_v45 }
 0x32f   :  { %v9267_v26 = vpop.f32.mrb[72].mxu0  ;;  %9732 = vst.msk [vmem:[#allocation8 + $0x8] sm:$0xff] %vm2607_vm8, %v9668_v55  ;;  %v10493_v46 = vpop.f32.mrb[100].mxu1 }
 0x330   :  { %v13680_v12 = vadd.f32 %v9267_v26, %v8979_v22  ;;  %v9269_v34 = vpop.f32.mrb[73].mxu0  ;;  %v9437_v1 = vadd.f32 %v10589_v17, %v10493_v46  ;;  %v9428_v59 = vpop.f32.mrb[101].mxu1  ;;  %v8987_v22 = vadd.f32 %v13526_v27, %v13939_v11  ;;  %v10593_v17 = vadd.f32 %v13526_v27, %v13940_v39  ;;  %v13942_v46 = vld [vmem:[#allocation16_spill] sm:$0xff] }
 0x331   :  { %v9270_v53 = vpop.f32.mrb[74].mxu0  ;;  %v9429_v6 = vadd.f32 %v10587_v7, %v9428_v59  ;;  %v10494_v13 = vpop.f32.mrb[102].mxu1  ;;  %v13941_v7 = vld [vmem:[#allocation13_spill] sm:$0xff]  ;;  %v10591_v34 = vadd.f32 %v13526_v27, %v13942_v46  ;;  %v13945_v46 = vld [vmem:[#allocation14_spill] sm:$0xff] }
 0x332   :  { %v13686_v4 = vadd.f32 %v9270_v53, %v8982_v38  ;;  %v9272_v42 = vpop.f32.mrb[75].mxu0  ;;  %v9673_v41 = vmax.f32 %v9437_v1, 0.0  ;;  %v9440_v25 = vadd.f32 %v10590_v60, %v10494_v13  ;;  %v9431_v15 = vpop.f32.mrb[103].mxu1  ;;  %v8990_v38 = vadd.f32 %v13526_v27, %v13941_v7  ;;  %v13943_v53 = vld [vmem:[#allocation21_spill] sm:$0xff] }
 0x333   :  { %v9671_v5 = vmax.f32 %v9429_v6, 0.0  ;;  %v9432_v0 = vadd.f32 %v10588_v14, %v9431_v15  ;;  %v10594_v14 = vadd.f32 %v13526_v27, %v13943_v53  ;;  %v13947_v53 = vld [vmem:[#allocation15_spill] sm:$0xff] }
 0x334   :  { %9737 = vst.msk [vmem:[#allocation8 + $0x30] sm:$0xff] %vm2607_vm8, %v9673_v41  ;;  %v9674_v45 = vmax.f32 %v9440_v25, 0.0  ;;  %v13944_v41 = vld [vmem:[#allocation17_spill] sm:$0xff] }
 0x335   :  { %9735 = vst.msk [vmem:[#allocation8 + $0x20] sm:$0xff] %vm2607_vm8, %v9671_v5  ;;  %v9672_v55 = vmax.f32 %v9432_v0, 0.0  ;;  %v10592_v25 = vadd.f32 %v13526_v27, %v13944_v41 }
 0x336   :  { %9738 = vst.msk [vmem:[#allocation8 + $0x38] sm:$0xff] %vm2607_vm8, %v9674_v45 }
 0x337   :  { %v9275_v26 = vpop.f32.mrb[76].mxu0  ;;  %9736 = vst.msk [vmem:[#allocation8 + $0x28] sm:$0xff] %vm2607_vm8, %v9672_v55  ;;  %v10497_v60 = vpop.f32.mrb[104].mxu1 }
 0x338   :  { %v13700_v1 = vadd.f32 %v9275_v26, %v8987_v22  ;;  %v9277_v59 = vpop.f32.mrb[77].mxu0  ;;  %v9453_v6 = vadd.f32 %v10593_v17, %v10497_v60  ;;  %v9444_v13 = vpop.f32.mrb[105].mxu1  ;;  %v8995_v17 = vadd.f32 %v13526_v27, %v13945_v46 }
 0x339   :  { %v9278_v42 = vpop.f32.mrb[78].mxu0  ;;  %v9445_v15 = vadd.f32 %v10591_v34, %v9444_v13  ;;  %v10498_v5 = vpop.f32.mrb[106].mxu1  ;;  %v13946_v59 = vld [vmem:[#allocation28_spill] sm:$0xff] }
 0x33a   :  { %v13706_v0 = vadd.f32 %v9278_v42, %v8990_v38  ;;  %v9280_v45 = vpop.f32.mrb[79].mxu0  ;;  %v9677_v11 = vmax.f32 %v9453_v6, 0.0  ;;  %v9456_v55 = vadd.f32 %v10594_v14, %v10498_v5  ;;  %v9447_v39 = vpop.f32.mrb[107].mxu1  ;;  %v10597_v34 = vadd.f32 %v13526_v27, %v13946_v59  ;;  %v13948_v6 = vld [vmem:[#allocation24_spill] sm:$0xff] }
 0x33b   :  { %v9675_v22 = vmax.f32 %v9445_v15, 0.0  ;;  %v9448_v26 = vadd.f32 %v10592_v25, %v9447_v39  ;;  %v8998_v14 = vadd.f32 %v13526_v27, %v13947_v53  ;;  %v10595_v13 = vadd.f32 %v13526_v27, %v13948_v6 }
 0x33c   :  { %9741 = vst.msk [vmem:[#allocation8 + $0x50] sm:$0xff] %vm2607_vm8, %v9677_v11  ;;  %v9678_v7 = vmax.f32 %v9456_v55, 0.0  ;;  %v10598_v15 = vadd.f32 %v13526_v27, %v13497_v48  ;;  %v13949_v55 = vld [vmem:[#allocation25_spill] sm:$0xff]  ;;  %v13950_v48 = vld [vmem:[#allocation18_spill] sm:$0xff] }
 0x33d   :  { %9739 = vst.msk [vmem:[#allocation8 + $0x40] sm:$0xff] %vm2607_vm8, %v9675_v22  ;;  %v9676_v60 = vmax.f32 %v9448_v26, 0.0  ;;  %v10596_v39 = vadd.f32 %v13526_v27, %v13949_v55 }
 0x33e   :  { %9742 = vst.msk [vmem:[#allocation8 + $0x58] sm:$0xff] %vm2607_vm8, %v9678_v7 }
 0x33f   :  { %v9283_v38 = vpop.f32.mrb[80].mxu0  ;;  %9740 = vst.msk [vmem:[#allocation8 + $0x48] sm:$0xff] %vm2607_vm8, %v9676_v60  ;;  %v10501_v42 = vpop.f32.mrb[108].mxu1 }
 0x340   :  { %v13720_v41 = vadd.f32 %v9283_v38, %v8995_v17  ;;  %v9285_v25 = vpop.f32.mrb[81].mxu0  ;;  %v9469_v5 = vadd.f32 %v10597_v34, %v10501_v42  ;;  %v9460_v45 = vpop.f32.mrb[109].mxu1  ;;  %v9003_v34 = vadd.f32 %v13526_v27, %v13950_v48 }
 0x341   :  { %v9286_v11 = vpop.f32.mrb[82].mxu0  ;;  %v9461_v22 = vadd.f32 %v10595_v13, %v9460_v45  ;;  %v10502_v26 = vpop.f32.mrb[110].mxu1 }
 0x342   :  { %v13726_v7 = vadd.f32 %v9286_v11, %v8998_v14  ;;  %v9288_v46 = vpop.f32.mrb[83].mxu0  ;;  %v9681_v59 = vmax.f32 %v9469_v5, 0.0  ;;  %v9472_v60 = vadd.f32 %v10598_v15, %v10502_v26  ;;  %v9463_v53 = vpop.f32.mrb[111].mxu1  ;;  %v13951_v14 = vld [vmem:[#allocation19_spill] sm:$0xff] }
 0x343   :  { %v9679_v17 = vmax.f32 %v9461_v22, 0.0  ;;  %v9464_v38 = vadd.f32 %v10596_v39, %v9463_v53  ;;  %v9006_v25 = vadd.f32 %v13526_v27, %v13951_v14 }
 0x344   :  { %9745 = vst.msk [vmem:[#allocation8 + $0x70] sm:$0xff] %vm2607_vm8, %v9681_v59  ;;  %v9682_v6 = vmax.f32 %v9472_v60, 0.0 }
 0x345   :  { %9743 = vst.msk [vmem:[#allocation8 + $0x60] sm:$0xff] %vm2607_vm8, %v9679_v17  ;;  %v9680_v42 = vmax.f32 %v9464_v38, 0.0 }
 0x346   :  { %9746 = vst.msk [vmem:[#allocation8 + $0x78] sm:$0xff] %vm2607_vm8, %v9682_v6 }
 0x347   :  { %9744 = vst.msk [vmem:[#allocation8 + $0x68] sm:$0xff] %vm2607_vm8, %v9680_v42 }
 0x348   :  { %v10505_v15 = vpop.f32.mrb[112].mxu1 }
 0x349   :  { %v9291_v13 = vpop.f32.mrb[84].mxu0  ;;  %v9485_v11 = vadd.f32 %v10505_v15, %v13568_v35  ;;  %v9476_v55 = vpop.f32.mrb[113].mxu1 }
 0x34a   :  { %v13736_v5 = vadd.f32 %v9291_v13, %v9003_v34  ;;  %v9293_v45 = vpop.f32.mrb[85].mxu0  ;;  %v9477_v22 = vadd.f32 %v9476_v55, %v13551_v44  ;;  %v10506_v26 = vpop.f32.mrb[114].mxu1  ;;  %v13952_v34 = vld [vmem:[#allocation22_spill] sm:$0xff]  ;;  %v13953_v13 = vld [vmem:[#allocation23_spill] sm:$0xff] }
 0x34b   :  { %v9294_v39 = vpop.f32.mrb[86].mxu0  ;;  %v9685_v60 = vmax.f32 %v9485_v11, 0.0  ;;  %v9488_v53 = vadd.f32 %v10506_v26, %v13570_v51  ;;  %v9479_v17 = vpop.f32.mrb[115].mxu1  ;;  %v9011_v35 = vadd.f32 %v13526_v27, %v13952_v34  ;;  %v9014_v14 = vadd.f32 %v13526_v27, %v13953_v13 }
 0x34c   :  { %v13740_v46 = vadd.f32 %v9294_v39, %v9006_v25  ;;  %v9296_v59 = vpop.f32.mrb[87].mxu0  ;;  %v9683_v38 = vmax.f32 %v9477_v22, 0.0  ;;  %v9480_v6 = vadd.f32 %v9479_v17, %v13553_v21 }
 0x34d   :  { %9749 = vst.msk [vmem:[#allocation8 + $0x90] sm:$0xff] %vm2607_vm8, %v9685_v60  ;;  %v9686_v48 = vmax.f32 %v9488_v53, 0.0 }
 0x34e   :  { %9747 = vst.msk [vmem:[#allocation8 + $0x80] sm:$0xff] %vm2607_vm8, %v9683_v38  ;;  %v9684_v44 = vmax.f32 %v9480_v6, 0.0 }
 0x34f   :  { %9750 = vst.msk [vmem:[#allocation8 + $0x98] sm:$0xff] %vm2607_vm8, %v9686_v48  ;;  %v13954_v48 = vld [vmem:[#allocation26_spill] sm:$0xff] }
 0x350   :  { %9748 = vst.msk [vmem:[#allocation8 + $0x88] sm:$0xff] %vm2607_vm8, %v9684_v44 }
 0x351   :  { %v9299_v42 = vpop.f32.mrb[88].mxu0 }
 0x352   :  { %v10509_v51 = vpop.f32.mrb[116].mxu1  ;;  %v13752_v25 = vadd.f32 %v9299_v42, %v9011_v35  ;;  %v9301_v21 = vpop.f32.mrb[89].mxu0  ;;  %v13955_v35 = vld [vmem:[#allocation27_spill] sm:$0xff] }
 0x353   :  { %v9501_v15 = vadd.f32 %v10509_v51, %v13592_v58  ;;  %v9492_v45 = vpop.f32.mrb[117].mxu1  ;;  %v9302_v11 = vpop.f32.mrb[90].mxu0  ;;  %v9019_v58 = vadd.f32 %v13526_v27, %v13954_v48  ;;  %v9022_v44 = vadd.f32 %v13526_v27, %v13955_v35 }
 0x354   :  { %v9493_v55 = vadd.f32 %v9492_v45, %v13580_v10  ;;  %v10510_v39 = vpop.f32.mrb[118].mxu1  ;;  %v13756_v22 = vadd.f32 %v9302_v11, %v9014_v14  ;;  %v9304_v26 = vpop.f32.mrb[91].mxu0 }
 0x355   :  { %v9689_v59 = vmax.f32 %v9501_v15, 0.0  ;;  %v9504_v60 = vadd.f32 %v10510_v39, %v13594_v19  ;;  %v9495_v53 = vpop.f32.mrb[119].mxu1 }
 0x356   :  { %v9687_v17 = vmax.f32 %v9493_v55, 0.0  ;;  %v9496_v38 = vadd.f32 %v9495_v53, %v13582_v61 }
 0x357   :  { %9753 = vst.msk [vmem:[#allocation8 + $0xb0] sm:$0xff] %vm2607_vm8, %v9689_v59  ;;  %v9690_v6 = vmax.f32 %v9504_v60, 0.0 }
 0x358   :  { %9751 = vst.msk [vmem:[#allocation8 + $0xa0] sm:$0xff] %vm2607_vm8, %v9687_v17  ;;  %v9688_v10 = vmax.f32 %v9496_v38, 0.0  ;;  %v9030_v38 = vadd.f32 %v13526_v27, %v13513_v3 }
 0x359   :  { %9754 = vst.msk [vmem:[#allocation8 + $0xb8] sm:$0xff] %vm2607_vm8, %v9690_v6 }
 0x35a   :  { %9752 = vst.msk [vmem:[#allocation8 + $0xa8] sm:$0xff] %vm2607_vm8, %v9688_v10 }
 0x35c   :  { %v10513_v19 = vpop.f32.mrb[120].mxu1 }
 0x35d   :  { %v9307_v34 = vpop.f32.mrb[92].mxu0  ;;  %v9517_v13 = vadd.f32 %v10513_v19, %v13616_v62  ;;  %v9508_v14 = vpop.f32.mrb[121].mxu1  ;;  %v9027_v62 = vadd.f32 %v13526_v27, %v13509_v30 }
 0x35e   :  { %v13768_v42 = vadd.f32 %v9307_v34, %v9019_v58  ;;  %v9309_v61 = vpop.f32.mrb[93].mxu0  ;;  %v9509_v21 = vadd.f32 %v9508_v14, %v13604_v31  ;;  %v10514_v15 = vpop.f32.mrb[122].mxu1 }
 0x35f   :  { %v9310_v51 = vpop.f32.mrb[94].mxu0  ;;  %v9693_v55 = vmax.f32 %v9517_v13, 0.0  ;;  %v9520_v39 = vadd.f32 %v10514_v15, %v13618_v49  ;;  %v9511_v26 = vpop.f32.mrb[123].mxu1 }
 0x360   :  { %v13772_v45 = vadd.f32 %v9310_v51, %v9022_v44  ;;  %v9312_v11 = vpop.f32.mrb[95].mxu0  ;;  %v9691_v59 = vmax.f32 %v9509_v21, 0.0  ;;  %v9512_v60 = vadd.f32 %v9511_v26, %v13606_v20 }
 0x361   :  { %9757 = vst.msk [vmem:[#allocation8 + $0xd0] sm:$0xff] %vm2607_vm8, %v9693_v55  ;;  %v9694_v53 = vmax.f32 %v9520_v39, 0.0 }
 0x362   :  { %9755 = vst.msk [vmem:[#allocation8 + $0xc0] sm:$0xff] %vm2607_vm8, %v9691_v59  ;;  %v9692_v31 = vmax.f32 %v9512_v60, 0.0 }
 0x363   :  { %9758 = vst.msk [vmem:[#allocation8 + $0xd8] sm:$0xff] %vm2607_vm8, %v9694_v53 }
 0x364   :  { %9756 = vst.msk [vmem:[#allocation8 + $0xc8] sm:$0xff] %vm2607_vm8, %v9692_v31 }
 0x365   :  { %v9315_v17 = vpop.f32.mrb[96].mxu0 }
 0x366   :  { %v10517_v49 = vpop.f32.mrb[124].mxu1  ;;  %v13784_v6 = vadd.f32 %v9315_v17, %v9027_v62  ;;  %v9317_v20 = vpop.f32.mrb[97].mxu0 }
 0x367   :  { %v9533_v48 = vadd.f32 %v10517_v49, %v13640_v32  ;;  %v9524_v58 = vpop.f32.mrb[125].mxu1  ;;  %v9318_v10 = vpop.f32.mrb[98].mxu0 }
 0x368   :  { %v9525_v30 = vadd.f32 %v9524_v58, %v13628_v43  ;;  %v10518_v34 = vpop.f32.mrb[126].mxu1  ;;  %v13788_v35 = vadd.f32 %v9318_v10, %v9030_v38  ;;  %v9320_v44 = vpop.f32.mrb[99].mxu0  ;;  %v9035_v43 = vadd.f32 %v13526_v27, %v13557_v52 }
 0x369   :  { %v9697_v19 = vmax.f32 %v9533_v48, 0.0  ;;  %v9536_v61 = vadd.f32 %v10518_v34, %v13642_v56  ;;  %v9527_v3 = vpop.f32.mrb[127].mxu1  ;;  %v9038_v56 = vadd.f32 %v13526_v27, %v13562_v18  ;;  %v9046_v48 = vadd.f32 %v13526_v27, %v13574_v54 }
 0x36a   :  { %v9695_v13 = vmax.f32 %v9525_v30, 0.0  ;;  %v9528_v14 = vadd.f32 %v9527_v3, %v13630_v29 }
 0x36b   :  { %9761 = vst.msk [vmem:[#allocation8 + $0xf0] sm:$0xff] %vm2607_vm8, %v9697_v19  ;;  %v9698_v51 = vmax.f32 %v9536_v61, 0.0 }
 0x36c   :  { %9759 = vst.msk [vmem:[#allocation8 + $0xe0] sm:$0xff] %vm2607_vm8, %v9695_v13  ;;  %v9696_v32 = vmax.f32 %v9528_v14, 0.0 }
 0x36d   :  { %9762 = vst.msk [vmem:[#allocation8 + $0xf8] sm:$0xff] %vm2607_vm8, %v9698_v51 }
 0x36e   :  { %9760 = vst.msk [vmem:[#allocation8 + $0xe8] sm:$0xff] %vm2607_vm8, %v9696_v32 }
 0x36f   :  { %v10521_v21 = vpop.f32.mrb[128].mxu1  ;;  %v9323_v15 = vpop.f32.mrb[100].mxu0 }
 0x370   :  { %v9549_v29 = vadd.f32 %v10521_v21, %v13660_v28  ;;  %v9540_v11 = vpop.f32.mrb[129].mxu1  ;;  %v13801_v55 = vadd.f32 %v9323_v15, %v9035_v43  ;;  %v9325_v39 = vpop.f32.mrb[101].mxu0  ;;  %v9054_v21 = vadd.f32 %v13526_v27, %v13586_v37 }
 0x371   :  { %v9541_v26 = vadd.f32 %v9540_v11, %v13648_v2  ;;  %v10522_v59 = vpop.f32.mrb[130].mxu1  ;;  %v9326_v60 = vpop.f32.mrb[102].mxu0  ;;  %v9043_v2 = vadd.f32 %v13526_v27, %v13572_v63 }
 0x372   :  { %v9701_v52 = vmax.f32 %v9549_v29, 0.0  ;;  %v9552_v53 = vadd.f32 %v10522_v59, %v13666_v8  ;;  %v9543_v62 = vpop.f32.mrb[131].mxu1  ;;  %v13805_v31 = vadd.f32 %v9326_v60, %v9038_v56  ;;  %v9328_v17 = vpop.f32.mrb[103].mxu0 }
 0x373   :  { %v9699_v38 = vmax.f32 %v9541_v26, 0.0  ;;  %v9544_v18 = vadd.f32 %v9543_v62, %v13650_v33 }
 0x374   :  { %9765 = vst.msk [vmem:[#allocation8 + $0x110] sm:$0xff] %vm2607_vm8, %v9701_v52  ;;  %v9702_v28 = vmax.f32 %v9552_v53, 0.0 }
 0x375   :  { %9763 = vst.msk [vmem:[#allocation8 + $0x100] sm:$0xff] %vm2607_vm8, %v9699_v38  ;;  %v9700_v49 = vmax.f32 %v9544_v18, 0.0  ;;  %v9062_v38 = vadd.f32 %v13526_v27, %v13598_v24 }
 0x376   :  { %9766 = vst.msk [vmem:[#allocation8 + $0x118] sm:$0xff] %vm2607_vm8, %v9702_v28 }
 0x377   :  { %9764 = vst.msk [vmem:[#allocation8 + $0x108] sm:$0xff] %vm2607_vm8, %v9700_v49 }
 0x378   :  { %v9331_v20 = vpop.f32.mrb[104].mxu0 }
 0x379   :  { %v10525_v8 = vpop.f32.mrb[132].mxu1  ;;  %v13817_v10 = vadd.f32 %v9331_v20, %v9043_v2  ;;  %v9333_v30 = vpop.f32.mrb[105].mxu0 }
 0x37a   :  { %v9565_v33 = vadd.f32 %v10525_v8, %v13700_v1  ;;  %v9556_v58 = vpop.f32.mrb[133].mxu1  ;;  %v9334_v19 = vpop.f32.mrb[106].mxu0 }
 0x37b   :  { %v9557_v34 = vadd.f32 %v9556_v58, %v13680_v12  ;;  %v10526_v44 = vpop.f32.mrb[134].mxu1  ;;  %v13821_v13 = vadd.f32 %v9334_v19, %v9046_v48  ;;  %v9336_v14 = vpop.f32.mrb[107].mxu0  ;;  %v9051_v12 = vadd.f32 %v13526_v27, %v13584_v47 }
 0x37c   :  { %v9705_v63 = vmax.f32 %v9565_v33, 0.0  ;;  %v9568_v61 = vadd.f32 %v10526_v44, %v13706_v0  ;;  %v9559_v3 = vpop.f32.mrb[135].mxu1 }
 0x37d   :  { %v9703_v51 = vmax.f32 %v9557_v34, 0.0  ;;  %v9560_v54 = vadd.f32 %v9559_v3, %v13686_v4 }
 0x37e   :  { %9769 = vst.msk [vmem:[#allocation8 + $0x130] sm:$0xff] %vm2607_vm8, %v9705_v63  ;;  %v9706_v1 = vmax.f32 %v9568_v61, 0.0 }
 0x37f   :  { %9767 = vst.msk [vmem:[#allocation8 + $0x120] sm:$0xff] %vm2607_vm8, %v9703_v51  ;;  %v9704_v32 = vmax.f32 %v9560_v54, 0.0 }
 0x380   :  { %9770 = vst.msk [vmem:[#allocation8 + $0x138] sm:$0xff] %vm2607_vm8, %v9706_v1 }
 0x381   :  { %9768 = vst.msk [vmem:[#allocation8 + $0x128] sm:$0xff] %vm2607_vm8, %v9704_v32  ;;  %v9339_v43 = vpop.f32.mrb[108].mxu0 }
 0x382   :  { %v10529_v0 = vpop.f32.mrb[136].mxu1  ;;  %v13833_v56 = vadd.f32 %v9339_v43, %v9051_v12  ;;  %v9341_v29 = vpop.f32.mrb[109].mxu0 }
 0x383   :  { %v9581_v4 = vadd.f32 %v10529_v0, %v13736_v5  ;;  %v9572_v15 = vpop.f32.mrb[137].mxu1  ;;  %v9342_v26 = vpop.f32.mrb[110].mxu0 }
 0x384   :  { %v9573_v11 = vadd.f32 %v9572_v15, %v13720_v41  ;;  %v10530_v39 = vpop.f32.mrb[138].mxu1  ;;  %v13837_v52 = vadd.f32 %v9342_v26, %v9054_v21  ;;  %v9344_v53 = vpop.f32.mrb[111].mxu0  ;;  %v9059_v41 = vadd.f32 %v13526_v27, %v13596_v57 }
 0x385   :  { %v9709_v47 = vmax.f32 %v9581_v4, 0.0  ;;  %v9584_v59 = vadd.f32 %v10530_v39, %v13740_v46  ;;  %v9575_v60 = vpop.f32.mrb[139].mxu1 }
 0x386   :  { %v9707_v62 = vmax.f32 %v9573_v11, 0.0  ;;  %v9576_v37 = vadd.f32 %v9575_v60, %v13726_v7 }
 0x387   :  { %9773 = vst.msk [vmem:[#allocation8 + $0x150] sm:$0xff] %vm2607_vm8, %v9709_v47  ;;  %v9710_v5 = vmax.f32 %v9584_v59, 0.0 }
 0x388   :  { %9771 = vst.msk [vmem:[#allocation8 + $0x140] sm:$0xff] %vm2607_vm8, %v9707_v62  ;;  %v9708_v17 = vmax.f32 %v9576_v37, 0.0 }
 0x389   :  { %9774 = vst.msk [vmem:[#allocation8 + $0x158] sm:$0xff] %vm2607_vm8, %v9710_v5 }
 0x38a   :  { %9772 = vst.msk [vmem:[#allocation8 + $0x148] sm:$0xff] %vm2607_vm8, %v9708_v17 }
 0x38b   :  { %v9347_v46 = vpop.f32.mrb[112].mxu0  ;;  %v10533_v18 = vpop.f32.mrb[140].mxu1 }
 0x38c   :  { %v13848_v28 = vadd.f32 %v9347_v46, %v9059_v41  ;;  %v9349_v7 = vpop.f32.mrb[113].mxu0  ;;  %v9597_v49 = vadd.f32 %v10533_v18, %v13768_v42  ;;  %v9588_v2 = vpop.f32.mrb[141].mxu1 }
 0x38d   :  { %v9350_v8 = vpop.f32.mrb[114].mxu0  ;;  %v9589_v20 = vadd.f32 %v9588_v2, %v13752_v25  ;;  %v10534_v48 = vpop.f32.mrb[142].mxu1  ;;  %v9067_v25 = vadd.f32 %v13526_v27, %v13608_v9 }
 0x38e   :  { %v13852_v57 = vadd.f32 %v9350_v8, %v9062_v38  ;;  %v9352_v33 = vpop.f32.mrb[115].mxu0  ;;  %v9713_v58 = vmax.f32 %v9597_v49, 0.0  ;;  %v9600_v30 = vadd.f32 %v10534_v48, %v13772_v45  ;;  %v9591_v34 = vpop.f32.mrb[143].mxu1 }
 0x38f   :  { %v9711_v44 = vmax.f32 %v9589_v20, 0.0  ;;  %v9592_v24 = vadd.f32 %v9591_v34, %v13756_v22  ;;  %v9070_v22 = vadd.f32 %v13526_v27, %v13610_v16 }
 0x390   :  { %9777 = vst.msk [vmem:[#allocation8 + $0x170] sm:$0xff] %vm2607_vm8, %v9713_v58  ;;  %v9714_v19 = vmax.f32 %v9600_v30, 0.0 }
 0x391   :  { %9775 = vst.msk [vmem:[#allocation8 + $0x160] sm:$0xff] %vm2607_vm8, %v9711_v44  ;;  %v9712_v42 = vmax.f32 %v9592_v24, 0.0 }
 0x392   :  { %9778 = vst.msk [vmem:[#allocation8 + $0x178] sm:$0xff] %vm2607_vm8, %v9714_v19 }
 0x393   :  { %9776 = vst.msk [vmem:[#allocation8 + $0x168] sm:$0xff] %vm2607_vm8, %v9712_v42 }
 0x394   :  { %v10537_v63 = vpop.f32.mrb[144].mxu1 }
 0x395   :  { %v9613_v45 = vadd.f32 %v10537_v63, %v13801_v55  ;;  %v9604_v61 = vpop.f32.mrb[145].mxu1  ;;  %v9355_v3 = vpop.f32.mrb[116].mxu0 }
 0x396   :  { %v9605_v14 = vadd.f32 %v9604_v61, %v13784_v6  ;;  %v10538_v51 = vpop.f32.mrb[146].mxu1  ;;  %v9356_v54 = vadd.f32 %v9355_v3, %v9067_v25  ;;  %v9357_v1 = vpop.f32.mrb[117].mxu0  ;;  %v9075_v6 = vadd.f32 %v13526_v27, %v13620_v50 }
 0x397   :  { %v9717_v32 = vmax.f32 %v9613_v45, 0.0  ;;  %v9616_v12 = vadd.f32 %v10538_v51, %v13805_v31  ;;  %v9607_v0 = vpop.f32.mrb[147].mxu1  ;;  %v9358_v9 = vpop.f32.mrb[118].mxu0 }
 0x398   :  { %v9715_v43 = vmax.f32 %v9605_v14, 0.0  ;;  %v9608_v21 = vadd.f32 %v9607_v0, %v13788_v35  ;;  %v9359_v4 = vadd.f32 %v9358_v9, %v9070_v22  ;;  %v9360_v55 = vpop.f32.mrb[119].mxu0  ;;  %v9078_v35 = vadd.f32 %v13526_v27, %v13622_v40 }
 0x399   :  { %9781 = vst.msk [vmem:[#allocation8 + $0x190] sm:$0xff] %vm2607_vm8, %v9717_v32  ;;  %v9718_v15 = vmax.f32 %v9616_v12, 0.0 }
 0x39a   :  { %9779 = vst.msk [vmem:[#allocation8 + $0x180] sm:$0xff] %vm2607_vm8, %v9715_v43  ;;  %v9716_v16 = vmax.f32 %v9608_v21, 0.0 }
 0x39b   :  { %9782 = vst.msk [vmem:[#allocation8 + $0x198] sm:$0xff] %vm2607_vm8, %v9718_v15 }
 0x39c   :  { %9780 = vst.msk [vmem:[#allocation8 + $0x188] sm:$0xff] %vm2607_vm8, %v9716_v16 }
 0x39d   :  { %v9363_v29 = vpop.f32.mrb[120].mxu0 }
 0x39e   :  { %v10541_v31 = vpop.f32.mrb[148].mxu1  ;;  %v9364_v26 = vadd.f32 %v9363_v29, %v9075_v6  ;;  %v9365_v47 = vpop.f32.mrb[121].mxu0 }
 0x39f   :  { %v9629_v11 = vadd.f32 %v10541_v31, %v13833_v56  ;;  %v9620_v39 = vpop.f32.mrb[149].mxu1  ;;  %v9366_v53 = vpop.f32.mrb[122].mxu0 }
 0x3a0   :  { %v9621_v59 = vadd.f32 %v9620_v39, %v13817_v10  ;;  %v10542_v60 = vpop.f32.mrb[150].mxu1  ;;  %v9367_v5 = vadd.f32 %v9366_v53, %v9078_v35  ;;  %v9368_v17 = vpop.f32.mrb[123].mxu0  ;;  %v9083_v10 = vadd.f32 %v13526_v27, %v13632_v36 }
 0x3a1   :  { %v9721_v62 = vmax.f32 %v9629_v11, 0.0  ;;  %v9632_v37 = vadd.f32 %v10542_v60, %v13837_v52  ;;  %v9623_v50 = vpop.f32.mrb[151].mxu1 }
 0x3a2   :  { %v9719_v41 = vmax.f32 %v9621_v59, 0.0  ;;  %v9624_v46 = vadd.f32 %v9623_v50, %v13821_v13  ;;  %v9086_v13 = vadd.f32 %v13526_v27, %v13634_v23 }
 0x3a3   :  { %9785 = vst.msk [vmem:[#allocation8 + $0x1b0] sm:$0xff] %vm2607_vm8, %v9721_v62  ;;  %v9722_v40 = vmax.f32 %v9632_v37, 0.0 }
 0x3a4   :  { %9783 = vst.msk [vmem:[#allocation8 + $0x1a0] sm:$0xff] %vm2607_vm8, %v9719_v41  ;;  %v9720_v56 = vmax.f32 %v9624_v46, 0.0 }
 0x3a5   :  { %9786 = vst.msk [vmem:[#allocation8 + $0x1b8] sm:$0xff] %vm2607_vm8, %v9722_v40 }
 0x3a6   :  { %9784 = vst.msk [vmem:[#allocation8 + $0x1a8] sm:$0xff] %vm2607_vm8, %v9720_v56 }
 0x3a8   :  { %v10545_v52 = vpop.f32.mrb[152].mxu1 }
 0x3a9   :  { %v9645_v38 = vadd.f32 %v10545_v52, %v9356_v54  ;;  %v9636_v18 = vpop.f32.mrb[153].mxu1  ;;  %v9371_v7 = vpop.f32.mrb[124].mxu0 }
 0x3aa   :  { %v9637_v49 = vadd.f32 %v9636_v18, %v13848_v28  ;;  %v10546_v2 = vpop.f32.mrb[154].mxu1  ;;  %v9372_v8 = vadd.f32 %v9371_v7, %v9083_v10  ;;  %v9373_v20 = vpop.f32.mrb[125].mxu0 }
 0x3ab   :  { %v9725_v48 = vmax.f32 %v9645_v38, 0.0  ;;  %v9648_v33 = vadd.f32 %v10546_v2, %v9359_v4  ;;  %v9639_v58 = vpop.f32.mrb[155].mxu1  ;;  %v9374_v30 = vpop.f32.mrb[126].mxu0 }
 0x3ac   :  { %v9723_v34 = vmax.f32 %v9637_v49, 0.0  ;;  %v9640_v44 = vadd.f32 %v9639_v58, %v13852_v57  ;;  %v9375_v36 = vadd.f32 %v9374_v30, %v9086_v13  ;;  %v9376_v24 = vpop.f32.mrb[127].mxu0 }
 0x3ad   :  { %9789 = vst.msk [vmem:[#allocation8 + $0x1d0] sm:$0xff] %vm2607_vm8, %v9725_v48  ;;  %v9726_v19 = vmax.f32 %v9648_v33, 0.0 }
 0x3ae   :  { %9787 = vst.msk [vmem:[#allocation8 + $0x1c0] sm:$0xff] %vm2607_vm8, %v9723_v34  ;;  %v9724_v27 = vmax.f32 %v9640_v44, 0.0 }
 0x3af   :  { %9790 = vst.msk [vmem:[#allocation8 + $0x1d8] sm:$0xff] %vm2607_vm8, %v9726_v19 }
 0x3b0   :  { %9788 = vst.msk [vmem:[#allocation8 + $0x1c8] sm:$0xff] %vm2607_vm8, %v9724_v27  ;;  %v10549_v23 = vpop.f32.mrb[156].mxu1 }
 0x3b1   :  { %v9661_v28 = vadd.f32 %v10549_v23, %v9372_v8  ;;  %v9652_v42 = vpop.f32.mrb[157].mxu1 }
 0x3b2   :  { %v9653_v25 = vadd.f32 %v9652_v42, %v9364_v26  ;;  %v10550_v63 = vpop.f32.mrb[158].mxu1 }
 0x3b3   :  { %v9729_v57 = vmax.f32 %v9661_v28, 0.0  ;;  %v9664_v45 = vadd.f32 %v10550_v63, %v9375_v36  ;;  %v9655_v61 = vpop.f32.mrb[159].mxu1 }
 0x3b4   :  { %v9727_v3 = vmax.f32 %v9653_v25, 0.0  ;;  %v9656_v22 = vadd.f32 %v9655_v61, %v9367_v5 }
 0x3b5   :  { %9793 = vst.msk [vmem:[#allocation8 + $0x1f0] sm:$0xff] %vm2607_vm8, %v9729_v57  ;;  %v9730_v14 = vmax.f32 %v9664_v45, 0.0 }
 0x3b6   :  { %9791 = vst.msk [vmem:[#allocation8 + $0x1e0] sm:$0xff] %vm2607_vm8, %v9727_v3  ;;  %v9728_v51 = vmax.f32 %v9656_v22, 0.0 }
 0x3b7   :  { %9794 = vst.msk [vmem:[#allocation8 + $0x1f8] sm:$0xff] %vm2607_vm8, %v9730_v14 }
 0x3b8   :  { %9792 = vst.msk [vmem:[#allocation8 + $0x1e8] sm:$0xff] %vm2607_vm8, %v9728_v51 }
 0x3b9   :  { %10880 = shalt.err (!%p10877_p4)
}
 0x3ba   :  { %s10881_s8 = scalar_lea.hbm %s13914_s4, 8192 }
 0x3bb   :  { %p10882_p5 = scmp.ne.s32.totalorder %s13914_s4, %s10881_s8  ;;  %p10885_p6 = scmp.lt.u32.totalorder %s10881_s8, %s13914_s4 }
 0x3bd   :  { %p10887_p7 = pnand %p10885_p6, %p10882_p5 }
 0x3bf   :  { %10890 = shalt.err (!%p10887_p7)
}
 0x3c0   :  { %s10897_s13 = smov 128   ;;  %s10898_s14 = smov 8  }
 0x3c1   :  { %9806 = dma.vmem_to_hbm [thread:$0]  %s9801_s30, 8192, %s13914_s4, [#allocation9], %s10897_s13, %s10897_s13, %s10898_s14  }
 0x3c2   :  { %10891 = dma.done.wait [#allocation9], 8192  }
 0x3c3   :  { %10892 = vsyncadd [#allocation9], 4294959104 }
 0x3c4   :  { %9810 = vsyncpa [#allocation9], 1 }

</bundles_post_ra>
